<compile_context>
chip_gen: v5e
topology: v5e:2x2
jax: 0.10.0
libtpu: 0.0.40
codegen_flags: <defaults>
</compile_context>

<pallas_src>
import functools

import jax
import jax.numpy as jnp
from jax.experimental import pallas as pl
from jax.experimental.pallas import tpu as pltpu


def _reveal_fused_kernel(x0_ref, w0_ref, w1_ref, w2_ref, w3_ref, aff_ref,
                         o_ref, buf_a, buf_b, rows3, *, H, W, C, col0):
    """Fused 4-layer forward for ONE image (all activations VMEM-resident).

    x0_ref:  (1, H*W, K0)     layer-0 im2col (K0 = 9*3 padded to 32)
    w0_ref:  (K0, C)          layer-0 weight (zero-padded rows)
    w1..w3:  (3, 3*C, C)      per-dy packed weights; layer 3 Cout padded 3->C
    aff_ref: (8, C)           rows 2l / 2l+1 = folded BN scale / shift of layer l
    o_ref:   (1, H*W, C)      lane-dense output slab (only first 3 ch. are real)
    buf_a/b: (H+2, WBUF, C)   ping-pong padded activation buffers
    rows3:   (H+2, W, 3*C)    dx-fused im2col rows
    """
    HW = H * W

    # Zero the padded buffers once per image; only interiors get written after
    # this, so borders stay zero == SAME padding.
    buf_a[...] = jnp.zeros_like(buf_a)
    buf_b[...] = jnp.zeros_like(buf_b)

    def affine(y, li, relu):
        y = y * aff_ref[2 * li:2 * li + 1, :] + aff_ref[2 * li + 1:2 * li + 2, :]
        return jnp.maximum(y, 0.0) if relu else y

    # ---- layer 0: ConvBlock(3 -> 128) as a single matmul -------------------
    y = jnp.dot(x0_ref[0], w0_ref[...], preferred_element_type=jnp.float32)
    y = affine(y, 0, True)
    buf_a[1:1 + H, col0:col0 + W, :] = y.reshape(H, W, C)

    # ---- layers 1..3: 3x3 conv on a C-channel VMEM-resident activation -----
    def conv3x3(src, w_ref, li, relu):
        # Fuse the 3 dx taps along K: rows3[h, x, dx*C + c] = padded[h, x+dx, c]
        for dx in range(3):
            rows3[:, :, dx * C:(dx + 1) * C] = (
                src[:, col0 - 1 + dx:col0 - 1 + dx + W, :])
        acc = jnp.zeros((HW, C), jnp.float32)
        for dy in range(3):                       # 3 matmuls, K = 3*C = 384
            lhs = rows3[dy:dy + H].reshape(HW, 3 * C)
            acc += jnp.dot(lhs, w_ref[dy], preferred_element_type=jnp.float32)
        return affine(acc, li, relu)

    y = conv3x3(buf_a, w1_ref, 1, True)
    buf_b[1:1 + H, col0:col0 + W, :] = y.reshape(H, W, C)
    y = conv3x3(buf_b, w2_ref, 2, True)
    buf_a[1:1 + H, col0:col0 + W, :] = y.reshape(H, W, C)
    o_ref[0] = conv3x3(buf_a, w3_ref, 3, False)   # Cout padded 3->C, lane dense


def _im2col_3x3(x_nhwc):
    """(N, H, W, C) -> (N, H*W, 9*C) im2col for a SAME 3x3 conv (glue only)."""
    N, H, W, C = x_nhwc.shape
    xp = jnp.pad(x_nhwc, ((0, 0), (1, 1), (1, 1), (0, 0)))
    cols = [xp[:, dy:dy + H, dx:dx + W, :]
            for dy in range(3) for dx in range(3)]
    return jnp.concatenate(cols, axis=-1).reshape(N, H * W, 9 * C)


def reveal_network_forward(x_nchw, params):
    """Pallas implementation of RevealNetwork.forward (NCHW in / NCHW out)."""
    N, cin, H, W = x_nchw.shape
    C = params[0]["w"].shape[-1]                  # 128
    col0 = 8                                      # aligned interior column
    wbuf = col0 + ((W + 1 + 7) // 8) * 8          # padded buffer width
    k0 = ((9 * cin + 7) // 8) * 8                 # layer-0 K (27 -> 32)

    x = jnp.transpose(x_nchw, (0, 2, 3, 1)).astype(jnp.float32)   # NHWC

    # Layer-0 im2col + weight packing (layout plumbing in glue).
    x0 = _im2col_3x3(x)
    x0 = jnp.pad(x0, ((0, 0), (0, 0), (0, k0 - x0.shape[-1])))
    w0 = params[0]["w"].reshape(9 * cin, C)
    w0 = jnp.pad(w0, ((0, k0 - 9 * cin), (0, 0)))

    def pack_w(w_hwio):                           # (3,3,Ci,Co) -> (3, 3*Ci, C)
        kh, kw, ci, co = w_hwio.shape
        w = w_hwio.reshape(kh, kw * ci, co)
        return jnp.pad(w, ((0, 0), (0, 0), (0, C - co)))

    def pack_aff(p):
        s, t = p["scale"], p["shift"]
        pad = C - s.shape[0]
        return jnp.stack([jnp.pad(s, (0, pad), constant_values=1.0),
                          jnp.pad(t, (0, pad))])

    w1, w2, w3 = (pack_w(params[i]["w"]) for i in (1, 2, 3))
    aff = jnp.concatenate([pack_aff(p) for p in params], axis=0)  # (8, C)

    kernel = functools.partial(_reveal_fused_kernel, H=H, W=W, C=C, col0=col0)
    out = pl.pallas_call(
        kernel,
        out_shape=jax.ShapeDtypeStruct((N, H * W, C), jnp.float32),
        grid=(N,),
        in_specs=[
            pl.BlockSpec((1, H * W, k0), lambda n: (n, 0, 0)),
            pl.BlockSpec((k0, C), lambda n: (0, 0)),
            pl.BlockSpec((3, 3 * C, C), lambda n: (0, 0, 0)),
            pl.BlockSpec((3, 3 * C, C), lambda n: (0, 0, 0)),
            pl.BlockSpec((3, 3 * C, C), lambda n: (0, 0, 0)),
            pl.BlockSpec((8, C), lambda n: (0, 0)),
        ],
        out_specs=pl.BlockSpec((1, H * W, C), lambda n: (n, 0, 0)),
        scratch_shapes=[
            pltpu.VMEM((H + 2, wbuf, C), jnp.float32),
            pltpu.VMEM((H + 2, wbuf, C), jnp.float32),
            pltpu.VMEM((H + 2, W, 3 * C), jnp.float32),
        ],
        compiler_params=pltpu.CompilerParams(
            dimension_semantics=("parallel",),
            vmem_limit_bytes=32 * 1024 * 1024),
    )(x0, w0, w1, w2, w3, aff)

    y = out[:, :, :3].reshape(N, H, W, 3)
    return jnp.transpose(y, (0, 3, 1, 2))          # NHWC -> NCHW


# ---------------------------------------------------------------------------
# Deterministic parameter construction (matching nn.Module shapes) + reference
# ---------------------------------------------------------------------------
_BN_EPS = 1e-5


def _make_conv_block_params(key, cin, cout):
    kw, kb, kg, kbe, km, kv = jax.random.split(key, 6)
    w_oihw = jax.random.normal(kw, (cout, cin, 3, 3), jnp.float32)
    w_oihw = w_oihw * (1.0 / (cin * 9) ** 0.5)
    b = 0.1 * jax.random.normal(kb, (cout,), jnp.float32)
    gamma = 1.0 + 0.1 * jax.random.normal(kg, (cout,), jnp.float32)
    beta = 0.1 * jax.random.normal(kbe, (cout,), jnp.float32)
    r_mean = 0.1 * jax.random.normal(km, (cout,), jnp.float32)
    r_var = 0.5 + 0.5 * jnp.abs(jax.random.normal(kv, (cout,), jnp.float32))
    scale = gamma / jnp.sqrt(r_var + _BN_EPS)
    shift = beta + (b - r_mean) * scale
    return {"w": jnp.transpose(w_oihw, (2, 3, 1, 0)),  # OIHW -> HWIO
            "scale": scale, "shift": shift, "relu": True}


def _make_plain_conv_params(key, cin, cout):
    kw, kb = jax.random.split(key, 2)
    w_oihw = jax.random.normal(kw, (cout, cin, 3, 3), jnp.float32)
    w_oihw = w_oihw * (1.0 / (cin * 9) ** 0.5)
    b = 0.1 * jax.random.normal(kb, (cout,), jnp.float32)
    return {"w": jnp.transpose(w_oihw, (2, 3, 1, 0)),
            "scale": jnp.ones((cout,), jnp.float32), "shift": b, "relu": False}


def _reference_forward(x_nchw, params):
    x = jnp.transpose(x_nchw, (0, 2, 3, 1))
    for layer in params:
        y = jax.lax.conv_general_dilated(
            x, layer["w"], window_strides=(1, 1), padding="SAME",
            dimension_numbers=("NHWC", "HWIO", "NHWC"))
        y = y * layer["scale"] + layer["shift"]
        if layer["relu"]:
            y = jnp.maximum(y, 0.0)
        x = y
    return jnp.transpose(x, (0, 3, 1, 2))


if __name__ == "__main__":
    root = jax.random.PRNGKey(0)
    kx, k0, k1, k2, k3 = jax.random.split(root, 5)

    # RevealNetwork: ConvBlock(3,128), ConvBlock(128,128), ConvBlock(128,128),
    # Conv2d(128, 3, k=3, p=1)
    params = [
        _make_conv_block_params(k0, 3, 128),
        _make_conv_block_params(k1, 128, 128),
        _make_conv_block_params(k2, 128, 128),
        _make_plain_conv_params(k3, 128, 3),
    ]

    # Small NCHW stego image batch.
    x = jax.random.normal(kx, (2, 3, 16, 16), jnp.float32)

    out = reveal_network_forward(x, params)
    out = jax.block_until_ready(out)
    assert out.shape == (2, 3, 16, 16), out.shape

    ref = jax.block_until_ready(_reference_forward(x, params))
    assert jnp.allclose(out, ref, rtol=2e-3, atol=2e-3), (
        float(jnp.max(jnp.abs(out - ref))))

    print("KERNEL_OK")
</pallas_src>

<mosaic_0001>
module attributes {stable_mosaic.version = 11 : i64} {
  func.func @_reveal_fused_kernel(%arg0: i32, %arg1: memref<1x256x32xf32, #tpu.memory_space<vmem>>, %arg2: memref<32x128xf32, #tpu.memory_space<vmem>>, %arg3: memref<3x384x128xf32, #tpu.memory_space<vmem>>, %arg4: memref<3x384x128xf32, #tpu.memory_space<vmem>>, %arg5: memref<3x384x128xf32, #tpu.memory_space<vmem>>, %arg6: memref<8x128xf32, #tpu.memory_space<vmem>>, %arg7: memref<1x256x128xf32, #tpu.memory_space<vmem>>, %arg8: memref<18x32x128xf32, #tpu.memory_space<vmem>>, %arg9: memref<18x32x128xf32, #tpu.memory_space<vmem>>, %arg10: memref<18x16x384xf32, #tpu.memory_space<vmem>>) attributes {dimension_semantics = [#tpu.dimension_semantics<parallel>], iteration_bounds = array<i64: 2>, scalar_prefetch = 0 : i64, scratch_operands = 3 : i64, tpu.core_type = #tpu.core_type<tc>, window_params = [{transform_indices = @transform_0, window_bounds = array<i64: 1, 256, 32>}, {pipeline_mode = #tpu.pipeline_mode<synchronous>, transform_indices = @transform_1, window_bounds = array<i64: 32, 128>}, {pipeline_mode = #tpu.pipeline_mode<synchronous>, transform_indices = @transform_2, window_bounds = array<i64: 3, 384, 128>}, {pipeline_mode = #tpu.pipeline_mode<synchronous>, transform_indices = @transform_3, window_bounds = array<i64: 3, 384, 128>}, {pipeline_mode = #tpu.pipeline_mode<synchronous>, transform_indices = @transform_4, window_bounds = array<i64: 3, 384, 128>}, {pipeline_mode = #tpu.pipeline_mode<synchronous>, transform_indices = @transform_5, window_bounds = array<i64: 8, 128>}, {transform_indices = @transform_6, window_bounds = array<i64: 1, 256, 128>}]} {
    %cst = arith.constant 0.000000e+00 : f32
    %0 = vector.broadcast %cst : f32 to vector<18x32x128xf32>
    %c0 = arith.constant 0 : index
    %c0_0 = arith.constant 0 : index
    %c0_1 = arith.constant 0 : index
    %1 = vector.load %arg8[%c0, %c0_0, %c0_1] : memref<18x32x128xf32, #tpu.memory_space<vmem>>, vector<18x32x128xf32>
    tpu.vector_store %arg8[%c0, %c0_0, %c0_1], %0 {strides = array<i32>} : memref<18x32x128xf32, #tpu.memory_space<vmem>>, vector<18x32x128xf32>,
    %cst_2 = arith.constant 0.000000e+00 : f32
    %2 = vector.broadcast %cst_2 : f32 to vector<18x32x128xf32>
    %c0_3 = arith.constant 0 : index
    %c0_4 = arith.constant 0 : index
    %c0_5 = arith.constant 0 : index
    %3 = vector.load %arg9[%c0_3, %c0_4, %c0_5] : memref<18x32x128xf32, #tpu.memory_space<vmem>>, vector<18x32x128xf32>
    tpu.vector_store %arg9[%c0_3, %c0_4, %c0_5], %2 {strides = array<i32>} : memref<18x32x128xf32, #tpu.memory_space<vmem>>, vector<18x32x128xf32>,
    %c0_6 = arith.constant 0 : index
    %c0_7 = arith.constant 0 : index
    %c0_8 = arith.constant 0 : index
    %4 = vector.load %arg1[%c0_6, %c0_7, %c0_8] : memref<1x256x32xf32, #tpu.memory_space<vmem>>, vector<1x256x32xf32>
    %5 = vector.shape_cast %4 : vector<1x256x32xf32> to vector<256x32xf32>
    %c0_9 = arith.constant 0 : index
    %c0_10 = arith.constant 0 : index
    %6 = vector.load %arg2[%c0_9, %c0_10] : memref<32x128xf32, #tpu.memory_space<vmem>>, vector<32x128xf32>
    %cst_11 = arith.constant dense<0.000000e+00> : vector<256x128xf32>
    %7 = tpu.matmul %5, %6, %cst_11 {dimension_numbers = #tpu.dot_dimension_numbers<[1], [0], [0], [1], [0, 0, 1, 1], [], []>} : vector<256x32xf32>, vector<32x128xf32>, vector<256x128xf32> -> vector<256x128xf32>
    %c0_12 = arith.constant 0 : index
    %c0_13 = arith.constant 0 : index
    %8 = vector.load %arg6[%c0_12, %c0_13] : memref<8x128xf32, #tpu.memory_space<vmem>>, vector<1x128xf32>
    %9 = vector.broadcast %8 : vector<1x128xf32> to vector<256x128xf32>
    %10 = arith.mulf %7, %9 : vector<256x128xf32>
    %c1 = arith.constant 1 : index
    %c0_14 = arith.constant 0 : index
    %11 = vector.load %arg6[%c1, %c0_14] : memref<8x128xf32, #tpu.memory_space<vmem>>, vector<1x128xf32>
    %12 = vector.broadcast %11 : vector<1x128xf32> to vector<256x128xf32>
    %13 = arith.addf %10, %12 : vector<256x128xf32>
    %cst_15 = arith.constant 0.000000e+00 : f32
    %14 = vector.broadcast %cst_15 : f32 to vector<256x128xf32>
    %15 = arith.maximumf %13, %14 : vector<256x128xf32>
    %16 = vector.shape_cast %15 : vector<256x128xf32> to vector<16x16x128xf32>
    %c1_16 = arith.constant 1 : index
    %c8 = arith.constant 8 : index
    %c0_17 = arith.constant 0 : index
    %17 = vector.load %arg8[%c1_16, %c8, %c0_17] : memref<18x32x128xf32, #tpu.memory_space<vmem>>, vector<16x16x128xf32>
    tpu.vector_store %arg8[%c1_16, %c8, %c0_17], %16 {strides = array<i32>} : memref<18x32x128xf32, #tpu.memory_space<vmem>>, vector<16x16x128xf32>,
    %c0_18 = arith.constant 0 : index
    %c7 = arith.constant 7 : index
    %c0_19 = arith.constant 0 : index
    %18 = vector.load %arg8[%c0_18, %c7, %c0_19] : memref<18x32x128xf32, #tpu.memory_space<vmem>>, vector<18x16x128xf32>
    %c0_20 = arith.constant 0 : index
    %c0_21 = arith.constant 0 : index
    %c0_22 = arith.constant 0 : index
    %19 = vector.load %arg10[%c0_20, %c0_21, %c0_22] : memref<18x16x384xf32, #tpu.memory_space<vmem>>, vector<18x16x128xf32>
    tpu.vector_store %arg10[%c0_20, %c0_21, %c0_22], %18 {strides = array<i32>} : memref<18x16x384xf32, #tpu.memory_space<vmem>>, vector<18x16x128xf32>,
    %c0_23 = arith.constant 0 : index
    %c8_24 = arith.constant 8 : index
    %c0_25 = arith.constant 0 : index
    %20 = vector.load %arg8[%c0_23, %c8_24, %c0_25] : memref<18x32x128xf32, #tpu.memory_space<vmem>>, vector<18x16x128xf32>
    %c0_26 = arith.constant 0 : index
    %c0_27 = arith.constant 0 : index
    %c128 = arith.constant 128 : index
    %21 = vector.load %arg10[%c0_26, %c0_27, %c128] : memref<18x16x384xf32, #tpu.memory_space<vmem>>, vector<18x16x128xf32>
    tpu.vector_store %arg10[%c0_26, %c0_27, %c128], %20 {strides = array<i32>} : memref<18x16x384xf32, #tpu.memory_space<vmem>>, vector<18x16x128xf32>,
    %c0_28 = arith.constant 0 : index
    %c9 = arith.constant 9 : index
    %c0_29 = arith.constant 0 : index
    %22 = vector.load %arg8[%c0_28, %c9, %c0_29] : memref<18x32x128xf32, #tpu.memory_space<vmem>>, vector<18x16x128xf32>
    %c0_30 = arith.constant 0 : index
    %c0_31 = arith.constant 0 : index
    %c256 = arith.constant 256 : index
    %23 = vector.load %arg10[%c0_30, %c0_31, %c256] : memref<18x16x384xf32, #tpu.memory_space<vmem>>, vector<18x16x128xf32>
    tpu.vector_store %arg10[%c0_30, %c0_31, %c256], %22 {strides = array<i32>} : memref<18x16x384xf32, #tpu.memory_space<vmem>>, vector<18x16x128xf32>,
    %cst_32 = arith.constant 0.000000e+00 : f32
    %24 = vector.broadcast %cst_32 : f32 to vector<256x128xf32>
    %c0_33 = arith.constant 0 : index
    %c0_34 = arith.constant 0 : index
    %c0_35 = arith.constant 0 : index
    %25 = vector.load %arg10[%c0_33, %c0_34, %c0_35] : memref<18x16x384xf32, #tpu.memory_space<vmem>>, vector<16x16x384xf32>
    %26 = vector.shape_cast %25 : vector<16x16x384xf32> to vector<256x384xf32>
    %c0_36 = arith.constant 0 : index
    %c0_37 = arith.constant 0 : index
    %c0_38 = arith.constant 0 : index
    %27 = vector.load %arg3[%c0_36, %c0_37, %c0_38] : memref<3x384x128xf32, #tpu.memory_space<vmem>>, vector<1x384x128xf32>
    %28 = vector.shape_cast %27 : vector<1x384x128xf32> to vector<384x128xf32>
    %cst_39 = arith.constant dense<0.000000e+00> : vector<256x128xf32>
    %29 = tpu.matmul %26, %28, %cst_39 {dimension_numbers = #tpu.dot_dimension_numbers<[1], [0], [0], [1], [0, 0, 1, 1], [], []>} : vector<256x384xf32>, vector<384x128xf32>, vector<256x128xf32> -> vector<256x128xf32>
    %30 = arith.addf %24, %29 : vector<256x128xf32>
    %c1_40 = arith.constant 1 : index
    %c0_41 = arith.constant 0 : index
    %c0_42 = arith.constant 0 : index
    %31 = vector.load %arg10[%c1_40, %c0_41, %c0_42] : memref<18x16x384xf32, #tpu.memory_space<vmem>>, vector<16x16x384xf32>
    %32 = vector.shape_cast %31 : vector<16x16x384xf32> to vector<256x384xf32>
    %c1_43 = arith.constant 1 : index
    %c0_44 = arith.constant 0 : index
    %c0_45 = arith.constant 0 : index
    %33 = vector.load %arg3[%c1_43, %c0_44, %c0_45] : memref<3x384x128xf32, #tpu.memory_space<vmem>>, vector<1x384x128xf32>
    %34 = vector.shape_cast %33 : vector<1x384x128xf32> to vector<384x128xf32>
    %cst_46 = arith.constant dense<0.000000e+00> : vector<256x128xf32>
    %35 = tpu.matmul %32, %34, %cst_46 {dimension_numbers = #tpu.dot_dimension_numbers<[1], [0], [0], [1], [0, 0, 1, 1], [], []>} : vector<256x384xf32>, vector<384x128xf32>, vector<256x128xf32> -> vector<256x128xf32>
    %36 = arith.addf %30, %35 : vector<256x128xf32>
    %c2 = arith.constant 2 : index
    %c0_47 = arith.constant 0 : index
    %c0_48 = arith.constant 0 : index
    %37 = vector.load %arg10[%c2, %c0_47, %c0_48] : memref<18x16x384xf32, #tpu.memory_space<vmem>>, vector<16x16x384xf32>
    %38 = vector.shape_cast %37 : vector<16x16x384xf32> to vector<256x384xf32>
    %c2_49 = arith.constant 2 : index
    %c0_50 = arith.constant 0 : index
    %c0_51 = arith.constant 0 : index
    %39 = vector.load %arg3[%c2_49, %c0_50, %c0_51] : memref<3x384x128xf32, #tpu.memory_space<vmem>>, vector<1x384x128xf32>
    %40 = vector.shape_cast %39 : vector<1x384x128xf32> to vector<384x128xf32>
    %cst_52 = arith.constant dense<0.000000e+00> : vector<256x128xf32>
    %41 = tpu.matmul %38, %40, %cst_52 {dimension_numbers = #tpu.dot_dimension_numbers<[1], [0], [0], [1], [0, 0, 1, 1], [], []>} : vector<256x384xf32>, vector<384x128xf32>, vector<256x128xf32> -> vector<256x128xf32>
    %42 = arith.addf %36, %41 : vector<256x128xf32>
    %c2_53 = arith.constant 2 : index
    %c0_54 = arith.constant 0 : index
    %43 = vector.load %arg6[%c2_53, %c0_54] : memref<8x128xf32, #tpu.memory_space<vmem>>, vector<1x128xf32>
    %44 = vector.broadcast %43 : vector<1x128xf32> to vector<256x128xf32>
    %45 = arith.mulf %42, %44 : vector<256x128xf32>
    %c3 = arith.constant 3 : index
    %c0_55 = arith.constant 0 : index
    %46 = vector.load %arg6[%c3, %c0_55] : memref<8x128xf32, #tpu.memory_space<vmem>>, vector<1x128xf32>
    %47 = vector.broadcast %46 : vector<1x128xf32> to vector<256x128xf32>
    %48 = arith.addf %45, %47 : vector<256x128xf32>
    %cst_56 = arith.constant 0.000000e+00 : f32
    %49 = vector.broadcast %cst_56 : f32 to vector<256x128xf32>
    %50 = arith.maximumf %48, %49 : vector<256x128xf32>
    %51 = vector.shape_cast %50 : vector<256x128xf32> to vector<16x16x128xf32>
    %c1_57 = arith.constant 1 : index
    %c8_58 = arith.constant 8 : index
    %c0_59 = arith.constant 0 : index
    %52 = vector.load %arg9[%c1_57, %c8_58, %c0_59] : memref<18x32x128xf32, #tpu.memory_space<vmem>>, vector<16x16x128xf32>
    tpu.vector_store %arg9[%c1_57, %c8_58, %c0_59], %51 {strides = array<i32>} : memref<18x32x128xf32, #tpu.memory_space<vmem>>, vector<16x16x128xf32>,
    %c0_60 = arith.constant 0 : index
    %c7_61 = arith.constant 7 : index
    %c0_62 = arith.constant 0 : index
    %53 = vector.load %arg9[%c0_60, %c7_61, %c0_62] : memref<18x32x128xf32, #tpu.memory_space<vmem>>, vector<18x16x128xf32>
    %c0_63 = arith.constant 0 : index
    %c0_64 = arith.constant 0 : index
    %c0_65 = arith.constant 0 : index
    %54 = vector.load %arg10[%c0_63, %c0_64, %c0_65] : memref<18x16x384xf32, #tpu.memory_space<vmem>>, vector<18x16x128xf32>
    tpu.vector_store %arg10[%c0_63, %c0_64, %c0_65], %53 {strides = array<i32>} : memref<18x16x384xf32, #tpu.memory_space<vmem>>, vector<18x16x128xf32>,
    %c0_66 = arith.constant 0 : index
    %c8_67 = arith.constant 8 : index
    %c0_68 = arith.constant 0 : index
    %55 = vector.load %arg9[%c0_66, %c8_67, %c0_68] : memref<18x32x128xf32, #tpu.memory_space<vmem>>, vector<18x16x128xf32>
    %c0_69 = arith.constant 0 : index
    %c0_70 = arith.constant 0 : index
    %c128_71 = arith.constant 128 : index
    %56 = vector.load %arg10[%c0_69, %c0_70, %c128_71] : memref<18x16x384xf32, #tpu.memory_space<vmem>>, vector<18x16x128xf32>
    tpu.vector_store %arg10[%c0_69, %c0_70, %c128_71], %55 {strides = array<i32>} : memref<18x16x384xf32, #tpu.memory_space<vmem>>, vector<18x16x128xf32>,
    %c0_72 = arith.constant 0 : index
    %c9_73 = arith.constant 9 : index
    %c0_74 = arith.constant 0 : index
    %57 = vector.load %arg9[%c0_72, %c9_73, %c0_74] : memref<18x32x128xf32, #tpu.memory_space<vmem>>, vector<18x16x128xf32>
    %c0_75 = arith.constant 0 : index
    %c0_76 = arith.constant 0 : index
    %c256_77 = arith.constant 256 : index
    %58 = vector.load %arg10[%c0_75, %c0_76, %c256_77] : memref<18x16x384xf32, #tpu.memory_space<vmem>>, vector<18x16x128xf32>
    tpu.vector_store %arg10[%c0_75, %c0_76, %c256_77], %57 {strides = array<i32>} : memref<18x16x384xf32, #tpu.memory_space<vmem>>, vector<18x16x128xf32>,
    %cst_78 = arith.constant 0.000000e+00 : f32
    %59 = vector.broadcast %cst_78 : f32 to vector<256x128xf32>
    %c0_79 = arith.constant 0 : index
    %c0_80 = arith.constant 0 : index
    %c0_81 = arith.constant 0 : index
    %60 = vector.load %arg10[%c0_79, %c0_80, %c0_81] : memref<18x16x384xf32, #tpu.memory_space<vmem>>, vector<16x16x384xf32>
    %61 = vector.shape_cast %60 : vector<16x16x384xf32> to vector<256x384xf32>
    %c0_82 = arith.constant 0 : index
    %c0_83 = arith.constant 0 : index
    %c0_84 = arith.constant 0 : index
    %62 = vector.load %arg4[%c0_82, %c0_83, %c0_84] : memref<3x384x128xf32, #tpu.memory_space<vmem>>, vector<1x384x128xf32>
    %63 = vector.shape_cast %62 : vector<1x384x128xf32> to vector<384x128xf32>
    %cst_85 = arith.constant dense<0.000000e+00> : vector<256x128xf32>
    %64 = tpu.matmul %61, %63, %cst_85 {dimension_numbers = #tpu.dot_dimension_numbers<[1], [0], [0], [1], [0, 0, 1, 1], [], []>} : vector<256x384xf32>, vector<384x128xf32>, vector<256x128xf32> -> vector<256x128xf32>
    %65 = arith.addf %59, %64 : vector<256x128xf32>
    %c1_86 = arith.constant 1 : index
    %c0_87 = arith.constant 0 : index
    %c0_88 = arith.constant 0 : index
    %66 = vector.load %arg10[%c1_86, %c0_87, %c0_88] : memref<18x16x384xf32, #tpu.memory_space<vmem>>, vector<16x16x384xf32>
    %67 = vector.shape_cast %66 : vector<16x16x384xf32> to vector<256x384xf32>
    %c1_89 = arith.constant 1 : index
    %c0_90 = arith.constant 0 : index
    %c0_91 = arith.constant 0 : index
    %68 = vector.load %arg4[%c1_89, %c0_90, %c0_91] : memref<3x384x128xf32, #tpu.memory_space<vmem>>, vector<1x384x128xf32>
    %69 = vector.shape_cast %68 : vector<1x384x128xf32> to vector<384x128xf32>
    %cst_92 = arith.constant dense<0.000000e+00> : vector<256x128xf32>
    %70 = tpu.matmul %67, %69, %cst_92 {dimension_numbers = #tpu.dot_dimension_numbers<[1], [0], [0], [1], [0, 0, 1, 1], [], []>} : vector<256x384xf32>, vector<384x128xf32>, vector<256x128xf32> -> vector<256x128xf32>
    %71 = arith.addf %65, %70 : vector<256x128xf32>
    %c2_93 = arith.constant 2 : index
    %c0_94 = arith.constant 0 : index
    %c0_95 = arith.constant 0 : index
    %72 = vector.load %arg10[%c2_93, %c0_94, %c0_95] : memref<18x16x384xf32, #tpu.memory_space<vmem>>, vector<16x16x384xf32>
    %73 = vector.shape_cast %72 : vector<16x16x384xf32> to vector<256x384xf32>
    %c2_96 = arith.constant 2 : index
    %c0_97 = arith.constant 0 : index
    %c0_98 = arith.constant 0 : index
    %74 = vector.load %arg4[%c2_96, %c0_97, %c0_98] : memref<3x384x128xf32, #tpu.memory_space<vmem>>, vector<1x384x128xf32>
    %75 = vector.shape_cast %74 : vector<1x384x128xf32> to vector<384x128xf32>
    %cst_99 = arith.constant dense<0.000000e+00> : vector<256x128xf32>
    %76 = tpu.matmul %73, %75, %cst_99 {dimension_numbers = #tpu.dot_dimension_numbers<[1], [0], [0], [1], [0, 0, 1, 1], [], []>} : vector<256x384xf32>, vector<384x128xf32>, vector<256x128xf32> -> vector<256x128xf32>
    %77 = arith.addf %71, %76 : vector<256x128xf32>
    %c4 = arith.constant 4 : index
    %c0_100 = arith.constant 0 : index
    %78 = vector.load %arg6[%c4, %c0_100] : memref<8x128xf32, #tpu.memory_space<vmem>>, vector<1x128xf32>
    %79 = vector.broadcast %78 : vector<1x128xf32> to vector<256x128xf32>
    %80 = arith.mulf %77, %79 : vector<256x128xf32>
    %c5 = arith.constant 5 : index
    %c0_101 = arith.constant 0 : index
    %81 = vector.load %arg6[%c5, %c0_101] : memref<8x128xf32, #tpu.memory_space<vmem>>, vector<1x128xf32>
    %82 = vector.broadcast %81 : vector<1x128xf32> to vector<256x128xf32>
    %83 = arith.addf %80, %82 : vector<256x128xf32>
    %cst_102 = arith.constant 0.000000e+00 : f32
    %84 = vector.broadcast %cst_102 : f32 to vector<256x128xf32>
    %85 = arith.maximumf %83, %84 : vector<256x128xf32>
    %86 = vector.shape_cast %85 : vector<256x128xf32> to vector<16x16x128xf32>
    %c1_103 = arith.constant 1 : index
    %c8_104 = arith.constant 8 : index
    %c0_105 = arith.constant 0 : index
    %87 = vector.load %arg8[%c1_103, %c8_104, %c0_105] : memref<18x32x128xf32, #tpu.memory_space<vmem>>, vector<16x16x128xf32>
    tpu.vector_store %arg8[%c1_103, %c8_104, %c0_105], %86 {strides = array<i32>} : memref<18x32x128xf32, #tpu.memory_space<vmem>>, vector<16x16x128xf32>,
    %c0_106 = arith.constant 0 : index
    %c7_107 = arith.constant 7 : index
    %c0_108 = arith.constant 0 : index
    %88 = vector.load %arg8[%c0_106, %c7_107, %c0_108] : memref<18x32x128xf32, #tpu.memory_space<vmem>>, vector<18x16x128xf32>
    %c0_109 = arith.constant 0 : index
    %c0_110 = arith.constant 0 : index
    %c0_111 = arith.constant 0 : index
    %89 = vector.load %arg10[%c0_109, %c0_110, %c0_111] : memref<18x16x384xf32, #tpu.memory_space<vmem>>, vector<18x16x128xf32>
    tpu.vector_store %arg10[%c0_109, %c0_110, %c0_111], %88 {strides = array<i32>} : memref<18x16x384xf32, #tpu.memory_space<vmem>>, vector<18x16x128xf32>,
    %c0_112 = arith.constant 0 : index
    %c8_113 = arith.constant 8 : index
    %c0_114 = arith.constant 0 : index
    %90 = vector.load %arg8[%c0_112, %c8_113, %c0_114] : memref<18x32x128xf32, #tpu.memory_space<vmem>>, vector<18x16x128xf32>
    %c0_115 = arith.constant 0 : index
    %c0_116 = arith.constant 0 : index
    %c128_117 = arith.constant 128 : index
    %91 = vector.load %arg10[%c0_115, %c0_116, %c128_117] : memref<18x16x384xf32, #tpu.memory_space<vmem>>, vector<18x16x128xf32>
    tpu.vector_store %arg10[%c0_115, %c0_116, %c128_117], %90 {strides = array<i32>} : memref<18x16x384xf32, #tpu.memory_space<vmem>>, vector<18x16x128xf32>,
    %c0_118 = arith.constant 0 : index
    %c9_119 = arith.constant 9 : index
    %c0_120 = arith.constant 0 : index
    %92 = vector.load %arg8[%c0_118, %c9_119, %c0_120] : memref<18x32x128xf32, #tpu.memory_space<vmem>>, vector<18x16x128xf32>
    %c0_121 = arith.constant 0 : index
    %c0_122 = arith.constant 0 : index
    %c256_123 = arith.constant 256 : index
    %93 = vector.load %arg10[%c0_121, %c0_122, %c256_123] : memref<18x16x384xf32, #tpu.memory_space<vmem>>, vector<18x16x128xf32>
    tpu.vector_store %arg10[%c0_121, %c0_122, %c256_123], %92 {strides = array<i32>} : memref<18x16x384xf32, #tpu.memory_space<vmem>>, vector<18x16x128xf32>,
    %cst_124 = arith.constant 0.000000e+00 : f32
    %94 = vector.broadcast %cst_124 : f32 to vector<256x128xf32>
    %c0_125 = arith.constant 0 : index
    %c0_126 = arith.constant 0 : index
    %c0_127 = arith.constant 0 : index
    %95 = vector.load %arg10[%c0_125, %c0_126, %c0_127] : memref<18x16x384xf32, #tpu.memory_space<vmem>>, vector<16x16x384xf32>
    %96 = vector.shape_cast %95 : vector<16x16x384xf32> to vector<256x384xf32>
    %c0_128 = arith.constant 0 : index
    %c0_129 = arith.constant 0 : index
    %c0_130 = arith.constant 0 : index
    %97 = vector.load %arg5[%c0_128, %c0_129, %c0_130] : memref<3x384x128xf32, #tpu.memory_space<vmem>>, vector<1x384x128xf32>
    %98 = vector.shape_cast %97 : vector<1x384x128xf32> to vector<384x128xf32>
    %cst_131 = arith.constant dense<0.000000e+00> : vector<256x128xf32>
    %99 = tpu.matmul %96, %98, %cst_131 {dimension_numbers = #tpu.dot_dimension_numbers<[1], [0], [0], [1], [0, 0, 1, 1], [], []>} : vector<256x384xf32>, vector<384x128xf32>, vector<256x128xf32> -> vector<256x128xf32>
    %100 = arith.addf %94, %99 : vector<256x128xf32>
    %c1_132 = arith.constant 1 : index
    %c0_133 = arith.constant 0 : index
    %c0_134 = arith.constant 0 : index
    %101 = vector.load %arg10[%c1_132, %c0_133, %c0_134] : memref<18x16x384xf32, #tpu.memory_space<vmem>>, vector<16x16x384xf32>
    %102 = vector.shape_cast %101 : vector<16x16x384xf32> to vector<256x384xf32>
    %c1_135 = arith.constant 1 : index
    %c0_136 = arith.constant 0 : index
    %c0_137 = arith.constant 0 : index
    %103 = vector.load %arg5[%c1_135, %c0_136, %c0_137] : memref<3x384x128xf32, #tpu.memory_space<vmem>>, vector<1x384x128xf32>
    %104 = vector.shape_cast %103 : vector<1x384x128xf32> to vector<384x128xf32>
    %cst_138 = arith.constant dense<0.000000e+00> : vector<256x128xf32>
    %105 = tpu.matmul %102, %104, %cst_138 {dimension_numbers = #tpu.dot_dimension_numbers<[1], [0], [0], [1], [0, 0, 1, 1], [], []>} : vector<256x384xf32>, vector<384x128xf32>, vector<256x128xf32> -> vector<256x128xf32>
    %106 = arith.addf %100, %105 : vector<256x128xf32>
    %c2_139 = arith.constant 2 : index
    %c0_140 = arith.constant 0 : index
    %c0_141 = arith.constant 0 : index
    %107 = vector.load %arg10[%c2_139, %c0_140, %c0_141] : memref<18x16x384xf32, #tpu.memory_space<vmem>>, vector<16x16x384xf32>
    %108 = vector.shape_cast %107 : vector<16x16x384xf32> to vector<256x384xf32>
    %c2_142 = arith.constant 2 : index
    %c0_143 = arith.constant 0 : index
    %c0_144 = arith.constant 0 : index
    %109 = vector.load %arg5[%c2_142, %c0_143, %c0_144] : memref<3x384x128xf32, #tpu.memory_space<vmem>>, vector<1x384x128xf32>
    %110 = vector.shape_cast %109 : vector<1x384x128xf32> to vector<384x128xf32>
    %cst_145 = arith.constant dense<0.000000e+00> : vector<256x128xf32>
    %111 = tpu.matmul %108, %110, %cst_145 {dimension_numbers = #tpu.dot_dimension_numbers<[1], [0], [0], [1], [0, 0, 1, 1], [], []>} : vector<256x384xf32>, vector<384x128xf32>, vector<256x128xf32> -> vector<256x128xf32>
    %112 = arith.addf %106, %111 : vector<256x128xf32>
    %c6 = arith.constant 6 : index
    %c0_146 = arith.constant 0 : index
    %113 = vector.load %arg6[%c6, %c0_146] : memref<8x128xf32, #tpu.memory_space<vmem>>, vector<1x128xf32>
    %114 = vector.broadcast %113 : vector<1x128xf32> to vector<256x128xf32>
    %115 = arith.mulf %112, %114 : vector<256x128xf32>
    %c7_147 = arith.constant 7 : index
    %c0_148 = arith.constant 0 : index
    %116 = vector.load %arg6[%c7_147, %c0_148] : memref<8x128xf32, #tpu.memory_space<vmem>>, vector<1x128xf32>
    %117 = vector.broadcast %116 : vector<1x128xf32> to vector<256x128xf32>
    %118 = arith.addf %115, %117 : vector<256x128xf32>
    %c0_149 = arith.constant 0 : index
    %c0_150 = arith.constant 0 : index
    %c0_151 = arith.constant 0 : index
    %119 = vector.load %arg7[%c0_149, %c0_150, %c0_151] : memref<1x256x128xf32, #tpu.memory_space<vmem>>, vector<1x256x128xf32>
    %120 = vector.shape_cast %119 : vector<1x256x128xf32> to vector<256x128xf32>
    %121 = vector.shape_cast %118 : vector<256x128xf32> to vector<1x256x128xf32>
    tpu.vector_store %arg7[%c0_149, %c0_150, %c0_151], %121 {strides = array<i32>} : memref<1x256x128xf32, #tpu.memory_space<vmem>>, vector<1x256x128xf32>,
    return
  }
  func.func @transform_0(%arg0: i32) -> (i32, i32, i32) {
    %c0_i32 = arith.constant 0 : i32
    %c0_i32_0 = arith.constant 0 : i32
    %c0_i32_1 = arith.constant 0 : i32
    return %arg0, %c0_i32, %c0_i32_0 : i32, i32, i32
  }
  func.func @transform_1(%arg0: i32) -> (i32, i32) {
    %c0_i32 = arith.constant 0 : i32
    %c0_i32_0 = arith.constant 0 : i32
    %c0_i32_1 = arith.constant 0 : i32
    return %c0_i32, %c0_i32_0 : i32, i32
  }
  func.func @transform_2(%arg0: i32) -> (i32, i32, i32) {
    %c0_i32 = arith.constant 0 : i32
    %c0_i32_0 = arith.constant 0 : i32
    %c0_i32_1 = arith.constant 0 : i32
    %c0_i32_2 = arith.constant 0 : i32
    return %c0_i32, %c0_i32_0, %c0_i32_1 : i32, i32, i32
  }
  func.func @transform_3(%arg0: i32) -> (i32, i32, i32) {
    %c0_i32 = arith.constant 0 : i32
    %c0_i32_0 = arith.constant 0 : i32
    %c0_i32_1 = arith.constant 0 : i32
    %c0_i32_2 = arith.constant 0 : i32
    return %c0_i32, %c0_i32_0, %c0_i32_1 : i32, i32, i32
  }
  func.func @transform_4(%arg0: i32) -> (i32, i32, i32) {
    %c0_i32 = arith.constant 0 : i32
    %c0_i32_0 = arith.constant 0 : i32
    %c0_i32_1 = arith.constant 0 : i32
    %c0_i32_2 = arith.constant 0 : i32
    return %c0_i32, %c0_i32_0, %c0_i32_1 : i32, i32, i32
  }
  func.func @transform_5(%arg0: i32) -> (i32, i32) {
    %c0_i32 = arith.constant 0 : i32
    %c0_i32_0 = arith.constant 0 : i32
    %c0_i32_1 = arith.constant 0 : i32
    return %c0_i32, %c0_i32_0 : i32, i32
  }
  func.func @transform_6(%arg0: i32) -> (i32, i32, i32) {
    %c0_i32 = arith.constant 0 : i32
    %c0_i32_0 = arith.constant 0 : i32
    %c0_i32_1 = arith.constant 0 : i32
    return %arg0, %c0_i32, %c0_i32_0 : i32, i32, i32
  }
}

</mosaic_0001>

<bundles_post_ra>
// kernel: tpu_custom_call.1
= control target key start
LH: loop header
LB: loop body
LE: loop exit
PB: predicated region body
PF: predicated region fallthrough
CT: control target
= control target key end

     0   :  { %11 = vsyncpa [#allocation6], 0  ;;  %s10464_s0 = inlined_call_operand.vmem [shape: f32[2,256,32], index: 0, kind: input, shape index: {}]   ;;  %s10465_s1 = inlined_call_operand.vmem [shape: f32[32,128], index: 1, kind: input, shape index: {}]   ;;  %s10466_s2 = inlined_call_operand.hbm [shape: f32[3,384,128], index: 2, kind: input, shape index: {}]   ;;  %s10467_s3 = inlined_call_operand.hbm [shape: f32[3,384,128], index: 3, kind: input, shape index: {}]   ;;  %s10468_s4 = inlined_call_operand.hbm [shape: f32[3,384,128], index: 4, kind: input, shape index: {}]   ;;  %s10469_s5 = inlined_call_operand.vmem [shape: f32[8,128], index: 5, kind: input, shape index: {}]   ;;  %s10470_s6 = inlined_call_operand.hbm [shape: f32[2,256,128], index: 6, kind: output, shape index: {}]  }
   0x1   :  { %12 = vsyncpa [#allocation9], 0 }
   0x2   :  { %13 = vsyncpa [#allocation7], 0 }
   0x3   :  { %15 = vsyncpa [#allocation7 + $0x1], 0  ;;  %s6992_s21 = smov 0   ;;  %s6994_s22 = smov 0  }
   0x4   :  { %s6996_s23 = smov 0   ;;  %s6998_s24 = smov 0  }
   0x5 LB: > { %s7013_s25 = sadd.s32 4294967295, %s6947_s24   ;;  %s6396_s26 = sadd.s32 4294967294, %s6947_s24   ;;  %s6947_s24 = sphi %s6998_s24, %s11024_s24   ;;  %s6943_s23 = sphi %s6996_s23, %s11023_s23   ;;  %s6939_s22 = sphi %s6994_s22, %s11022_s22   ;;  %s6935_s21 = sphi %s6992_s21, %s11021_s21  }
   0x6   : > { %s7017_s27 = sadd.s32 1, %s6947_s24   ;;  %s159_s28 = sadd.s32 1, %s6943_s23 }
   0x7   : > { %s156_s29 = ssub.s32 %s6947_s24, %s7017_s27  ;;  %p169_p0 = scmp.ne.s32.totalorder %s6943_s23, %s6939_s22 }
   0x8   : > { %p157_p1 = scmp.eq.s32.totalorder %s156_s29, 0  ;;  %p170_p2 = scmp.eq.s32.totalorder %s7013_s25, 1 }
   0x9   : > { %p175_p3 = scmp.ne.s32.totalorder %s6939_s22, %s6935_s21  ;;  %p176_p4 = scmp.eq.s32.totalorder %s6396_s26, 1 }
   0xa   : > { %s7028_s30 = scalar_select %p157_p1, %s6943_s23, %s159_s28  }
   0xb   : > { %p7030_p5 = por %p170_p2, %p169_p0  ;;  %p7034_p6 = por %p176_p4, %p175_p3 }
   0xc   : > { %p6397_p7 = scmp.ge.s32.totalorder %s6947_s24, 1  ;;  %p183_p8 = scmp.lt.s32.totalorder %s6947_s24, 3 }
   0xd   : > { %p6476_p9 = scmp.eq.s32.totalorder %s7013_s25, 0  ;;  %s211_s12 = sshll.u32 %s10467_s3, 4  ;;  %s212_s12 = int_to_ptr.hbm [resolvable:$true] %s211_s12 }
   0xe   : > { %p7041_p10 = pnand %p6397_p7, %p183_p8  ;;  %s197_s15 = sshll.u32 %s10466_s2, 4  ;;  %s198_s15 = int_to_ptr.hbm [resolvable:$true] %s197_s15 }
   0xf   : > { %s6949_s17 = smov [#allocation8]   ;;  %s6950_s19 = smov 128  }
  0x10   : > { %p6462_p11 = pneg %p7041_p10  ;;  %s213_s18 = sshll.u32 %s6949_s17, 4  ;;  %s214_s18 = int_to_ptr.vmem [resolvable:$true] %s213_s18 }
  0x11   : > { %s6951_s20 = smov 8   ;;  %s6952_s26 = smov [#allocation5]  }
  0x12   : > { %p7055_p12 = pnand %p6476_p9, %p6462_p11  ;;  %s199_s28 = sshll.u32 %s6952_s26, 4  ;;  %s200_s28 = int_to_ptr.vmem [resolvable:$true] %s199_s28 }
  0x13   : > { %s225_s11 = sshll.u32 %s10468_s4, 4  ;;  %s6953_s13 = smov [#allocation10]   ;;  %s226_s11 = int_to_ptr.hbm [resolvable:$true] %s225_s11 }
  0x14   : > { %6468 = dma.hbm_to_vmem [thread:$0]  (!%p7055_p12), %s212_s12, 18432, %s214_s18, [#allocation9], %s6950_s19, %s6950_s19, %s6951_s20  }
  0x15   : > { %6465 = dma.hbm_to_vmem [thread:$0]  (!%p7055_p12), %s198_s15, 18432, %s200_s28, [#allocation6], %s6950_s19, %s6950_s19, %s6951_s20  }
  0x16   : > { %s227_s14 = sshll.u32 %s6953_s13, 4  ;;  %254 = sbr.rel (%p7041_p10) target bundleno = 2429 (0x97d), region = 44  ;;  %s228_s14 = int_to_ptr.vmem [resolvable:$true] %s227_s14 }
  0x17   : > { %6471 = dma.hbm_to_vmem [thread:$0]  (!%p7055_p12), %s226_s11, 18432, %s228_s14, [#allocation9], %s6950_s19, %s6950_s19, %s6951_s20  }
  0x1b   : > { %6922 = dma.done.wait (%p6476_p9), [#allocation6], 18432  }
  0x1c   : > { %6924 = vsyncadd (%p6476_p9), [#allocation6], 4294948864 }
  0x1d   : > { %6926 = dma.done.wait (%p6476_p9), [#allocation9], 36864  }
  0x1e   : > { %6928 = vsyncadd (%p6476_p9), [#allocation9], 4294930432  ;;  %p295_p13 = scmp.lt.s32.totalorder %s7013_s25, 1  ;;  %v479_v0 = vld [vmem:[%s10465_s1 + $0x18] sm:$0xff]  ;;  %v478_v1 = vld [vmem:[%s10465_s1 + $0x10] sm:$0xff]  ;;  %vm480_vm0 = vcmask 261120  }
  0x1f   : > { %589 = vmatpush.msra.mxu0 %v479_v0  ;;  %v477_v2 = vld [vmem:[%s10465_s1 + $0x8] sm:$0xff]  ;;  %v476_v3 = vld [vmem:[%s10465_s1] sm:$0xff]  ;;  %v1312_v13 = vld [vmem:[#allocation5 + $0x278] sm:$0xff]  ;;  %v6954_v38 = vmov 0.0   ;;  %s292_s20 = sand.u32 1, %s6939_s22   ;;  %s6447_s14 = sshll.u32 %s7013_s25, 8 }
  0x20   : > { %s296_s12 = scalar_select %p295_p13, %s7013_s25, 1  ;;  %1442 = vmatpush.msra.mxu2 %v1312_v13  ;;  %v1311_v15 = vld [vmem:[#allocation5 + $0x270] sm:$0xff]  ;;  %v1296_v16 = vld [vmem:[#allocation5 + $0x1f8] sm:$0xff]  ;;  %v1310_v18 = vld [vmem:[#allocation5 + $0x268] sm:$0xff]  ;;  %300 = vst [vmem:[#allocation2] sm:$0xff] %v6954_v38 }
  0x21   : > { %590 = vmatpush.msra.mxu0 %v478_v1  ;;  %v1295_v17 = vld [vmem:[#allocation5 + $0x1f0] sm:$0xff]  ;;  %1329 = vmatpush.msra.mxu1 %v1296_v16  ;;  %v1309_v19 = vld [vmem:[#allocation5 + $0x260] sm:$0xff]  ;;  %v1308_v20 = vld [vmem:[#allocation5 + $0x258] sm:$0xff]  ;;  %301 = vst [vmem:[#allocation2 + $0x8] sm:$0xff] %v6954_v38  ;;  %s6406_s29 = sshll.u32 %s292_s20, 8  ;;  %s6299_s16 = scalar_lea.hbm %s10470_s6, %s6447_s14 }
  0x22   : > { %s6446_s15 = sshll.u32 %s296_s12, 8  ;;  %1443 = vmatpush.msra.mxu2 %v1311_v15  ;;  %v1307_v22 = vld [vmem:[#allocation5 + $0x250] sm:$0xff]  ;;  %v1294_v23 = vld [vmem:[#allocation5 + $0x1e8] sm:$0xff]  ;;  %v1293_v24 = vld [vmem:[#allocation5 + $0x1e0] sm:$0xff]  ;;  %302 = vst [vmem:[#allocation2 + $0x10] sm:$0xff] %v6954_v38  ;;  %s10241_s13 = scalar_lea.vmem [#allocation11], %s6406_s29 }
  0x23   : > { %s7095_s11 = scalar_lea.vmem %s10464_s0, %s6446_s15  ;;  %591 = vmatpush.msra.mxu0 %v477_v2  ;;  %1330 = vmatpush.msra.mxu1 %v1295_v17  ;;  %v1328_v25 = vld [vmem:[#allocation5 + $0x2f8] sm:$0xff]  ;;  %v1327_v26 = vld [vmem:[#allocation5 + $0x2f0] sm:$0xff]  ;;  %v1306_v28 = vld [vmem:[#allocation5 + $0x248] sm:$0xff]  ;;  %303 = vst [vmem:[#allocation2 + $0x18] sm:$0xff] %v6954_v38  ;;  %s6300_s9 = sshll.u32 %s10241_s13, 4  ;;  %s6301_s9 = int_to_ptr.vmem [resolvable:$true] %s6300_s9 }
  0x24   : > { %v444_v4 = vld [vmem:[%s7095_s11] sm:$0xff]  ;;  %v445_v5 = vld [vmem:[%s7095_s11 + $0x8] sm:$0xff]  ;;  %v446_v6 = vld [vmem:[%s7095_s11 + $0x10] sm:$0xff]  ;;  %1444 = vmatpush.msra.mxu2 %v1310_v18  ;;  %1555 = vmatpush.msra.mxu3 %v1328_v25  ;;  %304 = vst [vmem:[#allocation2 + $0x20] sm:$0xff] %v6954_v38  ;;  %s6302_s17 = sshll.u32 %s6299_s16, 4  ;;  %s6288_s25 = scalar_lea.sflag [#allocation7], %s292_s20  ;;  %s6303_s17 = int_to_ptr.hbm [resolvable:$true] %s6302_s17 }
  0x25   : > { %592 = vmatpush.msra.mxu0 %v476_v3  ;;  %v447_v7 = vld [vmem:[%s7095_s11 + $0x18] sm:$0xff]  ;;  %v448_v8 = vld [vmem:[%s7095_s11 + $0x20] sm:$0xff]  ;;  %v449_v9 = vld [vmem:[%s7095_s11 + $0x28] sm:$0xff]  ;;  %1331 = vmatpush.msra.mxu1 %v1294_v23  ;;  %307 = vst [vmem:[#allocation2 + $0x38] sm:$0xff] %v6954_v38  ;;  %s6891_s18 = sshra.s32 %s6303_s17, 4  ;;  %s6897_s29 = scalar_lea.hbm %s10470_s6, 512  ;;  %s6892_s18 = int_to_ptr.hbm [resolvable:$true] %s6891_s18 }
  0x26   : > { %6409 = vmatmul.msk.f32.vlgmr.msra.gmra.mxu0 %vm480_vm0, %v444_v4  ;;  %v450_v10 = vld [vmem:[%s7095_s11 + $0x30] sm:$0xff]  ;;  %v451_v11 = vld [vmem:[%s7095_s11 + $0x38] sm:$0xff]  ;;  %v452_v12 = vld [vmem:[%s7095_s11 + $0x40] sm:$0xff]  ;;  %1445 = vmatpush.msra.mxu2 %v1309_v19  ;;  %308 = vst [vmem:[#allocation2 + $0x40] sm:$0xff] %v6954_v38  ;;  %s6893_s19 = scalar_lea.hbm %s6892_s18, 256  ;;  %p6898_p3 = scmp.lt.s32.totalorder %s6892_s18, %s10470_s6 }
  0x27   : > { %v453_v14 = vld [vmem:[%s7095_s11 + $0x48] sm:$0xff]  ;;  %v454_v21 = vld [vmem:[%s7095_s11 + $0x50] sm:$0xff]  ;;  %v1292_v27 = vld [vmem:[#allocation5 + $0x1d8] sm:$0xff]  ;;  %1332 = vmatpush.msra.mxu1 %v1293_v24  ;;  %1556 = vmatpush.msra.mxu3 %v1327_v26  ;;  %311 = vst [vmem:[#allocation2 + $0x58] sm:$0xff] %v6954_v38  ;;  %p6894_p0 = scmp.ne.s32.totalorder %s6892_s18, %s6893_s19  ;;  %p6899_p4 = scmp.lt.s32.totalorder %s6897_s29, %s6893_s19 }
  0x28   : > { %1446 = vmatpush.msra.mxu2 %v1308_v20  ;;  %v1305_v29 = vld [vmem:[#allocation5 + $0x240] sm:$0xff]  ;;  %v1291_v30 = vld [vmem:[#allocation5 + $0x1d0] sm:$0xff]  ;;  %v1304_v31 = vld [vmem:[#allocation5 + $0x238] sm:$0xff]  ;;  %312 = vst [vmem:[#allocation2 + $0x60] sm:$0xff] %v6954_v38 }
  0x29   : > { %v455_v32 = vld [vmem:[%s7095_s11 + $0x58] sm:$0xff]  ;;  %1333 = vmatpush.msra.mxu1 %v1292_v27  ;;  %v1303_v33 = vld [vmem:[#allocation5 + $0x230] sm:$0xff]  ;;  %v1290_v34 = vld [vmem:[#allocation5 + $0x1c8] sm:$0xff]  ;;  %315 = vst [vmem:[#allocation2 + $0x78] sm:$0xff] %v6954_v38  ;;  %p6895_p1 = pnand %p6894_p0, %p7030_p5  ;;  %p6900_p7 = por %p6899_p4, %p6898_p3 }
  0x2a   : > { %1447 = vmatpush.msra.mxu2 %v1307_v22  ;;  %v1326_v35 = vld [vmem:[#allocation5 + $0x2e8] sm:$0xff]  ;;  %v1289_v36 = vld [vmem:[#allocation5 + $0x1c0] sm:$0xff]  ;;  %v1288_v41 = vld [vmem:[#allocation5 + $0x1b8] sm:$0xff]  ;;  %316 = vst [vmem:[#allocation2 + $0x80] sm:$0xff] %v6954_v38 }
  0x2b   : > { %1334 = vmatpush.msra.mxu1 %v1291_v30  ;;  %1557 = vmatpush.msra.mxu3 %v1326_v35  ;;  %v1325_v37 = vld [vmem:[#allocation5 + $0x2e0] sm:$0xff]  ;;  %v1302_v39 = vld [vmem:[#allocation5 + $0x228] sm:$0xff]  ;;  %v1324_v42 = vld [vmem:[#allocation5 + $0x2d8] sm:$0xff]  ;;  %319 = vst [vmem:[#allocation2 + $0x98] sm:$0xff] %v6954_v38  ;;  %p6896_p2 = pneg %p6895_p1 }
  0x2c   : > { %1448 = vmatpush.msra.mxu2 %v1306_v28  ;;  %v1301_v40 = vld [vmem:[#allocation5 + $0x220] sm:$0xff]  ;;  %v1287_v44 = vld [vmem:[#allocation5 + $0x1b0] sm:$0xff]  ;;  %v1286_v46 = vld [vmem:[#allocation5 + $0x1a8] sm:$0xff]  ;;  %320 = vst [vmem:[#allocation2 + $0xa0] sm:$0xff] %v6954_v38 }
  0x2d   : > { %1335 = vmatpush.msra.mxu1 %v1290_v34  ;;  %1558 = vmatpush.msra.mxu3 %v1325_v37  ;;  %v456_v43 = vld [vmem:[%s7095_s11 + $0x60] sm:$0xff]  ;;  %v1323_v45 = vld [vmem:[#allocation5 + $0x2d0] sm:$0xff]  ;;  %v1322_v47 = vld [vmem:[#allocation5 + $0x2c8] sm:$0xff]  ;;  %323 = vst [vmem:[#allocation2 + $0xb8] sm:$0xff] %v6954_v38  ;;  %p6901_p8 = pnand %p6900_p7, %p6896_p2 }
  0x2e   : > { %6410 = vmatmul.msk.f32.gmra.mxu0 %vm480_vm0, %v445_v5  ;;  %1449 = vmatpush.msra.mxu2 %v1305_v29  ;;  %v1285_v48 = vld [vmem:[#allocation5 + $0x1a0] sm:$0xff]  ;;  %v457_v50 = vld [vmem:[%s7095_s11 + $0x68] sm:$0xff]  ;;  %324 = vst [vmem:[#allocation2 + $0xc0] sm:$0xff] %v6954_v38  ;;  %v458_v51 = vld [vmem:[%s7095_s11 + $0x70] sm:$0xff] }
  0x2f   : > { %1336 = vmatpush.msra.mxu1 %v1289_v36  ;;  %1559 = vmatpush.msra.mxu3 %v1324_v42  ;;  %v1321_v49 = vld [vmem:[#allocation5 + $0x2c0] sm:$0xff]  ;;  %327 = vst [vmem:[#allocation2 + $0xd8] sm:$0xff] %v6954_v38  ;;  %v459_v52 = vld [vmem:[%s7095_s11 + $0x78] sm:$0xff]  ;;  %v1299_v56 = vld [vmem:[#allocation5 + $0x210] sm:$0xff] }
  0x30   : > { %1450 = vmatpush.msra.mxu2 %v1304_v31  ;;  %328 = vst [vmem:[#allocation2 + $0xe0] sm:$0xff] %v6954_v38  ;;  %v7165_v53 = vld [vmem:[%s10469_s5] ss:$0 sm:$0xff]  ;;  %v1300_v54 = vld [vmem:[#allocation5 + $0x218] sm:$0xff]  ;;  %v7172_v55 = vld [vmem:[%s10469_s5 + $0x1] ss:$0 sm:$0xff] }
  0x31   : > { %1337 = vmatpush.msra.mxu1 %v1288_v41  ;;  %1560 = vmatpush.msra.mxu3 %v1323_v45  ;;  %331 = vst [vmem:[#allocation2 + $0xf8] sm:$0xff] %v6954_v38  ;;  %v460_v58 = vld [vmem:[%s7095_s11 + $0x80] sm:$0xff]  ;;  %v1298_v60 = vld [vmem:[#allocation5 + $0x208] sm:$0xff]  ;;  %v1284_v0 = vld [vmem:[#allocation5 + $0x198] sm:$0xff] }
  0x32   : > { %1451 = vmatpush.msra.mxu2 %v1303_v33  ;;  %332 = vst [vmem:[#allocation2 + $0x100] sm:$0xff] %v6954_v38  ;;  %v1297_v62 = vld [vmem:[#allocation5 + $0x200] sm:$0xff]  ;;  %v1320_v1 = vld [vmem:[#allocation5 + $0x2b8] sm:$0xff]  ;;  %v1283_v2 = vld [vmem:[#allocation5 + $0x190] sm:$0xff] }
  0x33   : > { %1338 = vmatpush.msra.mxu1 %v1287_v44  ;;  %1561 = vmatpush.msra.mxu3 %v1322_v47  ;;  %335 = vst [vmem:[#allocation2 + $0x118] sm:$0xff] %v6954_v38  ;;  %v1319_v3 = vld [vmem:[#allocation5 + $0x2b0] sm:$0xff]  ;;  %v461_v5 = vld [vmem:[%s7095_s11 + $0x88] sm:$0xff]  ;;  %v1150_v13 = vld [vmem:[#allocation5 + $0x78] sm:$0xff] }
  0x34   : > { %1452 = vmatpush.msra.mxu2 %v1302_v39  ;;  %336 = vst [vmem:[#allocation2 + $0x120] sm:$0xff] %v6954_v38  ;;  %v1316_v15 = vld [vmem:[#allocation5 + $0x298] sm:$0xff]  ;;  %1668 = vmatpush.msrb.mxu0 %v1150_v13  ;;  %v1315_v17 = vld [vmem:[#allocation5 + $0x290] sm:$0xff]  ;;  %v1314_v20 = vld [vmem:[#allocation5 + $0x288] sm:$0xff] }
  0x35   : > { %1339 = vmatpush.msra.mxu1 %v1286_v46  ;;  %1562 = vmatpush.msra.mxu3 %v1321_v49  ;;  %339 = vst [vmem:[#allocation2 + $0x138] sm:$0xff] %v6954_v38  ;;  %v462_v19 = vld [vmem:[%s7095_s11 + $0x90] sm:$0xff]  ;;  %v1313_v22 = vld [vmem:[#allocation5 + $0x280] sm:$0xff]  ;;  %v463_v27 = vld [vmem:[%s7095_s11 + $0x98] sm:$0xff] }
  0x36   : > { %6411 = vmatmul.msk.f32.gmra.mxu0 %vm480_vm0, %v446_v6  ;;  %1453 = vmatpush.msra.mxu2 %v1301_v40  ;;  %340 = vst [vmem:[#allocation2 + $0x140] sm:$0xff] %v6954_v38  ;;  %v1149_v25 = vld [vmem:[#allocation5 + $0x70] sm:$0xff]  ;;  %v464_v33 = vld [vmem:[%s7095_s11 + $0xa0] sm:$0xff]  ;;  %v1148_v37 = vld [vmem:[#allocation5 + $0x68] sm:$0xff] }
  0x37   : > { %1340 = vmatpush.msra.mxu1 %v1285_v48  ;;  %343 = vst [vmem:[#allocation2 + $0x158] sm:$0xff] %v6954_v38  ;;  %1563 = vmatpush.msra.mxu3 %v1320_v1  ;;  %v1165_v31 = vld [vmem:[#allocation5 + $0xf0] sm:$0xff]  ;;  %v465_v40 = vld [vmem:[%s7095_s11 + $0xa8] sm:$0xff]  ;;  %v1162_v13 = vld [vmem:[#allocation5 + $0xd8] sm:$0xff] }
  0x38   : > { %344 = vst [vmem:[#allocation2 + $0x160] sm:$0xff] %v6954_v38  ;;  %1454 = vmatpush.msra.mxu2 %v1300_v54  ;;  %1669 = vmatpush.msrb.mxu0 %v1149_v25  ;;  %v1164_v44 = vld [vmem:[#allocation5 + $0xe8] sm:$0xff]  ;;  %v466_v46 = vld [vmem:[%s7095_s11 + $0xb0] sm:$0xff]  ;;  %v467_v54 = vld [vmem:[%s7095_s11 + $0xb8] sm:$0xff] }
  0x39   : > { %347 = vst [vmem:[#allocation2 + $0x178] sm:$0xff] %v6954_v38  ;;  %1341 = vmatpush.msra.mxu1 %v1284_v0  ;;  %1564 = vmatpush.msra.mxu3 %v1319_v3 }
  0x3a   : > { %348 = vst [vmem:[#allocation2 + $0x180] sm:$0xff] %v6954_v38  ;;  %1455 = vmatpush.msra.mxu2 %v1299_v56  ;;  %1670 = vmatpush.msrb.mxu0 %v1148_v37 }
  0x3b   : > { %351 = vst [vmem:[#allocation2 + $0x198] sm:$0xff] %v6954_v38  ;;  %1342 = vmatpush.msra.mxu1 %v1283_v2 }
  0x3c   : > { %352 = vst [vmem:[#allocation2 + $0x1a0] sm:$0xff] %v6954_v38  ;;  %1456 = vmatpush.msra.mxu2 %v1298_v60 }
  0x3d   : > { %355 = vst [vmem:[#allocation2 + $0x1b8] sm:$0xff] %v6954_v38 }
  0x3e   : > { %6412 = vmatmul.msk.f32.gmra.mxu0 %vm480_vm0, %v447_v7  ;;  %356 = vst [vmem:[#allocation2 + $0x1c0] sm:$0xff] %v6954_v38  ;;  %1457 = vmatpush.msra.mxu2 %v1297_v62  ;;  %v1282_v7 = vld [vmem:[#allocation5 + $0x188] sm:$0xff] }
  0x3f   : > { %359 = vst [vmem:[#allocation2 + $0x1d8] sm:$0xff] %v6954_v38  ;;  %1343 = vmatpush.msra.mxu1 %v1282_v7  ;;  %v469_v7 = vld [vmem:[%s7095_s11 + $0xc8] sm:$0xff] }
  0x40   : > { %360 = vst [vmem:[#allocation2 + $0x1e0] sm:$0xff] %v6954_v38 }
  0x41   : > { %363 = vst [vmem:[#allocation2 + $0x1f8] sm:$0xff] %v6954_v38 }
  0x42   : > { %364 = vst [vmem:[#allocation2 + $0x200] sm:$0xff] %v6954_v38 }
  0x43   : > { %367 = vst [vmem:[#allocation2 + $0x218] sm:$0xff] %v6954_v38 }
  0x44   : > { %368 = vst [vmem:[#allocation2 + $0x220] sm:$0xff] %v6954_v38 }
  0x45   : > { %369 = vst [vmem:[#allocation2 + $0x228] sm:$0xff] %v6954_v38 }
  0x46   : > { %6413 = vmatmul.msk.f32.gmra.mxu0 %vm480_vm0, %v448_v8  ;;  %370 = vst [vmem:[#allocation2 + $0x230] sm:$0xff] %v6954_v38  ;;  %v1318_v8 = vld [vmem:[#allocation5 + $0x2a8] sm:$0xff] }
  0x47   : > { %371 = vst [vmem:[#allocation2 + $0x238] sm:$0xff] %v6954_v38  ;;  %1565 = vmatpush.msra.mxu3 %v1318_v8 }
  0x48   : > { %372 = vst [vmem:[#allocation3] sm:$0xff] %v6954_v38 }
  0x49   : > { %373 = vst [vmem:[#allocation3 + $0x8] sm:$0xff] %v6954_v38 }
  0x4a   : > { %374 = vst [vmem:[#allocation3 + $0x10] sm:$0xff] %v6954_v38 }
  0x4b   : > { %375 = vst [vmem:[#allocation3 + $0x18] sm:$0xff] %v6954_v38 }
  0x4c   : > { %376 = vst [vmem:[#allocation3 + $0x20] sm:$0xff] %v6954_v38 }
  0x4d   : > { %379 = vst [vmem:[#allocation3 + $0x38] sm:$0xff] %v6954_v38 }
  0x4e   : > { %6414 = vmatmul.msk.f32.gmra.mxu0 %vm480_vm0, %v449_v9  ;;  %380 = vst [vmem:[#allocation3 + $0x40] sm:$0xff] %v6954_v38 }
  0x4f   : > { %383 = vst [vmem:[#allocation3 + $0x58] sm:$0xff] %v6954_v38 }
  0x50   : > { %384 = vst [vmem:[#allocation3 + $0x60] sm:$0xff] %v6954_v38 }
  0x51   : > { %387 = vst [vmem:[#allocation3 + $0x78] sm:$0xff] %v6954_v38 }
  0x52   : > { %388 = vst [vmem:[#allocation3 + $0x80] sm:$0xff] %v6954_v38 }
  0x53   : > { %391 = vst [vmem:[#allocation3 + $0x98] sm:$0xff] %v6954_v38 }
  0x54   : > { %392 = vst [vmem:[#allocation3 + $0xa0] sm:$0xff] %v6954_v38 }
  0x55   : > { %395 = vst [vmem:[#allocation3 + $0xb8] sm:$0xff] %v6954_v38 }
  0x56   : > { %6415 = vmatmul.msk.f32.gmra.mxu0 %vm480_vm0, %v450_v10  ;;  %v1281_v10 = vld [vmem:[#allocation5 + $0x180] sm:$0xff]  ;;  %396 = vst [vmem:[#allocation3 + $0xc0] sm:$0xff] %v6954_v38 }
  0x57   : > { %1344 = vmatpush.msra.mxu1 %v1281_v10  ;;  %399 = vst [vmem:[#allocation3 + $0xd8] sm:$0xff] %v6954_v38 }
  0x58   : > { %400 = vst [vmem:[#allocation3 + $0xe0] sm:$0xff] %v6954_v38 }
  0x59   : > { %403 = vst [vmem:[#allocation3 + $0xf8] sm:$0xff] %v6954_v38 }
  0x5a   : > { %404 = vst [vmem:[#allocation3 + $0x100] sm:$0xff] %v6954_v38 }
  0x5b   : > { %407 = vst [vmem:[#allocation3 + $0x118] sm:$0xff] %v6954_v38 }
  0x5c   : > { %408 = vst [vmem:[#allocation3 + $0x120] sm:$0xff] %v6954_v38 }
  0x5d   : > { %411 = vst [vmem:[#allocation3 + $0x138] sm:$0xff] %v6954_v38 }
  0x5e   : > { %6416 = vmatmul.msk.f32.gmra.mxu0 %vm480_vm0, %v451_v11  ;;  %v1317_v11 = vld [vmem:[#allocation5 + $0x2a0] sm:$0xff]  ;;  %412 = vst [vmem:[#allocation3 + $0x140] sm:$0xff] %v6954_v38 }
  0x5f   : > { %1566 = vmatpush.msra.mxu3 %v1317_v11  ;;  %415 = vst [vmem:[#allocation3 + $0x158] sm:$0xff] %v6954_v38 }
  0x60   : > { %416 = vst [vmem:[#allocation3 + $0x160] sm:$0xff] %v6954_v38 }
  0x61   : > { %1567 = vmatpush.msra.mxu3 %v1316_v15  ;;  %419 = vst [vmem:[#allocation3 + $0x178] sm:$0xff] %v6954_v38  ;;  %v470_v15 = vld [vmem:[%s7095_s11 + $0xd0] sm:$0xff] }
  0x62   : > { %420 = vst [vmem:[#allocation3 + $0x180] sm:$0xff] %v6954_v38 }
  0x63   : > { %1568 = vmatpush.msra.mxu3 %v1315_v17  ;;  %423 = vst [vmem:[#allocation3 + $0x198] sm:$0xff] %v6954_v38 }
  0x64   : > { %424 = vst [vmem:[#allocation3 + $0x1a0] sm:$0xff] %v6954_v38 }
  0x65   : > { %1569 = vmatpush.msra.mxu3 %v1314_v20  ;;  %427 = vst [vmem:[#allocation3 + $0x1b8] sm:$0xff] %v6954_v38 }
  0x66   : > { %6417 = vmatmul.msk.f32.gmra.mxu0 %vm480_vm0, %v452_v12  ;;  %428 = vst [vmem:[#allocation3 + $0x1c0] sm:$0xff] %v6954_v38 }
  0x67   : > { %1570 = vmatpush.msra.mxu3 %v1313_v22  ;;  %431 = vst [vmem:[#allocation3 + $0x1d8] sm:$0xff] %v6954_v38  ;;  %v1145_v22 = vld [vmem:[#allocation5 + $0x50] sm:$0xff] }
  0x68   : > { %432 = vst [vmem:[#allocation3 + $0x1e0] sm:$0xff] %v6954_v38 }
  0x69   : > { %435 = vst [vmem:[#allocation3 + $0x1f8] sm:$0xff] %v6954_v38 }
  0x6a   : > { %436 = vst [vmem:[#allocation3 + $0x200] sm:$0xff] %v6954_v38 }
  0x6b   : > { %439 = vst [vmem:[#allocation3 + $0x218] sm:$0xff] %v6954_v38 }
  0x6c   : > { %440 = vst [vmem:[#allocation3 + $0x220] sm:$0xff] %v6954_v38 }
  0x6d   : > { %441 = vst [vmem:[#allocation3 + $0x228] sm:$0xff] %v6954_v38 }
  0x6e   : > { %6418 = vmatmul.msk.f32.gmra.mxu0 %vm480_vm0, %v453_v14  ;;  %v1166_v14 = vld [vmem:[#allocation5 + $0xf8] sm:$0xff]  ;;  %442 = vst [vmem:[#allocation3 + $0x230] sm:$0xff] %v6954_v38 }
  0x6f   : > { %1781 = vmatpush.msrb.mxu1 %v1166_v14  ;;  %443 = vst [vmem:[#allocation3 + $0x238] sm:$0xff] %v6954_v38 }
  0x71   : > { %1782 = vmatpush.msrb.mxu1 %v1165_v31 }
  0x73   : > { %1783 = vmatpush.msrb.mxu1 %v1164_v44 }
  0x76   : > { %6419 = vmatmul.msk.f32.gmra.mxu0 %vm480_vm0, %v454_v21 }
  0x7e   : > { %6420 = vmatmul.msk.f32.gmra.mxu0 %vm480_vm0, %v455_v32 }
  0x86   : > { %6421 = vmatmul.msk.f32.gmra.mxu0 %vm480_vm0, %v456_v43 }
  0x8e   : > { %6422 = vmatmul.msk.f32.gmra.mxu0 %vm480_vm0, %v457_v50 }
  0x96   : > { %6423 = vmatmul.msk.f32.gmra.mxu0 %vm480_vm0, %v458_v51  ;;  %v1147_v51 = vld [vmem:[#allocation5 + $0x60] sm:$0xff] }
  0x97   : > { %1671 = vmatpush.msrb.mxu0 %v1147_v51  ;;  %v1141_v51 = vld [vmem:[#allocation5 + $0x30] sm:$0xff] }
  0x9e   : > { %6424 = vmatmul.msk.f32.gmra.mxu0 %vm480_vm0, %v459_v52 }
  0xa3   : > { %v594_v57 = vpop.f32.mrf.mxu0 }
  0xa4   : > { %v692_v59 = vmul.f32 %v7165_v53, %v594_v57 }
  0xa6   : > { %v726_v61 = vadd.f32 %v7172_v55, %v692_v59  ;;  %6425 = vmatmul.msk.f32.gmra.mxu0 %vm480_vm0, %v460_v58 }
  0xa8   : > { %v758_v63 = vmax.f32 %v726_v61, 0.0  ;;  %v1163_v61 = vld [vmem:[#allocation5 + $0xe0] sm:$0xff] }
  0xa9   : > { %1784 = vmatpush.msrb.mxu1 %v1163_v61 }
  0xaa   : > { %791 = vst [vmem:[#allocation2 + $0x28] sm:$0xff] %v758_v63  ;;  %1458 = vmatmul.f32.vlgmr.msra.gmra.mxu2 %v758_v63  ;;  %v468_v63 = vld [vmem:[%s7095_s11 + $0xc0] sm:$0xff] }
  0xab   : > { %v597_v4 = vpop.f32.mrf.mxu0  ;;  %1785 = vmatpush.msrb.mxu1 %v1162_v13 }
  0xac   : > { %v693_v6 = vmul.f32 %v7165_v53, %v597_v4 }
  0xae   : > { %v7193_v9 = vadd.f32 %v7172_v55, %v693_v6  ;;  %6426 = vmatmul.msk.f32.gmra.mxu0 %vm480_vm0, %v461_v5  ;;  %v1146_v5 = vld [vmem:[#allocation5 + $0x58] sm:$0xff] }
  0xaf   : > { %1672 = vmatpush.msrb.mxu0 %v1146_v5  ;;  %v475_v5 = vld [vmem:[%s7095_s11 + $0xf8] sm:$0xff] }
  0xb0   : > { %v759_v12 = vmax.f32 %v7193_v9, 0.0 }
  0xb1   : > { %v7200_v16 = vld [vmem:[#allocation2 + $0x27] sm:$0xff]  ;;  %1673 = vmatpush.msrb.mxu0 %v1145_v22 }
  0xb2   : > { %1345 = vmatmul.f32.vlgmr.msra.gmra.mxu1 %v7200_v16  ;;  %1461 = vmatmul.f32.gmra.mxu2 %v759_v12  ;;  %792 = vst [vmem:[#allocation2 + $0x30] sm:$0xff] %v759_v12 }
  0xb3   : > { %v600_v18 = vpop.f32.mrf.mxu0 }
  0xb4   : > { %v694_v21 = vmul.f32 %v7165_v53, %v600_v18 }
  0xb6   : > { %v728_v23 = vadd.f32 %v7172_v55, %v694_v21  ;;  %6427 = vmatmul.msk.f32.gmra.mxu0 %vm480_vm0, %v462_v19 }
  0xb8   : > { %v760_v24 = vmax.f32 %v728_v23, 0.0 }
  0xb9   : > { %v7257_v38 = vld [vmem:[#allocation2 + $0x2f] sm:$0xff] }
  0xba   : > { %1464 = vmatmul.f32.gmra.mxu2 %v760_v24  ;;  %793 = vst [vmem:[#allocation2 + $0x48] sm:$0xff] %v760_v24  ;;  %v7259_v49 = vld [vmem:[#allocation2 + $0x29] sm:$0xff]  ;;  %1348 = vmatmul.f32.gmra.mxu1 %v7257_v38  ;;  %v7269_v59 = vld [vmem:[#allocation2 + $0x31] sm:$0xff] }
  0xbb   : > { %v603_v26 = vpop.f32.mrf.mxu0  ;;  %1571 = vmatmul.f32.vlgmr.msra.gmra.mxu3 %v7259_v49  ;;  %v471_v24 = vld [vmem:[%s7095_s11 + $0xd8] sm:$0xff] }
  0xbc   : > { %v695_v28 = vmul.f32 %v7165_v53, %v603_v26 }
  0xbe   : > { %v729_v29 = vadd.f32 %v7172_v55, %v695_v28  ;;  %6428 = vmatmul.msk.f32.gmra.mxu0 %vm480_vm0, %v463_v27 }
  0xc0   : > { %v761_v30 = vmax.f32 %v729_v29, 0.0 }
  0xc1   : > { %v7265_v57 = vld [vmem:[#allocation2 + $0x47] sm:$0xff] }
  0xc2   : > { %1467 = vmatmul.f32.gmra.mxu2 %v761_v30  ;;  %794 = vst [vmem:[#allocation2 + $0x50] sm:$0xff] %v761_v30  ;;  %1351 = vmatmul.f32.gmra.mxu1 %v7265_v57  ;;  %v1161_v30 = vld [vmem:[#allocation5 + $0xd0] sm:$0xff] }
  0xc3   : > { %v606_v32 = vpop.f32.mrf.mxu0  ;;  %1574 = vmatmul.f32.gmra.mxu3 %v7269_v59  ;;  %1786 = vmatpush.msrb.mxu1 %v1161_v30  ;;  %v824_v30 = vld [vmem:[#allocation2 + $0xf] sm:$0xff] }
  0xc4   : > { %v696_v34 = vmul.f32 %v7165_v53, %v606_v32  ;;  %v472_v32 = vld [vmem:[%s7095_s11 + $0xe0] sm:$0xff] }
  0xc6   : > { %v730_v35 = vadd.f32 %v7172_v55, %v696_v34  ;;  %6429 = vmatmul.msk.f32.gmra.mxu0 %vm480_vm0, %v464_v33 }
  0xc8   : > { %v762_v36 = vmax.f32 %v730_v35, 0.0 }
  0xc9   : > { %v7275_v1 = vld [vmem:[#allocation2 + $0x4f] sm:$0xff] }
  0xca   : > { %1470 = vmatmul.f32.gmra.mxu2 %v762_v36  ;;  %795 = vst [vmem:[#allocation2 + $0x68] sm:$0xff] %v762_v36  ;;  %v7277_v2 = vld [vmem:[#allocation2 + $0x49] sm:$0xff]  ;;  %1354 = vmatmul.f32.gmra.mxu1 %v7275_v1  ;;  %v7289_v11 = vld [vmem:[#allocation2 + $0x51] sm:$0xff] }
  0xcb   : > { %v609_v39 = vpop.f32.mrf.mxu0  ;;  %1577 = vmatmul.f32.gmra.mxu3 %v7277_v2 }
  0xcc   : > { %v697_v41 = vmul.f32 %v7165_v53, %v609_v39  ;;  %v1144_v39 = vld [vmem:[#allocation5 + $0x48] sm:$0xff] }
  0xcd   : > { %1674 = vmatpush.msrb.mxu0 %v1144_v39 }
  0xce   : > { %v731_v42 = vadd.f32 %v7172_v55, %v697_v41  ;;  %6430 = vmatmul.msk.f32.gmra.mxu0 %vm480_vm0, %v465_v40  ;;  %v473_v41 = vld [vmem:[%s7095_s11 + $0xe8] sm:$0xff] }
  0xd0   : > { %v763_v43 = vmax.f32 %v731_v42, 0.0 }
  0xd1   : > { %v7285_v9 = vld [vmem:[#allocation2 + $0x67] sm:$0xff] }
  0xd2   : > { %1473 = vmatmul.f32.gmra.mxu2 %v763_v43  ;;  %796 = vst [vmem:[#allocation2 + $0x70] sm:$0xff] %v763_v43  ;;  %1357 = vmatmul.f32.gmra.mxu1 %v7285_v9 }
  0xd3   : > { %v612_v45 = vpop.f32.mrf.mxu0  ;;  %1580 = vmatmul.f32.gmra.mxu3 %v7289_v11 }
  0xd4   : > { %v698_v47 = vmul.f32 %v7165_v53, %v612_v45 }
  0xd6   : > { %v732_v48 = vadd.f32 %v7172_v55, %v698_v47  ;;  %6431 = vmatmul.msk.f32.gmra.mxu0 %vm480_vm0, %v466_v46  ;;  %v1160_v47 = vld [vmem:[#allocation5 + $0xc8] sm:$0xff] }
  0xd7   : > { %1787 = vmatpush.msrb.mxu1 %v1160_v47 }
  0xd8   : > { %v764_v50 = vmax.f32 %v732_v48, 0.0  ;;  %v1143_v48 = vld [vmem:[#allocation5 + $0x40] sm:$0xff] }
  0xd9   : > { %v7295_v18 = vld [vmem:[#allocation2 + $0x6f] sm:$0xff]  ;;  %1675 = vmatpush.msrb.mxu0 %v1143_v48 }
  0xda   : > { %797 = vst [vmem:[#allocation2 + $0x88] sm:$0xff] %v764_v50  ;;  %1476 = vmatmul.f32.gmra.mxu2 %v764_v50  ;;  %v7297_v19 = vld [vmem:[#allocation2 + $0x69] sm:$0xff]  ;;  %1360 = vmatmul.f32.gmra.mxu1 %v7295_v18  ;;  %v7309_v28 = vld [vmem:[#allocation2 + $0x71] sm:$0xff] }
  0xdb   : > { %v615_v52 = vpop.f32.mrf.mxu0  ;;  %1583 = vmatmul.f32.gmra.mxu3 %v7297_v19  ;;  %v1142_v50 = vld [vmem:[#allocation5 + $0x38] sm:$0xff] }
  0xdc   : > { %v699_v56 = vmul.f32 %v7165_v53, %v615_v52  ;;  %1676 = vmatpush.msrb.mxu0 %v1142_v50 }
  0xde   : > { %v733_v58 = vadd.f32 %v7172_v55, %v699_v56  ;;  %6432 = vmatmul.msk.f32.gmra.mxu0 %vm480_vm0, %v467_v54  ;;  %v474_v54 = vld [vmem:[%s7095_s11 + $0xf0] sm:$0xff] }
  0xdf   : > { %1677 = vmatpush.msrb.mxu0 %v1141_v51 }
  0xe0   : > { %v765_v60 = vmax.f32 %v733_v58, 0.0 }
  0xe1   : > { %v7305_v26 = vld [vmem:[#allocation2 + $0x87] sm:$0xff] }
  0xe2   : > { %798 = vst [vmem:[#allocation2 + $0x90] sm:$0xff] %v765_v60  ;;  %1479 = vmatmul.f32.gmra.mxu2 %v765_v60  ;;  %1363 = vmatmul.f32.gmra.mxu1 %v7305_v26 }
  0xe3   : > { %v618_v62 = vpop.f32.mrf.mxu0  ;;  %1586 = vmatmul.f32.gmra.mxu3 %v7309_v28 }
  0xe4   : > { %v700_v0 = vmul.f32 %v7165_v53, %v618_v62 }
  0xe6   : > { %v734_v3 = vadd.f32 %v7172_v55, %v700_v0  ;;  %6433 = vmatmul.msk.f32.gmra.mxu0 %vm480_vm0, %v468_v63  ;;  %v1140_v63 = vld [vmem:[#allocation5 + $0x28] sm:$0xff]  ;;  %v1139_v0 = vld [vmem:[#allocation5 + $0x20] sm:$0xff] }
  0xe7   : > { %1678 = vmatpush.msrb.mxu0 %v1140_v63  ;;  %v1157_v63 = vld [vmem:[#allocation5 + $0xb0] sm:$0xff] }
  0xe8   : > { %v766_v4 = vmax.f32 %v734_v3, 0.0  ;;  %v1138_v3 = vld [vmem:[#allocation5 + $0x18] sm:$0xff] }
  0xe9   : > { %v7315_v34 = vld [vmem:[#allocation2 + $0x8f] sm:$0xff]  ;;  %1679 = vmatpush.msrb.mxu0 %v1139_v0  ;;  %v1182_v0 = vld [vmem:[#allocation5 + $0x178] sm:$0xff] }
  0xea   : > { %799 = vst [vmem:[#allocation2 + $0xa8] sm:$0xff] %v766_v4  ;;  %1482 = vmatmul.f32.gmra.mxu2 %v766_v4  ;;  %v7317_v35 = vld [vmem:[#allocation2 + $0x89] sm:$0xff]  ;;  %1366 = vmatmul.f32.gmra.mxu1 %v7315_v34  ;;  %v7329_v45 = vld [vmem:[#allocation2 + $0x91] sm:$0xff] }
  0xeb   : > { %v621_v6 = vpop.f32.mrf.mxu0  ;;  %1589 = vmatmul.f32.gmra.mxu3 %v7317_v35  ;;  %1680 = vmatpush.msrb.mxu0 %v1138_v3 }
  0xec   : > { %v701_v8 = vmul.f32 %v7165_v53, %v621_v6  ;;  %1894 = vmatpush.msrb.mxu2 %v1182_v0 }
  0xee   : > { %v735_v10 = vadd.f32 %v7172_v55, %v701_v8  ;;  %6434 = vmatmul.msk.f32.gmra.mxu0 %vm480_vm0, %v469_v7  ;;  %v1137_v7 = vld [vmem:[#allocation5 + $0x10] sm:$0xff] }
  0xef   : > { %1681 = vmatpush.msrb.mxu0 %v1137_v7 }
  0xf0   : > { %v767_v12 = vmax.f32 %v735_v10, 0.0 }
  0xf1   : > { %v7325_v43 = vld [vmem:[#allocation2 + $0xa7] sm:$0xff] }
  0xf2   : > { %800 = vst [vmem:[#allocation2 + $0xb0] sm:$0xff] %v767_v12  ;;  %1485 = vmatmul.f32.gmra.mxu2 %v767_v12  ;;  %1369 = vmatmul.f32.gmra.mxu1 %v7325_v43 }
  0xf3   : > { %v624_v14 = vpop.f32.mrf.mxu0  ;;  %1592 = vmatmul.f32.gmra.mxu3 %v7329_v45 }
  0xf4   : > { %v702_v17 = vmul.f32 %v7165_v53, %v624_v14  ;;  %v1159_v14 = vld [vmem:[#allocation5 + $0xc0] sm:$0xff] }
  0xf5   : > { %1788 = vmatpush.msrb.mxu1 %v1159_v14 }
  0xf6   : > { %v736_v20 = vadd.f32 %v7172_v55, %v702_v17  ;;  %6435 = vmatmul.msk.f32.gmra.mxu0 %vm480_vm0, %v470_v15  ;;  %v1136_v15 = vld [vmem:[#allocation5 + $0x8] sm:$0xff]  ;;  %v1135_v17 = vld [vmem:[#allocation5] sm:$0xff] }
  0xf7   : > { %1682 = vmatpush.msrb.mxu0 %v1136_v15 }
  0xf8   : > { %v768_v21 = vmax.f32 %v736_v20, 0.0 }
  0xf9   : > { %v7335_v58 = vld [vmem:[#allocation2 + $0xaf] sm:$0xff]  ;;  %1683 = vmatpush.msrb.mxu0 %v1135_v17 }
  0xfa   : > { %801 = vst [vmem:[#allocation2 + $0xc8] sm:$0xff] %v768_v21  ;;  %1488 = vmatmul.f32.gmra.mxu2 %v768_v21  ;;  %v7337_v60 = vld [vmem:[#allocation2 + $0xa9] sm:$0xff]  ;;  %1372 = vmatmul.f32.gmra.mxu1 %v7335_v58  ;;  %v7349_v12 = vld [vmem:[#allocation2 + $0xb1] sm:$0xff] }
  0xfb   : > { %v627_v23 = vpop.f32.mrf.mxu0  ;;  %1595 = vmatmul.f32.gmra.mxu3 %v7337_v60  ;;  %v823_v21 = vld [vmem:[#allocation2 + $0x7] sm:$0xff] }
  0xfc   : > { %v703_v25 = vmul.f32 %v7165_v53, %v627_v23 }
  0xfe   : > { %v737_v27 = vadd.f32 %v7172_v55, %v703_v25  ;;  %6436 = vmatmul.msk.f32.gmra.mxu0 %vm480_vm0, %v471_v24 }
 0x100   : > { %v769_v29 = vmax.f32 %v737_v27, 0.0 }
 0x101   : > { %v7345_v8 = vld [vmem:[#allocation2 + $0xc7] sm:$0xff] }
 0x102   : > { %802 = vst [vmem:[#allocation2 + $0xd0] sm:$0xff] %v769_v29  ;;  %1491 = vmatmul.f32.gmra.mxu2 %v769_v29  ;;  %1375 = vmatmul.f32.gmra.mxu1 %v7345_v8 }
 0x103   : > { %v630_v31 = vpop.f32.mrf.mxu0  ;;  %1598 = vmatmul.f32.gmra.mxu3 %v7349_v12 }
 0x104   : > { %v704_v33 = vmul.f32 %v7165_v53, %v630_v31 }
 0x106   : > { %v738_v36 = vadd.f32 %v7172_v55, %v704_v33  ;;  %6437 = vmatmul.msk.f32.gmra.mxu0 %vm480_vm0, %v472_v32 }
 0x108   : > { %v770_v37 = vmax.f32 %v738_v36, 0.0 }
 0x109   : > { %v7354_v23 = vld [vmem:[#allocation2 + $0xcf] sm:$0xff] }
 0x10a   : > { %803 = vst [vmem:[#allocation2 + $0xe8] sm:$0xff] %v770_v37  ;;  %1494 = vmatmul.f32.gmra.mxu2 %v770_v37  ;;  %v7356_v24 = vld [vmem:[#allocation2 + $0xc9] sm:$0xff]  ;;  %1378 = vmatmul.f32.gmra.mxu1 %v7354_v23  ;;  %v7367_v37 = vld [vmem:[#allocation2 + $0xd1] sm:$0xff] }
 0x10b   : > { %v633_v40 = vpop.f32.mrf.mxu0  ;;  %1601 = vmatmul.f32.gmra.mxu3 %v7356_v24 }
 0x10c   : > { %v705_v42 = vmul.f32 %v7165_v53, %v633_v40  ;;  %v1158_v40 = vld [vmem:[#allocation5 + $0xb8] sm:$0xff] }
 0x10d   : > { %1789 = vmatpush.msrb.mxu1 %v1158_v40 }
 0x10e   : > { %v739_v44 = vadd.f32 %v7172_v55, %v705_v42  ;;  %6438 = vmatmul.msk.f32.gmra.mxu0 %vm480_vm0, %v473_v41 }
 0x10f   : > { %1790 = vmatpush.msrb.mxu1 %v1157_v63 }
 0x110   : > { %v771_v46 = vmax.f32 %v739_v44, 0.0 }
 0x111   : > { %v7362_v32 = vld [vmem:[#allocation2 + $0xe7] sm:$0xff] }
 0x112   : > { %804 = vst [vmem:[#allocation2 + $0xf0] sm:$0xff] %v771_v46  ;;  %1497 = vmatmul.f32.gmra.mxu2 %v771_v46  ;;  %1381 = vmatmul.f32.gmra.mxu1 %v7362_v32 }
 0x113   : > { %v636_v52 = vpop.f32.mrf.mxu0  ;;  %1604 = vmatmul.f32.gmra.mxu3 %v7367_v37 }
 0x114   : > { %v706_v56 = vmul.f32 %v7165_v53, %v636_v52 }
 0x116   : > { %v740_v61 = vadd.f32 %v7172_v55, %v706_v56  ;;  %6439 = vmatmul.msk.f32.gmra.mxu0 %vm480_vm0, %v474_v54 }
 0x118   : > { %v772_v62 = vmax.f32 %v740_v61, 0.0 }
 0x119   : > { %v7372_v44 = vld [vmem:[#allocation2 + $0xef] sm:$0xff] }
 0x11a   : > { %805 = vst [vmem:[#allocation2 + $0x108] sm:$0xff] %v772_v62  ;;  %1500 = vmatmul.f32.gmra.mxu2 %v772_v62  ;;  %v7374_v46 = vld [vmem:[#allocation2 + $0xe9] sm:$0xff]  ;;  %1384 = vmatmul.f32.gmra.mxu1 %v7372_v44 }
 0x11b   : > { %v639_v4 = vpop.f32.mrf.mxu0  ;;  %1607 = vmatmul.f32.gmra.mxu3 %v7374_v46 }
 0x11c   : > { %v707_v6 = vmul.f32 %v7165_v53, %v639_v4 }
 0x11e   : > { %v741_v10 = vadd.f32 %v7172_v55, %v707_v6  ;;  %6440 = vmatmul.msk.f32.gmra.mxu0 %vm480_vm0, %v475_v5 }
 0x120   : > { %v773_v13 = vmax.f32 %v741_v10, 0.0 }
 0x121   : > { %v7383_v54 = vld [vmem:[#allocation2 + $0x107] sm:$0xff] }
 0x122   : > { %806 = vst [vmem:[#allocation2 + $0x110] sm:$0xff] %v773_v13  ;;  %1503 = vmatmul.f32.gmra.mxu2 %v773_v13  ;;  %1387 = vmatmul.f32.gmra.mxu1 %v7383_v54 }
 0x123   : > { %v642_v20 = vpop.f32.mrf.mxu0 }
 0x124   : > { %v708_v22 = vmul.f32 %v7165_v53, %v642_v20 }
 0x126   : > { %v742_v25 = vadd.f32 %v7172_v55, %v708_v22  ;;  %1684 = vmatmul.f32.vlgmr.msrb.gmra.mxu0 %v823_v21 }
 0x128   : > { %v774_v27 = vmax.f32 %v742_v25, 0.0  ;;  %v1156_v25 = vld [vmem:[#allocation5 + $0xa8] sm:$0xff] }
 0x129   : > { %v7394_v5 = vld [vmem:[#allocation2 + $0x10f] sm:$0xff]  ;;  %1791 = vmatpush.msrb.mxu1 %v1156_v25 }
 0x12a   : > { %807 = vst [vmem:[#allocation2 + $0x128] sm:$0xff] %v774_v27  ;;  %1506 = vmatmul.f32.gmra.mxu2 %v774_v27  ;;  %1390 = vmatmul.f32.gmra.mxu1 %v7394_v5  ;;  %v7411_v21 = vld [vmem:[#allocation2 + $0x111] sm:$0xff] }
 0x12b   : > { %v645_v29 = vpop.f32.mrf.mxu0  ;;  %v1181_v27 = vld [vmem:[#allocation5 + $0x170] sm:$0xff] }
 0x12c   : > { %v709_v31 = vmul.f32 %v7165_v53, %v645_v29  ;;  %1895 = vmatpush.msrb.mxu2 %v1181_v27 }
 0x12d   : > { %v7364_v33 = vpop.f32.mrf.mxu2 }
 0x12e   : > { %v743_v36 = vadd.f32 %v7172_v55, %v709_v31  ;;  %1687 = vmatmul.f32.gmra.mxu0 %v824_v30 }
 0x12f   : > { %v1346_v13 = vpop.f32.mrf.mxu1 }
 0x130   : > { %v775_v39 = vmax.f32 %v743_v36, 0.0 }
 0x131   : > { %v7405_v17 = vld [vmem:[#allocation2 + $0x127] sm:$0xff] }
 0x132   : > { %808 = vst [vmem:[#allocation2 + $0x130] sm:$0xff] %v775_v39  ;;  %1509 = vmatmul.f32.gmra.mxu2 %v775_v39  ;;  %1393 = vmatmul.f32.gmra.mxu1 %v7405_v17 }
 0x133   : > { %v648_v41 = vpop.f32.mrf.mxu0 }
 0x134   : > { %v710_v42 = vmul.f32 %v7165_v53, %v648_v41 }
 0x135   : > { %v7378_v48 = vpop.f32.mrf.mxu2 }
 0x136   : > { %v744_v47 = vadd.f32 %v7172_v55, %v710_v42  ;;  %1690 = vmatmul.f32.gmra.mxu0 %v7200_v16  ;;  %v7389_v16 = vld [vmem:[#allocation2 + $0xf1] sm:$0xff]  ;;  %v1460_v42 = vadd.f32 %v7364_v33, %v1346_v13 }
 0x137   : > { %1610 = vmatmul.f32.gmra.mxu3 %v7389_v16  ;;  %v1349_v31 = vpop.f32.mrf.mxu1 }
 0x138   : > { %v776_v50 = vmax.f32 %v744_v47, 0.0 }
 0x139   : > { %v7418_v36 = vld [vmem:[#allocation2 + $0x129] sm:$0xff]  ;;  %v7436_v0 = vld [vmem:[#allocation2 + $0x131] sm:$0xff] }
 0x13a   : > { %809 = vst [vmem:[#allocation2 + $0x148] sm:$0xff] %v776_v50  ;;  %1512 = vmatmul.f32.gmra.mxu2 %v776_v50 }
 0x13b   : > { %v651_v51 = vpop.f32.mrf.mxu0 }
 0x13c   : > { %v711_v52 = vmul.f32 %v7165_v53, %v651_v51 }
 0x13d   : > { %v7387_v61 = vpop.f32.mrf.mxu2 }
 0x13e   : > { %v745_v56 = vadd.f32 %v7172_v55, %v711_v52  ;;  %1693 = vmatmul.f32.gmra.mxu0 %v7257_v38  ;;  %v7396_v38 = vld [vmem:[#allocation2 + $0x109] sm:$0xff]  ;;  %v1572_v47 = vpop.f32.mrf.mxu3 }
 0x13f   : > { %1613 = vmatmul.f32.gmra.mxu3 %v7396_v38  ;;  %v7427_v51 = vadd.f32 %v1572_v47, %v1460_v42 }
 0x140   : > { %v777_v62 = vmax.f32 %v745_v56, 0.0  ;;  %v1352_v56 = vpop.f32.mrf.mxu1 }
 0x142   : > { %810 = vst [vmem:[#allocation2 + $0x150] sm:$0xff] %v777_v62  ;;  %1515 = vmatmul.f32.gmra.mxu2 %v777_v62  ;;  %v7430_v62 = vld [vmem:[#allocation2 + $0x147] sm:$0xff] }
 0x143   : > { %v654_v3 = vpop.f32.mrf.mxu0 }
 0x144   : > { %v712_v4 = vmul.f32 %v7165_v53, %v654_v3  ;;  %v1155_v3 = vld [vmem:[#allocation5 + $0xa0] sm:$0xff] }
 0x145   : > { %v7400_v7 = vpop.f32.mrf.mxu2  ;;  %1792 = vmatpush.msrb.mxu1 %v1155_v3 }
 0x146   : > { %v746_v6 = vadd.f32 %v7172_v55, %v712_v4  ;;  %1696 = vmatmul.f32.gmra.mxu0 %v7265_v57  ;;  %v1180_v4 = vld [vmem:[#allocation5 + $0x168] sm:$0xff] }
 0x147   : > { %1616 = vmatmul.f32.gmra.mxu3 %v7411_v21  ;;  %1896 = vmatpush.msrb.mxu2 %v1180_v4 }
 0x148   : > { %v778_v10 = vmax.f32 %v746_v6, 0.0  ;;  %v1463_v6 = vadd.f32 %v7378_v48, %v1349_v31 }
 0x14a   : > { %811 = vst [vmem:[#allocation2 + $0x168] sm:$0xff] %v778_v10  ;;  %1518 = vmatmul.f32.gmra.mxu2 %v778_v10  ;;  %v1575_v10 = vpop.f32.mrf.mxu3 }
 0x14b   : > { %v657_v14 = vpop.f32.mrf.mxu0 }
 0x14c   : > { %v713_v15 = vmul.f32 %v7165_v53, %v657_v14 }
 0x14d   : > { %v7409_v57 = vpop.f32.mrf.mxu2 }
 0x14e   : > { %v747_v20 = vadd.f32 %v7172_v55, %v713_v15  ;;  %1699 = vmatmul.f32.gmra.mxu0 %v7275_v1  ;;  %v7416_v1 = vld [vmem:[#allocation2 + $0x12f] sm:$0xff]  ;;  %v1355_v15 = vpop.f32.mrf.mxu1 }
 0x14f   : > { %1396 = vmatmul.f32.gmra.mxu1 %v7416_v1  ;;  %1619 = vmatmul.f32.gmra.mxu3 %v7418_v36 }
 0x150   : > { %v779_v22 = vmax.f32 %v747_v20, 0.0  ;;  %v7444_v20 = vld [vmem:[#allocation2 + $0x14f] sm:$0xff] }
 0x151   : > { %v7458_v47 = vld [vmem:[#allocation2 + $0x167] sm:$0xff] }
 0x152   : > { %812 = vst [vmem:[#allocation2 + $0x170] sm:$0xff] %v779_v22  ;;  %1521 = vmatmul.f32.gmra.mxu2 %v779_v22  ;;  %v7446_v22 = vld [vmem:[#allocation2 + $0x149] sm:$0xff] }
 0x153   : > { %v660_v29 = vpop.f32.mrf.mxu0 }
 0x154   : > { %v714_v30 = vmul.f32 %v7165_v53, %v660_v29  ;;  %v1466_v29 = vadd.f32 %v7387_v61, %v1352_v56  ;;  %v1154_v56 = vld [vmem:[#allocation5 + $0x98] sm:$0xff] }
 0x155   : > { %v7422_v40 = vpop.f32.mrf.mxu2  ;;  %1793 = vmatpush.msrb.mxu1 %v1154_v56 }
 0x156   : > { %v748_v39 = vadd.f32 %v7172_v55, %v714_v30  ;;  %1702 = vmatmul.f32.gmra.mxu0 %v7285_v9  ;;  %v1578_v30 = vpop.f32.mrf.mxu3  ;;  %v1358_v42 = vpop.f32.mrf.mxu1 }
 0x157   : > { %1399 = vmatmul.f32.gmra.mxu1 %v7430_v62  ;;  %1622 = vmatmul.f32.gmra.mxu3 %v7436_v0 }
 0x158   : > { %v780_v41 = vmax.f32 %v748_v39, 0.0  ;;  %v7455_v39 = vadd.f32 %v1578_v30, %v1466_v29 }
 0x15a   : > { %813 = vst [vmem:[#allocation2 + $0x188] sm:$0xff] %v780_v41  ;;  %1524 = vmatmul.f32.gmra.mxu2 %v780_v41 }
 0x15b   : > { %v663_v50 = vpop.f32.mrf.mxu0 }
 0x15c   : > { %v715_v52 = vmul.f32 %v7165_v53, %v663_v50 }
 0x15d   : > { %v7434_v63 = vpop.f32.mrf.mxu2 }
 0x15e   : > { %v749_v9 = vadd.f32 %v7172_v55, %v715_v52  ;;  %1705 = vmatmul.f32.gmra.mxu0 %v7295_v18  ;;  %v7441_v18 = vadd.f32 %v1575_v10, %v1463_v6  ;;  %v7464_v52 = vld [vmem:[#allocation2 + $0x151] sm:$0xff]  ;;  %v1581_v3 = vpop.f32.mrf.mxu3  ;;  %v1361_v10 = vpop.f32.mrf.mxu1 }
 0x15f   : > { %1402 = vmatmul.f32.gmra.mxu1 %v7444_v20  ;;  %1625 = vmatmul.f32.gmra.mxu3 %v7446_v22 }
 0x160   : > { %v781_v33 = vmax.f32 %v749_v9, 0.0  ;;  %v1179_v9 = vld [vmem:[#allocation5 + $0x160] sm:$0xff] }
 0x161   : > { %1897 = vmatpush.msrb.mxu2 %v1179_v9  ;;  %v7492_v9 = vld [vmem:[#allocation2 + $0x171] sm:$0xff] }
 0x162   : > { %814 = vst [vmem:[#allocation2 + $0x190] sm:$0xff] %v781_v33  ;;  %1527 = vmatmul.f32.gmra.mxu2 %v781_v33  ;;  %v1469_v33 = vadd.f32 %v7400_v7, %v1355_v15  ;;  %v1472_v15 = vadd.f32 %v7409_v57, %v1358_v42  ;;  %v1153_v42 = vld [vmem:[#allocation5 + $0x90] sm:$0xff] }
 0x163   : > { %v666_v13 = vpop.f32.mrf.mxu0  ;;  %1794 = vmatpush.msrb.mxu1 %v1153_v42 }
 0x164   : > { %v716_v14 = vmul.f32 %v7165_v53, %v666_v13  ;;  %v7472_v13 = vld [vmem:[#allocation2 + $0x16f] sm:$0xff] }
 0x165   : > { %v7450_v27 = vpop.f32.mrf.mxu2 }
 0x166   : > { %v750_v25 = vadd.f32 %v7172_v55, %v716_v14  ;;  %1708 = vmatmul.f32.gmra.mxu0 %v7305_v26  ;;  %v7474_v14 = vld [vmem:[#allocation2 + $0x169] sm:$0xff]  ;;  %v1584_v29 = vpop.f32.mrf.mxu3 }
 0x167   : > { %1405 = vmatmul.f32.gmra.mxu1 %v7458_v47  ;;  %1628 = vmatmul.f32.gmra.mxu3 %v7464_v52 }
 0x168   : > { %v782_v48 = vmax.f32 %v750_v25, 0.0 }
 0x16a   : > { %815 = vst [vmem:[#allocation2 + $0x1a8] sm:$0xff] %v782_v48  ;;  %1530 = vmatmul.f32.gmra.mxu2 %v782_v48 }
 0x16b   : > { %v669_v31 = vpop.f32.mrf.mxu0 }
 0x16c   : > { %v717_v41 = vmul.f32 %v7165_v53, %v669_v31  ;;  %v7483_v31 = vadd.f32 %v1584_v29, %v1472_v15  ;;  %v7500_v15 = vld [vmem:[#allocation2 + $0x18f] sm:$0xff] }
 0x16d   : > { %v7462_v50 = vpop.f32.mrf.mxu2  ;;  %v7502_v29 = vld [vmem:[#allocation2 + $0x189] sm:$0xff] }
 0x16e   : > { %v751_v26 = vadd.f32 %v7172_v55, %v717_v41  ;;  %1711 = vmatmul.f32.gmra.mxu0 %v7315_v34  ;;  %v7469_v34 = vadd.f32 %v1581_v3, %v1469_v33  ;;  %v1178_v33 = vld [vmem:[#allocation5 + $0x158] sm:$0xff]  ;;  %v1475_v3 = vadd.f32 %v7422_v40, %v1361_v10  ;;  %10546 = vst [vmem:[#allocation16_spill] sm:$0xff] %v7502_v29 }
 0x16f   : > { %1408 = vmatmul.f32.gmra.mxu1 %v7472_v13  ;;  %1631 = vmatmul.f32.gmra.mxu3 %v7474_v14 }
 0x170   : > { %v783_v61 = vmax.f32 %v751_v26, 0.0  ;;  %v1364_v26 = vpop.f32.mrf.mxu1  ;;  %1898 = vmatpush.msrb.mxu2 %v1178_v33 }
 0x171   : > { %v1478_v10 = vadd.f32 %v7434_v63, %v1364_v26  ;;  %v1152_v26 = vld [vmem:[#allocation5 + $0x88] sm:$0xff] }
 0x172   : > { %816 = vst [vmem:[#allocation2 + $0x1b0] sm:$0xff] %v783_v61  ;;  %1533 = vmatmul.f32.gmra.mxu2 %v783_v61  ;;  %v7486_v61 = vld [vmem:[#allocation2 + $0x187] sm:$0xff]  ;;  %1795 = vmatpush.msrb.mxu1 %v1152_v26 }
 0x173   : > { %v672_v4 = vpop.f32.mrf.mxu0  ;;  %v1175_v26 = vld [vmem:[#allocation5 + $0x140] sm:$0xff] }
 0x174   : > { %v718_v6 = vmul.f32 %v7165_v53, %v672_v4  ;;  %v1587_v4 = vpop.f32.mrf.mxu3 }
 0x175   : > { %v7478_v48 = vpop.f32.mrf.mxu2 }
 0x176   : > { %v752_v25 = vadd.f32 %v7172_v55, %v718_v6  ;;  %1714 = vmatmul.f32.gmra.mxu0 %v7325_v43 }
 0x177   : > { %1411 = vmatmul.f32.gmra.mxu1 %v7486_v61  ;;  %1634 = vmatmul.f32.gmra.mxu3 %v7492_v9 }
 0x178   : > { %v784_v7 = vmax.f32 %v752_v25, 0.0 }
 0x17a   : > { %817 = vst [vmem:[#allocation2 + $0x1c8] sm:$0xff] %v784_v7  ;;  %1536 = vmatmul.f32.gmra.mxu2 %v784_v7  ;;  %v1367_v7 = vpop.f32.mrf.mxu1 }
 0x17b   : > { %v675_v30 = vpop.f32.mrf.mxu0 }
 0x17c   : > { %v719_v41 = vmul.f32 %v7165_v53, %v675_v30 }
 0x17d   : > { %v7490_v56 = vpop.f32.mrf.mxu2 }
 0x17e   : > { %v753_v43 = vadd.f32 %v7172_v55, %v719_v41  ;;  %1717 = vmatmul.f32.gmra.mxu0 %v7335_v58  ;;  %v7497_v58 = vadd.f32 %v1587_v4, %v1475_v3  ;;  %v7514_v4 = vld [vmem:[#allocation2 + $0x1a7] sm:$0xff] }
 0x17f   : > { %1414 = vmatmul.f32.gmra.mxu1 %v7500_v15  ;;  %1637 = vmatmul.f32.gmra.mxu3 %v7502_v29 }
 0x180   : > { %v785_v57 = vmax.f32 %v753_v43, 0.0  ;;  %10545 = vst [vmem:[#allocation15_spill] sm:$0xff] %v7497_v58  ;;  %v1590_v43 = vpop.f32.mrf.mxu3  ;;  %v2118_v58 = vld [vmem:[#allocation5 + $0x368] sm:$0xff] }
 0x181   : > { %v7511_v42 = vadd.f32 %v1590_v43, %v1478_v10  ;;  %v6531_v10 = vld [vmem:[%s10469_s5] ss:$0 sm:$0xff]  ;;  %v7545_v29 = vld [vmem:[#allocation2 + $0x1c7] sm:$0xff] }
 0x182   : > { %818 = vst [vmem:[#allocation2 + $0x1d0] sm:$0xff] %v785_v57  ;;  %1539 = vmatmul.f32.gmra.mxu2 %v785_v57  ;;  %v1370_v3 = vpop.f32.mrf.mxu1 }
 0x183   : > { %v678_v6 = vpop.f32.mrf.mxu0  ;;  %10547 = vst [vmem:[#allocation17_spill] sm:$0xff] %v7511_v42  ;;  %v7532_v42 = vld [vmem:[#allocation2 + $0x1a9] sm:$0xff] }
 0x184   : > { %v720_v25 = vmul.f32 %v7165_v53, %v678_v6  ;;  %10550 = vst [vmem:[#allocation20_spill] sm:$0xff] %v7532_v42 }
 0x185   : > { %v7506_v41 = vpop.f32.mrf.mxu2 }
 0x186   : > { %v754_v30 = vadd.f32 %v7172_v55, %v720_v25  ;;  %1720 = vmatmul.f32.gmra.mxu0 %v7345_v8  ;;  %v7520_v25 = vld [vmem:[#allocation2 + $0x191] sm:$0xff] }
 0x187   : > { %10548 = vst [vmem:[#allocation18_spill] sm:$0xff] %v7520_v25  ;;  %1417 = vmatmul.f32.gmra.mxu1 %v7514_v4  ;;  %1640 = vmatmul.f32.gmra.mxu3 %v7520_v25 }
 0x188   : > { %v786_v40 = vmax.f32 %v754_v30, 0.0  ;;  %v1177_v30 = vld [vmem:[#allocation5 + $0x150] sm:$0xff] }
 0x189   : > { %1899 = vmatpush.msrb.mxu2 %v1177_v30 }
 0x18a   : > { %819 = vst [vmem:[#allocation2 + $0x1e8] sm:$0xff] %v786_v40  ;;  %1542 = vmatmul.f32.gmra.mxu2 %v786_v40  ;;  %v1593_v40 = vpop.f32.mrf.mxu3 }
 0x18b   : > { %v681_v57 = vpop.f32.mrf.mxu0 }
 0x18c   : > { %v721_v33 = vmul.f32 %v7165_v53, %v681_v57  ;;  %v1481_v53 = vadd.f32 %v7450_v27, %v1367_v7  ;;  %v1176_v57 = vld [vmem:[#allocation5 + $0x148] sm:$0xff]  ;;  %v6532_v27 = vld [vmem:[%s10469_s5 + $0x1] ss:$0 sm:$0xff] }
 0x18d   : > { %v7518_v6 = vpop.f32.mrf.mxu2  ;;  %1900 = vmatpush.msrb.mxu2 %v1176_v57  ;;  %v2119_v57 = vld [vmem:[#allocation5 + $0x370] sm:$0xff] }
 0x18e   : > { %v755_v8 = vadd.f32 %v7172_v55, %v721_v33  ;;  %1723 = vmatmul.f32.gmra.mxu0 %v7354_v23  ;;  %v7525_v23 = vadd.f32 %v1593_v40, %v1481_v53  ;;  %v1373_v33 = vpop.f32.mrf.mxu1  ;;  %v2120_v53 = vld [vmem:[#allocation5 + $0x378] sm:$0xff] }
 0x18f   : > { %1901 = vmatpush.msrb.mxu2 %v1175_v26  ;;  %1643 = vmatmul.f32.gmra.mxu3 %v7532_v42  ;;  %v1174_v40 = vld [vmem:[#allocation5 + $0x138] sm:$0xff]  ;;  %v1172_v42 = vld [vmem:[#allocation5 + $0x128] sm:$0xff] }
 0x190   : > { %v787_v63 = vmax.f32 %v755_v8, 0.0  ;;  %10549 = vst [vmem:[#allocation19_spill] sm:$0xff] %v7525_v23  ;;  %v7530_v8 = vld [vmem:[#allocation2 + $0x1af] sm:$0xff]  ;;  %2153 = vmatpush.msrb.mxu3 %v2120_v53  ;;  %v2117_v53 = vld [vmem:[#allocation5 + $0x360] sm:$0xff] }
 0x191   : > { %1420 = vmatmul.f32.gmra.mxu1 %v7530_v8  ;;  %1902 = vmatpush.msrb.mxu2 %v1174_v40 }
 0x192   : > { %820 = vst [vmem:[#allocation2 + $0x1f0] sm:$0xff] %v787_v63  ;;  %1545 = vmatmul.f32.gmra.mxu2 %v787_v63  ;;  %v1596_v23 = vpop.f32.mrf.mxu3  ;;  %2154 = vmatpush.msrb.mxu3 %v2119_v57 }
 0x193   : > { %v684_v55 = vpop.f32.mrf.mxu0 }
 0x194   : > { %v722_v43 = vmul.f32 %v6531_v10, %v684_v55  ;;  %v1484_v55 = vadd.f32 %v7462_v50, %v1370_v3  ;;  %2155 = vmatpush.msrb.mxu3 %v2118_v58  ;;  %v7550_v3 = vld [vmem:[#allocation2 + $0x1b1] sm:$0xff] }
 0x195   : > { %v7538_v63 = vpop.f32.mrf.mxu2  ;;  %v1170_v58 = vld [vmem:[#allocation5 + $0x118] sm:$0xff] }
 0x196   : > { %v756_v7 = vadd.f32 %v6532_v27, %v722_v43  ;;  %1726 = vmatmul.f32.gmra.mxu0 %v7362_v32  ;;  %v1173_v43 = vld [vmem:[#allocation5 + $0x130] sm:$0xff]  ;;  %v7543_v25 = vadd.f32 %v1596_v23, %v1484_v55  ;;  %2156 = vmatpush.msrb.mxu3 %v2117_v53  ;;  %v1171_v23 = vld [vmem:[#allocation5 + $0x120] sm:$0xff]  ;;  %v2116_v55 = vld [vmem:[#allocation5 + $0x358] sm:$0xff] }
 0x197   : > { %1903 = vmatpush.msrb.mxu2 %v1173_v43  ;;  %1646 = vmatmul.f32.gmra.mxu3 %v7550_v3  ;;  %v1169_v43 = vld [vmem:[#allocation5 + $0x110] sm:$0xff] }
 0x198   : > { %v788_v30 = vmax.f32 %v756_v7, 0.0  ;;  %10551 = vst [vmem:[#allocation21_spill] sm:$0xff] %v7543_v25  ;;  %v1376_v7 = vpop.f32.mrf.mxu1  ;;  %2157 = vmatpush.msrb.mxu3 %v2116_v55  ;;  %v1167_v55 = vld [vmem:[#allocation5 + $0x100] sm:$0xff]  ;;  %v2136_v25 = vld [vmem:[#allocation5 + $0x3f8] sm:$0xff] }
 0x199   : > { %1904 = vmatpush.msrb.mxu2 %v1172_v42  ;;  %1423 = vmatmul.f32.gmra.mxu1 %v7545_v29 }
 0x19a   : > { %821 = vst [vmem:[#allocation2 + $0x208] sm:$0xff] %v788_v30  ;;  %1548 = vmatmul.f32.gmra.mxu2 %v788_v30  ;;  %v1151_v30 = vld [vmem:[#allocation5 + $0x80] sm:$0xff]  ;;  %v1599_v42 = vpop.f32.mrf.mxu3  ;;  %2266 = vmatpush.msra.mxu0 %v2136_v25  ;;  %v2106_v25 = vld [vmem:[#allocation5 + $0x308] sm:$0xff] }
 0x19b   : > { %v687_v32 = vpop.f32.mrf.mxu0  ;;  %1796 = vmatpush.msrb.mxu1 %v1151_v30  ;;  %1905 = vmatpush.msrb.mxu2 %v1171_v23  ;;  %v7561_v30 = vld [vmem:[#allocation2 + $0x1c9] sm:$0xff] }
 0x19c   : > { %v723_v26 = vmul.f32 %v6531_v10, %v687_v32  ;;  %v1168_v23 = vld [vmem:[#allocation5 + $0x108] sm:$0xff] }
 0x19d   : > { %v7548_v50 = vpop.f32.mrf.mxu2  ;;  %1906 = vmatpush.msrb.mxu2 %v1170_v58  ;;  %v967_v58 = vld [vmem:[#allocation2 + $0x9] sm:$0xff] }
 0x19e   : > { %v757_v40 = vadd.f32 %v6532_v27, %v723_v26  ;;  %1729 = vmatmul.f32.gmra.mxu0 %v7372_v44  ;;  %v1487_v27 = vadd.f32 %v7478_v48, %v1373_v33  ;;  %v2115_v44 = vld [vmem:[#allocation5 + $0x350] sm:$0xff]  ;;  %v2114_v26 = vld [vmem:[#allocation5 + $0x348] sm:$0xff]  ;;  %v2113_v48 = vld [vmem:[#allocation5 + $0x340] sm:$0xff] }
 0x19f   : > { %2158 = vmatpush.msrb.mxu3 %v2115_v44  ;;  %1907 = vmatpush.msrb.mxu2 %v1169_v43  ;;  %v2111_v44 = vld [vmem:[#allocation5 + $0x330] sm:$0xff]  ;;  %v2110_v43 = vld [vmem:[#allocation5 + $0x328] sm:$0xff] }
 0x1a0   : > { %v789_v10 = vmax.f32 %v757_v40, 0.0  ;;  %v7557_v32 = vadd.f32 %v1599_v42, %v1487_v27  ;;  %v1379_v53 = vpop.f32.mrf.mxu1  ;;  %v7559_v40 = vld [vmem:[#allocation2 + $0x1cf] sm:$0xff]  ;;  %1649 = vmatmul.f32.gmra.mxu3 %v7561_v30  ;;  %v1490_v27 = vadd.f32 %v7490_v56, %v1376_v7  ;;  %v2152_v7 = vld [vmem:[#allocation5 + $0x478] sm:$0xff] }
 0x1a1   : > { %2159 = vmatpush.msrb.mxu3 %v2114_v26  ;;  %1426 = vmatmul.f32.gmra.mxu1 %v7559_v40  ;;  %v7578_v56 = vld [vmem:[#allocation2 + $0x1d1] sm:$0xff] }
 0x1a2   : > { %822 = vst [vmem:[#allocation2 + $0x210] sm:$0xff] %v789_v10  ;;  %1551 = vmatmul.f32.gmra.mxu2 %v789_v10  ;;  %v2112_v10 = vld [vmem:[#allocation5 + $0x338] sm:$0xff]  ;;  %v1602_v42 = vpop.f32.mrf.mxu3  ;;  %2379 = vmatpush.msra.mxu1 %v2152_v7  ;;  %v2105_v7 = vld [vmem:[#allocation5 + $0x300] sm:$0xff] }
 0x1a3   : > { %v7555_v57 = vpop.f32.mrf.mxu0  ;;  %10552 = vst [vmem:[#allocation22_spill] sm:$0xff] %v7557_v32  ;;  %2160 = vmatpush.msrb.mxu3 %v2113_v48  ;;  %1908 = vmatpush.msrb.mxu2 %v1168_v23  ;;  %v7573_v32 = vld [vmem:[#allocation2 + $0x1e7] sm:$0xff] }
 0x1a4   : > { %10554 = vst [vmem:[#allocation24_spill] sm:$0xff] %v7578_v56 }
 0x1a5   : > { %v7564_v33 = vpop.f32.mrf.mxu2  ;;  %2161 = vmatpush.msrb.mxu3 %v2112_v10  ;;  %1909 = vmatpush.msrb.mxu2 %v1167_v55  ;;  %v2109_v10 = vld [vmem:[#allocation5 + $0x320] sm:$0xff]  ;;  %v2108_v55 = vld [vmem:[#allocation5 + $0x318] sm:$0xff] }
 0x1a6   : > { %1732 = vmatmul.f32.gmra.mxu0 %v7383_v54  ;;  %v7571_v54 = vadd.f32 %v1602_v42, %v1490_v27  ;;  %v1493_v27 = vadd.f32 %v7506_v41, %v1379_v53 }
 0x1a7   : > { %2162 = vmatpush.msrb.mxu3 %v2111_v44  ;;  %v2107_v44 = vld [vmem:[#allocation5 + $0x310] sm:$0xff] }
 0x1a8   : > { %10553 = vst [vmem:[#allocation23_spill] sm:$0xff] %v7571_v54  ;;  %v1382_v48 = vpop.f32.mrf.mxu1  ;;  %1652 = vmatmul.f32.gmra.mxu3 %v7578_v56  ;;  %v7587_v54 = vld [vmem:[#allocation2 + $0x1ef] sm:$0xff] }
 0x1a9   : > { %2163 = vmatpush.msrb.mxu3 %v2110_v43  ;;  %1429 = vmatmul.f32.gmra.mxu1 %v7573_v32  ;;  %v7589_v56 = vld [vmem:[#allocation2 + $0x1e9] sm:$0xff]  ;;  %v1496_v41 = vadd.f32 %v7518_v6, %v1382_v48 }
 0x1aa   : > { %1910 = vmatmul.f32.vlgmr.msrb.gmra.mxu2 %v967_v58  ;;  %v968_v58 = vld [vmem:[#allocation2 + $0x11] sm:$0xff]  ;;  %v1605_v42 = vpop.f32.mrf.mxu3  ;;  %10556 = vst [vmem:[#allocation26_spill] sm:$0xff] %v7589_v56 }
 0x1ab   : > { %v7569_v26 = vpop.f32.mrf.mxu0  ;;  %2164 = vmatpush.msrb.mxu3 %v2109_v10  ;;  %v7585_v43 = vadd.f32 %v1605_v42, %v1493_v27  ;;  %v7602_v42 = vld [vmem:[#allocation2 + $0x207] sm:$0xff]  ;;  %v2151_v6 = vld [vmem:[#allocation5 + $0x470] sm:$0xff] }
 0x1ac   : > { %10558 = vst [vmem:[#allocation28_spill] sm:$0xff] %v7602_v42  ;;  %2380 = vmatpush.msra.mxu1 %v2151_v6 }
 0x1ad   : > { %v7576_v23 = vpop.f32.mrf.mxu2  ;;  %2165 = vmatpush.msrb.mxu3 %v2108_v55  ;;  %10555 = vst [vmem:[#allocation25_spill] sm:$0xff] %v7585_v43  ;;  %v7617_v43 = vld [vmem:[#allocation2 + $0x20f] sm:$0xff] }
 0x1ae   : > { %1735 = vmatmul.f32.gmra.mxu0 %v7394_v5  ;;  %10560 = vst [vmem:[#allocation30_spill] sm:$0xff] %v7617_v43 }
 0x1af   : > { %2166 = vmatpush.msrb.mxu3 %v2107_v44 }
 0x1b0   : > { %v1385_v10 = vpop.f32.mrf.mxu1  ;;  %1655 = vmatmul.f32.gmra.mxu3 %v7589_v56  ;;  %v999_v56 = vld [vmem:[#allocation2 + $0x209] sm:$0xff] }
 0x1b1   : > { %2167 = vmatpush.msrb.mxu3 %v2106_v25  ;;  %1432 = vmatmul.f32.gmra.mxu1 %v7587_v54  ;;  %v1499_v48 = vadd.f32 %v7538_v63, %v1385_v10 }
 0x1b2   : > { %1913 = vmatmul.f32.gmra.mxu2 %v968_v58  ;;  %v1608_v53 = vpop.f32.mrf.mxu3 }
 0x1b3   : > { %v7583_v5 = vpop.f32.mrf.mxu0  ;;  %2168 = vmatpush.msrb.mxu3 %v2105_v7  ;;  %v7599_v27 = vadd.f32 %v1608_v53, %v1496_v41  ;;  %v7607_v7 = vld [vmem:[#allocation2 + $0x1f1] sm:$0xff] }
 0x1b5   : > { %v7592_v55 = vpop.f32.mrf.mxu2  ;;  %10557 = vst [vmem:[#allocation27_spill] sm:$0xff] %v7599_v27 }
 0x1b6   : > { %1738 = vmatmul.f32.gmra.mxu0 %v7405_v17  ;;  %v2135_v17 = vld [vmem:[#allocation5 + $0x3f0] sm:$0xff] }
 0x1b7   : > { %2267 = vmatpush.msra.mxu0 %v2135_v17 }
 0x1b8   : > { %v1388_v44 = vpop.f32.mrf.mxu1  ;;  %1658 = vmatmul.f32.gmra.mxu3 %v7607_v7 }
 0x1b9   : > { %1435 = vmatmul.f32.gmra.mxu1 %v7602_v42  ;;  %v1502_v63 = vadd.f32 %v7548_v50, %v1388_v44  ;;  %v1000_v42 = vld [vmem:[#allocation2 + $0x211] sm:$0xff]  ;;  %v2150_v50 = vld [vmem:[#allocation5 + $0x468] sm:$0xff] }
 0x1ba   : > { %1916 = vmatmul.f32.gmra.mxu2 %v7259_v49  ;;  %v1611_v49 = vpop.f32.mrf.mxu3  ;;  %2381 = vmatpush.msra.mxu1 %v2150_v50 }
 0x1bb   : > { %v7597_v58 = vpop.f32.mrf.mxu0  ;;  %v7614_v53 = vadd.f32 %v1611_v49, %v1499_v48  ;;  %v2134_v49 = vld [vmem:[#allocation5 + $0x3e8] sm:$0xff] }
 0x1bc   : > { %2268 = vmatpush.msra.mxu0 %v2134_v49 }
 0x1bd   : > { %v7605_v25 = vpop.f32.mrf.mxu2  ;;  %10559 = vst [vmem:[#allocation29_spill] sm:$0xff] %v7614_v53 }
 0x1be   : > { %1741 = vmatmul.f32.gmra.mxu0 %v7416_v1 }
 0x1c0   : > { %v1391_v27 = vpop.f32.mrf.mxu1  ;;  %1661 = vmatmul.f32.gmra.mxu3 %v999_v56 }
 0x1c1   : > { %1438 = vmatmul.f32.gmra.mxu1 %v7617_v43  ;;  %v7632_v43 = vld [vmem:[#allocation2] sm:$0xff]  ;;  %v1505_v56 = vadd.f32 %v7564_v33, %v1391_v27 }
 0x1c2   : > { %1919 = vmatmul.f32.gmra.mxu2 %v7269_v59  ;;  %v1614_v10 = vpop.f32.mrf.mxu3  ;;  %10562 = vst [vmem:[#allocation32_spill] sm:$0xff] %v7632_v43 }
 0x1c3   : > { %v7612_v41 = vpop.f32.mrf.mxu0  ;;  %v7626_v48 = vadd.f32 %v1614_v10, %v1502_v63 }
 0x1c5   : > { %v7620_v17 = vpop.f32.mrf.mxu2  ;;  %10561 = vst [vmem:[#allocation31_spill] sm:$0xff] %v7626_v48 }
 0x1c6   : > { %1744 = vmatmul.f32.gmra.mxu0 %v7430_v62 }
 0x1c8   : > { %v1394_v59 = vpop.f32.mrf.mxu1  ;;  %1664 = vmatmul.f32.gmra.mxu3 %v1000_v42  ;;  %v6534_v42 = vld [vmem:[#allocation2 + $0x47] sm:$0xff] }
 0x1c9   : > { %1797 = vmatmul.f32.vlgmr.msrb.gmra.mxu1 %v7632_v43  ;;  %v1508_v50 = vadd.f32 %v7576_v23, %v1394_v59 }
 0x1ca   : > { %1922 = vmatmul.f32.gmra.mxu2 %v7277_v2  ;;  %v1617_v44 = vpop.f32.mrf.mxu3 }
 0x1cb   : > { %v7624_v6 = vpop.f32.mrf.mxu0  ;;  %v7638_v2 = vadd.f32 %v1617_v44, %v1505_v56 }
 0x1cd   : > { %v7630_v53 = vpop.f32.mrf.mxu2  ;;  %10563 = vst [vmem:[#allocation33_spill] sm:$0xff] %v7638_v2  ;;  %v6535_v2 = vld [vmem:[#allocation2 + $0x28] sm:$0xff] }
 0x1ce   : > { %1747 = vmatmul.f32.gmra.mxu0 %v7444_v20 }
 0x1d0   : > { %v1397_v10 = vpop.f32.mrf.mxu1  ;;  %2169 = vmatmul.f32.vlgmr.msrb.gmra.mxu3 %v6534_v42  ;;  %v2149_v42 = vld [vmem:[#allocation5 + $0x460] sm:$0xff] }
 0x1d1   : > { %1800 = vmatmul.f32.gmra.mxu1 %v7632_v43  ;;  %v6536_v43 = vld [vmem:[#allocation2 + $0x4f] sm:$0xff]  ;;  %v1511_v23 = vadd.f32 %v7592_v55, %v1397_v10 }
 0x1d2   : > { %1925 = vmatmul.f32.gmra.mxu2 %v7289_v11  ;;  %v1620_v48 = vpop.f32.mrf.mxu3  ;;  %v2133_v11 = vld [vmem:[#allocation5 + $0x3e0] sm:$0xff]  ;;  %2382 = vmatpush.msra.mxu1 %v2149_v42 }
 0x1d3   : > { %v7636_v63 = vpop.f32.mrf.mxu0  ;;  %v7648_v27 = vadd.f32 %v1620_v48, %v1508_v50  ;;  %2269 = vmatpush.msra.mxu0 %v2133_v11  ;;  %v6537_v11 = vld [vmem:[#allocation2 + $0x30] sm:$0xff] }
 0x1d5   : > { %v7642_v49 = vpop.f32.mrf.mxu2  ;;  %10564 = vst [vmem:[#allocation34_spill] sm:$0xff] %v7648_v27 }
 0x1d6   : > { %1750 = vmatmul.f32.gmra.mxu0 %v7458_v47 }
 0x1d8   : > { %v1400_v56 = vpop.f32.mrf.mxu1  ;;  %2172 = vmatmul.f32.gmra.mxu3 %v6536_v43 }
 0x1d9   : > { %1803 = vmatmul.f32.gmra.mxu1 %v6535_v2  ;;  %v6538_v2 = vld [vmem:[#allocation2 + $0x67] sm:$0xff]  ;;  %v1514_v43 = vadd.f32 %v7605_v25, %v1400_v56 }
 0x1da   : > { %1928 = vmatmul.f32.gmra.mxu2 %v7297_v19  ;;  %v1623_v59 = vpop.f32.mrf.mxu3 }
 0x1db   : > { %v7646_v33 = vpop.f32.mrf.mxu0  ;;  %v7657_v50 = vadd.f32 %v1623_v59, %v1511_v23  ;;  %v7670_v59 = vld [vmem:[#allocation2 + $0x48] sm:$0xff] }
 0x1dd   : > { %v7652_v44 = vpop.f32.mrf.mxu2  ;;  %10565 = vst [vmem:[#allocation35_spill] sm:$0xff] %v7657_v50 }
 0x1de   : > { %1753 = vmatmul.f32.gmra.mxu0 %v7472_v13 }
 0x1e0   : > { %v1403_v19 = vpop.f32.mrf.mxu1  ;;  %2175 = vmatmul.f32.gmra.mxu3 %v6538_v2  ;;  %v2148_v2 = vld [vmem:[#allocation5 + $0x458] sm:$0xff] }
 0x1e1   : > { %1806 = vmatmul.f32.gmra.mxu1 %v6537_v11  ;;  %v6540_v11 = vld [vmem:[#allocation2 + $0x6f] sm:$0xff]  ;;  %v1517_v56 = vadd.f32 %v7620_v17, %v1403_v19 }
 0x1e2   : > { %1931 = vmatmul.f32.gmra.mxu2 %v7309_v28  ;;  %v1626_v42 = vpop.f32.mrf.mxu3  ;;  %v2132_v28 = vld [vmem:[#allocation5 + $0x3d8] sm:$0xff]  ;;  %2383 = vmatpush.msra.mxu1 %v2148_v2 }
 0x1e3   : > { %v7655_v48 = vpop.f32.mrf.mxu0  ;;  %v7666_v10 = vadd.f32 %v1626_v42, %v1514_v43  ;;  %2270 = vmatpush.msra.mxu0 %v2132_v28 }
 0x1e5   : > { %v7661_v27 = vpop.f32.mrf.mxu2  ;;  %10566 = vst [vmem:[#allocation36_spill] sm:$0xff] %v7666_v10  ;;  %v7682_v10 = vld [vmem:[#allocation2 + $0x50] sm:$0xff] }
 0x1e6   : > { %1756 = vmatmul.f32.gmra.mxu0 %v7486_v61 }
 0x1e8   : > { %v1406_v23 = vpop.f32.mrf.mxu1  ;;  %2178 = vmatmul.f32.gmra.mxu3 %v6540_v11  ;;  %v6542_v11 = vld [vmem:[#allocation2 + $0x87] sm:$0xff] }
 0x1e9   : > { %1809 = vmatmul.f32.gmra.mxu1 %v7670_v59  ;;  %v1520_v2 = vadd.f32 %v7630_v53, %v1406_v23  ;;  %v2147_v53 = vld [vmem:[#allocation5 + $0x450] sm:$0xff] }
 0x1ea   : > { %1934 = vmatmul.f32.gmra.mxu2 %v7317_v35  ;;  %v1629_v43 = vpop.f32.mrf.mxu3  ;;  %2384 = vmatpush.msra.mxu1 %v2147_v53 }
 0x1eb   : > { %v7664_v55 = vpop.f32.mrf.mxu0  ;;  %v7678_v35 = vadd.f32 %v1629_v43, %v1517_v56  ;;  %v2131_v43 = vld [vmem:[#allocation5 + $0x3d0] sm:$0xff] }
 0x1ec   : > { %2271 = vmatpush.msra.mxu0 %v2131_v43 }
 0x1ed   : > { %v7673_v25 = vpop.f32.mrf.mxu2  ;;  %10568 = vst [vmem:[#allocation38_spill] sm:$0xff] %v7678_v35  ;;  %v7694_v35 = vld [vmem:[#allocation2 + $0x68] sm:$0xff] }
 0x1ee   : > { %1759 = vmatmul.f32.gmra.mxu0 %v7500_v15 }
 0x1f0   : > { %v1409_v28 = vpop.f32.mrf.mxu1  ;;  %2181 = vmatmul.f32.gmra.mxu3 %v6542_v11  ;;  %v6544_v11 = vld [vmem:[#allocation2 + $0x8f] sm:$0xff] }
 0x1f1   : > { %1812 = vmatmul.f32.gmra.mxu1 %v7682_v10  ;;  %v1523_v23 = vadd.f32 %v7642_v49, %v1409_v28 }
 0x1f2   : > { %1937 = vmatmul.f32.gmra.mxu2 %v7329_v45  ;;  %v1632_v17 = vpop.f32.mrf.mxu3 }
 0x1f3   : > { %v7676_v42 = vpop.f32.mrf.mxu0  ;;  %v7690_v56 = vadd.f32 %v1632_v17, %v1520_v2 }
 0x1f4   : > { %10567 = vst [vmem:[#allocation37_spill] sm:$0xff] %v7676_v42  ;;  %v2127_v42 = vld [vmem:[#allocation5 + $0x3b0] sm:$0xff] }
 0x1f5   : > { %v7686_v50 = vpop.f32.mrf.mxu2  ;;  %10570 = vst [vmem:[#allocation40_spill] sm:$0xff] %v7690_v56  ;;  %v7706_v56 = vld [vmem:[#allocation2 + $0x70] sm:$0xff] }
 0x1f6   : > { %1762 = vmatmul.f32.gmra.mxu0 %v7514_v4 }
 0x1f8   : > { %v1412_v45 = vpop.f32.mrf.mxu1  ;;  %2184 = vmatmul.f32.gmra.mxu3 %v6544_v11  ;;  %v6546_v11 = vld [vmem:[#allocation2 + $0xa7] sm:$0xff] }
 0x1f9   : > { %1815 = vmatmul.f32.gmra.mxu1 %v7694_v35  ;;  %v1526_v49 = vadd.f32 %v7652_v44, %v1412_v45  ;;  %v2146_v44 = vld [vmem:[#allocation5 + $0x448] sm:$0xff] }
 0x1fa   : > { %1940 = vmatmul.f32.gmra.mxu2 %v7337_v60  ;;  %2385 = vmatpush.msra.mxu1 %v2146_v44  ;;  %v2126_v44 = vld [vmem:[#allocation5 + $0x3a8] sm:$0xff] }
 0x1fb   : > { %v7688_v19 = vpop.f32.mrf.mxu0 }
 0x1fc   : > { %10569 = vst [vmem:[#allocation39_spill] sm:$0xff] %v7688_v19  ;;  %v1635_v19 = vpop.f32.mrf.mxu3 }
 0x1fd   : > { %v7700_v17 = vadd.f32 %v1635_v19, %v1523_v23  ;;  %v7702_v60 = vpop.f32.mrf.mxu2 }
 0x1fe   : > { %1765 = vmatmul.f32.gmra.mxu0 %v7530_v8 }
 0x1ff   : > { %10572 = vst [vmem:[#allocation42_spill] sm:$0xff] %v7700_v17 }
 0x200   : > { %v1415_v43 = vpop.f32.mrf.mxu1  ;;  %2187 = vmatmul.f32.gmra.mxu3 %v6546_v11  ;;  %v6548_v11 = vld [vmem:[#allocation2 + $0xaf] sm:$0xff] }
 0x201   : > { %1818 = vmatmul.f32.gmra.mxu1 %v7706_v56  ;;  %v1529_v45 = vadd.f32 %v7661_v27, %v1415_v43  ;;  %v6550_v27 = vld [vmem:[#allocation2 + $0xc7] sm:$0xff] }
 0x202   : > { %1943 = vmatmul.f32.gmra.mxu2 %v7349_v12  ;;  %v2130_v12 = vld [vmem:[#allocation5 + $0x3c8] sm:$0xff] }
 0x203   : > { %v7698_v2 = vpop.f32.mrf.mxu0  ;;  %2272 = vmatpush.msra.mxu0 %v2130_v12 }
 0x204   : > { %10571 = vst [vmem:[#allocation41_spill] sm:$0xff] %v7698_v2  ;;  %v1638_v28 = vpop.f32.mrf.mxu3  ;;  %v7718_v2 = vld [vmem:[#allocation2 + $0x88] sm:$0xff] }
 0x205   : > { %v7712_v19 = vadd.f32 %v1638_v28, %v1526_v49  ;;  %v7715_v17 = vpop.f32.mrf.mxu2  ;;  %v2129_v49 = vld [vmem:[#allocation5 + $0x3c0] sm:$0xff] }
 0x206   : > { %1768 = vmatmul.f32.gmra.mxu0 %v7545_v29 }
 0x207   : > { %10574 = vst [vmem:[#allocation44_spill] sm:$0xff] %v7712_v19  ;;  %2273 = vmatpush.msra.mxu0 %v2129_v49  ;;  %v2125_v49 = vld [vmem:[#allocation5 + $0x3a0] sm:$0xff] }
 0x208   : > { %v1418_v23 = vpop.f32.mrf.mxu1  ;;  %2190 = vmatmul.f32.gmra.mxu3 %v6548_v11  ;;  %v7728_v11 = vld [vmem:[#allocation2 + $0x90] sm:$0xff] }
 0x209   : > { %1821 = vmatmul.f32.gmra.mxu1 %v7718_v2 }
 0x20a   : > { %1946 = vmatmul.f32.gmra.mxu2 %v7356_v24 }
 0x20b   : > { %v7710_v53 = vpop.f32.mrf.mxu0 }
 0x20c   : > { %10573 = vst [vmem:[#allocation43_spill] sm:$0xff] %v7710_v53  ;;  %v1641_v28 = vpop.f32.mrf.mxu3  ;;  %v2128_v53 = vld [vmem:[#allocation5 + $0x3b8] sm:$0xff] }
 0x20d   : > { %v7724_v19 = vadd.f32 %v1641_v28, %v1529_v45  ;;  %2274 = vmatpush.msra.mxu0 %v2128_v53  ;;  %v7731_v43 = vpop.f32.mrf.mxu2  ;;  %v1532_v45 = vadd.f32 %v7673_v25, %v1418_v23  ;;  %v6552_v25 = vld [vmem:[#allocation2 + $0xcf] sm:$0xff]  ;;  %v2145_v23 = vld [vmem:[#allocation5 + $0x440] sm:$0xff] }
 0x20e   : > { %1771 = vmatmul.f32.gmra.mxu0 %v7559_v40  ;;  %2386 = vmatpush.msra.mxu1 %v2145_v23  ;;  %v6554_v23 = vld [vmem:[#allocation2 + $0xe7] sm:$0xff] }
 0x20f   : > { %10576 = vst [vmem:[#allocation46_spill] sm:$0xff] %v7724_v19  ;;  %2275 = vmatpush.msra.mxu0 %v2127_v42  ;;  %v2124_v42 = vld [vmem:[#allocation5 + $0x398] sm:$0xff] }
 0x210   : > { %v1421_v12 = vpop.f32.mrf.mxu1  ;;  %2193 = vmatmul.f32.gmra.mxu3 %v6550_v27  ;;  %v7740_v27 = vld [vmem:[#allocation2 + $0xa8] sm:$0xff] }
 0x211   : > { %1824 = vmatmul.f32.gmra.mxu1 %v7728_v11  ;;  %2276 = vmatpush.msra.mxu0 %v2126_v44  ;;  %v2122_v44 = vld [vmem:[#allocation5 + $0x388] sm:$0xff] }
 0x212   : > { %1949 = vmatmul.f32.gmra.mxu2 %v7367_v37 }
 0x213   : > { %v7722_v24 = vpop.f32.mrf.mxu0  ;;  %2277 = vmatpush.msra.mxu0 %v2125_v49 }
 0x214   : > { %10575 = vst [vmem:[#allocation45_spill] sm:$0xff] %v7722_v24  ;;  %v1644_v37 = vpop.f32.mrf.mxu3  ;;  %v2123_v24 = vld [vmem:[#allocation5 + $0x390] sm:$0xff] }
 0x215   : > { %v7736_v53 = vadd.f32 %v1644_v37, %v1532_v45  ;;  %2278 = vmatpush.msra.mxu0 %v2124_v42  ;;  %v1535_v45 = vadd.f32 %v7686_v50, %v1421_v12  ;;  %v1546_v49 = vpop.f32.mrf.mxu2 }
 0x216   : > { %1774 = vmatmul.f32.gmra.mxu0 %v7573_v32 }
 0x217   : > { %10578 = vst [vmem:[#allocation48_spill] sm:$0xff] %v7736_v53  ;;  %2279 = vmatpush.msra.mxu0 %v2123_v24 }
 0x218   : > { %v1424_v19 = vpop.f32.mrf.mxu1  ;;  %2196 = vmatmul.f32.gmra.mxu3 %v6552_v25  ;;  %v7750_v25 = vld [vmem:[#allocation2 + $0xb0] sm:$0xff] }
 0x219   : > { %1827 = vmatmul.f32.gmra.mxu1 %v7740_v27  ;;  %2280 = vmatpush.msra.mxu0 %v2122_v44  ;;  %v1538_v50 = vadd.f32 %v7702_v60, %v1424_v19 }
 0x21a   : > { %1952 = vmatmul.f32.gmra.mxu2 %v7374_v46  ;;  %v2121_v46 = vld [vmem:[#allocation5 + $0x380] sm:$0xff] }
 0x21b   : > { %v7734_v28 = vpop.f32.mrf.mxu0  ;;  %2281 = vmatpush.msra.mxu0 %v2121_v46  ;;  %v6556_v46 = vld [vmem:[#allocation2 + $0xef] sm:$0xff] }
 0x21c   : > { %10577 = vst [vmem:[#allocation47_spill] sm:$0xff] %v7734_v28  ;;  %v1647_v37 = vpop.f32.mrf.mxu3 }
 0x21d   : > { %v7746_v53 = vadd.f32 %v1647_v37, %v1535_v45  ;;  %v1549_v45 = vpop.f32.mrf.mxu2  ;;  %v2144_v37 = vld [vmem:[#allocation5 + $0x438] sm:$0xff] }
 0x21e   : > { %1777 = vmatmul.f32.gmra.mxu0 %v7587_v54  ;;  %2387 = vmatpush.msra.mxu1 %v2144_v37 }
 0x21f   : > { %10580 = vst [vmem:[#allocation50_spill] sm:$0xff] %v7746_v53  ;;  %v6587_v53 = vld [vmem:[#allocation2 + $0xb1] sm:$0xff] }
 0x220   : > { %v1427_v24 = vpop.f32.mrf.mxu1  ;;  %2199 = vmatmul.f32.gmra.mxu3 %v6554_v23 }
 0x221   : > { %1830 = vmatmul.f32.gmra.mxu1 %v7750_v25  ;;  %v1541_v60 = vadd.f32 %v7715_v17, %v1427_v24 }
 0x222   : > { %1955 = vmatmul.f32.gmra.mxu2 %v7389_v16 }
 0x223   : > { %v7744_v42 = vpop.f32.mrf.mxu0 }
 0x224   : > { %10579 = vst [vmem:[#allocation49_spill] sm:$0xff] %v7744_v42  ;;  %v1650_v12 = vpop.f32.mrf.mxu3 }
 0x225   : > { %v7756_v42 = vadd.f32 %v1650_v12, %v1538_v50  ;;  %v1552_v12 = vpop.f32.mrf.mxu2 }
 0x226   : > { %2282 = vmatmul.f32.vlgmr.msra.gmra.mxu0 %v7670_v59  ;;  %v7760_v59 = vld [vmem:[#allocation2 + $0xc8] sm:$0xff] }
 0x227   : > { %10582 = vst [vmem:[#allocation52_spill] sm:$0xff] %v7756_v42 }
 0x228   : > { %v1430_v16 = vpop.f32.mrf.mxu1  ;;  %2202 = vmatmul.f32.gmra.mxu3 %v6556_v46  ;;  %v6558_v46 = vld [vmem:[#allocation2 + $0x107] sm:$0xff] }
 0x229   : > { %1833 = vmatmul.f32.gmra.mxu1 %v7760_v59  ;;  %v1544_v37 = vadd.f32 %v7731_v43, %v1430_v16 }
 0x22a   : > { %1958 = vmatmul.f32.gmra.mxu2 %v7396_v38 }
 0x22b   : > { %v7754_v44 = vpop.f32.mrf.mxu0 }
 0x22c   : > { %10581 = vst [vmem:[#allocation51_spill] sm:$0xff] %v7754_v44  ;;  %v1653_v19 = vpop.f32.mrf.mxu3 }
 0x22d   : > { %v7766_v50 = vadd.f32 %v1653_v19, %v1541_v60  ;;  %v7780_v60 = vld [vmem:[#allocation2 + $0xe8] sm:$0xff]  ;;  %v1911_v19 = vpop.f32.mrf.mxu2 }
 0x22e   : > { %2285 = vmatmul.f32.gmra.mxu0 %v7682_v10  ;;  %v7770_v10 = vld [vmem:[#allocation2 + $0xd0] sm:$0xff] }
 0x22f   : > { %10584 = vst [vmem:[#allocation54_spill] sm:$0xff] %v7766_v50  ;;  %v3129_v50 = vld [vmem:[#allocation8 + $0x1f8] sm:$0xff] }
 0x230   : > { %v1433_v38 = vpop.f32.mrf.mxu1  ;;  %2205 = vmatmul.f32.gmra.mxu3 %v6558_v46  ;;  %v2143_v46 = vld [vmem:[#allocation5 + $0x430] sm:$0xff]  ;;  %3162 = vmatpush.msra.mxu2 %v3129_v50 }
 0x231   : > { %1836 = vmatmul.f32.gmra.mxu1 %v7770_v10  ;;  %v1547_v43 = vadd.f32 %v1546_v49, %v1433_v38  ;;  %v1686_v38 = vadd.f32 %v7555_v57, %v7427_v51 }
 0x232   : > { %1961 = vmatmul.f32.gmra.mxu2 %v7411_v21  ;;  %2388 = vmatpush.msra.mxu1 %v2143_v46 }
 0x233   : > { %v7764_v23 = vpop.f32.mrf.mxu0 }
 0x234   : > { %10583 = vst [vmem:[#allocation53_spill] sm:$0xff] %v7764_v23  ;;  %v1656_v17 = vpop.f32.mrf.mxu3  ;;  %v3161_v23 = vld [vmem:[#allocation8 + $0x2f8] sm:$0xff] }
 0x235   : > { %v7776_v42 = vadd.f32 %v1656_v17, %v1544_v37  ;;  %v1914_v46 = vpop.f32.mrf.mxu2  ;;  %3388 = vmatpush.msrb.mxu0 %v3161_v23  ;;  %v3157_v23 = vld [vmem:[#allocation8 + $0x2d8] sm:$0xff] }
 0x236   : > { %2288 = vmatmul.f32.gmra.mxu0 %v7694_v35  ;;  %v6560_v35 = vld [vmem:[#allocation2 + $0x10f] sm:$0xff] }
 0x237   : > { %10586 = vst [vmem:[#allocation56_spill] sm:$0xff] %v7776_v42 }
 0x238   : > { %v1436_v21 = vpop.f32.mrf.mxu1  ;;  %2208 = vmatmul.f32.gmra.mxu3 %v6560_v35  ;;  %v6562_v35 = vld [vmem:[#allocation2 + $0x127] sm:$0xff] }
 0x239   : > { %1839 = vmatmul.f32.gmra.mxu1 %v7780_v60  ;;  %v1550_v42 = vadd.f32 %v1549_v45, %v1436_v21  ;;  %v2142_v21 = vld [vmem:[#allocation5 + $0x428] sm:$0xff] }
 0x23a   : > { %1964 = vmatmul.f32.gmra.mxu2 %v7418_v36  ;;  %2389 = vmatpush.msra.mxu1 %v2142_v21  ;;  %v7838_v21 = vld [vmem:[#allocation2 + $0x130] sm:$0xff] }
 0x23b   : > { %v7774_v24 = vpop.f32.mrf.mxu0 }
 0x23c   : > { %10585 = vst [vmem:[#allocation55_spill] sm:$0xff] %v7774_v24  ;;  %v1659_v16 = vpop.f32.mrf.mxu3  ;;  %v3139_v24 = vld [vmem:[#allocation8 + $0x248] sm:$0xff] }
 0x23d   : > { %v7785_v17 = vadd.f32 %v1659_v16, %v1547_v43  ;;  %v7800_v16 = vld [vmem:[#allocation2 + $0x108] sm:$0xff] }
 0x23e   : > { %2291 = vmatmul.f32.gmra.mxu0 %v7706_v56  ;;  %v7789_v56 = vld [vmem:[#allocation2 + $0xf0] sm:$0xff] }
 0x23f   : > { %10588 = vst [vmem:[#allocation58_spill] sm:$0xff] %v7785_v17 }
 0x240   : > { %v1439_v36 = vpop.f32.mrf.mxu1  ;;  %2211 = vmatmul.f32.gmra.mxu3 %v6562_v35  ;;  %v3128_v35 = vld [vmem:[#allocation8 + $0x1f0] sm:$0xff] }
 0x241   : > { %1842 = vmatmul.f32.gmra.mxu1 %v7789_v56  ;;  %3163 = vmatpush.msra.mxu2 %v3128_v35  ;;  %v1553_v51 = vadd.f32 %v1552_v12, %v1439_v36 }
 0x242   : > { %1967 = vmatmul.f32.gmra.mxu2 %v7436_v0 }
 0x243   : > { %v7783_v37 = vpop.f32.mrf.mxu0 }
 0x244   : > { %10587 = vst [vmem:[#allocation57_spill] sm:$0xff] %v7783_v37  ;;  %v1662_v50 = vpop.f32.mrf.mxu3 }
 0x245   : > { %v7796_v43 = vadd.f32 %v1662_v50, %v1550_v42 }
 0x246   : > { %2294 = vmatmul.f32.gmra.mxu0 %v7718_v2 }
 0x247   : > { %10590 = vst [vmem:[#allocation60_spill] sm:$0xff] %v7796_v43 }
 0x248   : > { %v1798_v0 = vpop.f32.mrf.mxu1  ;;  %2214 = vmatmul.f32.gmra.mxu3 %v7416_v1 }
 0x249   : > { %v1799_v2 = vadd.f32 %v1798_v0, %v1686_v38  ;;  %1845 = vmatmul.f32.gmra.mxu1 %v7800_v16  ;;  %v1917_v38 = vpop.f32.mrf.mxu2  ;;  %v7826_v0 = vld [vmem:[#allocation2 + $0x128] sm:$0xff] }
 0x24a   : > { %1970 = vmatmul.f32.gmra.mxu2 %v7446_v22  ;;  %v1689_v22 = vadd.f32 %v7569_v26, %v7441_v18  ;;  %v1692_v18 = vadd.f32 %v7583_v5, %v7455_v39 }
 0x24b   : > { %v7792_v49 = vpop.f32.mrf.mxu0  ;;  %v7804_v45 = vadd.f32 %v1911_v19, %v1799_v2  ;;  %v7814_v19 = vld [vmem:[#allocation2 + $0x110] sm:$0xff]  ;;  %v3127_v2 = vld [vmem:[#allocation8 + $0x1e8] sm:$0xff] }
 0x24c   : > { %10589 = vst [vmem:[#allocation59_spill] sm:$0xff] %v7792_v49  ;;  %v1665_v57 = vpop.f32.mrf.mxu3  ;;  %3164 = vmatpush.msra.mxu2 %v3127_v2  ;;  %v10623_v49 = vld [vmem:[#allocation32_spill] sm:$0xff] }
 0x24e   : > { %2297 = vmatmul.f32.gmra.mxu0 %v7728_v11  ;;  %v7810_v11 = vadd.f32 %v1665_v57, %v1553_v51 }
 0x250   : > { %10592 = vst [vmem:[#allocation62_spill] sm:$0xff] %v7810_v11  ;;  %v1801_v50 = vpop.f32.mrf.mxu1  ;;  %2217 = vmatmul.f32.gmra.mxu3 %v7430_v62 }
 0x251   : > { %v1802_v1 = vadd.f32 %v1801_v50, %v1689_v22  ;;  %1848 = vmatmul.f32.gmra.mxu1 %v7814_v19  ;;  %v2140_v22 = vld [vmem:[#allocation5 + $0x418] sm:$0xff]  ;;  %v3126_v50 = vld [vmem:[#allocation8 + $0x1e0] sm:$0xff] }
 0x252   : > { %1973 = vmatmul.f32.gmra.mxu2 %v7464_v52 }
 0x253   : > { %v7806_v42 = vpop.f32.mrf.mxu0  ;;  %v7818_v12 = vadd.f32 %v1914_v46, %v1802_v1  ;;  %v2141_v46 = vld [vmem:[#allocation5 + $0x420] sm:$0xff]  ;;  %3165 = vmatpush.msra.mxu2 %v3126_v50  ;;  %v6570_v50 = vld [vmem:[#allocation2 + $0x170] sm:$0xff] }
 0x254   : > { %10591 = vst [vmem:[#allocation61_spill] sm:$0xff] %v7806_v42  ;;  %2390 = vmatpush.msra.mxu1 %v2141_v46  ;;  %v10601_v46 = vld [vmem:[#allocation17_spill] sm:$0xff] }
 0x255   : > { %v1704_v2 = vadd.f32 %v7636_v63, %v10601_v46  ;;  %v3116_v42 = vld [vmem:[#allocation8 + $0x190] sm:$0xff] }
 0x256   : > { %2300 = vmatmul.f32.gmra.mxu0 %v7740_v27  ;;  %v1920_v27 = vpop.f32.mrf.mxu2  ;;  %2391 = vmatpush.msra.mxu1 %v2140_v22 }
 0x258   : > { %v1804_v52 = vpop.f32.mrf.mxu1  ;;  %2220 = vmatmul.f32.gmra.mxu3 %v7444_v20 }
 0x259   : > { %v1805_v26 = vadd.f32 %v1804_v52, %v1692_v18  ;;  %1851 = vmatmul.f32.gmra.mxu1 %v7826_v0  ;;  %v10599_v18 = vld [vmem:[#allocation18_spill] sm:$0xff] }
 0x25a   : > { %1976 = vmatmul.f32.gmra.mxu2 %v7474_v14  ;;  %v1695_v14 = vadd.f32 %v7597_v58, %v7469_v34  ;;  %v1698_v34 = vadd.f32 %v7612_v41, %v7483_v31  ;;  %v10596_v58 = vld [vmem:[#allocation16_spill] sm:$0xff]  ;;  %v10598_v41 = vld [vmem:[#allocation15_spill] sm:$0xff] }
 0x25b   : > { %v7820_v36 = vpop.f32.mrf.mxu0  ;;  %v7830_v62 = vadd.f32 %v1917_v38, %v1805_v26  ;;  %v1701_v1 = vadd.f32 %v7624_v6, %v10598_v41  ;;  %v7862_v26 = vld [vmem:[#allocation2 + $0x150] sm:$0xff]  ;;  %v10602_v6 = vld [vmem:[#allocation20_spill] sm:$0xff] }
 0x25c   : > { %10593 = vst [vmem:[#allocation63_spill] sm:$0xff] %v7820_v36 }
 0x25e   : > { %2303 = vmatmul.f32.gmra.mxu0 %v7750_v25  ;;  %v1923_v35 = vpop.f32.mrf.mxu2 }
 0x260   : > { %v1807_v5 = vpop.f32.mrf.mxu1  ;;  %2223 = vmatmul.f32.gmra.mxu3 %v7458_v47 }
 0x261   : > { %v1808_v25 = vadd.f32 %v1807_v5, %v1695_v14  ;;  %1854 = vmatmul.f32.gmra.mxu1 %v7838_v21 }
 0x262   : > { %1979 = vmatmul.f32.gmra.mxu2 %v7492_v9 }
 0x263   : > { %v7832_v39 = vpop.f32.mrf.mxu0  ;;  %v7842_v20 = vadd.f32 %v1920_v27, %v1808_v25 }
 0x264   : > { %10594 = vst [vmem:[#allocation64_spill] sm:$0xff] %v7832_v39 }
 0x266   : > { %2306 = vmatmul.f32.gmra.mxu0 %v7760_v59  ;;  %v7850_v59 = vld [vmem:[#allocation2 + $0x148] sm:$0xff]  ;;  %v1926_v38 = vpop.f32.mrf.mxu2 }
 0x268   : > { %v1810_v9 = vpop.f32.mrf.mxu1  ;;  %2226 = vmatmul.f32.gmra.mxu3 %v7472_v13 }
 0x269   : > { %v1811_v57 = vadd.f32 %v1810_v9, %v1698_v34  ;;  %1857 = vmatmul.f32.gmra.mxu1 %v7850_v59  ;;  %v3125_v34 = vld [vmem:[#allocation8 + $0x1d8] sm:$0xff] }
 0x26a   : > { %1982 = vmatmul.f32.gmra.mxu2 %v10596_v58  ;;  %v10604_v58 = vld [vmem:[#allocation19_spill] sm:$0xff] }
 0x26b   : > { %v7844_v51 = vpop.f32.mrf.mxu0  ;;  %v7854_v47 = vadd.f32 %v1923_v35, %v1811_v57  ;;  %v2139_v35 = vld [vmem:[#allocation5 + $0x410] sm:$0xff]  ;;  %3166 = vmatpush.msra.mxu2 %v3125_v34  ;;  %v1707_v9 = vadd.f32 %v7646_v33, %v10604_v58  ;;  %v7894_v33 = vpop.f32.mrf.mxu3 }
 0x26c   : > { %10595 = vst [vmem:[#allocation65_spill] sm:$0xff] %v7844_v51  ;;  %2392 = vmatpush.msra.mxu1 %v2139_v35  ;;  %v6575_v35 = vld [vmem:[#allocation2 + $0x1c8] sm:$0xff] }
 0x26e   : > { %2309 = vmatmul.f32.gmra.mxu0 %v7770_v10  ;;  %v1929_v5 = vpop.f32.mrf.mxu2 }
 0x270   : > { %v1813_v10 = vpop.f32.mrf.mxu1  ;;  %2229 = vmatmul.f32.gmra.mxu3 %v7486_v61 }
 0x271   : > { %v1814_v52 = vadd.f32 %v1813_v10, %v1701_v1  ;;  %1860 = vmatmul.f32.gmra.mxu1 %v7862_v26  ;;  %v3124_v1 = vld [vmem:[#allocation8 + $0x1d0] sm:$0xff] }
 0x272   : > { %1985 = vmatmul.f32.gmra.mxu2 %v10599_v18  ;;  %v10607_v18 = vld [vmem:[#allocation24_spill] sm:$0xff] }
 0x273   : > { %v7856_v31 = vpop.f32.mrf.mxu0  ;;  %v7866_v13 = vadd.f32 %v1926_v38, %v1814_v52  ;;  %3167 = vmatpush.msra.mxu2 %v3124_v1  ;;  %v6572_v52 = vld [vmem:[#allocation2 + $0x190] sm:$0xff] }
 0x274   : > { %10597 = vst [vmem:[#allocation16_spill] sm:$0xff] %v7856_v31 }
 0x276   : > { %2312 = vmatmul.f32.gmra.mxu0 %v7780_v60  ;;  %v7874_v60 = vld [vmem:[#allocation2 + $0x168] sm:$0xff]  ;;  %v1932_v22 = vpop.f32.mrf.mxu2 }
 0x278   : > { %v1816_v14 = vpop.f32.mrf.mxu1  ;;  %2232 = vmatmul.f32.gmra.mxu3 %v7500_v15 }
 0x279   : > { %v1817_v25 = vadd.f32 %v1816_v14, %v1704_v2  ;;  %1863 = vmatmul.f32.gmra.mxu1 %v7874_v60  ;;  %v6573_v2 = vld [vmem:[#allocation2 + $0x1a8] sm:$0xff] }
 0x27a   : > { %1988 = vmatmul.f32.gmra.mxu2 %v10602_v6  ;;  %v2137_v6 = vld [vmem:[#allocation5 + $0x400] sm:$0xff] }
 0x27b   : > { %v7868_v27 = vpop.f32.mrf.mxu0  ;;  %v7878_v61 = vadd.f32 %v1929_v5, %v1817_v25  ;;  %v6574_v5 = vld [vmem:[#allocation2 + $0x1b0] sm:$0xff] }
 0x27c   : > { %10600 = vst [vmem:[#allocation15_spill] sm:$0xff] %v7868_v27 }
 0x27e   : > { %2315 = vmatmul.f32.gmra.mxu0 %v7789_v56 }
 0x280   : > { %v1819_v56 = vpop.f32.mrf.mxu1  ;;  %2235 = vmatmul.f32.gmra.mxu3 %v7514_v4 }
 0x281   : > { %v1820_v57 = vadd.f32 %v1819_v56, %v1707_v9  ;;  %1866 = vmatmul.f32.gmra.mxu1 %v6570_v50  ;;  %v10610_v9 = vld [vmem:[#allocation28_spill] sm:$0xff] }
 0x282   : > { %1991 = vmatmul.f32.gmra.mxu2 %v7550_v3  ;;  %v6571_v3 = vld [vmem:[#allocation2 + $0x188] sm:$0xff] }
 0x283   : > { %v7880_v63 = vpop.f32.mrf.mxu0  ;;  %v7887_v15 = vadd.f32 %v1932_v22, %v1820_v57  ;;  %v6577_v57 = vld [vmem:[#allocation2 + $0x1e8] sm:$0xff]  ;;  %v10611_v22 = vld [vmem:[#allocation30_spill] sm:$0xff] }
 0x284   : > { %10603 = vst [vmem:[#allocation18_spill] sm:$0xff] %v7880_v63 }
 0x286   : > { %2318 = vmatmul.f32.gmra.mxu0 %v7800_v16  ;;  %v2138_v16 = vld [vmem:[#allocation5 + $0x408] sm:$0xff] }
 0x287   : > { %2393 = vmatpush.msra.mxu1 %v2138_v16  ;;  %v3121_v16 = vld [vmem:[#allocation8 + $0x1b8] sm:$0xff] }
 0x288   : > { %v7892_v41 = vpop.f32.mrf.mxu1  ;;  %2238 = vmatmul.f32.gmra.mxu3 %v7530_v8 }
 0x289   : > { %1869 = vmatmul.f32.gmra.mxu1 %v6571_v3 }
 0x28a   : > { %1994 = vmatmul.f32.gmra.mxu2 %v7561_v30  ;;  %v7904_v30 = vpop.f32.mrf.mxu3  ;;  %2394 = vmatpush.msra.mxu1 %v2137_v6  ;;  %v6579_v6 = vld [vmem:[#allocation2 + $0x49] sm:$0xff] }
 0x28b   : > { %v7889_v38 = vpop.f32.mrf.mxu0 }
 0x28c   : > { %10605 = vst [vmem:[#allocation17_spill] sm:$0xff] %v7889_v38  ;;  %v7972_v38 = vpop.f32.mrf.mxu2 }
 0x28e   : > { %2321 = vmatmul.f32.gmra.mxu0 %v7814_v19  ;;  %v10608_v19 = vld [vmem:[#allocation26_spill] sm:$0xff] }
 0x290   : > { %v7901_v10 = vpop.f32.mrf.mxu1  ;;  %2241 = vmatmul.f32.gmra.mxu3 %v7545_v29 }
 0x291   : > { %1872 = vmatmul.f32.gmra.mxu1 %v6572_v52 }
 0x292   : > { %1997 = vmatmul.f32.gmra.mxu2 %v10607_v18  ;;  %v7914_v14 = vpop.f32.mrf.mxu3  ;;  %v6578_v18 = vld [vmem:[#allocation2 + $0x1f0] sm:$0xff] }
 0x293   : > { %v7898_v4 = vpop.f32.mrf.mxu0 }
 0x294   : > { %10606 = vst [vmem:[#allocation20_spill] sm:$0xff] %v7898_v4 }
 0x296   : > { %2324 = vmatmul.f32.gmra.mxu0 %v7826_v0  ;;  %v3123_v0 = vld [vmem:[#allocation8 + $0x1c8] sm:$0xff] }
 0x297   : > { %3168 = vmatpush.msra.mxu2 %v3123_v0  ;;  %v3120_v0 = vld [vmem:[#allocation8 + $0x1b0] sm:$0xff] }
 0x298   : > { %v7908_v8 = vpop.f32.mrf.mxu1  ;;  %2244 = vmatmul.f32.gmra.mxu3 %v7559_v40 }
 0x299   : > { %1875 = vmatmul.f32.gmra.mxu1 %v6573_v2 }
 0x29a   : > { %2000 = vmatmul.f32.gmra.mxu2 %v10608_v19  ;;  %v7923_v25 = vpop.f32.mrf.mxu3 }
 0x29b   : > { %v7910_v46 = vpop.f32.mrf.mxu0 }
 0x29c   : > { %10609 = vst [vmem:[#allocation19_spill] sm:$0xff] %v7910_v46 }
 0x29e   : > { %2327 = vmatmul.f32.gmra.mxu0 %v7838_v21 }
 0x2a0   : > { %v7917_v29 = vpop.f32.mrf.mxu1  ;;  %2247 = vmatmul.f32.gmra.mxu3 %v7573_v32  ;;  %v6576_v32 = vld [vmem:[#allocation2 + $0x1d0] sm:$0xff] }
 0x2a1   : > { %1878 = vmatmul.f32.gmra.mxu1 %v6574_v5 }
 0x2a2   : > { %2003 = vmatmul.f32.gmra.mxu2 %v7607_v7  ;;  %v3122_v7 = vld [vmem:[#allocation8 + $0x1c0] sm:$0xff]  ;;  %v7933_v58 = vpop.f32.mrf.mxu3 }
 0x2a3   : > { %v7921_v21 = vpop.f32.mrf.mxu0  ;;  %3169 = vmatpush.msra.mxu2 %v3122_v7 }
 0x2a5   : > { %3170 = vmatpush.msra.mxu2 %v3121_v16 }
 0x2a6   : > { %2330 = vmatmul.f32.gmra.mxu0 %v7850_v59 }
 0x2a7   : > { %3171 = vmatpush.msra.mxu2 %v3120_v0 }
 0x2a8   : > { %v7925_v40 = vpop.f32.mrf.mxu1  ;;  %2250 = vmatmul.f32.gmra.mxu3 %v7587_v54 }
 0x2a9   : > { %1881 = vmatmul.f32.gmra.mxu1 %v6575_v35 }
 0x2aa   : > { %v7941_v54 = vpop.f32.mrf.mxu3 }
 0x2ab   : > { %v7929_v34 = vpop.f32.mrf.mxu0 }
 0x2ae   : > { %2333 = vmatmul.f32.gmra.mxu0 %v7862_v26 }
 0x2b0   : > { %v7931_v59 = vpop.f32.mrf.mxu1  ;;  %2253 = vmatmul.f32.gmra.mxu3 %v10610_v9  ;;  %v3145_v9 = vld [vmem:[#allocation8 + $0x278] sm:$0xff] }
 0x2b1   : > { %1884 = vmatmul.f32.gmra.mxu1 %v6576_v32  ;;  %3275 = vmatpush.msra.mxu3 %v3145_v9  ;;  %v3144_v9 = vld [vmem:[#allocation8 + $0x270] sm:$0xff] }
 0x2b2   : > { %v7954_v16 = vpop.f32.mrf.mxu3 }
 0x2b3   : > { %v7937_v56 = vpop.f32.mrf.mxu0  ;;  %3276 = vmatpush.msra.mxu3 %v3144_v9 }
 0x2b6   : > { %2336 = vmatmul.f32.gmra.mxu0 %v7874_v60 }
 0x2b8   : > { %v7939_v26 = vpop.f32.mrf.mxu1  ;;  %2256 = vmatmul.f32.gmra.mxu3 %v10611_v22  ;;  %v6580_v22 = vld [vmem:[#allocation2 + $0x51] sm:$0xff] }
 0x2b9   : > { %1887 = vmatmul.f32.gmra.mxu1 %v6577_v57 }
 0x2ba   : > { %v7960_v11 = vpop.f32.mrf.mxu3 }
 0x2bb   : > { %v7946_v60 = vpop.f32.mrf.mxu0 }
 0x2be   : > { %2339 = vmatmul.f32.gmra.mxu0 %v6570_v50 }
 0x2c0   : > { %v7944_v1 = vpop.f32.mrf.mxu1 }
 0x2c1   : > { %10612 = vst [vmem:[#allocation24_spill] sm:$0xff] %v7944_v1  ;;  %1890 = vmatmul.f32.gmra.mxu1 %v6578_v18  ;;  %v6593_v1 = vld [vmem:[#allocation2 + $0x109] sm:$0xff] }
 0x2c2   : > { %v7966_v4 = vpop.f32.mrf.mxu3 }
 0x2c3   : > { %v7950_v50 = vpop.f32.mrf.mxu0 }
 0x2c6   : > { %2342 = vmatmul.f32.gmra.mxu0 %v6571_v3 }
 0x2c8   : > { %v7948_v19 = vpop.f32.mrf.mxu1 }
 0x2c9   : > { %10613 = vst [vmem:[#allocation26_spill] sm:$0xff] %v7948_v19  ;;  %2395 = vmatmul.f32.vlgmr.msra.gmra.mxu1 %v6579_v6  ;;  %v3119_v6 = vld [vmem:[#allocation8 + $0x1a8] sm:$0xff] }
 0x2ca   : > { %3172 = vmatpush.msra.mxu2 %v3119_v6  ;;  %v3118_v6 = vld [vmem:[#allocation8 + $0x1a0] sm:$0xff]  ;;  %v7976_v9 = vpop.f32.mrf.mxu3 }
 0x2cb   : > { %v7956_v3 = vpop.f32.mrf.mxu0 }
 0x2cc   : > { %3173 = vmatpush.msra.mxu2 %v3118_v6  ;;  %v3117_v6 = vld [vmem:[#allocation8 + $0x198] sm:$0xff] }
 0x2ce   : > { %2345 = vmatmul.f32.gmra.mxu0 %v6572_v52  ;;  %v6581_v52 = vld [vmem:[#allocation2 + $0x69] sm:$0xff]  ;;  %3174 = vmatpush.msra.mxu2 %v3117_v6 }
 0x2cf   : > { %v6589_v6 = vld [vmem:[#allocation2 + $0xc9] sm:$0xff] }
 0x2d0   : > { %v7952_v7 = vpop.f32.mrf.mxu1  ;;  %3175 = vmatpush.msra.mxu2 %v3116_v42 }
 0x2d1   : > { %10614 = vst [vmem:[#allocation28_spill] sm:$0xff] %v7952_v7  ;;  %2398 = vmatmul.f32.gmra.mxu1 %v6580_v22  ;;  %v6582_v22 = vld [vmem:[#allocation2 + $0x71] sm:$0xff] }
 0x2d2   : > { %v7984_v31 = vpop.f32.mrf.mxu3  ;;  %v3160_v7 = vld [vmem:[#allocation8 + $0x2f0] sm:$0xff] }
 0x2d3   : > { %v7962_v0 = vpop.f32.mrf.mxu0  ;;  %3389 = vmatpush.msrb.mxu0 %v3160_v7  ;;  %v3156_v7 = vld [vmem:[#allocation8 + $0x2d0] sm:$0xff] }
 0x2d6   : > { %2348 = vmatmul.f32.gmra.mxu0 %v6573_v2 }
 0x2d8   : > { %v7958_v46 = vpop.f32.mrf.mxu1 }
 0x2d9   : > { %10615 = vst [vmem:[#allocation30_spill] sm:$0xff] %v7958_v46  ;;  %2401 = vmatmul.f32.gmra.mxu1 %v6581_v52  ;;  %v6583_v52 = vld [vmem:[#allocation2 + $0x89] sm:$0xff] }
 0x2de   : > { %2351 = vmatmul.f32.gmra.mxu0 %v6574_v5  ;;  %v7970_v5 = vpop.f32.mrf.mxu0 }
 0x2e0   : > { %v7964_v2 = vpop.f32.mrf.mxu1 }
 0x2e1   : > { %10616 = vst [vmem:[#allocation66_spill] sm:$0xff] %v7964_v2  ;;  %2404 = vmatmul.f32.gmra.mxu1 %v6582_v22  ;;  %v6584_v22 = vld [vmem:[#allocation2 + $0x91] sm:$0xff] }
 0x2e2   : > { %v3140_v2 = vld [vmem:[#allocation8 + $0x250] sm:$0xff] }
 0x2e6   : > { %2354 = vmatmul.f32.gmra.mxu0 %v6575_v35  ;;  %v3143_v35 = vld [vmem:[#allocation8 + $0x268] sm:$0xff]  ;;  %v7978_v63 = vpop.f32.mrf.mxu0 }
 0x2e7   : > { %3277 = vmatpush.msra.mxu3 %v3143_v35  ;;  %v6586_v35 = vld [vmem:[#allocation2 + $0x208] sm:$0xff] }
 0x2e8   : > { %v7968_v43 = vpop.f32.mrf.mxu1 }
 0x2e9   : > { %10617 = vst [vmem:[#allocation67_spill] sm:$0xff] %v7968_v43  ;;  %2407 = vmatmul.f32.gmra.mxu1 %v6583_v52  ;;  %v6585_v52 = vld [vmem:[#allocation2 + $0xa9] sm:$0xff]  ;;  %v6590_v43 = vld [vmem:[#allocation2 + $0xd1] sm:$0xff] }
 0x2ee   : > { %2357 = vmatmul.f32.gmra.mxu0 %v6576_v32  ;;  %v7982_v32 = vpop.f32.mrf.mxu2 }
 0x2f0   : > { %v7974_v17 = vpop.f32.mrf.mxu1 }
 0x2f1   : > { %10618 = vst [vmem:[#allocation68_spill] sm:$0xff] %v7974_v17  ;;  %2410 = vmatmul.f32.gmra.mxu1 %v6584_v22  ;;  %v3142_v22 = vld [vmem:[#allocation8 + $0x260] sm:$0xff]  ;;  %v3141_v17 = vld [vmem:[#allocation8 + $0x258] sm:$0xff] }
 0x2f2   : > { %3278 = vmatpush.msra.mxu3 %v3142_v22 }
 0x2f4   : > { %3279 = vmatpush.msra.mxu3 %v3141_v17 }
 0x2f6   : > { %2360 = vmatmul.f32.gmra.mxu0 %v6577_v57  ;;  %v7986_v57 = vpop.f32.mrf.mxu0  ;;  %v7990_v39 = vpop.f32.mrf.mxu2  ;;  %3280 = vmatpush.msra.mxu3 %v3140_v2 }
 0x2f8   : > { %v7980_v27 = vpop.f32.mrf.mxu1  ;;  %3281 = vmatpush.msra.mxu3 %v3139_v24  ;;  %v3159_v24 = vld [vmem:[#allocation8 + $0x2e8] sm:$0xff] }
 0x2f9   : > { %10619 = vst [vmem:[#allocation69_spill] sm:$0xff] %v7980_v27  ;;  %2413 = vmatmul.f32.gmra.mxu1 %v6585_v52  ;;  %v6588_v27 = vld [vmem:[#allocation2 + $0x210] sm:$0xff]  ;;  %3390 = vmatpush.msrb.mxu0 %v3159_v24  ;;  %v3155_v24 = vld [vmem:[#allocation8 + $0x2c8] sm:$0xff] }
 0x2fe   : > { %2363 = vmatmul.f32.gmra.mxu0 %v6578_v18  ;;  %v7992_v18 = vpop.f32.mrf.mxu3  ;;  %v7994_v36 = vpop.f32.mrf.mxu0 }
 0x300   : > { %v7988_v51 = vpop.f32.mrf.mxu1 }
 0x301   : > { %10620 = vst [vmem:[#allocation70_spill] sm:$0xff] %v7988_v51  ;;  %2416 = vmatmul.f32.gmra.mxu1 %v6587_v53  ;;  %v7998_v51 = vpop.f32.mrf.mxu2 }
 0x306   : > { %2366 = vmatmul.f32.gmra.mxu0 %v6586_v35  ;;  %v8000_v35 = vpop.f32.mrf.mxu3  ;;  %v8004_v53 = vpop.f32.mrf.mxu0 }
 0x308   : > { %v7996_v52 = vpop.f32.mrf.mxu1 }
 0x309   : > { %10621 = vst [vmem:[#allocation71_spill] sm:$0xff] %v7996_v52  ;;  %2419 = vmatmul.f32.gmra.mxu1 %v6589_v6  ;;  %v8007_v52 = vpop.f32.mrf.mxu2  ;;  %v6591_v6 = vld [vmem:[#allocation2 + $0xe9] sm:$0xff] }
 0x30e   : > { %2369 = vmatmul.f32.gmra.mxu0 %v6588_v27  ;;  %v8012_v42 = vpop.f32.mrf.mxu3  ;;  %v8014_v37 = vpop.f32.mrf.mxu0 }
 0x310   : > { %v8002_v22 = vpop.f32.mrf.mxu1 }
 0x311   : > { %10622 = vst [vmem:[#allocation72_spill] sm:$0xff] %v8002_v22  ;;  %2422 = vmatmul.f32.gmra.mxu1 %v6590_v43  ;;  %v3115_v22 = vld [vmem:[#allocation8 + $0x188] sm:$0xff]  ;;  %v3138_v43 = vld [vmem:[#allocation8 + $0x240] sm:$0xff]  ;;  %v8018_v46 = vpop.f32.mrf.mxu2 }
 0x312   : > { %3176 = vmatpush.msra.mxu2 %v3115_v22  ;;  %3282 = vmatpush.msra.mxu3 %v3138_v43  ;;  %v3136_v22 = vld [vmem:[#allocation8 + $0x230] sm:$0xff]  ;;  %v3158_v43 = vld [vmem:[#allocation8 + $0x2e0] sm:$0xff] }
 0x313   : > { %3391 = vmatpush.msrb.mxu0 %v3158_v43  ;;  %v3131_v43 = vld [vmem:[#allocation8 + $0x208] sm:$0xff] }
 0x315   : > { %3392 = vmatpush.msrb.mxu0 %v3157_v23  ;;  %v6594_v23 = vld [vmem:[#allocation2 + $0x111] sm:$0xff] }
 0x316   : > { %2372 = vmatmul.f32.gmra.mxu0 %v10623_v49  ;;  %v8020_v44 = vpop.f32.mrf.mxu3  ;;  %v8022_v2 = vpop.f32.mrf.mxu0 }
 0x317   : > { %10626 = vst [vmem:[#allocation74_spill] sm:$0xff] %v8020_v44  ;;  %3393 = vmatpush.msrb.mxu0 %v3156_v7  ;;  %v3152_v7 = vld [vmem:[#allocation8 + $0x2b0] sm:$0xff] }
 0x318   : > { %v8009_v27 = vpop.f32.mrf.mxu1 }
 0x319   : > { %10624 = vst [vmem:[#allocation32_spill] sm:$0xff] %v8009_v27  ;;  %2425 = vmatmul.f32.gmra.mxu1 %v6591_v6  ;;  %v857_v27 = vld [vmem:[#allocation2 + $0x227] sm:$0xff]  ;;  %v3137_v6 = vld [vmem:[#allocation8 + $0x238] sm:$0xff]  ;;  %v8026_v28 = vpop.f32.mrf.mxu2  ;;  %3394 = vmatpush.msrb.mxu0 %v3155_v24 }
 0x31a   : > { %2259 = vmatmul.f32.gmra.mxu3 %v857_v27  ;;  %v858_v27 = vld [vmem:[#allocation2 + $0x22f] sm:$0xff]  ;;  %10628 = vst [vmem:[#allocation76_spill] sm:$0xff] %v8026_v28 }
 0x31b   : > { %3283 = vmatpush.msra.mxu3 %v3137_v6  ;;  %v3133_v6 = vld [vmem:[#allocation8 + $0x218] sm:$0xff] }
 0x31d   : > { %3284 = vmatpush.msra.mxu3 %v3136_v22  ;;  %v3132_v22 = vld [vmem:[#allocation8 + $0x210] sm:$0xff] }
 0x31e   : > { %2375 = vmatmul.f32.gmra.mxu0 %v10623_v49  ;;  %v6592_v49 = vld [vmem:[#allocation2 + $0xf1] sm:$0xff]  ;;  %v8028_v44 = vpop.f32.mrf.mxu3 }
 0x31f   : > { %10629 = vst [vmem:[#allocation77_spill] sm:$0xff] %v8028_v44  ;;  %v3151_v44 = vld [vmem:[#allocation8 + $0x2a8] sm:$0xff] }
 0x320   : > { %v8016_v17 = vpop.f32.mrf.mxu1 }
 0x321   : > { %10625 = vst [vmem:[#allocation73_spill] sm:$0xff] %v8016_v17  ;;  %2428 = vmatmul.f32.gmra.mxu1 %v6592_v49  ;;  %v3135_v17 = vld [vmem:[#allocation8 + $0x228] sm:$0xff]  ;;  %v3134_v49 = vld [vmem:[#allocation8 + $0x220] sm:$0xff] }
 0x322   : > { %3285 = vmatpush.msra.mxu3 %v3135_v17  ;;  %v8030_v17 = vpop.f32.mrf.mxu0 }
 0x323   : > { %2262 = vmatmul.f32.gmra.mxu3 %v858_v27  ;;  %v3130_v27 = vld [vmem:[#allocation8 + $0x200] sm:$0xff] }
 0x324   : > { %3286 = vmatpush.msra.mxu3 %v3134_v49 }
 0x326   : > { %3287 = vmatpush.msra.mxu3 %v3133_v6  ;;  %v3114_v6 = vld [vmem:[#allocation8 + $0x180] sm:$0xff]  ;;  %v8036_v28 = vpop.f32.mrf.mxu3 }
 0x327   : > { %3177 = vmatpush.msra.mxu2 %v3114_v6  ;;  %10632 = vst [vmem:[#allocation80_spill] sm:$0xff] %v8036_v28  ;;  %v3146_v28 = vld [vmem:[#allocation8 + $0x280] sm:$0xff] }
 0x328   : > { %v8024_v19 = vpop.f32.mrf.mxu1  ;;  %3288 = vmatpush.msra.mxu3 %v3132_v22  ;;  %v8034_v22 = vpop.f32.mrf.mxu2 }
 0x329   : > { %10627 = vst [vmem:[#allocation75_spill] sm:$0xff] %v8024_v19  ;;  %2431 = vmatmul.f32.gmra.mxu1 %v6593_v1  ;;  %v3154_v1 = vld [vmem:[#allocation8 + $0x2c0] sm:$0xff]  ;;  %v3153_v19 = vld [vmem:[#allocation8 + $0x2b8] sm:$0xff] }
 0x32a   : > { %3289 = vmatpush.msra.mxu3 %v3131_v43  ;;  %3395 = vmatpush.msrb.mxu0 %v3154_v1  ;;  %10631 = vst [vmem:[#allocation79_spill] sm:$0xff] %v8034_v22  ;;  %v8040_v24 = vpop.f32.mrf.mxu0  ;;  %v3150_v43 = vld [vmem:[#allocation8 + $0x2a0] sm:$0xff]  ;;  %v6595_v1 = vld [vmem:[#allocation2 + $0x129] sm:$0xff] }
 0x32b   : > { %10634 = vst [vmem:[#allocation82_spill] sm:$0xff] %v8040_v24 }
 0x32c   : > { %3290 = vmatpush.msra.mxu3 %v3130_v27  ;;  %3396 = vmatpush.msrb.mxu0 %v3153_v19  ;;  %v3149_v27 = vld [vmem:[#allocation8 + $0x298] sm:$0xff]  ;;  %v3147_v19 = vld [vmem:[#allocation8 + $0x288] sm:$0xff] }
 0x32e   : > { %3397 = vmatpush.msrb.mxu0 %v3152_v7  ;;  %v8046_v22 = vpop.f32.mrf.mxu3 }
 0x32f   : > { %10637 = vst [vmem:[#allocation85_spill] sm:$0xff] %v8046_v22 }
 0x330   : > { %v8032_v49 = vpop.f32.mrf.mxu1  ;;  %3398 = vmatpush.msrb.mxu0 %v3151_v44  ;;  %v8042_v6 = vpop.f32.mrf.mxu2 }
 0x331   : > { %10630 = vst [vmem:[#allocation78_spill] sm:$0xff] %v8032_v49  ;;  %2434 = vmatmul.f32.gmra.mxu1 %v6594_v23  ;;  %v3148_v23 = vld [vmem:[#allocation8 + $0x290] sm:$0xff] }
 0x332   : > { %3399 = vmatpush.msrb.mxu0 %v3150_v43  ;;  %10635 = vst [vmem:[#allocation83_spill] sm:$0xff] %v8042_v6  ;;  %v8048_v44 = vpop.f32.mrf.mxu0  ;;  %v3000_v43 = vld [vmem:[#allocation8 + $0xf8] sm:$0xff] }
 0x333   : > { %10638 = vst [vmem:[#allocation86_spill] sm:$0xff] %v8048_v44  ;;  %3614 = vmatpush.msrb.mxu2 %v3000_v43  ;;  %v6597_v43 = vld [vmem:[#allocation2 + $0x149] sm:$0xff]  ;;  %v6598_v44 = vld [vmem:[#allocation2 + $0x151] sm:$0xff] }
 0x334   : > { %3400 = vmatpush.msrb.mxu0 %v3149_v27  ;;  %v2284_v27 = vadd.f32 %v7921_v21, %v7894_v33 }
 0x336   : > { %3401 = vmatpush.msrb.mxu0 %v3148_v23 }
 0x338   : > { %v8038_v49 = vpop.f32.mrf.mxu1  ;;  %3402 = vmatpush.msrb.mxu0 %v3147_v19  ;;  %v8055_v19 = vld [vmem:[%s10469_s5 + $0x2] ss:$0 sm:$0xff] }
 0x339   : > { %10633 = vst [vmem:[#allocation81_spill] sm:$0xff] %v8038_v49  ;;  %2437 = vmatmul.f32.gmra.mxu1 %v6595_v1  ;;  %v6596_v49 = vld [vmem:[#allocation2 + $0x131] sm:$0xff] }
 0x33a   : > { %3403 = vmatpush.msrb.mxu0 %v3146_v28  ;;  %v2984_v1 = vld [vmem:[#allocation8 + $0x78] sm:$0xff]  ;;  %v8067_v33 = vpop.f32.mrf.mxu0 }
 0x33b   : > { %3501 = vmatpush.msrb.mxu1 %v2984_v1  ;;  %v8065_v1 = vpop.f32.mrf.mxu3 }
 0x33c   : > { %10640 = vst [vmem:[#allocation88_spill] sm:$0xff] %v8065_v1  ;;  %v2983_v1 = vld [vmem:[#allocation8 + $0x70] sm:$0xff] }
 0x33d   : > { %3502 = vmatpush.msrb.mxu1 %v2983_v1  ;;  %v6599_v1 = vld [vmem:[#allocation2 + $0x169] sm:$0xff] }
 0x340   : > { %v8044_v7 = vpop.f32.mrf.mxu1 }
 0x341   : > { %10636 = vst [vmem:[#allocation84_spill] sm:$0xff] %v8044_v7  ;;  %2440 = vmatmul.f32.gmra.mxu1 %v6596_v49  ;;  %v8057_v7 = vpop.f32.mrf.mxu2  ;;  %v8063_v49 = vld [vmem:[%s10469_s5 + $0x3] ss:$0 sm:$0xff] }
 0x342   : > { %10639 = vst [vmem:[#allocation87_spill] sm:$0xff] %v8057_v7 }
 0x348   : > { %v2396_v23 = vpop.f32.mrf.mxu1 }
 0x349   : > { %v2397_v6 = vadd.f32 %v2396_v23, %v2284_v27  ;;  %2443 = vmatmul.f32.gmra.mxu1 %v6597_v43  ;;  %v2287_v27 = vadd.f32 %v7929_v34, %v7904_v30  ;;  %v2999_v43 = vld [vmem:[#allocation8 + $0xf0] sm:$0xff]  ;;  %v8074_v24 = vpop.f32.mrf.mxu2  ;;  %v8077_v30 = vpop.f32.mrf.mxu3  ;;  %v2290_v34 = vadd.f32 %v7937_v56, %v7914_v14  ;;  %v2293_v56 = vadd.f32 %v7946_v60, %v7923_v25  ;;  %v2998_v25 = vld [vmem:[#allocation8 + $0xe8] sm:$0xff] }
 0x34a   : > { %3615 = vmatpush.msrb.mxu2 %v2999_v43  ;;  %v2982_v60 = vld [vmem:[#allocation8 + $0x68] sm:$0xff] }
 0x34b   : > { %v2492_v28 = vadd.f32 %v2397_v6, %v7804_v45  ;;  %3503 = vmatpush.msrb.mxu1 %v2982_v60 }
 0x34c   : > { %3616 = vmatpush.msrb.mxu2 %v2998_v25  ;;  %v2299_v25 = vadd.f32 %v7956_v3, %v7941_v54 }
 0x34d   : > { %v2526_v21 = vmul.f32 %v8055_v19, %v2492_v28 }
 0x34f   : > { %v2560_v23 = vadd.f32 %v8063_v49, %v2526_v21 }
 0x350   : > { %v2399_v7 = vpop.f32.mrf.mxu1 }
 0x351   : > { %v2592_v45 = vmax.f32 %v2560_v23, 0.0  ;;  %v2400_v6 = vadd.f32 %v2399_v7, %v2287_v27  ;;  %2446 = vmatmul.f32.gmra.mxu1 %v6598_v44  ;;  %v8081_v7 = vpop.f32.mrf.mxu0  ;;  %v8089_v14 = vpop.f32.mrf.mxu2 }
 0x352   : > { %v8094_v43 = vpop.f32.mrf.mxu3 }
 0x353   : > { %2625 = vst [vmem:[#allocation3 + $0x28] sm:$0xff] %v2592_v45  ;;  %v2493_v22 = vadd.f32 %v2400_v6, %v7818_v12  ;;  %3291 = vmatmul.f32.vlgmr.msra.gmra.mxu3 %v2592_v45 }
 0x354   : > { %10641 = vst [vmem:[#allocation89_spill] sm:$0xff] %v8094_v43 }
 0x355   : > { %v2527_v28 = vmul.f32 %v8055_v19, %v2493_v22 }
 0x357   : > { %v2561_v12 = vadd.f32 %v8063_v49, %v2527_v28 }
 0x358   : > { %v2402_v21 = vpop.f32.mrf.mxu1 }
 0x359   : > { %v2593_v44 = vmax.f32 %v2561_v12, 0.0  ;;  %v2403_v27 = vadd.f32 %v2402_v21, %v2290_v34  ;;  %2449 = vmatmul.f32.gmra.mxu1 %v6599_v1  ;;  %v8096_v34 = vpop.f32.mrf.mxu0 }
 0x35a   : > { %v8084_v23 = vld [vmem:[#allocation3 + $0x27] sm:$0xff] }
 0x35b   : > { %2626 = vst [vmem:[#allocation3 + $0x30] sm:$0xff] %v2593_v44  ;;  %v2494_v45 = vadd.f32 %v2403_v27, %v7830_v62  ;;  %3178 = vmatmul.f32.vlgmr.msra.gmra.mxu2 %v8084_v23  ;;  %3294 = vmatmul.f32.gmra.mxu3 %v2593_v44 }
 0x35d   : > { %v2528_v22 = vmul.f32 %v8055_v19, %v2494_v45  ;;  %v6600_v45 = vld [vmem:[#allocation2 + $0x171] sm:$0xff] }
 0x35f   : > { %v2562_v6 = vadd.f32 %v8063_v49, %v2528_v22  ;;  %v2296_v22 = vadd.f32 %v7950_v50, %v7933_v58 }
 0x360   : > { %v2405_v28 = vpop.f32.mrf.mxu1 }
 0x361   : > { %v2594_v62 = vmax.f32 %v2562_v6, 0.0  ;;  %v2406_v12 = vadd.f32 %v2405_v28, %v2293_v56  ;;  %2452 = vmatmul.f32.gmra.mxu1 %v6600_v45  ;;  %v8106_v6 = vpop.f32.mrf.mxu2  ;;  %v8108_v45 = vpop.f32.mrf.mxu3 }
 0x362   : > { %v8098_v21 = vld [vmem:[#allocation3 + $0x2f] sm:$0xff] }
 0x363   : > { %v2803_v27 = vld [vmem:[#allocation3 + $0x29] sm:$0xff]  ;;  %2627 = vst [vmem:[#allocation3 + $0x48] sm:$0xff] %v2594_v62  ;;  %v2495_v44 = vadd.f32 %v2406_v12, %v7842_v20  ;;  %3181 = vmatmul.f32.gmra.mxu2 %v8098_v21  ;;  %3297 = vmatmul.f32.gmra.mxu3 %v2594_v62  ;;  %v2804_v58 = vld [vmem:[#allocation3 + $0x31] sm:$0xff] }
 0x364   : > { %3404 = vmatmul.f32.vlgmr.msrb.gmra.mxu0 %v2803_v27  ;;  %v8112_v27 = vpop.f32.mrf.mxu0 }
 0x365   : > { %v2529_v1 = vmul.f32 %v8055_v19, %v2495_v44  ;;  %v6601_v44 = vld [vmem:[#allocation2 + $0x189] sm:$0xff] }
 0x367   : > { %v2563_v56 = vadd.f32 %v8063_v49, %v2529_v1 }
 0x368   : > { %v2408_v20 = vpop.f32.mrf.mxu1 }
 0x369   : > { %v2595_v28 = vmax.f32 %v2563_v56, 0.0  ;;  %v2409_v12 = vadd.f32 %v2408_v20, %v2296_v22  ;;  %2455 = vmatmul.f32.gmra.mxu1 %v6601_v44  ;;  %v8120_v20 = vpop.f32.mrf.mxu2  ;;  %v8126_v54 = vpop.f32.mrf.mxu3 }
 0x36a   : > { %v8110_v43 = vld [vmem:[#allocation3 + $0x47] sm:$0xff] }
 0x36b   : > { %2628 = vst [vmem:[#allocation3 + $0x50] sm:$0xff] %v2595_v28  ;;  %v2496_v62 = vadd.f32 %v2409_v12, %v7854_v47  ;;  %3184 = vmatmul.f32.gmra.mxu2 %v8110_v43  ;;  %3300 = vmatmul.f32.gmra.mxu3 %v2595_v28  ;;  %v2997_v28 = vld [vmem:[#allocation8 + $0xe0] sm:$0xff] }
 0x36c   : > { %3407 = vmatmul.f32.gmra.mxu0 %v2804_v58  ;;  %v6602_v58 = vld [vmem:[#allocation2 + $0x191] sm:$0xff]  ;;  %v8128_v3 = vpop.f32.mrf.mxu0  ;;  %3617 = vmatpush.msrb.mxu2 %v2997_v28 }
 0x36d   : > { %v2530_v50 = vmul.f32 %v8055_v19, %v2496_v62  ;;  %v2981_v62 = vld [vmem:[#allocation8 + $0x60] sm:$0xff] }
 0x36e   : > { %3504 = vmatpush.msrb.mxu1 %v2981_v62  ;;  %v2305_v62 = vadd.f32 %v7970_v5, %v7960_v11  ;;  %v2996_v11 = vld [vmem:[#allocation8 + $0xd8] sm:$0xff] }
 0x36f   : > { %v2564_v60 = vadd.f32 %v8063_v49, %v2530_v50  ;;  %v2980_v5 = vld [vmem:[#allocation8 + $0x58] sm:$0xff]  ;;  %3618 = vmatpush.msrb.mxu2 %v2996_v11 }
 0x370   : > { %v2411_v1 = vpop.f32.mrf.mxu1  ;;  %3505 = vmatpush.msrb.mxu1 %v2980_v5  ;;  %v6605_v5 = vld [vmem:[#allocation2 + $0x1c9] sm:$0xff] }
 0x371   : > { %v2596_v22 = vmax.f32 %v2564_v60, 0.0  ;;  %v2412_v56 = vadd.f32 %v2411_v1, %v2299_v25  ;;  %2458 = vmatmul.f32.gmra.mxu1 %v6602_v58  ;;  %v2302_v25 = vadd.f32 %v7962_v0, %v7954_v16  ;;  %v8138_v28 = vpop.f32.mrf.mxu2  ;;  %v8141_v0 = vpop.f32.mrf.mxu3 }
 0x372   : > { %v8122_v47 = vld [vmem:[#allocation3 + $0x4f] sm:$0xff] }
 0x373   : > { %v2805_v12 = vld [vmem:[#allocation3 + $0x49] sm:$0xff]  ;;  %2629 = vst [vmem:[#allocation3 + $0x68] sm:$0xff] %v2596_v22  ;;  %v2497_v44 = vadd.f32 %v2412_v56, %v7866_v13  ;;  %3187 = vmatmul.f32.gmra.mxu2 %v8122_v47  ;;  %3303 = vmatmul.f32.gmra.mxu3 %v2596_v22 }
 0x374   : > { %3410 = vmatmul.f32.gmra.mxu0 %v2805_v12  ;;  %v6603_v22 = vld [vmem:[#allocation2 + $0x1a9] sm:$0xff] }
 0x375   : > { %v2531_v50 = vmul.f32 %v8055_v19, %v2497_v44  ;;  %v2806_v44 = vld [vmem:[#allocation3 + $0x51] sm:$0xff] }
 0x377   : > { %v2565_v13 = vadd.f32 %v8063_v49, %v2531_v50  ;;  %v8145_v50 = vpop.f32.mrf.mxu0 }
 0x378   : > { %v2414_v60 = vpop.f32.mrf.mxu1 }
 0x379   : > { %v2597_v1 = vmax.f32 %v2565_v13, 0.0  ;;  %v2415_v56 = vadd.f32 %v2414_v60, %v2302_v25  ;;  %2461 = vmatmul.f32.gmra.mxu1 %v6603_v22 }
 0x37a   : > { %v8134_v58 = vld [vmem:[#allocation3 + $0x67] sm:$0xff] }
 0x37b   : > { %10642 = vst [vmem:[#allocation90_spill] sm:$0xff] %v8134_v58  ;;  %v2498_v12 = vadd.f32 %v2415_v56, %v7878_v61  ;;  %3190 = vmatmul.f32.gmra.mxu2 %v8134_v58  ;;  %3306 = vmatmul.f32.gmra.mxu3 %v2597_v1  ;;  %v10643_v58 = vld [vmem:[#allocation21_spill] sm:$0xff] }
 0x37c   : > { %2630 = vst [vmem:[#allocation3 + $0x70] sm:$0xff] %v2597_v1  ;;  %3413 = vmatmul.f32.gmra.mxu0 %v2806_v44  ;;  %v1710_v1 = vadd.f32 %v7655_v48, %v10643_v58  ;;  %v6604_v44 = vld [vmem:[#allocation2 + $0x1b1] sm:$0xff]  ;;  %v2308_v48 = vadd.f32 %v7978_v63, %v7966_v4  ;;  %v8161_v58 = vpop.f32.mrf.mxu3 }
 0x37d   : > { %v2532_v16 = vmul.f32 %v8055_v19, %v2498_v12 }
 0x37f   : > { %v2566_v61 = vadd.f32 %v8063_v49, %v2532_v16  ;;  %v1823_v16 = vadd.f32 %v7892_v41, %v1710_v1 }
 0x380   : > { %v2417_v25 = vpop.f32.mrf.mxu1 }
 0x381   : > { %v2598_v13 = vmax.f32 %v2566_v61, 0.0  ;;  %v2418_v60 = vadd.f32 %v2417_v25, %v2305_v62  ;;  %2464 = vmatmul.f32.gmra.mxu1 %v6604_v44  ;;  %v8156_v61 = vpop.f32.mrf.mxu2 }
 0x383   : > { %v8148_v56 = vld [vmem:[#allocation3 + $0x6f] sm:$0xff]  ;;  %2631 = vst [vmem:[#allocation3 + $0x88] sm:$0xff] %v2598_v13  ;;  %v2499_v12 = vadd.f32 %v2418_v60, %v7887_v15  ;;  %3309 = vmatmul.f32.gmra.mxu3 %v2598_v13  ;;  %v1936_v60 = vadd.f32 %v7972_v38, %v1823_v16  ;;  %v2311_v16 = vadd.f32 %v7986_v57, %v7976_v9 }
 0x384   : > { %v2807_v22 = vld [vmem:[#allocation3 + $0x69] sm:$0xff]  ;;  %3193 = vmatmul.f32.gmra.mxu2 %v8148_v56  ;;  %v2808_v63 = vld [vmem:[#allocation3 + $0x71] sm:$0xff] }
 0x385   : > { %3416 = vmatmul.f32.gmra.mxu0 %v2807_v22  ;;  %v2533_v62 = vmul.f32 %v8055_v19, %v2499_v12  ;;  %v8164_v22 = vpop.f32.mrf.mxu0  ;;  %v10644_v12 = vld [vmem:[#allocation22_spill] sm:$0xff] }
 0x386   : > { %v1713_v44 = vadd.f32 %v7664_v55, %v10644_v12  ;;  %v6606_v57 = vld [vmem:[#allocation2 + $0x1d1] sm:$0xff] }
 0x387   : > { %v2567_v15 = vadd.f32 %v8063_v49, %v2533_v62 }
 0x388   : > { %v2420_v25 = vpop.f32.mrf.mxu1  ;;  %v1826_v38 = vadd.f32 %v7901_v10, %v1713_v44  ;;  %v10645_v10 = vld [vmem:[#allocation23_spill] sm:$0xff]  ;;  %v10646_v44 = vld [vmem:[#allocation37_spill] sm:$0xff] }
 0x389   : > { %v2599_v13 = vmax.f32 %v2567_v15, 0.0  ;;  %v2421_v41 = vadd.f32 %v2420_v25, %v2308_v48  ;;  %2467 = vmatmul.f32.gmra.mxu1 %v6605_v5  ;;  %v8176_v48 = vpop.f32.mrf.mxu2 }
 0x38a   : > { %v8166_v1 = vld [vmem:[#allocation3 + $0x87] sm:$0xff]  ;;  %v1939_v15 = vadd.f32 %v7982_v32, %v1826_v38  ;;  %v2979_v32 = vld [vmem:[#allocation8 + $0x50] sm:$0xff] }
 0x38b   : > { %2632 = vst [vmem:[#allocation3 + $0x90] sm:$0xff] %v2599_v13  ;;  %v2500_v11 = vadd.f32 %v2421_v41, %v1936_v60  ;;  %3312 = vmatmul.f32.gmra.mxu3 %v2599_v13  ;;  %v8179_v41 = vpop.f32.mrf.mxu3  ;;  %3506 = vmatpush.msrb.mxu1 %v2979_v32 }
 0x38c   : > { %3196 = vmatmul.f32.gmra.mxu2 %v8166_v1 }
 0x38d   : > { %3419 = vmatmul.f32.gmra.mxu0 %v2808_v63  ;;  %v2534_v4 = vmul.f32 %v8055_v19, %v2500_v11  ;;  %v1716_v11 = vadd.f32 %v10646_v44, %v10645_v10  ;;  %v8185_v5 = vpop.f32.mrf.mxu0  ;;  %v2995_v63 = vld [vmem:[#allocation8 + $0xd0] sm:$0xff] }
 0x38e   : > { %3619 = vmatpush.msrb.mxu2 %v2995_v63 }
 0x38f   : > { %v2568_v62 = vadd.f32 %v8063_v49, %v2534_v4  ;;  %v1829_v38 = vadd.f32 %v7908_v8, %v1716_v11  ;;  %v2977_v8 = vld [vmem:[#allocation8 + $0x40] sm:$0xff]  ;;  %v10648_v11 = vld [vmem:[#allocation25_spill] sm:$0xff] }
 0x390   : > { %v2423_v55 = vpop.f32.mrf.mxu1 }
 0x391   : > { %v2600_v25 = vmax.f32 %v2568_v62, 0.0  ;;  %v2424_v60 = vadd.f32 %v2423_v55, %v2311_v16  ;;  %2470 = vmatmul.f32.gmra.mxu1 %v6606_v57  ;;  %v2314_v16 = vadd.f32 %v7994_v36, %v7984_v31  ;;  %v6607_v36 = vld [vmem:[#allocation2 + $0x1e9] sm:$0xff] }
 0x392   : > { %v8181_v12 = vld [vmem:[#allocation3 + $0x8f] sm:$0xff] }
 0x393   : > { %v2809_v13 = vld [vmem:[#allocation3 + $0x89] sm:$0xff]  ;;  %2633 = vst [vmem:[#allocation3 + $0xa8] sm:$0xff] %v2600_v25  ;;  %v2501_v9 = vadd.f32 %v2424_v60, %v1939_v15  ;;  %3315 = vmatmul.f32.gmra.mxu3 %v2600_v25  ;;  %v1942_v60 = vadd.f32 %v7990_v39, %v1829_v38  ;;  %v2810_v31 = vld [vmem:[#allocation3 + $0x91] sm:$0xff]  ;;  %v8201_v32 = vpop.f32.mrf.mxu3 }
 0x394   : > { %3199 = vmatmul.f32.gmra.mxu2 %v8181_v12  ;;  %v2978_v15 = vld [vmem:[#allocation8 + $0x48] sm:$0xff]  ;;  %v2976_v39 = vld [vmem:[#allocation8 + $0x38] sm:$0xff] }
 0x395   : > { %3422 = vmatmul.f32.gmra.mxu0 %v2809_v13  ;;  %v2535_v4 = vmul.f32 %v8055_v19, %v2501_v9  ;;  %3507 = vmatpush.msrb.mxu1 %v2978_v15  ;;  %v8194_v13 = vpop.f32.mrf.mxu2  ;;  %v10649_v9 = vld [vmem:[#allocation39_spill] sm:$0xff] }
 0x396   : > { %v1719_v57 = vadd.f32 %v10649_v9, %v10648_v11 }
 0x397   : > { %v2569_v62 = vadd.f32 %v8063_v49, %v2535_v4  ;;  %v8204_v4 = vpop.f32.mrf.mxu0  ;;  %3508 = vmatpush.msrb.mxu1 %v2977_v8 }
 0x398   : > { %v2426_v55 = vpop.f32.mrf.mxu1  ;;  %v1832_v38 = vadd.f32 %v7917_v29, %v1719_v57  ;;  %v2974_v57 = vld [vmem:[#allocation8 + $0x28] sm:$0xff] }
 0x399   : > { %v2601_v10 = vmax.f32 %v2569_v62, 0.0  ;;  %v2427_v44 = vadd.f32 %v2426_v55, %v2314_v16  ;;  %2473 = vmatmul.f32.gmra.mxu1 %v6607_v36  ;;  %v2975_v62 = vld [vmem:[#allocation8 + $0x30] sm:$0xff]  ;;  %v2317_v55 = vadd.f32 %v8004_v53, %v7992_v18  ;;  %v10650_v36 = vld [vmem:[#allocation27_spill] sm:$0xff]  ;;  %v2994_v18 = vld [vmem:[#allocation8 + $0xc8] sm:$0xff] }
 0x39a   : > { %v8196_v25 = vld [vmem:[#allocation3 + $0xa7] sm:$0xff]  ;;  %3509 = vmatpush.msrb.mxu1 %v2976_v39  ;;  %3620 = vmatpush.msrb.mxu2 %v2994_v18 }
 0x39b   : > { %10647 = vst [vmem:[#allocation21_spill] sm:$0xff] %v8196_v25  ;;  %v2502_v63 = vadd.f32 %v2427_v44, %v1942_v60  ;;  %3318 = vmatmul.f32.gmra.mxu3 %v2601_v10  ;;  %v1945_v44 = vadd.f32 %v7998_v51, %v1832_v38  ;;  %v2973_v51 = vld [vmem:[#allocation8 + $0x20] sm:$0xff] }
 0x39c   : > { %2634 = vst [vmem:[#allocation3 + $0xb0] sm:$0xff] %v2601_v10  ;;  %3202 = vmatmul.f32.gmra.mxu2 %v8196_v25  ;;  %3510 = vmatpush.msrb.mxu1 %v2975_v62  ;;  %v6608_v25 = vld [vmem:[#allocation2 + $0x1f1] sm:$0xff] }
 0x39d   : > { %3425 = vmatmul.f32.gmra.mxu0 %v2810_v31  ;;  %v2536_v16 = vmul.f32 %v8055_v19, %v2502_v63  ;;  %v10651_v63 = vld [vmem:[#allocation41_spill] sm:$0xff]  ;;  %v8216_v53 = vpop.f32.mrf.mxu2  ;;  %v2972_v62 = vld [vmem:[#allocation8 + $0x18] sm:$0xff] }
 0x39e   : > { %v1722_v8 = vadd.f32 %v10651_v63, %v10650_v36  ;;  %3511 = vmatpush.msrb.mxu1 %v2974_v57  ;;  %v10652_v57 = vld [vmem:[#allocation29_spill] sm:$0xff]  ;;  %v10653_v36 = vld [vmem:[#allocation43_spill] sm:$0xff] }
 0x39f   : > { %v2570_v15 = vadd.f32 %v8063_v49, %v2536_v16  ;;  %v8220_v16 = vpop.f32.mrf.mxu3  ;;  %v1725_v63 = vadd.f32 %v10653_v36, %v10652_v57  ;;  %v10655_v57 = vld [vmem:[#allocation31_spill] sm:$0xff]  ;;  %v10656_v36 = vld [vmem:[#allocation45_spill] sm:$0xff] }
 0x3a0   : > { %v2429_v60 = vpop.f32.mrf.mxu1  ;;  %v1835_v39 = vadd.f32 %v7925_v40, %v1722_v8  ;;  %3512 = vmatpush.msrb.mxu1 %v2973_v51 }
 0x3a1   : > { %v2602_v11 = vmax.f32 %v2570_v15, 0.0  ;;  %v2430_v10 = vadd.f32 %v2429_v60, %v2317_v55  ;;  %2476 = vmatmul.f32.gmra.mxu1 %v6608_v25  ;;  %v2320_v25 = vadd.f32 %v8014_v37, %v8000_v35  ;;  %v8224_v55 = vpop.f32.mrf.mxu0  ;;  %v6609_v37 = vld [vmem:[#allocation2 + $0x209] sm:$0xff] }
 0x3a2   : > { %3513 = vmatpush.msrb.mxu1 %v2972_v62 }
 0x3a3   : > { %v8211_v9 = vld [vmem:[#allocation3 + $0xaf] sm:$0xff]  ;;  %2635 = vst [vmem:[#allocation3 + $0xc8] sm:$0xff] %v2602_v11  ;;  %v2503_v31 = vadd.f32 %v2430_v10, %v1945_v44  ;;  %3321 = vmatmul.f32.gmra.mxu3 %v2602_v11  ;;  %v1948_v44 = vadd.f32 %v8007_v52, %v1835_v39  ;;  %v1838_v52 = vadd.f32 %v7931_v59, %v1725_v63  ;;  %v2969_v39 = vld [vmem:[#allocation8] sm:$0xff] }
 0x3a4   : > { %v2811_v29 = vld [vmem:[#allocation3 + $0xa9] sm:$0xff]  ;;  %3205 = vmatmul.f32.gmra.mxu2 %v8211_v9  ;;  %v2812_v35 = vld [vmem:[#allocation3 + $0xb1] sm:$0xff]  ;;  %v1728_v63 = vadd.f32 %v10656_v36, %v10655_v57  ;;  %v10661_v57 = vld [vmem:[#allocation47_spill] sm:$0xff] }
 0x3a5   : > { %3428 = vmatmul.f32.gmra.mxu0 %v2811_v29  ;;  %v2537_v38 = vmul.f32 %v8055_v19, %v2503_v31  ;;  %v2971_v29 = vld [vmem:[#allocation8 + $0x10] sm:$0xff]  ;;  %v2970_v31 = vld [vmem:[#allocation8 + $0x8] sm:$0xff]  ;;  %v8235_v51 = vpop.f32.mrf.mxu2 }
 0x3a6   : > { %3514 = vmatpush.msrb.mxu1 %v2971_v29 }
 0x3a7   : > { %v2571_v15 = vadd.f32 %v8063_v49, %v2537_v38  ;;  %v2323_v38 = vadd.f32 %v8022_v2, %v8012_v42  ;;  %v6610_v2 = vld [vmem:[#allocation2 + $0x211] sm:$0xff] }
 0x3a8   : > { %v2432_v60 = vpop.f32.mrf.mxu1  ;;  %3515 = vmatpush.msrb.mxu1 %v2970_v31 }
 0x3a9   : > { %v2603_v11 = vmax.f32 %v2571_v15, 0.0  ;;  %v2433_v40 = vadd.f32 %v2432_v60, %v2320_v25  ;;  %2479 = vmatmul.f32.gmra.mxu1 %v6609_v37  ;;  %v8240_v25 = vpop.f32.mrf.mxu3  ;;  %v1951_v60 = vadd.f32 %v8018_v46, %v1838_v52  ;;  %v1841_v46 = vadd.f32 %v7939_v26, %v1728_v63  ;;  %v10660_v26 = vld [vmem:[#allocation33_spill] sm:$0xff] }
 0x3aa   : > { %v8228_v10 = vld [vmem:[#allocation3 + $0xc7] sm:$0xff]  ;;  %3516 = vmatpush.msrb.mxu1 %v2969_v39  ;;  %v1731_v36 = vadd.f32 %v10661_v57, %v10660_v26 }
 0x3ab   : > { %2636 = vst [vmem:[#allocation3 + $0xd0] sm:$0xff] %v2603_v11  ;;  %v2504_v8 = vadd.f32 %v2433_v40, %v1948_v44  ;;  %3324 = vmatmul.f32.gmra.mxu3 %v2603_v11  ;;  %v8243_v44 = vpop.f32.mrf.mxu0  ;;  %v10665_v26 = vld [vmem:[#allocation79_spill] sm:$0xff] }
 0x3ac   : > { %3208 = vmatmul.f32.gmra.mxu2 %v8228_v10 }
 0x3ad   : > { %3431 = vmatmul.f32.gmra.mxu0 %v2812_v35  ;;  %v2538_v18 = vmul.f32 %v8055_v19, %v2504_v8  ;;  %v2993_v8 = vld [vmem:[#allocation8 + $0xc0] sm:$0xff]  ;;  %v10657_v35 = vld [vmem:[#allocation74_spill] sm:$0xff] }
 0x3ae   : > { %3621 = vmatpush.msrb.mxu2 %v2993_v8  ;;  %v2326_v31 = vadd.f32 %v8030_v17, %v10657_v35  ;;  %v10664_v35 = vld [vmem:[#allocation82_spill] sm:$0xff] }
 0x3af   : > { %v2572_v62 = vadd.f32 %v8063_v49, %v2538_v18  ;;  %v8255_v18 = vpop.f32.mrf.mxu2 }
 0x3b0   : > { %v2435_v15 = vpop.f32.mrf.mxu1 }
 0x3b1   : > { %v2604_v59 = vmax.f32 %v2572_v62, 0.0  ;;  %v2436_v11 = vadd.f32 %v2435_v15, %v2323_v38  ;;  %2482 = vmatmul.f32.gmra.mxu1 %v6610_v2  ;;  %v1001_v38 = vld [vmem:[#allocation2 + $0x229] sm:$0xff] }
 0x3b2   : > { %v8245_v40 = vld [vmem:[#allocation3 + $0xcf] sm:$0xff] }
 0x3b3   : > { %10654 = vst [vmem:[#allocation22_spill] sm:$0xff] %v8245_v40  ;;  %v2813_v29 = vld [vmem:[#allocation3 + $0xc9] sm:$0xff]  ;;  %v2505_v42 = vadd.f32 %v2436_v11, %v1951_v60  ;;  %3327 = vmatmul.f32.gmra.mxu3 %v2604_v59  ;;  %v8264_v63 = vpop.f32.mrf.mxu0 }
 0x3b4   : > { %2637 = vst [vmem:[#allocation3 + $0xe8] sm:$0xff] %v2604_v59  ;;  %3211 = vmatmul.f32.gmra.mxu2 %v8245_v40  ;;  %v10658_v62 = vld [vmem:[#allocation76_spill] sm:$0xff] }
 0x3b5   : > { %3434 = vmatmul.f32.gmra.mxu0 %v2813_v29  ;;  %v2539_v37 = vmul.f32 %v8055_v19, %v2505_v42  ;;  %v1954_v15 = vadd.f32 %v10658_v62, %v1841_v46  ;;  %v8258_v29 = vpop.f32.mrf.mxu3  ;;  %v2814_v42 = vld [vmem:[#allocation3 + $0xd1] sm:$0xff]  ;;  %v10662_v2 = vld [vmem:[#allocation24_spill] sm:$0xff] }
 0x3b6   : > { %v1844_v8 = vadd.f32 %v10662_v2, %v1731_v36  ;;  %v1002_v62 = vld [vmem:[#allocation2 + $0x231] sm:$0xff] }
 0x3b7   : > { %v2573_v52 = vadd.f32 %v8063_v49, %v2539_v37  ;;  %v10663_v37 = vld [vmem:[#allocation77_spill] sm:$0xff]  ;;  %v10669_v36 = vld [vmem:[#allocation34_spill] sm:$0xff] }
 0x3b8   : > { %v2438_v39 = vpop.f32.mrf.mxu1  ;;  %v1957_v57 = vadd.f32 %v10665_v26, %v1844_v8  ;;  %v10671_v8 = vld [vmem:[#allocation26_spill] sm:$0xff] }
 0x3b9   : > { %v2605_v60 = vmax.f32 %v2573_v52, 0.0  ;;  %v2439_v11 = vadd.f32 %v2438_v39, %v2326_v31  ;;  %2485 = vmatmul.f32.gmra.mxu1 %v1001_v38  ;;  %v2329_v31 = vadd.f32 %v10664_v35, %v10663_v37  ;;  %v10673_v26 = vld [vmem:[#allocation86_spill] sm:$0xff] }
 0x3bb   : > { %v8260_v59 = vld [vmem:[#allocation3 + $0xe7] sm:$0xff]  ;;  %2638 = vst [vmem:[#allocation3 + $0xf0] sm:$0xff] %v2605_v60  ;;  %v2506_v17 = vadd.f32 %v2439_v11, %v1954_v15  ;;  %3330 = vmatmul.f32.gmra.mxu3 %v2605_v60  ;;  %v8273_v11 = vpop.f32.mrf.mxu2 }
 0x3bc   : > { %10659 = vst [vmem:[#allocation23_spill] sm:$0xff] %v8260_v59  ;;  %3214 = vmatmul.f32.gmra.mxu2 %v8260_v59 }
 0x3bd   : > { %3437 = vmatmul.f32.gmra.mxu0 %v2814_v42  ;;  %v2540_v46 = vmul.f32 %v8055_v19, %v2506_v17  ;;  %10666 = vst [vmem:[#allocation37_spill] sm:$0xff] %v8273_v11  ;;  %v8277_v42 = vpop.f32.mrf.mxu3  ;;  %v10670_v17 = vld [vmem:[#allocation49_spill] sm:$0xff] }
 0x3be   : > { %10668 = vst [vmem:[#allocation39_spill] sm:$0xff] %v8277_v42  ;;  %v1734_v2 = vadd.f32 %v10670_v17, %v10669_v36 }
 0x3bf   : > { %v2574_v52 = vadd.f32 %v8063_v49, %v2540_v46  ;;  %v2992_v46 = vld [vmem:[#allocation8 + $0xb8] sm:$0xff] }
 0x3c0   : > { %v2441_v39 = vpop.f32.mrf.mxu1  ;;  %v1847_v35 = vadd.f32 %v10671_v8, %v1734_v2  ;;  %3622 = vmatpush.msrb.mxu2 %v2992_v46  ;;  %v10677_v2 = vld [vmem:[#allocation51_spill] sm:$0xff] }
 0x3c1   : > { %v2606_v15 = vmax.f32 %v2574_v52, 0.0  ;;  %v2442_v38 = vadd.f32 %v2441_v39, %v2329_v31  ;;  %2488 = vmatmul.f32.gmra.mxu1 %v1002_v62  ;;  %v8283_v31 = vpop.f32.mrf.mxu0  ;;  %v10672_v39 = vld [vmem:[#allocation80_spill] sm:$0xff]  ;;  %v10674_v62 = vld [vmem:[#allocation83_spill] sm:$0xff] }
 0x3c2   : > { %v8275_v59 = vld [vmem:[#allocation3 + $0xef] sm:$0xff]  ;;  %v2332_v42 = vadd.f32 %v10673_v26, %v10672_v39 }
 0x3c3   : > { %10667 = vst [vmem:[#allocation25_spill] sm:$0xff] %v8275_v59  ;;  %v2815_v60 = vld [vmem:[#allocation3 + $0xe9] sm:$0xff]  ;;  %v2507_v37 = vadd.f32 %v2442_v38, %v1957_v57  ;;  %3333 = vmatmul.f32.gmra.mxu3 %v2606_v15  ;;  %v1960_v38 = vadd.f32 %v10674_v62, %v1847_v35  ;;  %v8295_v46 = vpop.f32.mrf.mxu2 }
 0x3c4   : > { %2639 = vst [vmem:[#allocation3 + $0x108] sm:$0xff] %v2606_v15  ;;  %3217 = vmatmul.f32.gmra.mxu2 %v8275_v59  ;;  %v2657_v57 = vld [vmem:[#allocation3 + $0x7] sm:$0xff] }
 0x3c5   : > { %3440 = vmatmul.f32.gmra.mxu0 %v2815_v60  ;;  %v2541_v52 = vmul.f32 %v8055_v19, %v2507_v37  ;;  %v10676_v15 = vld [vmem:[#allocation35_spill] sm:$0xff]  ;;  %v2816_v37 = vld [vmem:[#allocation3 + $0xf1] sm:$0xff]  ;;  %v10679_v35 = vld [vmem:[#allocation28_spill] sm:$0xff] }
 0x3c6   : > { %v1737_v8 = vadd.f32 %v10677_v2, %v10676_v15 }
 0x3c7   : > { %v2575_v36 = vadd.f32 %v8063_v49, %v2541_v52  ;;  %v8297_v52 = vpop.f32.mrf.mxu3 }
 0x3c8   : > { %v2444_v17 = vpop.f32.mrf.mxu1  ;;  %10678 = vst [vmem:[#allocation41_spill] sm:$0xff] %v8297_v52  ;;  %v1850_v39 = vadd.f32 %v10679_v35, %v1737_v8  ;;  %v10683_v52 = vld [vmem:[#allocation36_spill] sm:$0xff]  ;;  %v10684_v8 = vld [vmem:[#allocation53_spill] sm:$0xff] }
 0x3c9   : > { %v2607_v59 = vmax.f32 %v2575_v36, 0.0  ;;  %v2445_v40 = vadd.f32 %v2444_v17, %v2332_v42  ;;  %3517 = vmatmul.f32.vlgmr.msrb.gmra.mxu1 %v2657_v57  ;;  %v8301_v26 = vpop.f32.mrf.mxu0  ;;  %v10680_v36 = vld [vmem:[#allocation85_spill] sm:$0xff]  ;;  %v10681_v57 = vld [vmem:[#allocation87_spill] sm:$0xff]  ;;  %v1740_v35 = vadd.f32 %v10684_v8, %v10683_v52 }
 0x3ca   : > { %v2335_v17 = vadd.f32 %v8067_v33, %v10680_v36  ;;  %v1963_v15 = vadd.f32 %v10681_v57, %v1850_v39  ;;  %v2991_v33 = vld [vmem:[#allocation8 + $0xb0] sm:$0xff] }
 0x3cb   : > { %v8290_v60 = vld [vmem:[#allocation3 + $0x107] sm:$0xff]  ;;  %2640 = vst [vmem:[#allocation3 + $0x110] sm:$0xff] %v2607_v59  ;;  %v2508_v11 = vadd.f32 %v2445_v40, %v1960_v38  ;;  %3336 = vmatmul.f32.gmra.mxu3 %v2607_v59  ;;  %v2658_v38 = vld [vmem:[#allocation3 + $0xf] sm:$0xff]  ;;  %3623 = vmatpush.msrb.mxu2 %v2991_v33 }
 0x3cc   : > { %10675 = vst [vmem:[#allocation27_spill] sm:$0xff] %v8290_v60  ;;  %3220 = vmatmul.f32.gmra.mxu2 %v8290_v60 }
 0x3cd   : > { %3443 = vmatmul.f32.gmra.mxu0 %v2816_v37  ;;  %v2542_v42 = vmul.f32 %v8055_v19, %v2508_v11 }
 0x3cf   : > { %v2576_v40 = vadd.f32 %v8063_v49, %v2542_v42  ;;  %v10685_v42 = vld [vmem:[#allocation30_spill] sm:$0xff] }
 0x3d0   : > { %v2447_v62 = vpop.f32.mrf.mxu1  ;;  %v1853_v36 = vadd.f32 %v10685_v42, %v1740_v35  ;;  %v10687_v35 = vld [vmem:[#allocation38_spill] sm:$0xff] }
 0x3d1   : > { %v2608_v2 = vmax.f32 %v2576_v40, 0.0  ;;  %v2448_v37 = vadd.f32 %v2447_v62, %v2335_v17  ;;  %3520 = vmatmul.f32.gmra.mxu1 %v2658_v38  ;;  %v8314_v17 = vpop.f32.mrf.mxu2  ;;  %v10686_v62 = vld [vmem:[#allocation88_spill] sm:$0xff] }
 0x3d2   : > { %v8307_v59 = vld [vmem:[#allocation3 + $0x10f] sm:$0xff]  ;;  %v2338_v57 = vadd.f32 %v8081_v7, %v10686_v62  ;;  %v1966_v38 = vadd.f32 %v8074_v24, %v1853_v36  ;;  %v3016_v7 = vld [vmem:[#allocation8 + $0x178] sm:$0xff] }
 0x3d3   : > { %10682 = vst [vmem:[#allocation29_spill] sm:$0xff] %v8307_v59  ;;  %v2817_v60 = vld [vmem:[#allocation3 + $0x109] sm:$0xff]  ;;  %v2509_v11 = vadd.f32 %v2448_v37, %v1963_v15  ;;  %3339 = vmatmul.f32.gmra.mxu3 %v2608_v2  ;;  %v8319_v15 = vpop.f32.mrf.mxu0 }
 0x3d4   : > { %2641 = vst [vmem:[#allocation3 + $0x128] sm:$0xff] %v2608_v2  ;;  %3223 = vmatmul.f32.gmra.mxu2 %v8307_v59  ;;  %v2818_v59 = vld [vmem:[#allocation3 + $0x111] sm:$0xff]  ;;  %3727 = vmatpush.msrb.mxu3 %v3016_v7 }
 0x3d5   : > { %3446 = vmatmul.f32.gmra.mxu0 %v2817_v60  ;;  %v2543_v39 = vmul.f32 %v8055_v19, %v2509_v11  ;;  %v10688_v11 = vld [vmem:[#allocation55_spill] sm:$0xff]  ;;  %v10691_v7 = vld [vmem:[#allocation57_spill] sm:$0xff] }
 0x3d6   : > { %v3292_v40 = vpop.f32.mrf.mxu3  ;;  %v1743_v33 = vadd.f32 %v10688_v11, %v10687_v35 }
 0x3d7   : > { %v2577_v52 = vadd.f32 %v8063_v49, %v2543_v39  ;;  %v10689_v39 = vld [vmem:[#allocation66_spill] sm:$0xff] }
 0x3d8   : > { %v2450_v37 = vpop.f32.mrf.mxu1  ;;  %v1856_v62 = vadd.f32 %v10689_v39, %v1743_v33 }
 0x3d9   : > { %v2609_v60 = vmax.f32 %v2577_v52, 0.0  ;;  %v2451_v2 = vadd.f32 %v2450_v37, %v2338_v57  ;;  %3523 = vmatmul.f32.gmra.mxu1 %v8084_v23  ;;  %v2341_v57 = vadd.f32 %v8096_v34, %v8077_v30  ;;  %v2990_v34 = vld [vmem:[#allocation8 + $0xa8] sm:$0xff] }
 0x3da   : > { %v1969_v23 = vadd.f32 %v8089_v14, %v1856_v62  ;;  %v10692_v14 = vld [vmem:[#allocation67_spill] sm:$0xff]  ;;  %3624 = vmatpush.msrb.mxu2 %v2990_v34 }
 0x3db   : > { %v8322_v8 = vld [vmem:[#allocation3 + $0x127] sm:$0xff]  ;;  %2642 = vst [vmem:[#allocation3 + $0x130] sm:$0xff] %v2609_v60  ;;  %v2510_v42 = vadd.f32 %v2451_v2, %v1966_v38  ;;  %3342 = vmatmul.f32.gmra.mxu3 %v2609_v60 }
 0x3dc   : > { %3226 = vmatmul.f32.gmra.mxu2 %v8322_v8 }
 0x3dd   : > { %3449 = vmatmul.f32.gmra.mxu0 %v2818_v59  ;;  %v2544_v24 = vmul.f32 %v8055_v19, %v2510_v42  ;;  %v10690_v42 = vld [vmem:[#allocation40_spill] sm:$0xff] }
 0x3de   : > { %v3179_v36 = vpop.f32.mrf.mxu2  ;;  %v3295_v38 = vpop.f32.mrf.mxu3  ;;  %v1746_v39 = vadd.f32 %v10691_v7, %v10690_v42 }
 0x3df   : > { %v2578_v52 = vadd.f32 %v8063_v49, %v2544_v24  ;;  %v8333_v37 = vadd.f32 %v3292_v40, %v3179_v36  ;;  %v10693_v36 = vld [vmem:[#allocation89_spill] sm:$0xff] }
 0x3e0   : > { %v2453_v2 = vpop.f32.mrf.mxu1  ;;  %v1859_v40 = vadd.f32 %v10692_v14, %v1746_v39  ;;  %v10694_v39 = vld [vmem:[#allocation42_spill] sm:$0xff] }
 0x3e1   : > { %v2610_v35 = vmax.f32 %v2578_v52, 0.0  ;;  %v2454_v59 = vadd.f32 %v2453_v2, %v2341_v57  ;;  %v8336_v60 = vpop.f32.mrf.mxu0  ;;  %3526 = vmatmul.f32.gmra.mxu1 %v8098_v21  ;;  %v2344_v57 = vadd.f32 %v8112_v27, %v10693_v36  ;;  %v2347_v36 = vadd.f32 %v8128_v3, %v8108_v45  ;;  %v2989_v3 = vld [vmem:[#allocation8 + $0xa0] sm:$0xff] }
 0x3e2   : > { %v8338_v11 = vld [vmem:[#allocation3 + $0x12f] sm:$0xff]  ;;  %v1972_v21 = vadd.f32 %v8106_v6, %v1859_v40  ;;  %3625 = vmatpush.msrb.mxu2 %v2989_v3 }
 0x3e3   : > { %v2819_v33 = vld [vmem:[#allocation3 + $0x129] sm:$0xff]  ;;  %2643 = vst [vmem:[#allocation3 + $0x148] sm:$0xff] %v2610_v35  ;;  %v2511_v30 = vadd.f32 %v2454_v59, %v1969_v23  ;;  %3345 = vmatmul.f32.gmra.mxu3 %v2610_v35  ;;  %v2820_v27 = vld [vmem:[#allocation3 + $0x131] sm:$0xff] }
 0x3e4   : > { %3229 = vmatmul.f32.gmra.mxu2 %v8338_v11  ;;  %v10696_v6 = vld [vmem:[#allocation68_spill] sm:$0xff] }
 0x3e5   : > { %3452 = vmatmul.f32.gmra.mxu0 %v2819_v33  ;;  %v2545_v62 = vmul.f32 %v8055_v19, %v2511_v30  ;;  %v10695_v30 = vld [vmem:[#allocation59_spill] sm:$0xff] }
 0x3e6   : > { %v3182_v24 = vpop.f32.mrf.mxu2  ;;  %v3298_v23 = vpop.f32.mrf.mxu3  ;;  %v1749_v34 = vadd.f32 %v10695_v30, %v10694_v39 }
 0x3e7   : > { %v2579_v52 = vadd.f32 %v8063_v49, %v2545_v62  ;;  %v8349_v2 = vadd.f32 %v3295_v38, %v3182_v24  ;;  %v3015_v38 = vld [vmem:[#allocation8 + $0x170] sm:$0xff] }
 0x3e8   : > { %v2456_v59 = vpop.f32.mrf.mxu1  ;;  %v1862_v40 = vadd.f32 %v10696_v6, %v1749_v34  ;;  %3728 = vmatpush.msrb.mxu3 %v3015_v38 }
 0x3e9   : > { %v2611_v42 = vmax.f32 %v2579_v52, 0.0  ;;  %v2457_v33 = vadd.f32 %v2456_v59, %v2344_v57  ;;  %v8352_v35 = vpop.f32.mrf.mxu0  ;;  %3529 = vmatmul.f32.gmra.mxu1 %v8110_v43 }
 0x3ea   : > { %v8354_v7 = vld [vmem:[#allocation3 + $0x147] sm:$0xff]  ;;  %v1975_v43 = vadd.f32 %v8120_v20, %v1862_v40  ;;  %v10699_v20 = vld [vmem:[#allocation69_spill] sm:$0xff] }
 0x3eb   : > { %2644 = vst [vmem:[#allocation3 + $0x150] sm:$0xff] %v2611_v42  ;;  %v2512_v14 = vadd.f32 %v2457_v33, %v1972_v21  ;;  %3348 = vmatmul.f32.gmra.mxu3 %v2611_v42 }
 0x3ec   : > { %3232 = vmatmul.f32.gmra.mxu2 %v8354_v7 }
 0x3ed   : > { %3455 = vmatmul.f32.gmra.mxu0 %v2820_v27  ;;  %v2546_v62 = vmul.f32 %v8055_v19, %v2512_v14  ;;  %v10697_v14 = vld [vmem:[#allocation44_spill] sm:$0xff]  ;;  %v10698_v27 = vld [vmem:[#allocation61_spill] sm:$0xff] }
 0x3ee   : > { %v3185_v24 = vpop.f32.mrf.mxu2  ;;  %v3301_v59 = vpop.f32.mrf.mxu3  ;;  %v1752_v38 = vadd.f32 %v10698_v27, %v10697_v14  ;;  %v10700_v14 = vld [vmem:[#allocation46_spill] sm:$0xff]  ;;  %v10701_v27 = vld [vmem:[#allocation63_spill] sm:$0xff] }
 0x3ef   : > { %v2580_v57 = vadd.f32 %v8063_v49, %v2546_v62  ;;  %v8365_v52 = vadd.f32 %v3298_v23, %v3185_v24  ;;  %v2350_v62 = vadd.f32 %v8145_v50, %v8126_v54  ;;  %v10702_v50 = vld [vmem:[#allocation90_spill] sm:$0xff] }
 0x3f0   : > { %v2459_v21 = vpop.f32.mrf.mxu1  ;;  %v1865_v23 = vadd.f32 %v10699_v20, %v1752_v38  ;;  %v1755_v38 = vadd.f32 %v10701_v27, %v10700_v14 }
 0x3f1   : > { %v2612_v33 = vmax.f32 %v2580_v57, 0.0  ;;  %v2460_v39 = vadd.f32 %v2459_v21, %v2347_v36  ;;  %v8368_v42 = vpop.f32.mrf.mxu0  ;;  %3532 = vmatmul.f32.gmra.mxu1 %v8122_v47 }
 0x3f2   : > { %v8370_v30 = vld [vmem:[#allocation3 + $0x14f] sm:$0xff]  ;;  %v1978_v47 = vadd.f32 %v8138_v28, %v1865_v23  ;;  %v10703_v28 = vld [vmem:[#allocation70_spill] sm:$0xff] }
 0x3f3   : > { %v2821_v34 = vld [vmem:[#allocation3 + $0x149] sm:$0xff]  ;;  %2645 = vst [vmem:[#allocation3 + $0x168] sm:$0xff] %v2612_v33  ;;  %v2513_v45 = vadd.f32 %v2460_v39, %v1975_v43  ;;  %3351 = vmatmul.f32.gmra.mxu3 %v2612_v33  ;;  %v2822_v54 = vld [vmem:[#allocation3 + $0x151] sm:$0xff]  ;;  %v1868_v3 = vadd.f32 %v10703_v28, %v1755_v38 }
 0x3f4   : > { %3235 = vmatmul.f32.gmra.mxu2 %v8370_v30 }
 0x3f5   : > { %3458 = vmatmul.f32.gmra.mxu0 %v2821_v34  ;;  %v2547_v6 = vmul.f32 %v8055_v19, %v2513_v45 }
 0x3f6   : > { %v3188_v40 = vpop.f32.mrf.mxu2  ;;  %v3304_v57 = vpop.f32.mrf.mxu3 }
 0x3f7   : > { %v2581_v24 = vadd.f32 %v8063_v49, %v2547_v6  ;;  %v8381_v36 = vadd.f32 %v3301_v59, %v3188_v40  ;;  %v3014_v59 = vld [vmem:[#allocation8 + $0x168] sm:$0xff]  ;;  %v2353_v6 = vadd.f32 %v8164_v22, %v8141_v0  ;;  %v2988_v22 = vld [vmem:[#allocation8 + $0x98] sm:$0xff] }
 0x3f8   : > { %v2462_v21 = vpop.f32.mrf.mxu1  ;;  %3729 = vmatpush.msrb.mxu3 %v3014_v59  ;;  %3626 = vmatpush.msrb.mxu2 %v2988_v22  ;;  %v2359_v22 = vadd.f32 %v8204_v4, %v8179_v41  ;;  %v10711_v41 = vld [vmem:[#allocation16_spill] sm:$0xff] }
 0x3f9   : > { %v2613_v43 = vmax.f32 %v2581_v24, 0.0  ;;  %v2463_v39 = vadd.f32 %v2462_v21, %v2350_v62  ;;  %v8384_v33 = vpop.f32.mrf.mxu0  ;;  %3535 = vmatmul.f32.gmra.mxu1 %v10702_v50 }
 0x3fa   : > { %v8386_v34 = vld [vmem:[#allocation3 + $0x167] sm:$0xff] }
 0x3fb   : > { %2646 = vst [vmem:[#allocation3 + $0x170] sm:$0xff] %v2613_v43  ;;  %v2514_v45 = vadd.f32 %v2463_v39, %v1978_v47  ;;  %3354 = vmatmul.f32.gmra.mxu3 %v2613_v43  ;;  %v1981_v47 = vadd.f32 %v8156_v61, %v1868_v3  ;;  %v10706_v61 = vld [vmem:[#allocation71_spill] sm:$0xff]  ;;  %v2356_v3 = vadd.f32 %v8185_v5, %v8161_v58 }
 0x3fc   : > { %3238 = vmatmul.f32.gmra.mxu2 %v8386_v34 }
 0x3fd   : > { %3461 = vmatmul.f32.gmra.mxu0 %v2822_v54  ;;  %v2548_v20 = vmul.f32 %v8055_v19, %v2514_v45  ;;  %v10704_v45 = vld [vmem:[#allocation48_spill] sm:$0xff] }
 0x3fe   : > { %v3191_v23 = vpop.f32.mrf.mxu2  ;;  %v3307_v24 = vpop.f32.mrf.mxu3  ;;  %v10705_v54 = vld [vmem:[#allocation64_spill] sm:$0xff] }
 0x3ff   : > { %v2582_v40 = vadd.f32 %v8063_v49, %v2548_v20  ;;  %v8397_v62 = vadd.f32 %v3304_v57, %v3191_v23  ;;  %v1758_v50 = vadd.f32 %v10705_v54, %v10704_v45  ;;  %v8428_v54 = vld [vmem:[%s10469_s5 + $0x2] ss:$0 sm:$0xff] }
 0x400   : > { %v2465_v21 = vpop.f32.mrf.mxu1 }
 0x401   : > { %v2614_v39 = vmax.f32 %v2582_v40, 0.0  ;;  %v2466_v14 = vadd.f32 %v2465_v21, %v2353_v6  ;;  %3538 = vmatmul.f32.gmra.mxu1 %v8148_v56  ;;  %v1871_v57 = vadd.f32 %v10706_v61, %v1758_v50 }
 0x402   : > { %v8400_v43 = vpop.f32.mrf.mxu0  ;;  %v8402_v27 = vld [vmem:[#allocation3 + $0x16f] sm:$0xff] }
 0x403   : > { %v2823_v38 = vld [vmem:[#allocation3 + $0x169] sm:$0xff]  ;;  %2647 = vst [vmem:[#allocation3 + $0x188] sm:$0xff] %v2614_v39  ;;  %v2515_v0 = vadd.f32 %v2466_v14, %v1981_v47  ;;  %3357 = vmatmul.f32.gmra.mxu3 %v2614_v39  ;;  %v1984_v56 = vadd.f32 %v8176_v48, %v1871_v57  ;;  %v10707_v14 = vld [vmem:[#allocation50_spill] sm:$0xff] }
 0x404   : > { %3241 = vmatmul.f32.gmra.mxu2 %v8402_v27  ;;  %v2824_v58 = vld [vmem:[#allocation3 + $0x171] sm:$0xff]  ;;  %v10709_v48 = vld [vmem:[#allocation72_spill] sm:$0xff] }
 0x405   : > { %3464 = vmatmul.f32.gmra.mxu0 %v2823_v38  ;;  %v2549_v59 = vmul.f32 %v8055_v19, %v2515_v0  ;;  %v10708_v38 = vld [vmem:[#allocation65_spill] sm:$0xff] }
 0x406   : > { %v3310_v6 = vpop.f32.mrf.mxu3  ;;  %v1761_v19 = vadd.f32 %v10708_v38, %v10707_v14  ;;  %v10712_v38 = vld [vmem:[#allocation32_spill] sm:$0xff] }
 0x407   : > { %v3194_v28 = vpop.f32.mrf.mxu2  ;;  %v2583_v20 = vadd.f32 %v8063_v49, %v2549_v59  ;;  %v3013_v49 = vld [vmem:[#allocation8 + $0x160] sm:$0xff] }
 0x408   : > { %v8413_v23 = vadd.f32 %v3307_v24, %v3194_v28  ;;  %v2468_v40 = vpop.f32.mrf.mxu1  ;;  %v1874_v24 = vadd.f32 %v10709_v48, %v1761_v19  ;;  %3730 = vmatpush.msrb.mxu3 %v3013_v49  ;;  %v2362_v49 = vadd.f32 %v8224_v55, %v8201_v32  ;;  %v10715_v55 = vld [vmem:[#allocation21_spill] sm:$0xff] }
 0x409   : > { %v2615_v21 = vmax.f32 %v2583_v20, 0.0  ;;  %v2469_v47 = vadd.f32 %v2468_v40, %v2356_v3  ;;  %3541 = vmatmul.f32.gmra.mxu1 %v8166_v1  ;;  %v8436_v1 = vld [vmem:[%s10469_s5 + $0x3] ss:$0 sm:$0xff] }
 0x40a   : > { %v8416_v39 = vld [vmem:[#allocation3 + $0x187] sm:$0xff]  ;;  %v8422_v5 = vpop.f32.mrf.mxu0  ;;  %v1987_v3 = vadd.f32 %v8194_v13, %v1874_v24 }
 0x40b   : > { %2648 = vst [vmem:[#allocation3 + $0x190] sm:$0xff] %v2615_v21  ;;  %v2516_v45 = vadd.f32 %v2469_v47, %v1984_v56  ;;  %3360 = vmatmul.f32.gmra.mxu3 %v2615_v21  ;;  %v10710_v47 = vld [vmem:[#allocation52_spill] sm:$0xff] }
 0x40c   : > { %3244 = vmatmul.f32.gmra.mxu2 %v8416_v39  ;;  %v1764_v4 = vadd.f32 %v10711_v41, %v10710_v47 }
 0x40d   : > { %3467 = vmatmul.f32.gmra.mxu0 %v2824_v58  ;;  %v2550_v50 = vmul.f32 %v8428_v54, %v2516_v45 }
 0x40e   : > { %v3313_v59 = vpop.f32.mrf.mxu3  ;;  %v1877_v19 = vadd.f32 %v10712_v38, %v1764_v4 }
 0x40f   : > { %v3197_v0 = vpop.f32.mrf.mxu2  ;;  %v2584_v61 = vadd.f32 %v8436_v1, %v2550_v50 }
 0x410   : > { %v8439_v57 = vadd.f32 %v3310_v6, %v3197_v0  ;;  %v2471_v28 = vpop.f32.mrf.mxu1  ;;  %v2987_v6 = vld [vmem:[#allocation8 + $0x90] sm:$0xff]  ;;  %v1990_v0 = vadd.f32 %v8216_v53, %v1877_v19 }
 0x411   : > { %v2616_v20 = vmax.f32 %v2584_v61, 0.0  ;;  %v2472_v40 = vadd.f32 %v2471_v28, %v2359_v22  ;;  %3544 = vmatmul.f32.gmra.mxu1 %v8181_v12  ;;  %3627 = vmatpush.msrb.mxu2 %v2987_v6  ;;  %v10716_v53 = vld [vmem:[#allocation73_spill] sm:$0xff]  ;;  %v2365_v6 = vadd.f32 %v8243_v44, %v8220_v16  ;;  %v10717_v16 = vld [vmem:[#allocation56_spill] sm:$0xff]  ;;  %v10718_v44 = vld [vmem:[#allocation18_spill] sm:$0xff] }
 0x412   : > { %v8442_v56 = vld [vmem:[#allocation3 + $0x18f] sm:$0xff]  ;;  %v8450_v45 = vpop.f32.mrf.mxu0 }
 0x413   : > { %v2825_v21 = vld [vmem:[#allocation3 + $0x189] sm:$0xff]  ;;  %2649 = vst [vmem:[#allocation3 + $0x1a8] sm:$0xff] %v2616_v20  ;;  %v2517_v14 = vadd.f32 %v2472_v40, %v1987_v3  ;;  %3363 = vmatmul.f32.gmra.mxu3 %v2616_v20  ;;  %v10713_v3 = vld [vmem:[#allocation54_spill] sm:$0xff]  ;;  %v10714_v20 = vld [vmem:[#allocation15_spill] sm:$0xff] }
 0x414   : > { %3247 = vmatmul.f32.gmra.mxu2 %v8442_v56  ;;  %v1767_v40 = vadd.f32 %v10714_v20, %v10713_v3  ;;  %v8463_v32 = vld [vmem:[#allocation3 + $0x191] sm:$0xff]  ;;  %v1770_v20 = vadd.f32 %v10718_v44, %v10717_v16 }
 0x415   : > { %3470 = vmatmul.f32.gmra.mxu0 %v2825_v21  ;;  %v2551_v13 = vmul.f32 %v8428_v54, %v2517_v14  ;;  %v3011_v14 = vld [vmem:[#allocation8 + $0x150] sm:$0xff] }
 0x416   : > { %v3316_v50 = vpop.f32.mrf.mxu3  ;;  %v1880_v47 = vadd.f32 %v10716_v53, %v1767_v40  ;;  %v2986_v40 = vld [vmem:[#allocation8 + $0x88] sm:$0xff] }
 0x417   : > { %v3200_v58 = vpop.f32.mrf.mxu2  ;;  %v2585_v48 = vadd.f32 %v8436_v1, %v2551_v13  ;;  %3628 = vmatpush.msrb.mxu2 %v2986_v40 }
 0x418   : > { %v8455_v24 = vadd.f32 %v3313_v59, %v3200_v58  ;;  %v2474_v12 = vpop.f32.mrf.mxu1  ;;  %v3012_v59 = vld [vmem:[#allocation8 + $0x158] sm:$0xff] }
 0x419   : > { %v2617_v22 = vmax.f32 %v2585_v48, 0.0  ;;  %v2475_v61 = vadd.f32 %v2474_v12, %v2362_v49  ;;  %3547 = vmatmul.f32.gmra.mxu1 %v10715_v55  ;;  %3731 = vmatpush.msrb.mxu3 %v3012_v59  ;;  %v3010_v48 = vld [vmem:[#allocation8 + $0x148] sm:$0xff]  ;;  %v1993_v12 = vadd.f32 %v8235_v51, %v1880_v47  ;;  %v3952_v51 = vld [vmem:[#allocation8 + $0x378] sm:$0xff]  ;;  %v10719_v55 = vld [vmem:[#allocation75_spill] sm:$0xff] }
 0x41a   : > { %v8458_v28 = vld [vmem:[#allocation3 + $0x1a7] sm:$0xff]  ;;  %v8474_v58 = vpop.f32.mrf.mxu0  ;;  %v1883_v59 = vadd.f32 %v10719_v55, %v1770_v20  ;;  %3985 = vmatpush.msra.mxu0 %v3952_v51  ;;  %v3008_v47 = vld [vmem:[#allocation8 + $0x138] sm:$0xff] }
 0x41b   : > { %2650 = vst [vmem:[#allocation3 + $0x1b0] sm:$0xff] %v2617_v22  ;;  %v2518_v21 = vadd.f32 %v2475_v61, %v1990_v0  ;;  %3366 = vmatmul.f32.gmra.mxu3 %v2617_v22  ;;  %v2985_v51 = vld [vmem:[#allocation8 + $0x80] sm:$0xff]  ;;  %v3948_v55 = vld [vmem:[#allocation8 + $0x358] sm:$0xff] }
 0x41c   : > { %3250 = vmatmul.f32.gmra.mxu2 %v8458_v28  ;;  %3732 = vmatpush.msrb.mxu3 %v3011_v14  ;;  %v2368_v14 = vadd.f32 %v8264_v63, %v8240_v25  ;;  %v3949_v25 = vld [vmem:[#allocation8 + $0x360] sm:$0xff]  ;;  %v10721_v63 = vld [vmem:[#allocation58_spill] sm:$0xff] }
 0x41d   : > { %3473 = vmatmul.f32.gmra.mxu0 %v8463_v32  ;;  %v2552_v41 = vmul.f32 %v8428_v54, %v2518_v21  ;;  %v3009_v21 = vld [vmem:[#allocation8 + $0x140] sm:$0xff]  ;;  %3629 = vmatpush.msrb.mxu2 %v2985_v51 }
 0x41e   : > { %v3319_v13 = vpop.f32.mrf.mxu3  ;;  %3733 = vmatpush.msrb.mxu3 %v3010_v48 }
 0x41f   : > { %v3203_v4 = vpop.f32.mrf.mxu2  ;;  %v2586_v38 = vadd.f32 %v8436_v1, %v2552_v41 }
 0x420   : > { %v8472_v19 = vadd.f32 %v3316_v50, %v3203_v4  ;;  %v2477_v49 = vpop.f32.mrf.mxu1  ;;  %v3951_v4 = vld [vmem:[#allocation8 + $0x370] sm:$0xff]  ;;  %3734 = vmatpush.msrb.mxu3 %v3009_v21 }
 0x421   : > { %v2618_v0 = vmax.f32 %v2586_v38, 0.0  ;;  %v2478_v22 = vadd.f32 %v2477_v49, %v2365_v6  ;;  %3550 = vmatmul.f32.gmra.mxu1 %v8211_v9  ;;  %3986 = vmatpush.msra.mxu0 %v3951_v4  ;;  %v3007_v49 = vld [vmem:[#allocation8 + $0x130] sm:$0xff] }
 0x422   : > { %v8477_v61 = vld [vmem:[#allocation3 + $0x1af] sm:$0xff]  ;;  %3735 = vmatpush.msrb.mxu3 %v3008_v47  ;;  %v8496_v44 = vpop.f32.mrf.mxu0 }
 0x423   : > { %v8479_v3 = vld [vmem:[#allocation3 + $0x1a9] sm:$0xff]  ;;  %2651 = vst [vmem:[#allocation3 + $0x1c8] sm:$0xff] %v2618_v0  ;;  %v2519_v50 = vadd.f32 %v2478_v22, %v1993_v12  ;;  %3369 = vmatmul.f32.gmra.mxu3 %v2618_v0  ;;  %v1996_v0 = vadd.f32 %v8255_v18, %v1883_v59  ;;  %v8504_v21 = vld [vmem:[#allocation3 + $0x1b1] sm:$0xff] }
 0x424   : > { %3253 = vmatmul.f32.gmra.mxu2 %v8477_v61  ;;  %v3950_v12 = vld [vmem:[#allocation8 + $0x368] sm:$0xff]  ;;  %3736 = vmatpush.msrb.mxu3 %v3007_v49  ;;  %v10723_v59 = vld [vmem:[#allocation78_spill] sm:$0xff] }
 0x425   : > { %3476 = vmatmul.f32.gmra.mxu0 %v8479_v3  ;;  %v2553_v53 = vmul.f32 %v8428_v54, %v2519_v50  ;;  %v3006_v18 = vld [vmem:[#allocation8 + $0x128] sm:$0xff] }
 0x426   : > { %v3322_v38 = vpop.f32.mrf.mxu3  ;;  %3987 = vmatpush.msra.mxu0 %v3950_v12  ;;  %3737 = vmatpush.msrb.mxu3 %v3006_v18  ;;  %v3004_v12 = vld [vmem:[#allocation8 + $0x118] sm:$0xff] }
 0x427   : > { %v3206_v41 = vpop.f32.mrf.mxu2  ;;  %v2587_v9 = vadd.f32 %v8436_v1, %v2553_v53 }
 0x428   : > { %v8491_v6 = vadd.f32 %v3319_v13, %v3206_v41  ;;  %v2480_v48 = vpop.f32.mrf.mxu1  ;;  %v10722_v13 = vld [vmem:[#allocation17_spill] sm:$0xff]  ;;  %3988 = vmatpush.msra.mxu0 %v3949_v25  ;;  %v3005_v41 = vld [vmem:[#allocation8 + $0x120] sm:$0xff] }
 0x429   : > { %v8494_v22 = vmax.f32 %v2587_v9, 0.0  ;;  %v2481_v16 = vadd.f32 %v2480_v48, %v2368_v14  ;;  %v1773_v50 = vadd.f32 %v10722_v13, %v10721_v63  ;;  %3553 = vmatmul.f32.gmra.mxu1 %v8228_v10  ;;  %v3947_v14 = vld [vmem:[#allocation8 + $0x350] sm:$0xff]  ;;  %v2371_v10 = vadd.f32 %v8283_v31, %v8258_v29  ;;  %3738 = vmatpush.msrb.mxu3 %v3005_v41  ;;  %v3946_v29 = vld [vmem:[#allocation8 + $0x348] sm:$0xff] }
 0x42a   : > { %v8498_v20 = vld [vmem:[#allocation3 + $0x1c7] sm:$0xff]  ;;  %3989 = vmatpush.msra.mxu0 %v3948_v55 }
 0x42b   : > { %10720 = vst [vmem:[#allocation43_spill] sm:$0xff] %v8494_v22  ;;  %v2520_v40 = vadd.f32 %v2481_v16, %v1996_v0  ;;  %3372 = vmatmul.f32.gmra.mxu3 %v8494_v22  ;;  %v1886_v53 = vadd.f32 %v10723_v59, %v1773_v50  ;;  %v10724_v16 = vld [vmem:[#allocation37_spill] sm:$0xff]  ;;  %v10727_v31 = vld [vmem:[#allocation60_spill] sm:$0xff]  ;;  %v10729_v59 = vld [vmem:[#allocation22_spill] sm:$0xff] }
 0x42c   : > { %2652 = vst [vmem:[#allocation3 + $0x1d0] sm:$0xff] %v8494_v22  ;;  %3256 = vmatmul.f32.gmra.mxu2 %v8498_v20  ;;  %3990 = vmatpush.msra.mxu0 %v3947_v14  ;;  %v3003_v50 = vld [vmem:[#allocation8 + $0x110] sm:$0xff]  ;;  %v3002_v41 = vld [vmem:[#allocation8 + $0x108] sm:$0xff]  ;;  %v3961_v22 = vld [vmem:[#allocation8 + $0x3c0] sm:$0xff] }
 0x42d   : > { %3479 = vmatmul.f32.gmra.mxu0 %v8504_v21  ;;  %v2554_v47 = vmul.f32 %v8428_v54, %v2520_v40  ;;  %v1999_v63 = vadd.f32 %v10724_v16, %v1886_v53  ;;  %3739 = vmatpush.msrb.mxu3 %v3004_v12  ;;  %v8528_v53 = vpop.f32.mrf.mxu0  ;;  %v3944_v16 = vld [vmem:[#allocation8 + $0x338] sm:$0xff] }
 0x42e   : > { %v3325_v48 = vpop.f32.mrf.mxu3  ;;  %3991 = vmatpush.msra.mxu0 %v3946_v29 }
 0x42f   : > { %v3209_v4 = vpop.f32.mrf.mxu2  ;;  %v2588_v9 = vadd.f32 %v8436_v1, %v2554_v47  ;;  %v3945_v47 = vld [vmem:[#allocation8 + $0x340] sm:$0xff]  ;;  %3740 = vmatpush.msrb.mxu3 %v3003_v50  ;;  %v3943_v50 = vld [vmem:[#allocation8 + $0x330] sm:$0xff] }
 0x430   : > { %v8514_v49 = vadd.f32 %v3322_v38, %v3209_v4  ;;  %v2483_v0 = vpop.f32.mrf.mxu1  ;;  %v10728_v38 = vld [vmem:[#allocation20_spill] sm:$0xff]  ;;  %v10730_v4 = vld [vmem:[#allocation81_spill] sm:$0xff]  ;;  %3992 = vmatpush.msra.mxu0 %v3945_v47 }
 0x431   : > { %v8517_v25 = vmax.f32 %v2588_v9, 0.0  ;;  %v2484_v13 = vadd.f32 %v2483_v0, %v2371_v10  ;;  %v1776_v51 = vadd.f32 %v10728_v38, %v10727_v31  ;;  %3556 = vmatmul.f32.gmra.mxu1 %v10729_v59  ;;  %v10731_v10 = vld [vmem:[#allocation39_spill] sm:$0xff]  ;;  %3741 = vmatpush.msrb.mxu3 %v3002_v41 }
 0x432   : > { %v2374_v9 = vadd.f32 %v8301_v26, %v10731_v10  ;;  %3993 = vmatpush.msra.mxu0 %v3944_v16  ;;  %v10735_v10 = vld [vmem:[#allocation19_spill] sm:$0xff] }
 0x433   : > { %10725 = vst [vmem:[#allocation31_spill] sm:$0xff] %v8517_v25  ;;  %v8519_v40 = vld [vmem:[#allocation3 + $0x1cf] sm:$0xff]  ;;  %v2521_v55 = vadd.f32 %v2484_v13, %v1999_v63  ;;  %3375 = vmatmul.f32.gmra.mxu3 %v8517_v25  ;;  %v1889_v14 = vadd.f32 %v10730_v4, %v1776_v51  ;;  %v3001_v63 = vld [vmem:[#allocation8 + $0x100] sm:$0xff] }
 0x434   : > { %v8521_v18 = vld [vmem:[#allocation3 + $0x1c9] sm:$0xff]  ;;  %2653 = vst [vmem:[#allocation3 + $0x1e8] sm:$0xff] %v8517_v25  ;;  %3259 = vmatmul.f32.gmra.mxu2 %v8519_v40  ;;  %3742 = vmatpush.msrb.mxu3 %v3001_v63  ;;  %v8548_v47 = vld [vmem:[#allocation3 + $0x1d1] sm:$0xff]  ;;  %v10737_v41 = vld [vmem:[#allocation23_spill] sm:$0xff] }
 0x435   : > { %10726 = vst [vmem:[#allocation45_spill] sm:$0xff] %v8521_v18  ;;  %3482 = vmatmul.f32.gmra.mxu0 %v8521_v18  ;;  %v2555_v12 = vmul.f32 %v8428_v54, %v2521_v55  ;;  %v2002_v51 = vadd.f32 %v8295_v46, %v1889_v14  ;;  %v10734_v55 = vld [vmem:[#allocation62_spill] sm:$0xff]  ;;  %v3942_v46 = vld [vmem:[#allocation8 + $0x328] sm:$0xff] }
 0x436   : > { %v3328_v38 = vpop.f32.mrf.mxu3  ;;  %v1779_v25 = vadd.f32 %v10735_v10, %v10734_v55  ;;  %10736 = vst [vmem:[#allocation33_spill] sm:$0xff] %v8548_v47  ;;  %v3984_v14 = vld [vmem:[#allocation8 + $0x478] sm:$0xff]  ;;  %3994 = vmatpush.msra.mxu0 %v3943_v50 }
 0x437   : > { %v3212_v0 = vpop.f32.mrf.mxu2  ;;  %v2589_v13 = vadd.f32 %v8436_v1, %v2555_v12  ;;  %4211 = vmatpush.msra.mxu2 %v3984_v14  ;;  %v3940_v14 = vld [vmem:[#allocation8 + $0x318] sm:$0xff] }
 0x438   : > { %v8537_v31 = vadd.f32 %v3325_v48, %v3212_v0  ;;  %v2486_v59 = vpop.f32.mrf.mxu1  ;;  %v10739_v0 = vld [vmem:[#allocation41_spill] sm:$0xff]  ;;  %3995 = vmatpush.msra.mxu0 %v3942_v46 }
 0x439   : > { %v8540_v4 = vmax.f32 %v2589_v13, 0.0  ;;  %v2487_v26 = vadd.f32 %v2486_v59, %v2374_v9  ;;  %3559 = vmatmul.f32.gmra.mxu1 %v10737_v41  ;;  %v10738_v9 = vld [vmem:[#allocation84_spill] sm:$0xff]  ;;  %v2377_v16 = vadd.f32 %v8319_v15, %v10739_v0  ;;  %v8557_v13 = vpop.f32.mrf.mxu0  ;;  %v3968_v41 = vld [vmem:[#allocation8 + $0x3f8] sm:$0xff]  ;;  %v3939_v46 = vld [vmem:[#allocation8 + $0x310] sm:$0xff] }
 0x43a   : > { %v1892_v12 = vadd.f32 %v10738_v9, %v1779_v25  ;;  %4098 = vmatpush.msra.mxu1 %v3968_v41 }
 0x43b   : > { %10732 = vst [vmem:[#allocation74_spill] sm:$0xff] %v8540_v4  ;;  %v8542_v29 = vld [vmem:[#allocation3 + $0x1e7] sm:$0xff]  ;;  %v2522_v48 = vadd.f32 %v2487_v26, %v2002_v51  ;;  %3378 = vmatmul.f32.gmra.mxu3 %v8540_v4 }
 0x43c   : > { %10733 = vst [vmem:[#allocation76_spill] sm:$0xff] %v8542_v29  ;;  %3262 = vmatmul.f32.gmra.mxu2 %v8542_v29  ;;  %v3941_v51 = vld [vmem:[#allocation8 + $0x320] sm:$0xff]  ;;  %v2005_v25 = vadd.f32 %v8314_v17, %v1892_v12  ;;  %v3938_v12 = vld [vmem:[#allocation8 + $0x308] sm:$0xff] }
 0x43d   : > { %2654 = vst [vmem:[#allocation3 + $0x1f0] sm:$0xff] %v8540_v4  ;;  %3485 = vmatmul.f32.gmra.mxu0 %v8548_v47  ;;  %v2556_v63 = vmul.f32 %v8428_v54, %v2522_v48 }
 0x43e   : > { %v3331_v10 = vpop.f32.mrf.mxu3  ;;  %3996 = vmatpush.msra.mxu0 %v3941_v51 }
 0x43f   : > { %v3215_v59 = vpop.f32.mrf.mxu2  ;;  %v2590_v26 = vadd.f32 %v8436_v1, %v2556_v63 }
 0x440   : > { %v8560_v55 = vadd.f32 %v3328_v38, %v3215_v59  ;;  %v2489_v4 = vpop.f32.mrf.mxu1  ;;  %v10743_v38 = vld [vmem:[#allocation25_spill] sm:$0xff]  ;;  %3997 = vmatpush.msra.mxu0 %v3940_v14 }
 0x441   : > { %v2622_v15 = vmax.f32 %v2590_v26, 0.0  ;;  %v2490_v9 = vadd.f32 %v2489_v4, %v2377_v16  ;;  %3562 = vmatmul.f32.gmra.mxu1 %v10743_v38  ;;  %v8574_v51 = vpop.f32.mrf.mxu0  ;;  %v3967_v38 = vld [vmem:[#allocation8 + $0x3f0] sm:$0xff] }
 0x442   : > { %10740 = vst [vmem:[#allocation47_spill] sm:$0xff] %v8560_v55  ;;  %3998 = vmatpush.msra.mxu0 %v3939_v46  ;;  %4099 = vmatpush.msra.mxu1 %v3967_v38  ;;  %v8694_v55 = vld [vmem:[#allocation3 + $0x90] sm:$0xff] }
 0x443   : > { %2655 = vst [vmem:[#allocation3 + $0x208] sm:$0xff] %v2622_v15  ;;  %v2523_v0 = vadd.f32 %v2490_v9, %v2005_v25  ;;  %3381 = vmatmul.f32.gmra.mxu3 %v2622_v15  ;;  %v3937_v15 = vld [vmem:[#allocation8 + $0x300] sm:$0xff] }
 0x444   : > { %v8563_v50 = vld [vmem:[#allocation3 + $0x1ef] sm:$0xff]  ;;  %10745 = vst [vmem:[#allocation79_spill] sm:$0xff] %v8574_v51  ;;  %3999 = vmatpush.msra.mxu0 %v3938_v12  ;;  %v10748_v9 = vld [vmem:[#allocation27_spill] sm:$0xff] }
 0x445   : > { %10741 = vst [vmem:[#allocation24_spill] sm:$0xff] %v8563_v50  ;;  %v8565_v48 = vld [vmem:[#allocation3 + $0x1e9] sm:$0xff]  ;;  %3265 = vmatmul.f32.gmra.mxu2 %v8563_v50  ;;  %v2557_v17 = vmul.f32 %v8428_v54, %v2523_v0  ;;  %v8581_v54 = vld [vmem:[#allocation3 + $0x1f1] sm:$0xff] }
 0x446   : > { %10742 = vst [vmem:[#allocation77_spill] sm:$0xff] %v8565_v48  ;;  %3488 = vmatmul.f32.gmra.mxu0 %v8565_v48  ;;  %v3334_v59 = vpop.f32.mrf.mxu3  ;;  %v8798_v51 = vld [vmem:[#allocation3 + $0x110] sm:$0xff] }
 0x447   : > { %v3218_v4 = vpop.f32.mrf.mxu2  ;;  %v2591_v16 = vadd.f32 %v8436_v1, %v2557_v17  ;;  %10747 = vst [vmem:[#allocation49_spill] sm:$0xff] %v8581_v54  ;;  %v3983_v1 = vld [vmem:[#allocation8 + $0x470] sm:$0xff]  ;;  %4000 = vmatpush.msra.mxu0 %v3937_v15 }
 0x448   : > { %v8572_v63 = vadd.f32 %v3331_v10, %v3218_v4  ;;  %v8576_v26 = vpop.f32.mrf.mxu1  ;;  %4212 = vmatpush.msra.mxu2 %v3983_v1  ;;  %v2801_v17 = vld [vmem:[#allocation3 + $0x9] sm:$0xff] }
 0x449   : > { %v2623_v41 = vmax.f32 %v2591_v16, 0.0  ;;  %3565 = vmatmul.f32.gmra.mxu1 %v10748_v9  ;;  %v8589_v4 = vpop.f32.mrf.mxu0 }
 0x44a   : > { %10744 = vst [vmem:[#allocation82_spill] sm:$0xff] %v8572_v63  ;;  %v8578_v25 = vld [vmem:[#allocation3 + $0x207] sm:$0xff] }
 0x44b   : > { %10746 = vst [vmem:[#allocation34_spill] sm:$0xff] %v8578_v25  ;;  %3384 = vmatmul.f32.gmra.mxu3 %v2623_v41 }
 0x44c   : > { %2656 = vst [vmem:[#allocation3 + $0x210] sm:$0xff] %v2623_v41  ;;  %v10752_v41 = vld [vmem:[#allocation29_spill] sm:$0xff] }
 0x44d   : > { %3268 = vmatmul.f32.gmra.mxu2 %v8578_v25  ;;  %10750 = vst [vmem:[#allocation80_spill] sm:$0xff] %v8589_v4  ;;  %v8668_v25 = vld [vmem:[#allocation3 + $0x70] sm:$0xff] }
 0x44e   : > { %3491 = vmatmul.f32.gmra.mxu0 %v8581_v54  ;;  %v3337_v0 = vpop.f32.mrf.mxu3  ;;  %v6613_v54 = vld [vmem:[#allocation2] sm:$0xff] }
 0x44f   : > { %v3221_v10 = vpop.f32.mrf.mxu2 }
 0x450   : > { %v8585_v14 = vadd.f32 %v3334_v59, %v3221_v10  ;;  %v8587_v46 = vpop.f32.mrf.mxu1  ;;  %v2802_v10 = vld [vmem:[#allocation3 + $0x11] sm:$0xff] }
 0x451   : > { %3568 = vmatmul.f32.gmra.mxu1 %v10752_v41  ;;  %v3966_v41 = vld [vmem:[#allocation8 + $0x3e8] sm:$0xff] }
 0x452   : > { %10749 = vst [vmem:[#allocation26_spill] sm:$0xff] %v8585_v14  ;;  %v8600_v14 = vpop.f32.mrf.mxu0  ;;  %4100 = vmatpush.msra.mxu1 %v3966_v41  ;;  %v6617_v41 = vld [vmem:[#allocation3 + $0x4f] sm:$0xff] }
 0x453   : > { %v8591_v12 = vld [vmem:[#allocation3 + $0x20f] sm:$0xff]  ;;  %3743 = vmatmul.f32.vlgmr.msrb.gmra.mxu3 %v2801_v17  ;;  %10754 = vst [vmem:[#allocation35_spill] sm:$0xff] %v8600_v14 }
 0x454   : > { %10751 = vst [vmem:[#allocation86_spill] sm:$0xff] %v8591_v12  ;;  %v2833_v16 = vld [vmem:[#allocation3 + $0x209] sm:$0xff]  ;;  %v2834_v38 = vld [vmem:[#allocation3 + $0x211] sm:$0xff] }
 0x455   : > { %3271 = vmatmul.f32.gmra.mxu2 %v8591_v12  ;;  %v3982_v12 = vld [vmem:[#allocation8 + $0x468] sm:$0xff] }
 0x456   : > { %3494 = vmatmul.f32.gmra.mxu0 %v2833_v16  ;;  %v3340_v9 = vpop.f32.mrf.mxu3  ;;  %4213 = vmatpush.msra.mxu2 %v3982_v12  ;;  %v8681_v14 = vld [vmem:[#allocation3 + $0x88] sm:$0xff] }
 0x457   : > { %v3224_v15 = vpop.f32.mrf.mxu2 }
 0x458   : > { %v8595_v59 = vadd.f32 %v3337_v0, %v3224_v15  ;;  %v8597_v1 = vpop.f32.mrf.mxu1 }
 0x459   : > { %3571 = vmatmul.f32.gmra.mxu1 %v8322_v8  ;;  %v6614_v8 = vld [vmem:[#allocation3 + $0x47] sm:$0xff] }
 0x45a   : > { %10753 = vst [vmem:[#allocation83_spill] sm:$0xff] %v8595_v59  ;;  %v6615_v59 = vld [vmem:[#allocation3 + $0x29] sm:$0xff]  ;;  %v8607_v48 = vpop.f32.mrf.mxu0 }
 0x45b   : > { %3746 = vmatmul.f32.gmra.mxu3 %v2802_v10  ;;  %10756 = vst [vmem:[#allocation28_spill] sm:$0xff] %v8607_v48  ;;  %v3965_v48 = vld [vmem:[#allocation8 + $0x3e0] sm:$0xff] }
 0x45c   : > { %4101 = vmatpush.msra.mxu1 %v3965_v48  ;;  %v8631_v48 = vld [vmem:[#allocation3 + $0x48] sm:$0xff] }
 0x45d   : > { %3630 = vmatmul.f32.vlgmr.msrb.gmra.mxu2 %v6613_v54 }
 0x45e   : > { %3497 = vmatmul.f32.gmra.mxu0 %v2834_v38  ;;  %v3343_v0 = vpop.f32.mrf.mxu3 }
 0x45f   : > { %v3227_v16 = vpop.f32.mrf.mxu2 }
 0x460   : > { %v8602_v17 = vadd.f32 %v3340_v9, %v3227_v16  ;;  %v8604_v15 = vpop.f32.mrf.mxu1  ;;  %v6616_v16 = vld [vmem:[#allocation3 + $0x28] sm:$0xff] }
 0x461   : > { %3574 = vmatmul.f32.gmra.mxu1 %v8338_v11  ;;  %v6618_v11 = vld [vmem:[#allocation3 + $0x31] sm:$0xff] }
 0x462   : > { %10755 = vst [vmem:[#allocation51_spill] sm:$0xff] %v8602_v17 }
 0x463   : > { %3749 = vmatmul.f32.gmra.mxu3 %v6615_v59 }
 0x465   : > { %3633 = vmatmul.f32.gmra.mxu2 %v6613_v54  ;;  %v3981_v54 = vld [vmem:[#allocation8 + $0x460] sm:$0xff] }
 0x466   : > { %4001 = vmatmul.f32.vlgmr.msra.gmra.mxu0 %v6614_v8  ;;  %v3346_v12 = vpop.f32.mrf.mxu3  ;;  %4214 = vmatpush.msra.mxu2 %v3981_v54 }
 0x467   : > { %v3230_v10 = vpop.f32.mrf.mxu2 }
 0x468   : > { %v8609_v38 = vadd.f32 %v3343_v0, %v3230_v10  ;;  %v8611_v9 = vpop.f32.mrf.mxu1  ;;  %v8616_v0 = vpop.f32.mrf.mxu0 }
 0x469   : > { %3577 = vmatmul.f32.gmra.mxu1 %v8354_v7  ;;  %10759 = vst [vmem:[#allocation36_spill] sm:$0xff] %v8616_v0  ;;  %v6619_v7 = vld [vmem:[#allocation3 + $0x30] sm:$0xff] }
 0x46a   : > { %10757 = vst [vmem:[#allocation85_spill] sm:$0xff] %v8609_v38  ;;  %v3964_v38 = vld [vmem:[#allocation8 + $0x3d8] sm:$0xff]  ;;  %v3963_v0 = vld [vmem:[#allocation8 + $0x3d0] sm:$0xff] }
 0x46b   : > { %3752 = vmatmul.f32.gmra.mxu3 %v6618_v11  ;;  %4102 = vmatpush.msra.mxu1 %v3964_v38  ;;  %v6629_v38 = vld [vmem:[#allocation3 + $0x8f] sm:$0xff] }
 0x46d   : > { %3636 = vmatmul.f32.gmra.mxu2 %v6616_v16  ;;  %v6620_v16 = vld [vmem:[#allocation3 + $0x67] sm:$0xff]  ;;  %4103 = vmatpush.msra.mxu1 %v3963_v0 }
 0x46e   : > { %4004 = vmatmul.f32.gmra.mxu0 %v6617_v41  ;;  %v3349_v17 = vpop.f32.mrf.mxu3  ;;  %v8621_v41 = vld [vmem:[#allocation3 + $0x49] sm:$0xff] }
 0x46f   : > { %v3233_v8 = vpop.f32.mrf.mxu2  ;;  %10760 = vst [vmem:[#allocation53_spill] sm:$0xff] %v8621_v41  ;;  %v3962_v0 = vld [vmem:[#allocation8 + $0x3c8] sm:$0xff] }
 0x470   : > { %v8614_v59 = vadd.f32 %v3346_v12, %v3233_v8  ;;  %v8618_v10 = vpop.f32.mrf.mxu1  ;;  %4104 = vmatpush.msra.mxu1 %v3962_v0 }
 0x471   : > { %3580 = vmatmul.f32.gmra.mxu1 %v8370_v30  ;;  %v6623_v30 = vld [vmem:[#allocation3 + $0x6f] sm:$0xff] }
 0x472   : > { %10758 = vst [vmem:[#allocation87_spill] sm:$0xff] %v8614_v59  ;;  %v8628_v59 = vpop.f32.mrf.mxu0  ;;  %4105 = vmatpush.msra.mxu1 %v3961_v22  ;;  %v6638_v22 = vld [vmem:[#allocation3 + $0xc7] sm:$0xff] }
 0x473   : > { %3755 = vmatmul.f32.gmra.mxu3 %v8621_v41  ;;  %10762 = vst [vmem:[#allocation88_spill] sm:$0xff] %v8628_v59  ;;  %v6626_v59 = vld [vmem:[#allocation3 + $0x87] sm:$0xff] }
 0x475   : > { %3639 = vmatmul.f32.gmra.mxu2 %v6619_v7  ;;  %v8634_v7 = vld [vmem:[#allocation3 + $0x51] sm:$0xff] }
 0x476   : > { %4007 = vmatmul.f32.gmra.mxu0 %v6620_v16  ;;  %v3352_v54 = vpop.f32.mrf.mxu3  ;;  %10763 = vst [vmem:[#allocation38_spill] sm:$0xff] %v8634_v7  ;;  %v3980_v16 = vld [vmem:[#allocation8 + $0x458] sm:$0xff] }
 0x477   : > { %v3236_v11 = vpop.f32.mrf.mxu2  ;;  %4215 = vmatpush.msra.mxu2 %v3980_v16 }
 0x478   : > { %v8624_v12 = vadd.f32 %v3349_v17, %v3236_v11  ;;  %v8626_v8 = vpop.f32.mrf.mxu1 }
 0x479   : > { %3583 = vmatmul.f32.gmra.mxu1 %v8386_v34  ;;  %v8642_v34 = vld [vmem:[#allocation3 + $0x50] sm:$0xff] }
 0x47a   : > { %10761 = vst [vmem:[#allocation30_spill] sm:$0xff] %v8624_v12 }
 0x47b   : > { %3758 = vmatmul.f32.gmra.mxu3 %v8634_v7  ;;  %v8647_v7 = vld [vmem:[#allocation3 + $0x69] sm:$0xff] }
 0x47c   : > { %10766 = vst [vmem:[#allocation40_spill] sm:$0xff] %v8647_v7 }
 0x47d   : > { %3642 = vmatmul.f32.gmra.mxu2 %v8631_v48 }
 0x47e   : > { %4010 = vmatmul.f32.gmra.mxu0 %v6623_v30  ;;  %v3355_v12 = vpop.f32.mrf.mxu3  ;;  %v8645_v30 = vpop.f32.mrf.mxu0 }
 0x47f   : > { %v3239_v17 = vpop.f32.mrf.mxu2  ;;  %10765 = vst [vmem:[#allocation66_spill] sm:$0xff] %v8645_v30  ;;  %v8658_v30 = vld [vmem:[#allocation3 + $0x71] sm:$0xff] }
 0x480   : > { %v8637_v11 = vadd.f32 %v3352_v54, %v3239_v17  ;;  %v8639_v41 = vpop.f32.mrf.mxu1  ;;  %10768 = vst [vmem:[#allocation67_spill] sm:$0xff] %v8658_v30 }
 0x481   : > { %3586 = vmatmul.f32.gmra.mxu1 %v8402_v27  ;;  %v8655_v27 = vld [vmem:[#allocation3 + $0x68] sm:$0xff] }
 0x482   : > { %10764 = vst [vmem:[#allocation55_spill] sm:$0xff] %v8637_v11 }
 0x483   : > { %3761 = vmatmul.f32.gmra.mxu3 %v8647_v7 }
 0x485   : > { %3645 = vmatmul.f32.gmra.mxu2 %v8642_v34 }
 0x486   : > { %4013 = vmatmul.f32.gmra.mxu0 %v6626_v59  ;;  %v3358_v17 = vpop.f32.mrf.mxu3  ;;  %v3979_v59 = vld [vmem:[#allocation8 + $0x450] sm:$0xff]  ;;  %v8661_v7 = vpop.f32.mrf.mxu0 }
 0x487   : > { %v3242_v54 = vpop.f32.mrf.mxu2  ;;  %4216 = vmatpush.msra.mxu2 %v3979_v59  ;;  %10769 = vst [vmem:[#allocation89_spill] sm:$0xff] %v8661_v7 }
 0x488   : > { %v8650_v16 = vadd.f32 %v3355_v12, %v3242_v54  ;;  %v8652_v11 = vpop.f32.mrf.mxu1 }
 0x489   : > { %3589 = vmatmul.f32.gmra.mxu1 %v8416_v39 }
 0x48a   : > { %10767 = vst [vmem:[#allocation57_spill] sm:$0xff] %v8650_v16 }
 0x48b   : > { %3764 = vmatmul.f32.gmra.mxu3 %v8658_v30  ;;  %v8671_v30 = vld [vmem:[#allocation3 + $0x89] sm:$0xff] }
 0x48c   : > { %10771 = vst [vmem:[#allocation59_spill] sm:$0xff] %v8671_v30 }
 0x48d   : > { %3648 = vmatmul.f32.gmra.mxu2 %v8655_v27 }
 0x48e   : > { %4016 = vmatmul.f32.gmra.mxu0 %v6629_v38  ;;  %v3361_v16 = vpop.f32.mrf.mxu3  ;;  %v6632_v38 = vld [vmem:[#allocation3 + $0xa7] sm:$0xff] }
 0x48f   : > { %v3245_v12 = vpop.f32.mrf.mxu2 }
 0x490   : > { %v8663_v54 = vadd.f32 %v3358_v17, %v3245_v12  ;;  %v8665_v39 = vpop.f32.mrf.mxu1 }
 0x491   : > { %3592 = vmatmul.f32.gmra.mxu1 %v8442_v56 }
 0x492   : > { %10770 = vst [vmem:[#allocation42_spill] sm:$0xff] %v8663_v54  ;;  %v8676_v54 = vpop.f32.mrf.mxu0 }
 0x493   : > { %3767 = vmatmul.f32.gmra.mxu3 %v8671_v30  ;;  %10773 = vst [vmem:[#allocation44_spill] sm:$0xff] %v8676_v54  ;;  %v8684_v30 = vld [vmem:[#allocation3 + $0x91] sm:$0xff] }
 0x494   : > { %10774 = vst [vmem:[#allocation61_spill] sm:$0xff] %v8684_v30  ;;  %v3959_v54 = vld [vmem:[#allocation8 + $0x3b0] sm:$0xff] }
 0x495   : > { %3651 = vmatmul.f32.gmra.mxu2 %v8668_v25 }
 0x496   : > { %4019 = vmatmul.f32.gmra.mxu0 %v6632_v38  ;;  %v3364_v12 = vpop.f32.mrf.mxu3  ;;  %v6635_v38 = vld [vmem:[#allocation3 + $0xaf] sm:$0xff] }
 0x497   : > { %v3248_v59 = vpop.f32.mrf.mxu2 }
 0x498   : > { %v8674_v17 = vadd.f32 %v3361_v16, %v3248_v59  ;;  %v8678_v7 = vpop.f32.mrf.mxu1  ;;  %v3978_v16 = vld [vmem:[#allocation8 + $0x448] sm:$0xff]  ;;  %v3960_v59 = vld [vmem:[#allocation8 + $0x3b8] sm:$0xff] }
 0x499   : > { %3595 = vmatmul.f32.gmra.mxu1 %v8458_v28  ;;  %4217 = vmatpush.msra.mxu2 %v3978_v16  ;;  %v8697_v16 = vld [vmem:[#allocation3 + $0xa9] sm:$0xff] }
 0x49a   : > { %10772 = vst [vmem:[#allocation68_spill] sm:$0xff] %v8674_v17  ;;  %4106 = vmatpush.msra.mxu1 %v3960_v59  ;;  %v8691_v4 = vpop.f32.mrf.mxu0  ;;  %v3956_v59 = vld [vmem:[#allocation8 + $0x398] sm:$0xff] }
 0x49b   : > { %3770 = vmatmul.f32.gmra.mxu3 %v8684_v30  ;;  %10777 = vst [vmem:[#allocation63_spill] sm:$0xff] %v8691_v4  ;;  %v3955_v4 = vld [vmem:[#allocation8 + $0x390] sm:$0xff] }
 0x49c   : > { %4107 = vmatpush.msra.mxu1 %v3959_v54  ;;  %10778 = vst [vmem:[#allocation90_spill] sm:$0xff] %v8697_v16 }
 0x49d   : > { %3654 = vmatmul.f32.gmra.mxu2 %v8681_v14 }
 0x49e   : > { %4022 = vmatmul.f32.gmra.mxu0 %v6635_v38  ;;  %v3367_v63 = vpop.f32.mrf.mxu3  ;;  %v3958_v38 = vld [vmem:[#allocation8 + $0x3a8] sm:$0xff] }
 0x49f   : > { %v3251_v17 = vpop.f32.mrf.mxu2  ;;  %4108 = vmatpush.msra.mxu1 %v3958_v38  ;;  %v8710_v38 = vld [vmem:[#allocation3 + $0xb1] sm:$0xff] }
 0x4a0   : > { %v8687_v0 = vadd.f32 %v3364_v12, %v3251_v17  ;;  %v8689_v47 = vpop.f32.mrf.mxu1  ;;  %v3957_v17 = vld [vmem:[#allocation8 + $0x3a0] sm:$0xff]  ;;  %10782 = vst [vmem:[#allocation71_spill] sm:$0xff] %v8710_v38 }
 0x4a1   : > { %10776 = vst [vmem:[#allocation46_spill] sm:$0xff] %v8689_v47  ;;  %3598 = vmatmul.f32.gmra.mxu1 %v8477_v61  ;;  %v8705_v47 = vld [vmem:[#allocation3 + $0xa8] sm:$0xff] }
 0x4a2   : > { %10775 = vst [vmem:[#allocation69_spill] sm:$0xff] %v8687_v0  ;;  %4109 = vmatpush.msra.mxu1 %v3957_v17  ;;  %v3977_v17 = vld [vmem:[#allocation8 + $0x440] sm:$0xff] }
 0x4a3   : > { %3773 = vmatmul.f32.gmra.mxu3 %v8697_v16  ;;  %v6641_v16 = vld [vmem:[#allocation3 + $0xcf] sm:$0xff]  ;;  %4218 = vmatpush.msra.mxu2 %v3977_v17 }
 0x4a4   : > { %4110 = vmatpush.msra.mxu1 %v3956_v59  ;;  %v3953_v59 = vld [vmem:[#allocation8 + $0x380] sm:$0xff] }
 0x4a5   : > { %3657 = vmatmul.f32.gmra.mxu2 %v8694_v55 }
 0x4a6   : > { %4025 = vmatmul.f32.gmra.mxu0 %v6638_v22  ;;  %v3370_v0 = vpop.f32.mrf.mxu3  ;;  %v8708_v22 = vpop.f32.mrf.mxu0  ;;  %4111 = vmatpush.msra.mxu1 %v3955_v4 }
 0x4a7   : > { %v3254_v12 = vpop.f32.mrf.mxu2  ;;  %10781 = vst [vmem:[#allocation64_spill] sm:$0xff] %v8708_v22  ;;  %v8721_v22 = vld [vmem:[#allocation3 + $0xc9] sm:$0xff] }
 0x4a8   : > { %v8700_v54 = vadd.f32 %v3367_v63, %v3254_v12  ;;  %v8702_v30 = vpop.f32.mrf.mxu1  ;;  %v3954_v63 = vld [vmem:[#allocation8 + $0x388] sm:$0xff]  ;;  %10785 = vst [vmem:[#allocation72_spill] sm:$0xff] %v8721_v22 }
 0x4a9   : > { %10780 = vst [vmem:[#allocation48_spill] sm:$0xff] %v8702_v30  ;;  %3601 = vmatmul.f32.gmra.mxu1 %v8498_v20 }
 0x4aa   : > { %10779 = vst [vmem:[#allocation70_spill] sm:$0xff] %v8700_v54  ;;  %4112 = vmatpush.msra.mxu1 %v3954_v63 }
 0x4ab   : > { %3776 = vmatmul.f32.gmra.mxu3 %v8710_v38  ;;  %v6644_v38 = vld [vmem:[#allocation3 + $0xe7] sm:$0xff] }
 0x4ac   : > { %4113 = vmatpush.msra.mxu1 %v3953_v59  ;;  %v8731_v59 = vld [vmem:[#allocation3 + $0xc8] sm:$0xff] }
 0x4ad   : > { %3660 = vmatmul.f32.gmra.mxu2 %v8705_v47 }
 0x4ae   : > { %4028 = vmatmul.f32.gmra.mxu0 %v6641_v16  ;;  %v3373_v30 = vpop.f32.mrf.mxu3  ;;  %v8718_v16 = vld [vmem:[#allocation3 + $0xb0] sm:$0xff]  ;;  %v8724_v4 = vpop.f32.mrf.mxu0 }
 0x4af   : > { %v3257_v12 = vpop.f32.mrf.mxu2  ;;  %10786 = vst [vmem:[#allocation52_spill] sm:$0xff] %v8724_v4 }
 0x4b0   : > { %v8713_v54 = vadd.f32 %v3370_v0, %v3257_v12  ;;  %v8715_v18 = vpop.f32.mrf.mxu1 }
 0x4b1   : > { %10784 = vst [vmem:[#allocation65_spill] sm:$0xff] %v8715_v18  ;;  %3604 = vmatmul.f32.gmra.mxu1 %v8519_v40  ;;  %v8744_v18 = vld [vmem:[#allocation3 + $0xd0] sm:$0xff] }
 0x4b2   : > { %10783 = vst [vmem:[#allocation50_spill] sm:$0xff] %v8713_v54  ;;  %v6647_v54 = vld [vmem:[#allocation3 + $0xef] sm:$0xff] }
 0x4b3   : > { %3779 = vmatmul.f32.gmra.mxu3 %v8721_v22  ;;  %v3976_v22 = vld [vmem:[#allocation8 + $0x438] sm:$0xff] }
 0x4b4   : > { %4219 = vmatpush.msra.mxu2 %v3976_v22 }
 0x4b5   : > { %3663 = vmatmul.f32.gmra.mxu2 %v8718_v16 }
 0x4b6   : > { %4031 = vmatmul.f32.gmra.mxu0 %v6644_v38  ;;  %v3376_v63 = vpop.f32.mrf.mxu3  ;;  %v8734_v38 = vld [vmem:[#allocation3 + $0xd1] sm:$0xff] }
 0x4b7   : > { %v3260_v0 = vpop.f32.mrf.mxu2  ;;  %10789 = vst [vmem:[#allocation54_spill] sm:$0xff] %v8734_v38 }
 0x4b8   : > { %v8726_v17 = vadd.f32 %v3373_v30, %v3260_v0  ;;  %v8728_v12 = vpop.f32.mrf.mxu1 }
 0x4b9   : > { %10788 = vst [vmem:[#allocation32_spill] sm:$0xff] %v8728_v12  ;;  %3607 = vmatmul.f32.gmra.mxu1 %v8542_v29  ;;  %v8747_v29 = vld [vmem:[#allocation3 + $0xe9] sm:$0xff] }
 0x4ba   : > { %10787 = vst [vmem:[#allocation16_spill] sm:$0xff] %v8726_v17  ;;  %v8739_v17 = vpop.f32.mrf.mxu0 }
 0x4bb   : > { %3782 = vmatmul.f32.gmra.mxu3 %v8734_v38  ;;  %10791 = vst [vmem:[#allocation21_spill] sm:$0xff] %v8739_v17  ;;  %v8756_v17 = vld [vmem:[#allocation3 + $0xe8] sm:$0xff] }
 0x4bc   : > { %10793 = vst [vmem:[#allocation56_spill] sm:$0xff] %v8747_v29 }
 0x4bd   : > { %3666 = vmatmul.f32.gmra.mxu2 %v8731_v59 }
 0x4be   : > { %4034 = vmatmul.f32.gmra.mxu0 %v6647_v54  ;;  %v3379_v0 = vpop.f32.mrf.mxu3  ;;  %v6650_v54 = vld [vmem:[#allocation3 + $0x107] sm:$0xff] }
 0x4bf   : > { %v3263_v4 = vpop.f32.mrf.mxu2 }
 0x4c0   : > { %v8737_v30 = vadd.f32 %v3376_v63, %v3263_v4  ;;  %v8741_v12 = vpop.f32.mrf.mxu1 }
 0x4c1   : > { %10792 = vst [vmem:[#allocation73_spill] sm:$0xff] %v8741_v12  ;;  %3610 = vmatmul.f32.gmra.mxu1 %v8563_v50  ;;  %v6653_v12 = vld [vmem:[#allocation3 + $0x10f] sm:$0xff] }
 0x4c2   : > { %10790 = vst [vmem:[#allocation15_spill] sm:$0xff] %v8737_v30  ;;  %v8754_v38 = vpop.f32.mrf.mxu0  ;;  %v8767_v50 = vld [vmem:[#allocation3 + $0xf0] sm:$0xff] }
 0x4c3   : > { %3785 = vmatmul.f32.gmra.mxu3 %v8747_v29  ;;  %10796 = vst [vmem:[#allocation58_spill] sm:$0xff] %v8754_v38  ;;  %v3975_v29 = vld [vmem:[#allocation8 + $0x430] sm:$0xff]  ;;  %v4960_v38 = vld [vmem:[#allocation10 + $0x1f8] sm:$0xff] }
 0x4c4   : > { %4220 = vmatpush.msra.mxu2 %v3975_v29  ;;  %4993 = vmatpush.msra.mxu3 %v4960_v38  ;;  %v3406_v38 = vadd.f32 %v8336_v60, %v8333_v37 }
 0x4c5   : > { %3669 = vmatmul.f32.gmra.mxu2 %v8744_v18 }
 0x4c6   : > { %4037 = vmatmul.f32.gmra.mxu0 %v6650_v54  ;;  %v3382_v63 = vpop.f32.mrf.mxu3  ;;  %v8760_v54 = vld [vmem:[#allocation3 + $0xf1] sm:$0xff] }
 0x4c7   : > { %10797 = vst [vmem:[#allocation17_spill] sm:$0xff] %v8760_v54 }
 0x4c8   : > { %v3266_v22 = vpop.f32.mrf.mxu2  ;;  %v8752_v30 = vpop.f32.mrf.mxu1 }
 0x4c9   : > { %v8750_v4 = vadd.f32 %v3379_v0, %v3266_v22  ;;  %10795 = vst [vmem:[#allocation75_spill] sm:$0xff] %v8752_v30  ;;  %4114 = vmatmul.f32.vlgmr.msra.gmra.mxu1 %v8631_v48 }
 0x4ca   : > { %v8771_v48 = vpop.f32.mrf.mxu0 }
 0x4cb   : > { %10794 = vst [vmem:[#allocation18_spill] sm:$0xff] %v8750_v4  ;;  %3788 = vmatmul.f32.gmra.mxu3 %v8760_v54  ;;  %v8773_v54 = vld [vmem:[#allocation3 + $0x109] sm:$0xff] }
 0x4cc   : > { %10800 = vst [vmem:[#allocation60_spill] sm:$0xff] %v8771_v48 }
 0x4cd   : > { %3672 = vmatmul.f32.gmra.mxu2 %v8756_v17  ;;  %10801 = vst [vmem:[#allocation20_spill] sm:$0xff] %v8773_v54 }
 0x4ce   : > { %4040 = vmatmul.f32.gmra.mxu0 %v6653_v12  ;;  %v3385_v4 = vpop.f32.mrf.mxu3  ;;  %v6656_v12 = vld [vmem:[#allocation3 + $0x127] sm:$0xff] }
 0x4d0   : > { %v3269_v0 = vpop.f32.mrf.mxu2  ;;  %v8765_v30 = vpop.f32.mrf.mxu1 }
 0x4d1   : > { %v8763_v22 = vadd.f32 %v3382_v63, %v3269_v0  ;;  %10799 = vst [vmem:[#allocation37_spill] sm:$0xff] %v8765_v30  ;;  %4117 = vmatmul.f32.gmra.mxu1 %v8642_v34  ;;  %v8782_v30 = vld [vmem:[#allocation3 + $0x108] sm:$0xff] }
 0x4d2   : > { %v6659_v34 = vld [vmem:[#allocation3 + $0x12f] sm:$0xff] }
 0x4d3   : > { %10798 = vst [vmem:[#allocation78_spill] sm:$0xff] %v8763_v22  ;;  %3791 = vmatmul.f32.gmra.mxu3 %v8773_v54 }
 0x4d5   : > { %3675 = vmatmul.f32.gmra.mxu2 %v8767_v50 }
 0x4d6   : > { %4043 = vmatmul.f32.gmra.mxu0 %v6656_v12  ;;  %v3744_v0 = vpop.f32.mrf.mxu3  ;;  %v8786_v12 = vld [vmem:[#allocation3 + $0x111] sm:$0xff] }
 0x4d8   : > { %v3272_v29 = vpop.f32.mrf.mxu2  ;;  %v8778_v22 = vpop.f32.mrf.mxu1 }
 0x4d9   : > { %v8776_v63 = vadd.f32 %v3385_v4, %v3272_v29  ;;  %10803 = vst [vmem:[#allocation81_spill] sm:$0xff] %v8778_v22  ;;  %4120 = vmatmul.f32.gmra.mxu1 %v8655_v27  ;;  %v3974_v4 = vld [vmem:[#allocation8 + $0x428] sm:$0xff]  ;;  %v3519_v29 = vadd.f32 %v8576_v26, %v3406_v38  ;;  %v4959_v27 = vld [vmem:[#allocation10 + $0x1f0] sm:$0xff] }
 0x4da   : > { %4221 = vmatpush.msra.mxu2 %v3974_v4  ;;  %4994 = vmatpush.msra.mxu3 %v4959_v27  ;;  %v6662_v26 = vld [vmem:[#allocation3 + $0x147] sm:$0xff] }
 0x4db   : > { %10802 = vst [vmem:[#allocation22_spill] sm:$0xff] %v8776_v63  ;;  %3794 = vmatmul.f32.gmra.mxu3 %v8786_v12  ;;  %v8790_v63 = vpop.f32.mrf.mxu0  ;;  %v8802_v38 = vld [vmem:[#allocation3 + $0x129] sm:$0xff] }
 0x4dc   : > { %v8814_v27 = vld [vmem:[#allocation3 + $0x128] sm:$0xff] }
 0x4dd   : > { %3678 = vmatmul.f32.gmra.mxu2 %v8782_v30 }
 0x4de   : > { %4046 = vmatmul.f32.gmra.mxu0 %v6659_v34  ;;  %v3747_v60 = vpop.f32.mrf.mxu3  ;;  %v3409_v34 = vadd.f32 %v8352_v35, %v8349_v2 }
 0x4e0   : > { %v3631_v54 = vpop.f32.mrf.mxu2  ;;  %v8792_v48 = vpop.f32.mrf.mxu1 }
 0x4e1   : > { %v3632_v37 = vadd.f32 %v3631_v54, %v3519_v29  ;;  %4123 = vmatmul.f32.gmra.mxu1 %v8668_v25  ;;  %v3522_v54 = vadd.f32 %v8587_v46, %v3409_v34  ;;  %v3412_v25 = vadd.f32 %v8368_v42, %v8365_v52  ;;  %v8818_v46 = vld [vmem:[#allocation3 + $0x131] sm:$0xff]  ;;  %v3973_v34 = vld [vmem:[#allocation8 + $0x420] sm:$0xff] }
 0x4e2   : > { %4222 = vmatpush.msra.mxu2 %v3973_v34 }
 0x4e3   : > { %v8794_v22 = vadd.f32 %v3744_v0, %v3632_v37  ;;  %3797 = vmatmul.f32.gmra.mxu3 %v8802_v38  ;;  %v8806_v37 = vpop.f32.mrf.mxu0 }
 0x4e5   : > { %10804 = vst [vmem:[#allocation39_spill] sm:$0xff] %v8794_v22  ;;  %3681 = vmatmul.f32.gmra.mxu2 %v8798_v51 }
 0x4e6   : > { %4049 = vmatmul.f32.gmra.mxu0 %v6662_v26  ;;  %v3750_v29 = vpop.f32.mrf.mxu3  ;;  %v6665_v26 = vld [vmem:[#allocation3 + $0x14f] sm:$0xff] }
 0x4e8   : > { %v3634_v0 = vpop.f32.mrf.mxu2  ;;  %v8808_v2 = vpop.f32.mrf.mxu1 }
 0x4e9   : > { %v3635_v4 = vadd.f32 %v3634_v0, %v3522_v54  ;;  %4126 = vmatmul.f32.gmra.mxu1 %v8681_v14  ;;  %v3525_v54 = vadd.f32 %v8597_v1, %v3412_v25  ;;  %v3415_v14 = vadd.f32 %v8384_v33, %v8381_v36  ;;  %v6668_v1 = vld [vmem:[#allocation3 + $0x167] sm:$0xff]  ;;  %v3418_v33 = vadd.f32 %v8400_v43, %v8397_v62 }
 0x4ea   : > { %v8834_v25 = vld [vmem:[#allocation3 + $0x149] sm:$0xff] }
 0x4eb   : > { %v8810_v35 = vadd.f32 %v3747_v60, %v3635_v4  ;;  %3800 = vmatmul.f32.gmra.mxu3 %v8818_v46  ;;  %v8826_v22 = vpop.f32.mrf.mxu0 }
 0x4ed   : > { %10805 = vst [vmem:[#allocation62_spill] sm:$0xff] %v8810_v35  ;;  %3684 = vmatmul.f32.gmra.mxu2 %v8814_v27  ;;  %v4958_v35 = vld [vmem:[#allocation10 + $0x1e8] sm:$0xff] }
 0x4ee   : > { %4052 = vmatmul.f32.gmra.mxu0 %v6665_v26  ;;  %v3753_v52 = vpop.f32.mrf.mxu3  ;;  %4995 = vmatpush.msra.mxu3 %v4958_v35  ;;  %v8830_v26 = vld [vmem:[#allocation3 + $0x130] sm:$0xff] }
 0x4f0   : > { %v3637_v60 = vpop.f32.mrf.mxu2  ;;  %v8822_v4 = vpop.f32.mrf.mxu1 }
 0x4f1   : > { %v3638_v0 = vadd.f32 %v3637_v60, %v3525_v54  ;;  %4129 = vmatmul.f32.gmra.mxu1 %v8694_v55 }
 0x4f3   : > { %v8824_v42 = vadd.f32 %v3750_v29, %v3638_v0  ;;  %3803 = vmatmul.f32.gmra.mxu3 %v8834_v25  ;;  %v3528_v29 = vadd.f32 %v8604_v15, %v3415_v14  ;;  %v8844_v0 = vld [vmem:[#allocation3 + $0x148] sm:$0xff]  ;;  %v8848_v55 = vpop.f32.mrf.mxu0  ;;  %v8850_v15 = vld [vmem:[#allocation3 + $0x151] sm:$0xff]  ;;  %v3531_v14 = vadd.f32 %v8611_v9, %v3418_v33 }
 0x4f4   : > { %v8864_v33 = vld [vmem:[#allocation3 + $0x169] sm:$0xff] }
 0x4f5   : > { %3687 = vmatmul.f32.gmra.mxu2 %v8830_v26 }
 0x4f6   : > { %4055 = vmatmul.f32.gmra.mxu0 %v6668_v1  ;;  %v3756_v36 = vpop.f32.mrf.mxu3  ;;  %v6671_v1 = vld [vmem:[#allocation3 + $0x16f] sm:$0xff] }
 0x4f8   : > { %v3640_v34 = vpop.f32.mrf.mxu2  ;;  %v8838_v35 = vpop.f32.mrf.mxu1 }
 0x4f9   : > { %v3641_v54 = vadd.f32 %v3640_v34, %v3528_v29  ;;  %4132 = vmatmul.f32.gmra.mxu1 %v8705_v47  ;;  %v3421_v47 = vadd.f32 %v8422_v5, %v8413_v23 }
 0x4fb   : > { %v8840_v60 = vadd.f32 %v3753_v52, %v3641_v54  ;;  %3806 = vmatmul.f32.gmra.mxu3 %v8850_v15  ;;  %v3972_v52 = vld [vmem:[#allocation8 + $0x418] sm:$0xff]  ;;  %v4957_v54 = vld [vmem:[#allocation10 + $0x1e0] sm:$0xff] }
 0x4fc   : > { %4223 = vmatpush.msra.mxu2 %v3972_v52  ;;  %4996 = vmatpush.msra.mxu3 %v4957_v54  ;;  %v8868_v52 = vpop.f32.mrf.mxu0 }
 0x4fd   : > { %10806 = vst [vmem:[#allocation19_spill] sm:$0xff] %v8840_v60  ;;  %3690 = vmatmul.f32.gmra.mxu2 %v8844_v0  ;;  %v6674_v60 = vld [vmem:[#allocation3 + $0x187] sm:$0xff] }
 0x4fe   : > { %4058 = vmatmul.f32.gmra.mxu0 %v6671_v1  ;;  %v8860_v1 = vld [vmem:[#allocation3 + $0x150] sm:$0xff]  ;;  %v3759_v9 = vpop.f32.mrf.mxu3 }
 0x500   : > { %v3643_v29 = vpop.f32.mrf.mxu2  ;;  %v8854_v43 = vpop.f32.mrf.mxu1 }
 0x501   : > { %v3644_v62 = vadd.f32 %v3643_v29, %v3531_v14  ;;  %4135 = vmatmul.f32.gmra.mxu1 %v8718_v16  ;;  %v3424_v16 = vadd.f32 %v8450_v45, %v8439_v57 }
 0x503   : > { %v8856_v34 = vadd.f32 %v3756_v36, %v3644_v62  ;;  %3809 = vmatmul.f32.gmra.mxu3 %v8864_v33  ;;  %v3534_v36 = vadd.f32 %v8618_v10, %v3421_v47  ;;  %v8876_v62 = vld [vmem:[#allocation3 + $0x168] sm:$0xff]  ;;  %v8881_v10 = vld [vmem:[#allocation3 + $0x171] sm:$0xff]  ;;  %v3537_v54 = vadd.f32 %v8626_v8, %v3424_v16 }
 0x504   : > { %v8885_v57 = vpop.f32.mrf.mxu0  ;;  %v8898_v8 = vld [vmem:[#allocation3 + $0x189] sm:$0xff] }
 0x505   : > { %3693 = vmatmul.f32.gmra.mxu2 %v8860_v1 }
 0x506   : > { %4061 = vmatmul.f32.gmra.mxu0 %v6674_v60  ;;  %v3971_v60 = vld [vmem:[#allocation8 + $0x410] sm:$0xff] }
 0x507   : > { %4224 = vmatpush.msra.mxu2 %v3971_v60 }
 0x508   : > { %v3646_v14 = vpop.f32.mrf.mxu2  ;;  %v8870_v23 = vpop.f32.mrf.mxu1 }
 0x509   : > { %v3647_v29 = vadd.f32 %v3646_v14, %v3534_v36  ;;  %4138 = vmatmul.f32.gmra.mxu1 %v8731_v59  ;;  %v4956_v59 = vld [vmem:[#allocation10 + $0x1d8] sm:$0xff] }
 0x50a   : > { %4997 = vmatpush.msra.mxu3 %v4956_v59 }
 0x50b   : > { %v8872_v5 = vadd.f32 %v3759_v9, %v3647_v29  ;;  %3812 = vmatmul.f32.gmra.mxu3 %v8881_v10  ;;  %v3762_v9 = vpop.f32.mrf.mxu3  ;;  %v8893_v29 = vld [vmem:[#allocation3 + $0x170] sm:$0xff] }
 0x50d   : > { %3696 = vmatmul.f32.gmra.mxu2 %v8876_v62 }
 0x50e   : > { %4064 = vmatmul.f32.gmra.mxu0 %v8442_v56  ;;  %v3427_v56 = vadd.f32 %v8474_v58, %v8455_v24  ;;  %v8906_v58 = vpop.f32.mrf.mxu0 }
 0x510   : > { %v3649_v47 = vpop.f32.mrf.mxu2  ;;  %v8887_v45 = vpop.f32.mrf.mxu1  ;;  %v3540_v16 = vadd.f32 %v8639_v41, %v3427_v56 }
 0x511   : > { %v3650_v36 = vadd.f32 %v3649_v47, %v3537_v54  ;;  %4141 = vmatmul.f32.gmra.mxu1 %v8744_v18  ;;  %v3430_v18 = vadd.f32 %v8496_v44, %v8472_v19  ;;  %v4955_v19 = vld [vmem:[#allocation10 + $0x1d0] sm:$0xff]  ;;  %v3433_v44 = vadd.f32 %v8528_v53, %v8491_v6  ;;  %v3436_v6 = vadd.f32 %v8557_v13, %v8514_v49  ;;  %v8938_v53 = vld [vmem:[#allocation3 + $0x1a8] sm:$0xff] }
 0x512   : > { %4998 = vmatpush.msra.mxu3 %v4955_v19  ;;  %v4954_v13 = vld [vmem:[#allocation10 + $0x1c8] sm:$0xff] }
 0x513   : > { %v8889_v14 = vadd.f32 %v3762_v9, %v3650_v36  ;;  %3815 = vmatmul.f32.gmra.mxu3 %v8898_v8  ;;  %v3765_v47 = vpop.f32.mrf.mxu3  ;;  %v8910_v36 = vld [vmem:[#allocation3 + $0x188] sm:$0xff]  ;;  %v3543_v41 = vadd.f32 %v8652_v11, %v3430_v18  ;;  %v10809_v18 = vld [vmem:[#allocation79_spill] sm:$0xff] }
 0x514   : > { %4999 = vmatpush.msra.mxu3 %v4954_v13 }
 0x515   : > { %3699 = vmatmul.f32.gmra.mxu2 %v8893_v29 }
 0x516   : > { %4067 = vmatmul.f32.gmra.mxu0 %v8458_v28  ;;  %v3970_v28 = vld [vmem:[#allocation8 + $0x408] sm:$0xff] }
 0x517   : > { %4225 = vmatpush.msra.mxu2 %v3970_v28  ;;  %v8953_v28 = vld [vmem:[#allocation3 + $0x1b0] sm:$0xff] }
 0x518   : > { %v3652_v60 = vpop.f32.mrf.mxu2  ;;  %v8902_v9 = vpop.f32.mrf.mxu1 }
 0x519   : > { %v3653_v54 = vadd.f32 %v3652_v60, %v3540_v16  ;;  %4144 = vmatmul.f32.gmra.mxu1 %v8756_v17  ;;  %v8923_v60 = vld [vmem:[#allocation3 + $0x190] sm:$0xff] }
 0x51b   : > { %v8904_v24 = vadd.f32 %v3765_v47, %v3653_v54  ;;  %3818 = vmatmul.f32.gmra.mxu3 %v8463_v32  ;;  %v8927_v32 = vpop.f32.mrf.mxu0 }
 0x51d   : > { %3702 = vmatmul.f32.gmra.mxu2 %v8910_v36 }
 0x51e   : > { %4070 = vmatmul.f32.gmra.mxu0 %v8477_v61  ;;  %v3546_v61 = vadd.f32 %v8665_v39, %v3433_v44 }
 0x520   : > { %v3655_v59 = vpop.f32.mrf.mxu2  ;;  %v8919_v16 = vpop.f32.mrf.mxu1 }
 0x521   : > { %v8917_v56 = vadd.f32 %v3655_v59, %v3543_v41  ;;  %4147 = vmatmul.f32.gmra.mxu1 %v8767_v50 }
 0x523   : > { %3821 = vmatmul.f32.gmra.mxu3 %v8479_v3  ;;  %v3969_v3 = vld [vmem:[#allocation8 + $0x400] sm:$0xff]  ;;  %v8945_v50 = vpop.f32.mrf.mxu0 }
 0x524   : > { %4226 = vmatpush.msra.mxu2 %v3969_v3  ;;  %v8968_v3 = vld [vmem:[#allocation3 + $0x1c8] sm:$0xff] }
 0x525   : > { %3705 = vmatmul.f32.gmra.mxu2 %v8923_v60 }
 0x526   : > { %4073 = vmatmul.f32.gmra.mxu0 %v8498_v20  ;;  %v3549_v20 = vadd.f32 %v8678_v7, %v3436_v6  ;;  %v10812_v7 = vld [vmem:[#allocation46_spill] sm:$0xff] }
 0x528   : > { %v3658_v11 = vpop.f32.mrf.mxu2  ;;  %v8934_v54 = vpop.f32.mrf.mxu1 }
 0x529   : > { %v8932_v17 = vadd.f32 %v3658_v11, %v3546_v61  ;;  %4150 = vmatmul.f32.gmra.mxu1 %v8782_v30  ;;  %v3439_v30 = vadd.f32 %v10809_v18, %v8537_v31  ;;  %v10814_v31 = vld [vmem:[#allocation47_spill] sm:$0xff]  ;;  %v10815_v11 = vld [vmem:[#allocation80_spill] sm:$0xff] }
 0x52a   : > { %v3442_v6 = vadd.f32 %v10815_v11, %v10814_v31  ;;  %v10822_v11 = vld [vmem:[#allocation43_spill] sm:$0xff] }
 0x52b   : > { %10807 = vst [vmem:[#allocation23_spill] sm:$0xff] %v8932_v17  ;;  %3824 = vmatmul.f32.gmra.mxu3 %v8504_v21  ;;  %v10810_v21 = vld [vmem:[#allocation76_spill] sm:$0xff]  ;;  %v3552_v41 = vadd.f32 %v10812_v7, %v3439_v30  ;;  %v8962_v44 = vpop.f32.mrf.mxu0 }
 0x52d   : > { %3708 = vmatmul.f32.gmra.mxu2 %v8938_v53 }
 0x52e   : > { %4076 = vmatmul.f32.gmra.mxu0 %v8519_v40  ;;  %v10811_v40 = vld [vmem:[#allocation45_spill] sm:$0xff] }
 0x530   : > { %v3661_v39 = vpop.f32.mrf.mxu2  ;;  %v8949_v49 = vpop.f32.mrf.mxu1 }
 0x531   : > { %v8947_v47 = vadd.f32 %v3661_v39, %v3549_v20  ;;  %4153 = vmatmul.f32.gmra.mxu1 %v8798_v51  ;;  %v10816_v51 = vld [vmem:[#allocation24_spill] sm:$0xff]  ;;  %v10817_v20 = vld [vmem:[#allocation33_spill] sm:$0xff] }
 0x532   : > { %v10818_v39 = vld [vmem:[#allocation48_spill] sm:$0xff] }
 0x533   : > { %10808 = vst [vmem:[#allocation84_spill] sm:$0xff] %v8947_v47  ;;  %3827 = vmatmul.f32.gmra.mxu3 %v10811_v40  ;;  %v3555_v13 = vadd.f32 %v10818_v39, %v3442_v6  ;;  %v4953_v40 = vld [vmem:[#allocation10 + $0x1c0] sm:$0xff]  ;;  %v8979_v7 = vpop.f32.mrf.mxu0  ;;  %v10825_v6 = vld [vmem:[#allocation65_spill] sm:$0xff] }
 0x534   : > { %5000 = vmatpush.msra.mxu3 %v4953_v40  ;;  %v10828_v40 = vld [vmem:[#allocation28_spill] sm:$0xff]  ;;  %v10829_v47 = vld [vmem:[#allocation31_spill] sm:$0xff] }
 0x535   : > { %3711 = vmatmul.f32.gmra.mxu2 %v8953_v28 }
 0x536   : > { %4079 = vmatmul.f32.gmra.mxu0 %v10810_v21 }
 0x538   : > { %v3664_v59 = vpop.f32.mrf.mxu2  ;;  %v8964_v61 = vpop.f32.mrf.mxu1 }
 0x539   : > { %v8960_v19 = vadd.f32 %v3664_v59, %v3552_v41  ;;  %4156 = vmatmul.f32.gmra.mxu1 %v8814_v27  ;;  %v10820_v41 = vld [vmem:[#allocation82_spill] sm:$0xff]  ;;  %v10821_v59 = vld [vmem:[#allocation35_spill] sm:$0xff] }
 0x53a   : > { %v3445_v31 = vadd.f32 %v10821_v59, %v10820_v41  ;;  %v10823_v27 = vld [vmem:[#allocation34_spill] sm:$0xff]  ;;  %v10831_v59 = vld [vmem:[#allocation49_spill] sm:$0xff] }
 0x53b   : > { %10813 = vst [vmem:[#allocation41_spill] sm:$0xff] %v8960_v19  ;;  %3830 = vmatmul.f32.gmra.mxu3 %v10817_v20  ;;  %v8996_v41 = vpop.f32.mrf.mxu0 }
 0x53c   : > { %v3558_v20 = vadd.f32 %v10825_v6, %v3445_v31 }
 0x53d   : > { %3714 = vmatmul.f32.gmra.mxu2 %v8968_v3 }
 0x53e   : > { %4082 = vmatmul.f32.gmra.mxu0 %v10816_v51  ;;  %v10824_v51 = vld [vmem:[#allocation77_spill] sm:$0xff] }
 0x540   : > { %v3667_v18 = vpop.f32.mrf.mxu2  ;;  %v8977_v21 = vpop.f32.mrf.mxu1 }
 0x541   : > { %v8975_v30 = vadd.f32 %v3667_v18, %v3555_v13  ;;  %4159 = vmatmul.f32.gmra.mxu1 %v8830_v26  ;;  %v10830_v26 = vld [vmem:[#allocation86_spill] sm:$0xff] }
 0x543   : > { %10819 = vst [vmem:[#allocation25_spill] sm:$0xff] %v8975_v30  ;;  %3833 = vmatmul.f32.gmra.mxu3 %v10824_v51  ;;  %v10827_v30 = vld [vmem:[#allocation26_spill] sm:$0xff] }
 0x544   : > { %v3448_v19 = vadd.f32 %v10828_v40, %v10827_v30  ;;  %v10834_v30 = vld [vmem:[#allocation83_spill] sm:$0xff]  ;;  %v10836_v40 = vld [vmem:[#allocation74_spill] sm:$0xff] }
 0x545   : > { %3717 = vmatmul.f32.gmra.mxu2 %v10822_v11  ;;  %v10832_v11 = vld [vmem:[#allocation32_spill] sm:$0xff] }
 0x546   : > { %4085 = vmatmul.f32.gmra.mxu0 %v10823_v27  ;;  %v3561_v31 = vadd.f32 %v10832_v11, %v3448_v19  ;;  %v10839_v11 = vld [vmem:[#allocation51_spill] sm:$0xff] }
 0x548   : > { %v3670_v39 = vpop.f32.mrf.mxu2  ;;  %v8990_v18 = vpop.f32.mrf.mxu1 }
 0x549   : > { %v8988_v13 = vadd.f32 %v3670_v39, %v3558_v20  ;;  %4162 = vmatmul.f32.gmra.mxu1 %v8844_v0  ;;  %v4952_v20 = vld [vmem:[#allocation10 + $0x1b8] sm:$0xff]  ;;  %v10835_v39 = vld [vmem:[#allocation36_spill] sm:$0xff]  ;;  %v10837_v0 = vld [vmem:[#allocation73_spill] sm:$0xff] }
 0x54a   : > { %5001 = vmatpush.msra.mxu3 %v4952_v20  ;;  %v10841_v20 = vld [vmem:[#allocation53_spill] sm:$0xff] }
 0x54b   : > { %10826 = vst [vmem:[#allocation27_spill] sm:$0xff] %v8988_v13  ;;  %3836 = vmatmul.f32.gmra.mxu3 %v10831_v59 }
 0x54d   : > { %3720 = vmatmul.f32.gmra.mxu2 %v10829_v47  ;;  %v3451_v47 = vadd.f32 %v10835_v39, %v10834_v30 }
 0x54e   : > { %4088 = vmatmul.f32.gmra.mxu0 %v10830_v26 }
 0x54f   : > { %v3564_v26 = vadd.f32 %v10837_v0, %v3451_v47  ;;  %v4951_v47 = vld [vmem:[#allocation10 + $0x1b0] sm:$0xff]  ;;  %v10845_v0 = vld [vmem:[#allocation66_spill] sm:$0xff] }
 0x550   : > { %v3673_v27 = vpop.f32.mrf.mxu2  ;;  %v9003_v6 = vpop.f32.mrf.mxu1  ;;  %5002 = vmatpush.msra.mxu3 %v4951_v47  ;;  %v10851_v47 = vld [vmem:[#allocation40_spill] sm:$0xff] }
 0x551   : > { %v9001_v51 = vadd.f32 %v3673_v27, %v3561_v31  ;;  %4165 = vmatmul.f32.gmra.mxu1 %v8860_v1  ;;  %v10840_v31 = vld [vmem:[#allocation88_spill] sm:$0xff] }
 0x552   : > { %v3454_v27 = vadd.f32 %v10840_v31, %v10839_v11  ;;  %v9027_v11 = vpop.f32.mrf.mxu0 }
 0x553   : > { %10833 = vst [vmem:[#allocation29_spill] sm:$0xff] %v9001_v51  ;;  %v10842_v51 = vld [vmem:[#allocation75_spill] sm:$0xff] }
 0x554   : > { %v3567_v30 = vadd.f32 %v10842_v51, %v3454_v27 }
 0x555   : > { %3723 = vmatmul.f32.gmra.mxu2 %v10836_v40 }
 0x558   : > { %v3676_v13 = vpop.f32.mrf.mxu2  ;;  %v9012_v19 = vpop.f32.mrf.mxu1 }
 0x559   : > { %v9010_v59 = vadd.f32 %v3676_v13, %v3564_v26  ;;  %4168 = vmatmul.f32.gmra.mxu1 %v8876_v62  ;;  %v10844_v13 = vld [vmem:[#allocation85_spill] sm:$0xff] }
 0x55a   : > { %v3457_v26 = vadd.f32 %v10845_v0, %v10844_v13  ;;  %v10847_v62 = vld [vmem:[#allocation37_spill] sm:$0xff]  ;;  %v9039_v0 = vpop.f32.mrf.mxu0 }
 0x55b   : > { %10838 = vst [vmem:[#allocation79_spill] sm:$0xff] %v9010_v59  ;;  %v10846_v59 = vld [vmem:[#allocation38_spill] sm:$0xff]  ;;  %v10852_v13 = vld [vmem:[#allocation81_spill] sm:$0xff] }
 0x55c   : > { %v3570_v31 = vadd.f32 %v10847_v62, %v3457_v26  ;;  %v4950_v62 = vld [vmem:[#allocation10 + $0x1a8] sm:$0xff] }
 0x55d   : > { %4227 = vmatmul.f32.vlgmr.msra.gmra.mxu2 %v10841_v20  ;;  %5003 = vmatpush.msra.mxu3 %v4950_v62  ;;  %v10860_v62 = vld [vmem:[#allocation59_spill] sm:$0xff] }
 0x560   : > { %v3679_v39 = vpop.f32.mrf.mxu2  ;;  %v9021_v1 = vpop.f32.mrf.mxu1 }
 0x561   : > { %v9019_v40 = vadd.f32 %v3679_v39, %v3567_v30  ;;  %4171 = vmatmul.f32.gmra.mxu1 %v8893_v29  ;;  %v10849_v30 = vld [vmem:[#allocation87_spill] sm:$0xff]  ;;  %v10850_v39 = vld [vmem:[#allocation89_spill] sm:$0xff] }
 0x563   : > { %10843 = vst [vmem:[#allocation76_spill] sm:$0xff] %v9019_v40  ;;  %v3460_v40 = vadd.f32 %v10850_v39, %v10849_v30  ;;  %v10856_v30 = vld [vmem:[#allocation67_spill] sm:$0xff] }
 0x565   : > { %4230 = vmatmul.f32.gmra.mxu2 %v10846_v59  ;;  %v3573_v29 = vadd.f32 %v10852_v13, %v3460_v40 }
 0x568   : > { %v3682_v20 = vpop.f32.mrf.mxu2  ;;  %v9032_v27 = vpop.f32.mrf.mxu1 }
 0x569   : > { %v9030_v51 = vadd.f32 %v3682_v20, %v3570_v31  ;;  %4174 = vmatmul.f32.gmra.mxu1 %v8910_v36  ;;  %v10854_v31 = vld [vmem:[#allocation30_spill] sm:$0xff]  ;;  %v10855_v20 = vld [vmem:[#allocation44_spill] sm:$0xff] }
 0x56b   : > { %10848 = vst [vmem:[#allocation45_spill] sm:$0xff] %v9030_v51  ;;  %v3463_v51 = vadd.f32 %v10855_v20, %v10854_v31 }
 0x56d   : > { %4233 = vmatmul.f32.gmra.mxu2 %v10851_v47  ;;  %v3576_v36 = vadd.f32 %v8792_v48, %v3463_v51  ;;  %v9052_v47 = vpop.f32.mrf.mxu0  ;;  %v4949_v51 = vld [vmem:[#allocation10 + $0x1a0] sm:$0xff] }
 0x56e   : > { %5004 = vmatpush.msra.mxu3 %v4949_v51  ;;  %v10868_v51 = vld [vmem:[#allocation90_spill] sm:$0xff] }
 0x570   : > { %v3685_v59 = vpop.f32.mrf.mxu2  ;;  %v9043_v26 = vpop.f32.mrf.mxu1 }
 0x571   : > { %v9041_v17 = vadd.f32 %v3685_v59, %v3573_v29  ;;  %4177 = vmatmul.f32.gmra.mxu1 %v8923_v60  ;;  %v10858_v29 = vld [vmem:[#allocation55_spill] sm:$0xff] }
 0x572   : > { %v10859_v59 = vld [vmem:[#allocation63_spill] sm:$0xff] }
 0x573   : > { %10853 = vst [vmem:[#allocation46_spill] sm:$0xff] %v9041_v17  ;;  %v3466_v17 = vadd.f32 %v10859_v59, %v10858_v29  ;;  %v10864_v29 = vld [vmem:[#allocation61_spill] sm:$0xff]  ;;  %v9072_v59 = vpop.f32.mrf.mxu3 }
 0x575   : > { %4236 = vmatmul.f32.gmra.mxu2 %v10856_v30  ;;  %v3579_v60 = vadd.f32 %v8808_v2, %v3466_v17  ;;  %v9065_v30 = vpop.f32.mrf.mxu0 }
 0x578   : > { %v3688_v39 = vpop.f32.mrf.mxu2  ;;  %v9054_v13 = vpop.f32.mrf.mxu1 }
 0x579   : > { %v9050_v40 = vadd.f32 %v3688_v39, %v3576_v36  ;;  %4180 = vmatmul.f32.gmra.mxu1 %v8938_v53  ;;  %v10862_v36 = vld [vmem:[#allocation57_spill] sm:$0xff]  ;;  %v10863_v39 = vld [vmem:[#allocation64_spill] sm:$0xff] }
 0x57b   : > { %10857 = vst [vmem:[#allocation47_spill] sm:$0xff] %v9050_v40  ;;  %v3469_v40 = vadd.f32 %v10863_v39, %v10862_v36 }
 0x57d   : > { %4239 = vmatmul.f32.gmra.mxu2 %v10860_v62  ;;  %v3582_v53 = vadd.f32 %v8822_v4, %v3469_v40  ;;  %v9082_v36 = vpop.f32.mrf.mxu0  ;;  %v9087_v40 = vpop.f32.mrf.mxu3 }
 0x57e   : > { %10869 = vst [vmem:[#allocation33_spill] sm:$0xff] %v9082_v36 }
 0x57f   : > { %10871 = vst [vmem:[#allocation82_spill] sm:$0xff] %v9087_v40 }
 0x580   : > { %v3691_v31 = vpop.f32.mrf.mxu2  ;;  %v9063_v48 = vpop.f32.mrf.mxu1 }
 0x581   : > { %v9061_v20 = vadd.f32 %v3691_v31, %v3579_v60  ;;  %4183 = vmatmul.f32.gmra.mxu1 %v8953_v28  ;;  %v10866_v60 = vld [vmem:[#allocation42_spill] sm:$0xff]  ;;  %v10867_v31 = vld [vmem:[#allocation52_spill] sm:$0xff] }
 0x583   : > { %10861 = vst [vmem:[#allocation80_spill] sm:$0xff] %v9061_v20  ;;  %v3472_v20 = vadd.f32 %v10867_v31, %v10866_v60  ;;  %v6685_v31 = vld [vmem:[#allocation3 + $0x1d0] sm:$0xff] }
 0x585   : > { %4242 = vmatmul.f32.gmra.mxu2 %v10864_v29  ;;  %v3585_v28 = vadd.f32 %v8838_v35, %v3472_v20  ;;  %v4948_v29 = vld [vmem:[#allocation10 + $0x198] sm:$0xff]  ;;  %v9095_v36 = vpop.f32.mrf.mxu0 }
 0x586   : > { %5005 = vmatpush.msra.mxu3 %v4948_v29  ;;  %10876 = vst [vmem:[#allocation43_spill] sm:$0xff] %v9095_v36  ;;  %v6686_v29 = vld [vmem:[#allocation3 + $0x1e8] sm:$0xff]  ;;  %v6687_v36 = vld [vmem:[#allocation3 + $0x1f0] sm:$0xff] }
 0x588   : > { %v3694_v2 = vpop.f32.mrf.mxu2  ;;  %v9076_v62 = vpop.f32.mrf.mxu1 }
 0x589   : > { %v9074_v17 = vadd.f32 %v3694_v2, %v3582_v53  ;;  %4186 = vmatmul.f32.gmra.mxu1 %v8968_v3  ;;  %v10873_v2 = vld [vmem:[#allocation68_spill] sm:$0xff]  ;;  %v10875_v3 = vld [vmem:[#allocation71_spill] sm:$0xff] }
 0x58b   : > { %10865 = vst [vmem:[#allocation24_spill] sm:$0xff] %v9074_v17  ;;  %v10874_v17 = vld [vmem:[#allocation21_spill] sm:$0xff] }
 0x58c   : > { %v3475_v60 = vadd.f32 %v10874_v17, %v10873_v2 }
 0x58d   : > { %4245 = vmatmul.f32.gmra.mxu2 %v10868_v51 }
 0x58e   : > { %v3588_v51 = vadd.f32 %v8854_v43, %v3475_v60  ;;  %v9109_v60 = vpop.f32.mrf.mxu0 }
 0x590   : > { %v3697_v39 = vpop.f32.mrf.mxu2  ;;  %v9089_v53 = vpop.f32.mrf.mxu1 }
 0x591   : > { %v9085_v4 = vadd.f32 %v3697_v39, %v3585_v28  ;;  %10872 = vst [vmem:[#allocation35_spill] sm:$0xff] %v9089_v53  ;;  %4189 = vmatmul.f32.gmra.mxu1 %v6685_v31  ;;  %v9099_v28 = vpop.f32.mrf.mxu3  ;;  %v10878_v39 = vld [vmem:[#allocation69_spill] sm:$0xff]  ;;  %v10880_v53 = vld [vmem:[#allocation72_spill] sm:$0xff] }
 0x593   : > { %10870 = vst [vmem:[#allocation48_spill] sm:$0xff] %v9085_v4  ;;  %v10879_v4 = vld [vmem:[#allocation58_spill] sm:$0xff] }
 0x594   : > { %v3478_v40 = vadd.f32 %v10879_v4, %v10878_v39  ;;  %v10884_v4 = vld [vmem:[#allocation54_spill] sm:$0xff] }
 0x595   : > { %4248 = vmatmul.f32.gmra.mxu2 %v10875_v3  ;;  %v4947_v3 = vld [vmem:[#allocation10 + $0x190] sm:$0xff] }
 0x596   : > { %v3591_v2 = vadd.f32 %v8870_v23, %v3478_v40  ;;  %5006 = vmatpush.msra.mxu3 %v4947_v3  ;;  %v10887_v3 = vld [vmem:[#allocation50_spill] sm:$0xff] }
 0x598   : > { %v3700_v35 = vpop.f32.mrf.mxu2  ;;  %v9104_v17 = vpop.f32.mrf.mxu1 }
 0x599   : > { %v9097_v20 = vadd.f32 %v3700_v35, %v3588_v51  ;;  %4192 = vmatmul.f32.gmra.mxu1 %v6686_v29  ;;  %v10882_v51 = vld [vmem:[#allocation70_spill] sm:$0xff]  ;;  %v10883_v35 = vld [vmem:[#allocation60_spill] sm:$0xff]  ;;  %v9114_v39 = vpop.f32.mrf.mxu3 }
 0x59b   : > { %10877 = vst [vmem:[#allocation34_spill] sm:$0xff] %v9097_v20  ;;  %v3481_v20 = vadd.f32 %v10883_v35, %v10882_v51  ;;  %v6688_v51 = vld [vmem:[#allocation3 + $0x208] sm:$0xff]  ;;  %v4975_v35 = vld [vmem:[#allocation10 + $0x270] sm:$0xff] }
 0x59d   : > { %4251 = vmatmul.f32.gmra.mxu2 %v10880_v53  ;;  %v3594_v53 = vadd.f32 %v8887_v45, %v3481_v20 }
 0x5a0   : > { %v3703_v31 = vpop.f32.mrf.mxu2  ;;  %v9117_v29 = vpop.f32.mrf.mxu1 }
 0x5a1   : > { %v9107_v43 = vadd.f32 %v3703_v31, %v3591_v2  ;;  %4195 = vmatmul.f32.gmra.mxu1 %v6687_v36  ;;  %v9121_v2 = vpop.f32.mrf.mxu0  ;;  %v4976_v31 = vld [vmem:[#allocation10 + $0x278] sm:$0xff]  ;;  %v10888_v36 = vld [vmem:[#allocation56_spill] sm:$0xff]  ;;  %v9127_v45 = vpop.f32.mrf.mxu3 }
 0x5a2   : > { %10886 = vst [vmem:[#allocation26_spill] sm:$0xff] %v9121_v2  ;;  %5106 = vmatpush.msrb.mxu0 %v4976_v31  ;;  %v4973_v2 = vld [vmem:[#allocation10 + $0x260] sm:$0xff] }
 0x5a3   : > { %10881 = vst [vmem:[#allocation77_spill] sm:$0xff] %v9107_v43  ;;  %v3484_v43 = vadd.f32 %v8790_v63, %v10887_v3  ;;  %v4946_v63 = vld [vmem:[#allocation10 + $0x188] sm:$0xff]  ;;  %v4972_v3 = vld [vmem:[#allocation10 + $0x258] sm:$0xff] }
 0x5a4   : > { %5107 = vmatpush.msrb.mxu0 %v4975_v35  ;;  %5007 = vmatpush.msra.mxu3 %v4946_v63  ;;  %v4971_v35 = vld [vmem:[#allocation10 + $0x250] sm:$0xff]  ;;  %v4969_v63 = vld [vmem:[#allocation10 + $0x240] sm:$0xff] }
 0x5a5   : > { %4254 = vmatmul.f32.gmra.mxu2 %v10884_v4  ;;  %v3597_v4 = vadd.f32 %v8902_v9, %v3484_v43  ;;  %v10891_v9 = vld [vmem:[#allocation17_spill] sm:$0xff] }
 0x5a8   : > { %v3706_v23 = vpop.f32.mrf.mxu2 }
 0x5a9   : > { %v9119_v40 = vadd.f32 %v3706_v23, %v3594_v53  ;;  %4198 = vmatmul.f32.gmra.mxu1 %v6688_v51  ;;  %v4974_v53 = vld [vmem:[#allocation10 + $0x268] sm:$0xff]  ;;  %v9136_v43 = vpop.f32.mrf.mxu0 }
 0x5aa   : > { %5108 = vmatpush.msrb.mxu0 %v4974_v53  ;;  %v10890_v51 = vld [vmem:[#allocation16_spill] sm:$0xff]  ;;  %10892 = vst [vmem:[#allocation31_spill] sm:$0xff] %v9136_v43 }
 0x5ab   : > { %10885 = vst [vmem:[#allocation65_spill] sm:$0xff] %v9119_v40  ;;  %v9131_v40 = vpop.f32.mrf.mxu1  ;;  %v3487_v31 = vadd.f32 %v8806_v37, %v10890_v51  ;;  %v4970_v53 = vld [vmem:[#allocation10 + $0x248] sm:$0xff]  ;;  %v4992_v37 = vld [vmem:[#allocation10 + $0x2f8] sm:$0xff] }
 0x5ac   : > { %5109 = vmatpush.msrb.mxu0 %v4973_v2  ;;  %v9141_v2 = vpop.f32.mrf.mxu3  ;;  %v2691_v51 = vld [vmem:[#allocation3 + $0x227] sm:$0xff]  ;;  %5219 = vmatpush.msrb.mxu1 %v4992_v37 }
 0x5ad   : > { %4257 = vmatmul.f32.gmra.mxu2 %v10888_v36  ;;  %v6689_v36 = vld [vmem:[#allocation3 + $0x210] sm:$0xff]  ;;  %10894 = vst [vmem:[#allocation49_spill] sm:$0xff] %v9141_v2  ;;  %4091 = vmatmul.f32.gmra.mxu0 %v2691_v51  ;;  %v4990_v37 = vld [vmem:[#allocation10 + $0x2e8] sm:$0xff] }
 0x5ae   : > { %5110 = vmatpush.msrb.mxu0 %v4972_v3  ;;  %v10895_v3 = vld [vmem:[#allocation15_spill] sm:$0xff]  ;;  %v2692_v51 = vld [vmem:[#allocation3 + $0x22f] sm:$0xff] }
 0x5af   : > { %v3490_v43 = vadd.f32 %v8826_v22, %v10895_v3  ;;  %v4989_v22 = vld [vmem:[#allocation10 + $0x2e0] sm:$0xff] }
 0x5b0   : > { %v3709_v20 = vpop.f32.mrf.mxu2  ;;  %5111 = vmatpush.msrb.mxu0 %v4971_v35  ;;  %v4967_v35 = vld [vmem:[#allocation10 + $0x230] sm:$0xff]  ;;  %v4965_v3 = vld [vmem:[#allocation10 + $0x220] sm:$0xff] }
 0x5b1   : > { %v9129_v23 = vadd.f32 %v3709_v20, %v3597_v4  ;;  %4201 = vmatmul.f32.gmra.mxu1 %v6689_v36  ;;  %v3600_v4 = vadd.f32 %v8919_v16, %v3487_v31  ;;  %v10896_v16 = vld [vmem:[#allocation20_spill] sm:$0xff]  ;;  %v4991_v31 = vld [vmem:[#allocation10 + $0x2f0] sm:$0xff] }
 0x5b2   : > { %5112 = vmatpush.msrb.mxu0 %v4970_v53  ;;  %5220 = vmatpush.msrb.mxu1 %v4991_v31  ;;  %v9149_v53 = vpop.f32.mrf.mxu0 }
 0x5b3   : > { %10889 = vst [vmem:[#allocation28_spill] sm:$0xff] %v9129_v23  ;;  %v9143_v36 = vpop.f32.mrf.mxu1 }
 0x5b4   : > { %5113 = vmatpush.msrb.mxu0 %v4969_v63  ;;  %v4966_v63 = vld [vmem:[#allocation10 + $0x228] sm:$0xff]  ;;  %5221 = vmatpush.msrb.mxu1 %v4990_v37 }
 0x5b5   : > { %4260 = vmatmul.f32.gmra.mxu2 %v10891_v9  ;;  %v4968_v9 = vld [vmem:[#allocation10 + $0x238] sm:$0xff]  ;;  %4094 = vmatmul.f32.gmra.mxu0 %v2692_v51  ;;  %v4961_v51 = vld [vmem:[#allocation10 + $0x200] sm:$0xff] }
 0x5b6   : > { %5114 = vmatpush.msrb.mxu0 %v4968_v9  ;;  %5222 = vmatpush.msrb.mxu1 %v4989_v22  ;;  %v9153_v9 = vpop.f32.mrf.mxu3  ;;  %v4986_v22 = vld [vmem:[#allocation10 + $0x2c8] sm:$0xff] }
 0x5b8   : > { %v3712_v20 = vpop.f32.mrf.mxu2  ;;  %5115 = vmatpush.msrb.mxu0 %v4967_v35 }
 0x5b9   : > { %v9139_v23 = vadd.f32 %v3712_v20, %v3600_v4  ;;  %v3603_v4 = vadd.f32 %v8934_v54, %v3490_v43  ;;  %v6690_v20 = vld [vmem:[#allocation2] sm:$0xff]  ;;  %v4964_v54 = vld [vmem:[#allocation10 + $0x218] sm:$0xff] }
 0x5ba   : > { %4204 = vmatmul.f32.gmra.mxu1 %v6690_v20  ;;  %5116 = vmatpush.msrb.mxu0 %v4966_v63  ;;  %v10898_v43 = vld [vmem:[#allocation18_spill] sm:$0xff] }
 0x5bb   : > { %10893 = vst [vmem:[#allocation86_spill] sm:$0xff] %v9139_v23  ;;  %v3493_v31 = vadd.f32 %v8848_v55, %v10898_v43  ;;  %v9158_v35 = vpop.f32.mrf.mxu1  ;;  %v9163_v55 = vpop.f32.mrf.mxu0  ;;  %v4984_v43 = vld [vmem:[#allocation10 + $0x2b8] sm:$0xff] }
 0x5bc   : > { %5117 = vmatpush.msrb.mxu0 %v4965_v3 }
 0x5bd   : > { %4263 = vmatmul.f32.gmra.mxu2 %v10896_v16  ;;  %v4988_v16 = vld [vmem:[#allocation10 + $0x2d8] sm:$0xff]  ;;  %v3606_v37 = vadd.f32 %v8949_v49, %v3493_v31  ;;  %v4983_v31 = vld [vmem:[#allocation10 + $0x2b0] sm:$0xff] }
 0x5be   : > { %5223 = vmatpush.msrb.mxu1 %v4988_v16  ;;  %5118 = vmatpush.msrb.mxu0 %v4964_v54  ;;  %v4945_v16 = vld [vmem:[#allocation10 + $0x180] sm:$0xff]  ;;  %v10900_v49 = vld [vmem:[#allocation78_spill] sm:$0xff] }
 0x5bf   : > { %5008 = vmatpush.msra.mxu3 %v4945_v16  ;;  %v3496_v54 = vadd.f32 %v8868_v52, %v10900_v49 }
 0x5c0   : > { %v3715_v23 = vpop.f32.mrf.mxu2 }
 0x5c1   : > { %v9151_v2 = vadd.f32 %v3715_v23, %v3603_v4  ;;  %v4987_v23 = vld [vmem:[#allocation10 + $0x2d0] sm:$0xff] }
 0x5c2   : > { %v4963_v4 = vld [vmem:[#allocation10 + $0x210] sm:$0xff]  ;;  %5224 = vmatpush.msrb.mxu1 %v4987_v23  ;;  %v3609_v23 = vadd.f32 %v8964_v61, %v3496_v54  ;;  %v4978_v54 = vld [vmem:[#allocation10 + $0x288] sm:$0xff] }
 0x5c3   : > { %10897 = vst [vmem:[#allocation32_spill] sm:$0xff] %v9151_v2  ;;  %v4962_v2 = vld [vmem:[#allocation10 + $0x208] sm:$0xff]  ;;  %4207 = vmatmul.f32.gmra.mxu1 %v6690_v20  ;;  %5119 = vmatpush.msrb.mxu0 %v4963_v4  ;;  %v9168_v20 = vpop.f32.mrf.mxu3  ;;  %v9171_v4 = vpop.f32.mrf.mxu1  ;;  %v4979_v61 = vld [vmem:[#allocation10 + $0x290] sm:$0xff] }
 0x5c4   : > { %5225 = vmatpush.msrb.mxu1 %v4986_v22  ;;  %v4981_v22 = vld [vmem:[#allocation10 + $0x2a0] sm:$0xff]  ;;  %v9175_v52 = vpop.f32.mrf.mxu0 }
 0x5c5   : > { %4266 = vmatmul.f32.gmra.mxu2 %v8786_v12  ;;  %v4985_v12 = vld [vmem:[#allocation10 + $0x2c0] sm:$0xff]  ;;  %5120 = vmatpush.msrb.mxu0 %v4962_v2  ;;  %v4982_v2 = vld [vmem:[#allocation10 + $0x2a8] sm:$0xff] }
 0x5c6   : > { %5226 = vmatpush.msrb.mxu1 %v4985_v12  ;;  %v10902_v12 = vld [vmem:[#allocation22_spill] sm:$0xff] }
 0x5c7   : > { %5121 = vmatpush.msrb.mxu0 %v4961_v51  ;;  %v3499_v16 = vadd.f32 %v8885_v57, %v10902_v12  ;;  %v4116_v57 = vadd.f32 %v8990_v18, %v8906_v58  ;;  %v9195_v12 = vld [vmem:[%s10469_s5 + $0x4] ss:$0 sm:$0xff]  ;;  %v4119_v18 = vadd.f32 %v9003_v6, %v8927_v32  ;;  %v4122_v6 = vadd.f32 %v9012_v19, %v8945_v50 }
 0x5c8   : > { %v3718_v63 = vpop.f32.mrf.mxu2  ;;  %5227 = vmatpush.msrb.mxu1 %v4984_v43  ;;  %v4125_v19 = vadd.f32 %v9021_v1, %v8962_v44  ;;  %v4128_v1 = vadd.f32 %v9032_v27, %v8979_v7  ;;  %v6691_v7 = vld [vmem:[#allocation3 + $0x191] sm:$0xff] }
 0x5c9   : > { %v9161_v3 = vadd.f32 %v3718_v63, %v3606_v37  ;;  %v3612_v51 = vadd.f32 %v8977_v21, %v3499_v16 }
 0x5ca   : > { %5228 = vmatpush.msrb.mxu1 %v4983_v31 }
 0x5cb   : > { %10899 = vst [vmem:[#allocation83_spill] sm:$0xff] %v9161_v3  ;;  %v9181_v43 = vpop.f32.mrf.mxu3 }
 0x5cc   : > { %5229 = vmatpush.msrb.mxu1 %v4982_v2  ;;  %v4815_v2 = vld [vmem:[#allocation10 + $0x78] sm:$0xff] }
 0x5cd   : > { %4269 = vmatmul.f32.gmra.mxu2 %v8802_v38  ;;  %v4980_v38 = vld [vmem:[#allocation10 + $0x298] sm:$0xff] }
 0x5ce   : > { %5230 = vmatpush.msrb.mxu1 %v4981_v22  ;;  %v4831_v22 = vld [vmem:[#allocation10 + $0xf8] sm:$0xff]  ;;  %5332 = vmatpush.msrb.mxu2 %v4815_v2 }
 0x5cf   : > { %5445 = vmatpush.msrb.mxu3 %v4831_v22 }
 0x5d0   : > { %v3721_v37 = vpop.f32.mrf.mxu2  ;;  %5231 = vmatpush.msrb.mxu1 %v4980_v38 }
 0x5d1   : > { %v9173_v63 = vadd.f32 %v3721_v37, %v3609_v23  ;;  %v9185_v23 = vpop.f32.mrf.mxu1  ;;  %v4977_v37 = vld [vmem:[#allocation10 + $0x280] sm:$0xff] }
 0x5d2   : > { %5232 = vmatpush.msrb.mxu1 %v4979_v61  ;;  %v10904_v61 = vld [vmem:[#allocation39_spill] sm:$0xff] }
 0x5d3   : > { %10901 = vst [vmem:[#allocation36_spill] sm:$0xff] %v9173_v63  ;;  %v9197_v16 = vpop.f32.mrf.mxu3 }
 0x5d4   : > { %5233 = vmatpush.msrb.mxu1 %v4978_v54 }
 0x5d5   : > { %4272 = vmatmul.f32.gmra.mxu2 %v8818_v46  ;;  %v9188_v46 = vpop.f32.mrf.mxu0 }
 0x5d6   : > { %5234 = vmatpush.msrb.mxu1 %v4977_v37 }
 0x5d8   : > { %v3724_v49 = vpop.f32.mrf.mxu2 }
 0x5d9   : > { %v9183_v31 = vadd.f32 %v3724_v49, %v3612_v51  ;;  %v9205_v49 = vpop.f32.mrf.mxu1 }
 0x5db   : > { %10903 = vst [vmem:[#allocation74_spill] sm:$0xff] %v9183_v31  ;;  %v4830_v31 = vld [vmem:[#allocation10 + $0xf0] sm:$0xff]  ;;  %v9215_v63 = vpop.f32.mrf.mxu3 }
 0x5dc   : > { %5446 = vmatpush.msrb.mxu3 %v4830_v31 }
 0x5dd   : > { %4275 = vmatmul.f32.gmra.mxu2 %v8834_v25  ;;  %v9203_v25 = vld [vmem:[%s10469_s5 + $0x5] ss:$0 sm:$0xff]  ;;  %v9212_v37 = vpop.f32.mrf.mxu0 }
 0x5e0   : > { %v4228_v21 = vpop.f32.mrf.mxu2 }
 0x5e1   : > { %v4229_v38 = vadd.f32 %v4228_v21, %v4116_v57  ;;  %v10905_v21 = vld [vmem:[#allocation62_spill] sm:$0xff]  ;;  %v9219_v32 = vpop.f32.mrf.mxu1 }
 0x5e3   : > { %v4324_v51 = vadd.f32 %v4229_v38, %v10904_v61  ;;  %v4814_v61 = vld [vmem:[#allocation10 + $0x70] sm:$0xff]  ;;  %v9232_v50 = vpop.f32.mrf.mxu3 }
 0x5e4   : > { %5333 = vmatpush.msrb.mxu2 %v4814_v61 }
 0x5e5   : > { %v4358_v58 = vmul.f32 %v9195_v12, %v4324_v51  ;;  %4278 = vmatmul.f32.gmra.mxu2 %v8850_v15 }
 0x5e7   : > { %v4392_v54 = vadd.f32 %v9203_v25, %v4358_v58 }
 0x5e8   : > { %v4231_v2 = vpop.f32.mrf.mxu2 }
 0x5e9   : > { %v4424_v22 = vmax.f32 %v4392_v54, 0.0  ;;  %v4232_v57 = vadd.f32 %v4231_v2, %v4119_v18  ;;  %v9224_v2 = vpop.f32.mrf.mxu0 }
 0x5eb   : > { %4456 = vst [vmem:[#allocation2 + $0x28] sm:$0xff] %v4424_v22  ;;  %v4325_v38 = vadd.f32 %v4232_v57, %v10905_v21  ;;  %5122 = vmatmul.f32.vlgmr.msrb.gmra.mxu0 %v4424_v22  ;;  %v9237_v21 = vpop.f32.mrf.mxu1 }
 0x5ed   : > { %v4359_v15 = vmul.f32 %v9195_v12, %v4325_v38  ;;  %4281 = vmatmul.f32.gmra.mxu2 %v8864_v33 }
 0x5ef   : > { %v4393_v51 = vadd.f32 %v9203_v25, %v4359_v15 }
 0x5f0   : > { %v4234_v58 = vpop.f32.mrf.mxu2 }
 0x5f1   : > { %v4425_v18 = vmax.f32 %v4393_v51, 0.0  ;;  %v4235_v54 = vadd.f32 %v4234_v58, %v4122_v6  ;;  %v10906_v51 = vld [vmem:[#allocation19_spill] sm:$0xff] }
 0x5f2   : > { %v9226_v22 = vld [vmem:[#allocation2 + $0x27] sm:$0xff] }
 0x5f3   : > { %4457 = vst [vmem:[#allocation2 + $0x30] sm:$0xff] %v4425_v18  ;;  %v4326_v31 = vadd.f32 %v4235_v54, %v8824_v42  ;;  %5009 = vmatmul.f32.vlgmr.msra.gmra.mxu3 %v9226_v22  ;;  %5125 = vmatmul.f32.gmra.mxu0 %v4425_v18  ;;  %v4829_v18 = vld [vmem:[#allocation10 + $0xe8] sm:$0xff]  ;;  %v9243_v54 = vpop.f32.mrf.mxu0 }
 0x5f4   : > { %5447 = vmatpush.msrb.mxu3 %v4829_v18 }
 0x5f5   : > { %v4360_v33 = vmul.f32 %v9195_v12, %v4326_v31  ;;  %4284 = vmatmul.f32.gmra.mxu2 %v8881_v10  ;;  %v4813_v10 = vld [vmem:[#allocation10 + $0x68] sm:$0xff] }
 0x5f6   : > { %5334 = vmatpush.msrb.mxu2 %v4813_v10 }
 0x5f7   : > { %v4394_v57 = vadd.f32 %v9203_v25, %v4360_v33  ;;  %v9250_v33 = vpop.f32.mrf.mxu3 }
 0x5f8   : > { %v4237_v38 = vpop.f32.mrf.mxu2 }
 0x5f9   : > { %v4426_v61 = vmax.f32 %v4394_v57, 0.0  ;;  %v4238_v15 = vadd.f32 %v4237_v38, %v4125_v19 }
 0x5fa   : > { %v9239_v42 = vld [vmem:[#allocation2 + $0x2f] sm:$0xff] }
 0x5fb   : > { %v4634_v6 = vld [vmem:[#allocation2 + $0x29] sm:$0xff]  ;;  %4458 = vst [vmem:[#allocation2 + $0x48] sm:$0xff] %v4426_v61  ;;  %v4327_v58 = vadd.f32 %v4238_v15, %v10906_v51  ;;  %5012 = vmatmul.f32.gmra.mxu3 %v9239_v42  ;;  %5128 = vmatmul.f32.gmra.mxu0 %v4426_v61  ;;  %v9252_v15 = vpop.f32.mrf.mxu1  ;;  %v4635_v61 = vld [vmem:[#allocation2 + $0x31] sm:$0xff]  ;;  %v9259_v27 = vpop.f32.mrf.mxu0 }
 0x5fc   : > { %5235 = vmatmul.f32.vlgmr.msrb.gmra.mxu1 %v4634_v6 }
 0x5fd   : > { %v4361_v44 = vmul.f32 %v9195_v12, %v4327_v58  ;;  %4287 = vmatmul.f32.gmra.mxu2 %v8898_v8  ;;  %v4131_v58 = vadd.f32 %v9043_v26, %v8996_v41  ;;  %v6692_v26 = vld [vmem:[#allocation3 + $0x1a9] sm:$0xff] }
 0x5ff   : > { %v4395_v31 = vadd.f32 %v9203_v25, %v4361_v44 }
 0x600   : > { %v4240_v19 = vpop.f32.mrf.mxu2 }
 0x601   : > { %v4427_v57 = vmax.f32 %v4395_v31, 0.0  ;;  %v4241_v38 = vadd.f32 %v4240_v19, %v4128_v1  ;;  %v9264_v31 = vpop.f32.mrf.mxu3 }
 0x602   : > { %v9254_v6 = vld [vmem:[#allocation2 + $0x47] sm:$0xff] }
 0x603   : > { %4459 = vst [vmem:[#allocation2 + $0x50] sm:$0xff] %v4427_v57  ;;  %v4328_v51 = vadd.f32 %v4241_v38, %v8856_v34  ;;  %5015 = vmatmul.f32.gmra.mxu3 %v9254_v6  ;;  %5131 = vmatmul.f32.gmra.mxu0 %v4427_v57  ;;  %v4812_v38 = vld [vmem:[#allocation10 + $0x60] sm:$0xff] }
 0x604   : > { %5238 = vmatmul.f32.gmra.mxu1 %v4635_v61  ;;  %v4828_v61 = vld [vmem:[#allocation10 + $0xe0] sm:$0xff]  ;;  %5335 = vmatpush.msrb.mxu2 %v4812_v38 }
 0x605   : > { %v4362_v8 = vmul.f32 %v9195_v12, %v4328_v51  ;;  %4290 = vmatmul.f32.gmra.mxu2 %v6691_v7  ;;  %v9270_v51 = vpop.f32.mrf.mxu1  ;;  %5448 = vmatpush.msrb.mxu3 %v4828_v61  ;;  %v4137_v61 = vadd.f32 %v9063_v48, %v9039_v0  ;;  %v6694_v48 = vld [vmem:[#allocation3 + $0x1c9] sm:$0xff] }
 0x607   : > { %v4396_v10 = vadd.f32 %v9203_v25, %v4362_v8  ;;  %v4134_v8 = vadd.f32 %v9054_v13, %v9027_v11  ;;  %v6693_v13 = vld [vmem:[#allocation3 + $0x1b1] sm:$0xff] }
 0x608   : > { %v4243_v18 = vpop.f32.mrf.mxu2 }
 0x609   : > { %v4428_v44 = vmax.f32 %v4396_v10, 0.0  ;;  %v4244_v1 = vadd.f32 %v4243_v18, %v4131_v58 }
 0x60a   : > { %v9266_v34 = vld [vmem:[#allocation2 + $0x4f] sm:$0xff] }
 0x60b   : > { %v4636_v19 = vld [vmem:[#allocation2 + $0x49] sm:$0xff]  ;;  %4460 = vst [vmem:[#allocation2 + $0x68] sm:$0xff] %v4428_v44  ;;  %v4329_v57 = vadd.f32 %v4244_v1, %v8872_v5  ;;  %5018 = vmatmul.f32.gmra.mxu3 %v9266_v34  ;;  %5134 = vmatmul.f32.gmra.mxu0 %v4428_v44  ;;  %v9276_v5 = vpop.f32.mrf.mxu0 }
 0x60c   : > { %5241 = vmatmul.f32.gmra.mxu1 %v4636_v19  ;;  %v4637_v19 = vld [vmem:[#allocation2 + $0x51] sm:$0xff] }
 0x60d   : > { %v4363_v41 = vmul.f32 %v9195_v12, %v4329_v57  ;;  %4293 = vmatmul.f32.gmra.mxu2 %v6692_v26  ;;  %v9282_v57 = vpop.f32.mrf.mxu3  ;;  %v9285_v38 = vpop.f32.mrf.mxu1 }
 0x60f   : > { %v4397_v7 = vadd.f32 %v9203_v25, %v4363_v41 }
 0x610   : > { %v4246_v58 = vpop.f32.mrf.mxu2 }
 0x611   : > { %v4429_v10 = vmax.f32 %v4397_v7, 0.0  ;;  %v4247_v18 = vadd.f32 %v4246_v58, %v4134_v8 }
 0x612   : > { %v9278_v1 = vld [vmem:[#allocation2 + $0x67] sm:$0xff] }
 0x613   : > { %4461 = vst [vmem:[#allocation2 + $0x70] sm:$0xff] %v4429_v10  ;;  %v4330_v44 = vadd.f32 %v4247_v18, %v8889_v14  ;;  %5021 = vmatmul.f32.gmra.mxu3 %v9278_v1  ;;  %5137 = vmatmul.f32.gmra.mxu0 %v4429_v10  ;;  %v9290_v7 = vpop.f32.mrf.mxu0 }
 0x614   : > { %5244 = vmatmul.f32.gmra.mxu1 %v4637_v19  ;;  %v4811_v19 = vld [vmem:[#allocation10 + $0x58] sm:$0xff] }
 0x615   : > { %v4364_v11 = vmul.f32 %v9195_v12, %v4330_v44  ;;  %4296 = vmatmul.f32.gmra.mxu2 %v6693_v13  ;;  %v4827_v44 = vld [vmem:[#allocation10 + $0xd8] sm:$0xff]  ;;  %v4140_v13 = vadd.f32 %v9076_v62, %v9052_v47 }
 0x616   : > { %5336 = vmatpush.msrb.mxu2 %v4811_v19  ;;  %5449 = vmatpush.msrb.mxu3 %v4827_v44  ;;  %v6695_v62 = vld [vmem:[#allocation3 + $0x1d1] sm:$0xff] }
 0x617   : > { %v4398_v41 = vadd.f32 %v9203_v25, %v4364_v11  ;;  %v9297_v11 = vpop.f32.mrf.mxu3 }
 0x618   : > { %v4249_v26 = vpop.f32.mrf.mxu2 }
 0x619   : > { %v4430_v8 = vmax.f32 %v4398_v41, 0.0  ;;  %v4250_v14 = vadd.f32 %v4249_v26, %v4137_v61  ;;  %v3769_v26 = vadd.f32 %v9072_v59, %v8917_v56 }
 0x61a   : > { %v9292_v58 = vld [vmem:[#allocation2 + $0x6f] sm:$0xff] }
 0x61b   : > { %v4638_v18 = vld [vmem:[#allocation2 + $0x69] sm:$0xff]  ;;  %4462 = vst [vmem:[#allocation2 + $0x88] sm:$0xff] %v4430_v8  ;;  %v4331_v10 = vadd.f32 %v4250_v14, %v8904_v24  ;;  %5024 = vmatmul.f32.gmra.mxu3 %v9292_v58  ;;  %5140 = vmatmul.f32.gmra.mxu0 %v4430_v8  ;;  %v9302_v24 = vpop.f32.mrf.mxu1  ;;  %v9309_v44 = vpop.f32.mrf.mxu0 }
 0x61c   : > { %5247 = vmatmul.f32.gmra.mxu1 %v4638_v18  ;;  %10907 = vst [vmem:[#allocation73_spill] sm:$0xff] %v9309_v44 }
 0x61d   : > { %v4365_v0 = vmul.f32 %v9195_v12, %v4331_v10  ;;  %4299 = vmatmul.f32.gmra.mxu2 %v6694_v48  ;;  %v4639_v10 = vld [vmem:[#allocation2 + $0x71] sm:$0xff] }
 0x61f   : > { %v4399_v61 = vadd.f32 %v9203_v25, %v4365_v0  ;;  %v10908_v0 = vld [vmem:[#allocation35_spill] sm:$0xff]  ;;  %v9315_v48 = vpop.f32.mrf.mxu3 }
 0x620   : > { %v4252_v41 = vpop.f32.mrf.mxu2  ;;  %v4143_v56 = vadd.f32 %v10908_v0, %v9065_v30  ;;  %10909 = vst [vmem:[#allocation51_spill] sm:$0xff] %v9315_v48  ;;  %v4826_v30 = vld [vmem:[#allocation10 + $0xd0] sm:$0xff] }
 0x621   : > { %v4431_v8 = vmax.f32 %v4399_v61, 0.0  ;;  %v4253_v14 = vadd.f32 %v4252_v41, %v4140_v13  ;;  %v4810_v61 = vld [vmem:[#allocation10 + $0x50] sm:$0xff]  ;;  %v10910_v41 = vld [vmem:[#allocation23_spill] sm:$0xff]  ;;  %5450 = vmatpush.msrb.mxu3 %v4826_v30 }
 0x622   : > { %v9306_v18 = vld [vmem:[#allocation2 + $0x87] sm:$0xff]  ;;  %5337 = vmatpush.msrb.mxu2 %v4810_v61 }
 0x623   : > { %4463 = vst [vmem:[#allocation2 + $0x90] sm:$0xff] %v4431_v8  ;;  %v4332_v19 = vadd.f32 %v4253_v14, %v3769_v26  ;;  %5027 = vmatmul.f32.gmra.mxu3 %v9306_v18  ;;  %5143 = vmatmul.f32.gmra.mxu0 %v4431_v8  ;;  %v10911_v26 = vld [vmem:[#allocation82_spill] sm:$0xff]  ;;  %v9319_v8 = vpop.f32.mrf.mxu1 }
 0x624   : > { %5250 = vmatmul.f32.gmra.mxu1 %v4639_v10  ;;  %v3772_v14 = vadd.f32 %v10911_v26, %v10910_v41  ;;  %v6696_v41 = vld [vmem:[#allocation3 + $0x1e9] sm:$0xff]  ;;  %v4807_v26 = vld [vmem:[#allocation10 + $0x38] sm:$0xff] }
 0x625   : > { %v4366_v47 = vmul.f32 %v9195_v12, %v4332_v19  ;;  %4302 = vmatmul.f32.gmra.mxu2 %v6695_v62 }
 0x627   : > { %v4400_v59 = vadd.f32 %v9203_v25, %v4366_v47  ;;  %v4809_v47 = vld [vmem:[#allocation10 + $0x48] sm:$0xff]  ;;  %v9332_v48 = vpop.f32.mrf.mxu3 }
 0x628   : > { %v4255_v13 = vpop.f32.mrf.mxu2  ;;  %5338 = vmatpush.msrb.mxu2 %v4809_v47 }
 0x629   : > { %v4432_v10 = vmax.f32 %v4400_v59, 0.0  ;;  %v4256_v3 = vadd.f32 %v4255_v13, %v4143_v56  ;;  %v4808_v56 = vld [vmem:[#allocation10 + $0x40] sm:$0xff]  ;;  %v9325_v59 = vpop.f32.mrf.mxu0  ;;  %v10914_v13 = vld [vmem:[#allocation33_spill] sm:$0xff] }
 0x62a   : > { %v9321_v19 = vld [vmem:[#allocation2 + $0x8f] sm:$0xff]  ;;  %10913 = vst [vmem:[#allocation53_spill] sm:$0xff] %v9325_v59  ;;  %v4146_v61 = vadd.f32 %v9104_v17, %v10914_v13  ;;  %5339 = vmatpush.msrb.mxu2 %v4808_v56  ;;  %v4804_v13 = vld [vmem:[#allocation10 + $0x20] sm:$0xff] }
 0x62b   : > { %10912 = vst [vmem:[#allocation88_spill] sm:$0xff] %v9321_v19  ;;  %v4640_v62 = vld [vmem:[#allocation2 + $0x89] sm:$0xff]  ;;  %v4333_v44 = vadd.f32 %v4256_v3, %v3772_v14  ;;  %5030 = vmatmul.f32.gmra.mxu3 %v9321_v19  ;;  %5146 = vmatmul.f32.gmra.mxu0 %v4432_v10  ;;  %v4641_v59 = vld [vmem:[#allocation2 + $0x91] sm:$0xff] }
 0x62c   : > { %4464 = vst [vmem:[#allocation2 + $0xa8] sm:$0xff] %v4432_v10  ;;  %5253 = vmatmul.f32.gmra.mxu1 %v4640_v62  ;;  %v10915_v62 = vld [vmem:[#allocation84_spill] sm:$0xff]  ;;  %5340 = vmatpush.msrb.mxu2 %v4807_v26  ;;  %v6697_v56 = vld [vmem:[#allocation3 + $0x1f1] sm:$0xff] }
 0x62d   : > { %v4367_v0 = vmul.f32 %v9195_v12, %v4333_v44  ;;  %4305 = vmatmul.f32.gmra.mxu2 %v6696_v41  ;;  %v3775_v10 = vadd.f32 %v9099_v28, %v10915_v62  ;;  %v4806_v44 = vld [vmem:[#allocation10 + $0x30] sm:$0xff]  ;;  %v4805_v17 = vld [vmem:[#allocation10 + $0x28] sm:$0xff] }
 0x62e   : > { %5341 = vmatpush.msrb.mxu2 %v4806_v44  ;;  %v10918_v62 = vld [vmem:[#allocation41_spill] sm:$0xff] }
 0x62f   : > { %v4401_v3 = vadd.f32 %v9203_v25, %v4367_v0  ;;  %v9337_v0 = vpop.f32.mrf.mxu1 }
 0x630   : > { %v4258_v14 = vpop.f32.mrf.mxu2  ;;  %5342 = vmatpush.msrb.mxu2 %v4805_v17 }
 0x631   : > { %v4433_v30 = vmax.f32 %v4401_v3, 0.0  ;;  %v4259_v19 = vadd.f32 %v4258_v14, %v4146_v61  ;;  %v10916_v61 = vld [vmem:[#allocation43_spill] sm:$0xff]  ;;  %v9343_v14 = vpop.f32.mrf.mxu0 }
 0x632   : > { %v4149_v3 = vadd.f32 %v9117_v29, %v10916_v61  ;;  %10917 = vst [vmem:[#allocation75_spill] sm:$0xff] %v9343_v14  ;;  %5343 = vmatpush.msrb.mxu2 %v4804_v13  ;;  %v4825_v29 = vld [vmem:[#allocation10 + $0xc8] sm:$0xff]  ;;  %v9350_v61 = vpop.f32.mrf.mxu3 }
 0x633   : > { %v9334_v41 = vld [vmem:[#allocation2 + $0xa7] sm:$0xff]  ;;  %4465 = vst [vmem:[#allocation2 + $0xb0] sm:$0xff] %v4433_v30  ;;  %v4334_v47 = vadd.f32 %v4259_v19, %v3775_v10  ;;  %5149 = vmatmul.f32.gmra.mxu0 %v4433_v30  ;;  %v4803_v19 = vld [vmem:[#allocation10 + $0x18] sm:$0xff]  ;;  %v3778_v10 = vadd.f32 %v9114_v39, %v10918_v62  ;;  %5451 = vmatpush.msrb.mxu3 %v4825_v29 }
 0x634   : > { %5033 = vmatmul.f32.gmra.mxu3 %v9334_v41  ;;  %5256 = vmatmul.f32.gmra.mxu1 %v4641_v59  ;;  %v6698_v39 = vld [vmem:[#allocation3 + $0x209] sm:$0xff]  ;;  %v4800_v62 = vld [vmem:[#allocation10] sm:$0xff] }
 0x635   : > { %v4368_v28 = vmul.f32 %v9195_v12, %v4334_v47  ;;  %4308 = vmatmul.f32.gmra.mxu2 %v6697_v56 }
 0x636   : > { %5344 = vmatpush.msrb.mxu2 %v4803_v19  ;;  %v4152_v19 = vadd.f32 %v9131_v40, %v9109_v60  ;;  %v6699_v40 = vld [vmem:[#allocation3 + $0x211] sm:$0xff] }
 0x637   : > { %v4402_v26 = vadd.f32 %v9203_v25, %v4368_v28  ;;  %v4802_v28 = vld [vmem:[#allocation10 + $0x10] sm:$0xff] }
 0x638   : > { %v4261_v59 = vpop.f32.mrf.mxu2  ;;  %5345 = vmatpush.msrb.mxu2 %v4802_v28 }
 0x639   : > { %v4434_v30 = vmax.f32 %v4402_v26, 0.0  ;;  %v4262_v44 = vadd.f32 %v4261_v59, %v4149_v3  ;;  %v4801_v3 = vld [vmem:[#allocation10 + $0x8] sm:$0xff]  ;;  %v9353_v26 = vpop.f32.mrf.mxu1 }
 0x63a   : > { %v9347_v47 = vld [vmem:[#allocation2 + $0xaf] sm:$0xff]  ;;  %5346 = vmatpush.msrb.mxu2 %v4801_v3 }
 0x63b   : > { %v4642_v56 = vld [vmem:[#allocation2 + $0xa9] sm:$0xff]  ;;  %4466 = vst [vmem:[#allocation2 + $0xc8] sm:$0xff] %v4434_v30  ;;  %v4335_v17 = vadd.f32 %v4262_v44, %v3778_v10  ;;  %5152 = vmatmul.f32.gmra.mxu0 %v4434_v30  ;;  %v4643_v14 = vld [vmem:[#allocation2 + $0xb1] sm:$0xff] }
 0x63c   : > { %5036 = vmatmul.f32.gmra.mxu3 %v9347_v47  ;;  %5259 = vmatmul.f32.gmra.mxu1 %v4642_v56  ;;  %v10919_v44 = vld [vmem:[#allocation25_spill] sm:$0xff] }
 0x63d   : > { %v4369_v13 = vmul.f32 %v9195_v12, %v4335_v17  ;;  %4311 = vmatmul.f32.gmra.mxu2 %v6698_v39  ;;  %v3781_v30 = vadd.f32 %v9127_v45, %v10919_v44  ;;  %v9360_v17 = vpop.f32.mrf.mxu0  ;;  %v10922_v45 = vld [vmem:[#allocation26_spill] sm:$0xff]  ;;  %v10924_v44 = vld [vmem:[#allocation49_spill] sm:$0xff] }
 0x63e   : > { %10920 = vst [vmem:[#allocation85_spill] sm:$0xff] %v9360_v17  ;;  %5347 = vmatpush.msrb.mxu2 %v4800_v62  ;;  %v4155_v3 = vadd.f32 %v9143_v36, %v10922_v45  ;;  %v2835_v17 = vld [vmem:[#allocation3 + $0x229] sm:$0xff]  ;;  %v4824_v36 = vld [vmem:[#allocation10 + $0xc0] sm:$0xff] }
 0x63f   : > { %v4403_v59 = vadd.f32 %v9203_v25, %v4369_v13  ;;  %v9366_v13 = vpop.f32.mrf.mxu3  ;;  %5452 = vmatpush.msrb.mxu3 %v4824_v36 }
 0x640   : > { %v4264_v10 = vpop.f32.mrf.mxu2 }
 0x641   : > { %v4435_v56 = vmax.f32 %v4403_v59, 0.0  ;;  %v4265_v29 = vadd.f32 %v4264_v10, %v4152_v19  ;;  %v9371_v59 = vpop.f32.mrf.mxu1  ;;  %v10923_v10 = vld [vmem:[#allocation27_spill] sm:$0xff] }
 0x642   : > { %v9362_v39 = vld [vmem:[#allocation2 + $0xc7] sm:$0xff] }
 0x643   : > { %10921 = vst [vmem:[#allocation66_spill] sm:$0xff] %v9362_v39  ;;  %v4336_v28 = vadd.f32 %v4265_v29, %v3781_v30  ;;  %5155 = vmatmul.f32.gmra.mxu0 %v4435_v56  ;;  %v3784_v30 = vadd.f32 %v10924_v44, %v10923_v10  ;;  %v10926_v10 = vld [vmem:[#allocation31_spill] sm:$0xff] }
 0x644   : > { %4467 = vst [vmem:[#allocation2 + $0xd0] sm:$0xff] %v4435_v56  ;;  %5039 = vmatmul.f32.gmra.mxu3 %v9362_v39  ;;  %5262 = vmatmul.f32.gmra.mxu1 %v4643_v14 }
 0x645   : > { %v4370_v60 = vmul.f32 %v9195_v12, %v4336_v28  ;;  %4314 = vmatmul.f32.gmra.mxu2 %v6699_v40  ;;  %v9378_v45 = vpop.f32.mrf.mxu0 }
 0x647   : > { %v4404_v19 = vadd.f32 %v9203_v25, %v4370_v60 }
 0x648   : > { %v4267_v62 = vpop.f32.mrf.mxu2 }
 0x649   : > { %v4436_v29 = vmax.f32 %v4404_v19, 0.0  ;;  %v4268_v14 = vadd.f32 %v4267_v62, %v4155_v3  ;;  %v4158_v3 = vadd.f32 %v9158_v35, %v10926_v10  ;;  %v9384_v62 = vpop.f32.mrf.mxu3  ;;  %v9388_v39 = vpop.f32.mrf.mxu1 }
 0x64b   : > { %v9375_v56 = vld [vmem:[#allocation2 + $0xcf] sm:$0xff]  ;;  %4468 = vst [vmem:[#allocation2 + $0xe8] sm:$0xff] %v4436_v29  ;;  %v4337_v40 = vadd.f32 %v4268_v14, %v3784_v30  ;;  %5158 = vmatmul.f32.gmra.mxu0 %v4436_v29 }
 0x64c   : > { %10925 = vst [vmem:[#allocation38_spill] sm:$0xff] %v9375_v56  ;;  %v4644_v28 = vld [vmem:[#allocation2 + $0xc9] sm:$0xff]  ;;  %5042 = vmatmul.f32.gmra.mxu3 %v9375_v56  ;;  %v4645_v36 = vld [vmem:[#allocation2 + $0xd1] sm:$0xff] }
 0x64d   : > { %5265 = vmatmul.f32.gmra.mxu1 %v4644_v28  ;;  %v4371_v60 = vmul.f32 %v9195_v12, %v4337_v40  ;;  %4317 = vmatmul.f32.gmra.mxu2 %v2835_v17  ;;  %v10927_v30 = vld [vmem:[#allocation29_spill] sm:$0xff]  ;;  %v9393_v35 = vpop.f32.mrf.mxu0 }
 0x64e   : > { %v3787_v14 = vadd.f32 %v9153_v9, %v10927_v30  ;;  %v2836_v40 = vld [vmem:[#allocation3 + $0x231] sm:$0xff]  ;;  %v4161_v9 = vadd.f32 %v9171_v4, %v9149_v53 }
 0x64f   : > { %v4405_v19 = vadd.f32 %v9203_v25, %v4371_v60  ;;  %v4823_v53 = vld [vmem:[#allocation10 + $0xb8] sm:$0xff] }
 0x650   : > { %v4270_v44 = vpop.f32.mrf.mxu2  ;;  %5453 = vmatpush.msrb.mxu3 %v4823_v53  ;;  %v4489_v53 = vld [vmem:[#allocation2 + $0xf] sm:$0xff] }
 0x651   : > { %v4437_v28 = vmax.f32 %v4405_v19, 0.0  ;;  %v4271_v56 = vadd.f32 %v4270_v44, %v4158_v3  ;;  %v10929_v19 = vld [vmem:[#allocation79_spill] sm:$0xff]  ;;  %v9406_v4 = vpop.f32.mrf.mxu1 }
 0x652   : > { %v9390_v29 = vld [vmem:[#allocation2 + $0xe7] sm:$0xff]  ;;  %v3790_v44 = vadd.f32 %v9168_v20, %v10929_v19 }
 0x653   : > { %10928 = vst [vmem:[#allocation37_spill] sm:$0xff] %v9390_v29  ;;  %v4338_v17 = vadd.f32 %v4271_v56, %v3787_v14  ;;  %5161 = vmatmul.f32.gmra.mxu0 %v4437_v28  ;;  %v9401_v14 = vpop.f32.mrf.mxu3 }
 0x654   : > { %4469 = vst [vmem:[#allocation2 + $0xf0] sm:$0xff] %v4437_v28  ;;  %5045 = vmatmul.f32.gmra.mxu3 %v9390_v29  ;;  %v4488_v29 = vld [vmem:[#allocation2 + $0x7] sm:$0xff] }
 0x655   : > { %5268 = vmatmul.f32.gmra.mxu1 %v4645_v36  ;;  %v4372_v60 = vmul.f32 %v9195_v12, %v4338_v17  ;;  %4320 = vmatmul.f32.gmra.mxu2 %v2836_v40  ;;  %v9409_v40 = vpop.f32.mrf.mxu0 }
 0x657   : > { %v4406_v10 = vadd.f32 %v9203_v25, %v4372_v60  ;;  %v4164_v60 = vadd.f32 %v9185_v23, %v9163_v55 }
 0x658   : > { %v4273_v3 = vpop.f32.mrf.mxu2 }
 0x659   : > { %v4438_v30 = vmax.f32 %v4406_v10, 0.0  ;;  %v4274_v56 = vadd.f32 %v4273_v3, %v4161_v9  ;;  %v10930_v3 = vld [vmem:[#allocation76_spill] sm:$0xff]  ;;  %v9421_v55 = vpop.f32.mrf.mxu1 }
 0x65a   : > { %v3793_v19 = vadd.f32 %v9181_v43, %v10930_v3  ;;  %v4167_v43 = vadd.f32 %v9205_v49, %v9175_v52 }
 0x65b   : > { %v9403_v36 = vld [vmem:[#allocation2 + $0xef] sm:$0xff]  ;;  %4470 = vst [vmem:[#allocation2 + $0x108] sm:$0xff] %v4438_v30  ;;  %v4339_v17 = vadd.f32 %v4274_v56, %v3790_v44  ;;  %5164 = vmatmul.f32.gmra.mxu0 %v4438_v30 }
 0x65c   : > { %v4646_v28 = vld [vmem:[#allocation2 + $0xe9] sm:$0xff]  ;;  %5048 = vmatmul.f32.gmra.mxu3 %v9403_v36  ;;  %v4647_v30 = vld [vmem:[#allocation2 + $0xf1] sm:$0xff] }
 0x65d   : > { %5271 = vmatmul.f32.gmra.mxu1 %v4646_v28  ;;  %v4373_v20 = vmul.f32 %v9195_v12, %v4339_v17  ;;  %5348 = vmatmul.f32.vlgmr.msrb.gmra.mxu2 %v4488_v29  ;;  %v9419_v29 = vpop.f32.mrf.mxu3 }
 0x65f   : > { %v4407_v9 = vadd.f32 %v9203_v25, %v4373_v20 }
 0x660   : > { %v4276_v10 = vpop.f32.mrf.mxu2 }
 0x661   : > { %v4439_v44 = vmax.f32 %v4407_v9, 0.0  ;;  %v4277_v56 = vadd.f32 %v4276_v10, %v4164_v60  ;;  %v10932_v10 = vld [vmem:[#allocation45_spill] sm:$0xff] }
 0x662   : > { %v9416_v28 = vld [vmem:[#allocation2 + $0x107] sm:$0xff]  ;;  %v3796_v3 = vadd.f32 %v9197_v16, %v10932_v10  ;;  %v9436_v16 = vpop.f32.mrf.mxu1 }
 0x663   : > { %10931 = vst [vmem:[#allocation87_spill] sm:$0xff] %v9416_v28  ;;  %v4340_v17 = vadd.f32 %v4277_v56, %v3793_v19  ;;  %5167 = vmatmul.f32.gmra.mxu0 %v4439_v44 }
 0x664   : > { %4471 = vst [vmem:[#allocation2 + $0x110] sm:$0xff] %v4439_v44  ;;  %5051 = vmatmul.f32.gmra.mxu3 %v9416_v28 }
 0x665   : > { %5274 = vmatmul.f32.gmra.mxu1 %v4647_v30  ;;  %v4374_v23 = vmul.f32 %v9195_v12, %v4340_v17  ;;  %5351 = vmatmul.f32.gmra.mxu2 %v4489_v53  ;;  %v4822_v53 = vld [vmem:[#allocation10 + $0xb0] sm:$0xff]  ;;  %v9434_v49 = vpop.f32.mrf.mxu3  ;;  %v4170_v17 = vadd.f32 %v9219_v32, %v9188_v46 }
 0x666   : > { %5454 = vmatpush.msrb.mxu3 %v4822_v53 }
 0x667   : > { %v4408_v20 = vadd.f32 %v9203_v25, %v4374_v23 }
 0x668   : > { %v4279_v60 = vpop.f32.mrf.mxu2  ;;  %v5123_v9 = vpop.f32.mrf.mxu0 }
 0x669   : > { %v4440_v19 = vmax.f32 %v4408_v20, 0.0  ;;  %v4280_v56 = vadd.f32 %v4279_v60, %v4167_v43  ;;  %v10933_v60 = vld [vmem:[#allocation46_spill] sm:$0xff] }
 0x66b   : > { %v9429_v30 = vld [vmem:[#allocation2 + $0x10f] sm:$0xff]  ;;  %4472 = vst [vmem:[#allocation2 + $0x128] sm:$0xff] %v4440_v19  ;;  %v4341_v44 = vadd.f32 %v4280_v56, %v3796_v3  ;;  %5170 = vmatmul.f32.gmra.mxu0 %v4440_v19 }
 0x66c   : > { %v4648_v28 = vld [vmem:[#allocation2 + $0x109] sm:$0xff]  ;;  %5054 = vmatmul.f32.gmra.mxu3 %v9429_v30  ;;  %v4649_v56 = vld [vmem:[#allocation2 + $0x111] sm:$0xff] }
 0x66d   : > { %5277 = vmatmul.f32.gmra.mxu1 %v4648_v28  ;;  %v4375_v52 = vmul.f32 %v9195_v12, %v4341_v44  ;;  %5354 = vmatmul.f32.gmra.mxu2 %v9226_v22  ;;  %v3799_v28 = vadd.f32 %v9215_v63, %v10933_v60  ;;  %v4173_v44 = vadd.f32 %v9237_v21, %v9212_v37  ;;  %v4821_v37 = vld [vmem:[#allocation10 + $0xa8] sm:$0xff] }
 0x66e   : > { %5455 = vmatpush.msrb.mxu3 %v4821_v37 }
 0x66f   : > { %v4409_v23 = vadd.f32 %v9203_v25, %v4375_v52 }
 0x670   : > { %v4282_v43 = vpop.f32.mrf.mxu2  ;;  %v5126_v20 = vpop.f32.mrf.mxu0 }
 0x671   : > { %v4441_v10 = vmax.f32 %v4409_v23, 0.0  ;;  %v4283_v3 = vadd.f32 %v4282_v43, %v4170_v17  ;;  %v10934_v23 = vld [vmem:[#allocation47_spill] sm:$0xff] }
 0x672   : > { %v9443_v19 = vld [vmem:[#allocation2 + $0x127] sm:$0xff]  ;;  %v3802_v43 = vadd.f32 %v9232_v50, %v10934_v23  ;;  %v4176_v50 = vadd.f32 %v9252_v15, %v9224_v2 }
 0x673   : > { %4473 = vst [vmem:[#allocation2 + $0x130] sm:$0xff] %v4441_v10  ;;  %v4342_v22 = vadd.f32 %v4283_v3, %v3799_v28  ;;  %5173 = vmatmul.f32.gmra.mxu0 %v4441_v10 }
 0x674   : > { %5057 = vmatmul.f32.gmra.mxu3 %v9443_v19 }
 0x675   : > { %5280 = vmatmul.f32.gmra.mxu1 %v4649_v56  ;;  %v4376_v46 = vmul.f32 %v9195_v12, %v4342_v22  ;;  %5357 = vmatmul.f32.gmra.mxu2 %v9239_v42 }
 0x676   : > { %v5010_v32 = vpop.f32.mrf.mxu3 }
 0x677   : > { %v4410_v63 = vadd.f32 %v9203_v25, %v4376_v46  ;;  %v9451_v53 = vadd.f32 %v5123_v9, %v5010_v32 }
 0x678   : > { %v4285_v52 = vpop.f32.mrf.mxu2  ;;  %v5129_v10 = vpop.f32.mrf.mxu0 }
 0x679   : > { %v9453_v17 = vpop.f32.mrf.mxu1  ;;  %v4442_v60 = vmax.f32 %v4410_v63, 0.0  ;;  %v4286_v28 = vadd.f32 %v4285_v52, %v4173_v44  ;;  %v10935_v63 = vld [vmem:[#allocation80_spill] sm:$0xff] }
 0x67a   : > { %v9457_v3 = vld [vmem:[#allocation2 + $0x12f] sm:$0xff]  ;;  %v3805_v52 = vadd.f32 %v9250_v33, %v10935_v63  ;;  %v4179_v33 = vadd.f32 %v9270_v51, %v9243_v54  ;;  %v4820_v54 = vld [vmem:[#allocation10 + $0xa0] sm:$0xff] }
 0x67b   : > { %v4650_v42 = vld [vmem:[#allocation2 + $0x129] sm:$0xff]  ;;  %4474 = vst [vmem:[#allocation2 + $0x148] sm:$0xff] %v4442_v60  ;;  %v4343_v56 = vadd.f32 %v4286_v28, %v3802_v43  ;;  %5176 = vmatmul.f32.gmra.mxu0 %v4442_v60  ;;  %5456 = vmatpush.msrb.mxu3 %v4820_v54 }
 0x67c   : > { %5060 = vmatmul.f32.gmra.mxu3 %v9457_v3 }
 0x67d   : > { %5283 = vmatmul.f32.gmra.mxu1 %v4650_v42  ;;  %v4377_v21 = vmul.f32 %v9195_v12, %v4343_v56  ;;  %5360 = vmatmul.f32.gmra.mxu2 %v9254_v6  ;;  %v4651_v6 = vld [vmem:[#allocation2 + $0x131] sm:$0xff] }
 0x67e   : > { %v5013_v9 = vpop.f32.mrf.mxu3 }
 0x67f   : > { %v4411_v22 = vadd.f32 %v9203_v25, %v4377_v21  ;;  %v9465_v46 = vadd.f32 %v5126_v20, %v5013_v9  ;;  %v10936_v9 = vld [vmem:[#allocation24_spill] sm:$0xff] }
 0x680   : > { %v4288_v32 = vpop.f32.mrf.mxu2  ;;  %v5132_v60 = vpop.f32.mrf.mxu0 }
 0x681   : > { %v9467_v44 = vpop.f32.mrf.mxu1  ;;  %v4443_v23 = vmax.f32 %v4411_v22, 0.0  ;;  %v4289_v43 = vadd.f32 %v4288_v32, %v4176_v50  ;;  %v3808_v50 = vadd.f32 %v9264_v31, %v10936_v9  ;;  %v4182_v31 = vadd.f32 %v9285_v38, %v9259_v27 }
 0x682   : > { %v9471_v28 = vld [vmem:[#allocation2 + $0x147] sm:$0xff] }
 0x683   : > { %4475 = vst [vmem:[#allocation2 + $0x150] sm:$0xff] %v4443_v23  ;;  %v4344_v42 = vadd.f32 %v4289_v43, %v3805_v52  ;;  %5179 = vmatmul.f32.gmra.mxu0 %v4443_v23 }
 0x684   : > { %5063 = vmatmul.f32.gmra.mxu3 %v9471_v28 }
 0x685   : > { %5286 = vmatmul.f32.gmra.mxu1 %v4651_v6  ;;  %v4378_v2 = vmul.f32 %v9195_v12, %v4344_v42  ;;  %5363 = vmatmul.f32.gmra.mxu2 %v9266_v34 }
 0x686   : > { %v5016_v15 = vpop.f32.mrf.mxu3 }
 0x687   : > { %v4412_v20 = vadd.f32 %v9203_v25, %v4378_v2  ;;  %v9479_v56 = vadd.f32 %v5129_v10, %v5016_v15  ;;  %v10937_v15 = vld [vmem:[#allocation48_spill] sm:$0xff] }
 0x688   : > { %v4291_v37 = vpop.f32.mrf.mxu2  ;;  %v5135_v63 = vpop.f32.mrf.mxu0 }
 0x689   : > { %v9481_v21 = vpop.f32.mrf.mxu1  ;;  %v4444_v22 = vmax.f32 %v4412_v20, 0.0  ;;  %v4292_v32 = vadd.f32 %v4291_v37, %v4179_v33  ;;  %v3811_v33 = vadd.f32 %v9282_v57, %v10937_v15  ;;  %v4185_v57 = vadd.f32 %v9302_v24, %v9276_v5  ;;  %v4819_v5 = vld [vmem:[#allocation10 + $0x98] sm:$0xff] }
 0x68a   : > { %v9485_v52 = vld [vmem:[#allocation2 + $0x14f] sm:$0xff]  ;;  %5457 = vmatpush.msrb.mxu3 %v4819_v5 }
 0x68b   : > { %v4652_v34 = vld [vmem:[#allocation2 + $0x149] sm:$0xff]  ;;  %4476 = vst [vmem:[#allocation2 + $0x168] sm:$0xff] %v4444_v22  ;;  %v4345_v23 = vadd.f32 %v4292_v32, %v3808_v50  ;;  %5182 = vmatmul.f32.gmra.mxu0 %v4444_v22 }
 0x68c   : > { %5066 = vmatmul.f32.gmra.mxu3 %v9485_v52 }
 0x68d   : > { %5289 = vmatmul.f32.gmra.mxu1 %v4652_v34  ;;  %v4379_v51 = vmul.f32 %v9195_v12, %v4345_v23  ;;  %5366 = vmatmul.f32.gmra.mxu2 %v9278_v1  ;;  %v4653_v1 = vld [vmem:[#allocation2 + $0x151] sm:$0xff] }
 0x68e   : > { %v5019_v10 = vpop.f32.mrf.mxu3  ;;  %v10938_v23 = vld [vmem:[#allocation34_spill] sm:$0xff] }
 0x68f   : > { %v4413_v43 = vadd.f32 %v9203_v25, %v4379_v51  ;;  %v9493_v6 = vadd.f32 %v5132_v60, %v5019_v10  ;;  %v3814_v54 = vadd.f32 %v9297_v11, %v10938_v23 }
 0x690   : > { %v4294_v42 = vpop.f32.mrf.mxu2  ;;  %v5138_v9 = vpop.f32.mrf.mxu0 }
 0x691   : > { %v9495_v2 = vpop.f32.mrf.mxu1  ;;  %v4445_v20 = vmax.f32 %v4413_v43, 0.0  ;;  %v4295_v37 = vadd.f32 %v4294_v42, %v4182_v31 }
 0x692   : > { %v9499_v50 = vld [vmem:[#allocation2 + $0x167] sm:$0xff] }
 0x693   : > { %4477 = vst [vmem:[#allocation2 + $0x170] sm:$0xff] %v4445_v20  ;;  %v4346_v22 = vadd.f32 %v4295_v37, %v3811_v33  ;;  %5185 = vmatmul.f32.gmra.mxu0 %v4445_v20 }
 0x694   : > { %5069 = vmatmul.f32.gmra.mxu3 %v9499_v50 }
 0x695   : > { %5292 = vmatmul.f32.gmra.mxu1 %v4653_v1  ;;  %v4380_v27 = vmul.f32 %v9195_v12, %v4346_v22  ;;  %5369 = vmatmul.f32.gmra.mxu2 %v9292_v58  ;;  %v10939_v1 = vld [vmem:[#allocation77_spill] sm:$0xff]  ;;  %v10940_v22 = vld [vmem:[#allocation51_spill] sm:$0xff] }
 0x696   : > { %v5022_v38 = vpop.f32.mrf.mxu3 }
 0x697   : > { %v4414_v60 = vadd.f32 %v9203_v25, %v4380_v27  ;;  %v9507_v32 = vadd.f32 %v5135_v63, %v5022_v38  ;;  %v4188_v63 = vadd.f32 %v9319_v8, %v9290_v7  ;;  %v3817_v27 = vadd.f32 %v10940_v22, %v10939_v1  ;;  %v10941_v8 = vld [vmem:[#allocation88_spill] sm:$0xff] }
 0x698   : > { %v4297_v34 = vpop.f32.mrf.mxu2  ;;  %v5141_v43 = vpop.f32.mrf.mxu0 }
 0x699   : > { %v4446_v51 = vmax.f32 %v4414_v60, 0.0  ;;  %v4298_v10 = vadd.f32 %v4297_v34, %v4185_v57  ;;  %v9511_v31 = vpop.f32.mrf.mxu1 }
 0x69a   : > { %v9513_v42 = vld [vmem:[#allocation2 + $0x16f] sm:$0xff] }
 0x69b   : > { %v4654_v58 = vld [vmem:[#allocation2 + $0x169] sm:$0xff]  ;;  %4478 = vst [vmem:[#allocation2 + $0x188] sm:$0xff] %v4446_v51  ;;  %v4347_v15 = vadd.f32 %v4298_v10, %v3814_v54  ;;  %5188 = vmatmul.f32.gmra.mxu0 %v4446_v51  ;;  %v4655_v23 = vld [vmem:[#allocation2 + $0x171] sm:$0xff] }
 0x69c   : > { %5072 = vmatmul.f32.gmra.mxu3 %v9513_v42  ;;  %v10942_v51 = vld [vmem:[#allocation73_spill] sm:$0xff] }
 0x69d   : > { %5295 = vmatmul.f32.gmra.mxu1 %v4654_v58  ;;  %v4381_v24 = vmul.f32 %v9195_v12, %v4347_v15  ;;  %5372 = vmatmul.f32.gmra.mxu2 %v9306_v18  ;;  %v4191_v10 = vadd.f32 %v9337_v0, %v10942_v51  ;;  %v4818_v0 = vld [vmem:[#allocation10 + $0x90] sm:$0xff] }
 0x69e   : > { %v5025_v11 = vpop.f32.mrf.mxu3  ;;  %5458 = vmatpush.msrb.mxu3 %v4818_v0  ;;  %v10946_v0 = vld [vmem:[#allocation75_spill] sm:$0xff] }
 0x69f   : > { %v4415_v33 = vadd.f32 %v9203_v25, %v4381_v24  ;;  %v9521_v20 = vadd.f32 %v5138_v9, %v5025_v11  ;;  %v10943_v24 = vld [vmem:[#allocation65_spill] sm:$0xff] }
 0x6a0   : > { %v4300_v37 = vpop.f32.mrf.mxu2  ;;  %v5144_v60 = vpop.f32.mrf.mxu0  ;;  %v3820_v11 = vadd.f32 %v9332_v48, %v10943_v24 }
 0x6a1   : > { %v4447_v38 = vmax.f32 %v4415_v33, 0.0  ;;  %v4301_v57 = vadd.f32 %v4300_v37, %v4188_v63  ;;  %v9527_v54 = vpop.f32.mrf.mxu1 }
 0x6a2   : > { %v9525_v34 = vld [vmem:[#allocation2 + $0x187] sm:$0xff] }
 0x6a3   : > { %4479 = vst [vmem:[#allocation2 + $0x190] sm:$0xff] %v4447_v38  ;;  %v4348_v18 = vadd.f32 %v4301_v57, %v3817_v27  ;;  %5191 = vmatmul.f32.gmra.mxu0 %v4447_v38 }
 0x6a4   : > { %5075 = vmatmul.f32.gmra.mxu3 %v9525_v34 }
 0x6a5   : > { %5298 = vmatmul.f32.gmra.mxu1 %v4655_v23  ;;  %v4382_v7 = vmul.f32 %v9195_v12, %v4348_v18  ;;  %5375 = vmatmul.f32.gmra.mxu2 %v10941_v8  ;;  %v4846_v23 = vld [vmem:[#allocation10 + $0x170] sm:$0xff] }
 0x6a6   : > { %v5028_v9 = vpop.f32.mrf.mxu3  ;;  %v10944_v18 = vld [vmem:[#allocation53_spill] sm:$0xff] }
 0x6a7   : > { %v4416_v58 = vadd.f32 %v9203_v25, %v4382_v7  ;;  %v9535_v15 = vadd.f32 %v5141_v43, %v5028_v9  ;;  %v4847_v43 = vld [vmem:[#allocation10 + $0x178] sm:$0xff]  ;;  %v4194_v7 = vadd.f32 %v9353_v26, %v10944_v18 }
 0x6a8   : > { %v4303_v5 = vpop.f32.mrf.mxu2  ;;  %v5147_v37 = vpop.f32.mrf.mxu0  ;;  %5558 = vmatpush.msra.mxu0 %v4847_v43  ;;  %v4197_v43 = vadd.f32 %v9371_v59, %v10946_v0 }
 0x6a9   : > { %v4448_v63 = vmax.f32 %v4416_v58, 0.0  ;;  %v4304_v33 = vadd.f32 %v4303_v5, %v4191_v10  ;;  %v9543_v57 = vpop.f32.mrf.mxu1  ;;  %v4845_v10 = vld [vmem:[#allocation10 + $0x168] sm:$0xff] }
 0x6aa   : > { %v9539_v1 = vld [vmem:[#allocation2 + $0x18f] sm:$0xff]  ;;  %5559 = vmatpush.msra.mxu0 %v4846_v23 }
 0x6ab   : > { %v4656_v22 = vld [vmem:[#allocation2 + $0x189] sm:$0xff]  ;;  %4480 = vst [vmem:[#allocation2 + $0x1a8] sm:$0xff] %v4448_v63  ;;  %v4349_v27 = vadd.f32 %v4304_v33, %v3820_v11  ;;  %5194 = vmatmul.f32.gmra.mxu0 %v4448_v63  ;;  %v4657_v63 = vld [vmem:[#allocation2 + $0x191] sm:$0xff]  ;;  %v4844_v33 = vld [vmem:[#allocation10 + $0x160] sm:$0xff] }
 0x6ac   : > { %5078 = vmatmul.f32.gmra.mxu3 %v9539_v1  ;;  %v10945_v58 = vld [vmem:[#allocation28_spill] sm:$0xff]  ;;  %5560 = vmatpush.msra.mxu0 %v4845_v10 }
 0x6ad   : > { %5301 = vmatmul.f32.gmra.mxu1 %v4656_v22  ;;  %v4383_v38 = vmul.f32 %v9195_v12, %v4349_v27  ;;  %5378 = vmatmul.f32.gmra.mxu2 %v9334_v41  ;;  %v3823_v12 = vadd.f32 %v9350_v61, %v10945_v58  ;;  %v4842_v27 = vld [vmem:[#allocation10 + $0x150] sm:$0xff] }
 0x6ae   : > { %v5031_v48 = vpop.f32.mrf.mxu3  ;;  %5561 = vmatpush.msra.mxu0 %v4844_v33 }
 0x6af   : > { %v4417_v8 = vadd.f32 %v9203_v25, %v4383_v38  ;;  %v9549_v9 = vadd.f32 %v5144_v60, %v5031_v48  ;;  %v4843_v25 = vld [vmem:[#allocation10 + $0x158] sm:$0xff]  ;;  %v9559_v60 = vld [vmem:[%s10469_s5 + $0x4] ss:$0 sm:$0xff]  ;;  %v9568_v38 = vld [vmem:[%s10469_s5 + $0x5] ss:$0 sm:$0xff] }
 0x6b0   : > { %v4306_v51 = vpop.f32.mrf.mxu2  ;;  %v5150_v11 = vpop.f32.mrf.mxu0  ;;  %5562 = vmatpush.msra.mxu0 %v4843_v25 }
 0x6b1   : > { %v4449_v5 = vmax.f32 %v4417_v8, 0.0  ;;  %v4307_v24 = vadd.f32 %v4306_v51, %v4194_v7  ;;  %v9571_v23 = vpop.f32.mrf.mxu1 }
 0x6b2   : > { %v9553_v41 = vld [vmem:[#allocation2 + $0x1a7] sm:$0xff]  ;;  %5563 = vmatpush.msra.mxu0 %v4842_v27 }
 0x6b3   : > { %4481 = vst [vmem:[#allocation2 + $0x1b0] sm:$0xff] %v4449_v5  ;;  %v4350_v26 = vadd.f32 %v4307_v24, %v3823_v12  ;;  %5197 = vmatmul.f32.gmra.mxu0 %v4449_v5  ;;  %v4817_v24 = vld [vmem:[#allocation10 + $0x88] sm:$0xff] }
 0x6b4   : > { %5081 = vmatmul.f32.gmra.mxu3 %v9553_v41 }
 0x6b5   : > { %5304 = vmatmul.f32.gmra.mxu1 %v4657_v63  ;;  %v4384_v61 = vmul.f32 %v9559_v60, %v4350_v26  ;;  %5381 = vmatmul.f32.gmra.mxu2 %v9347_v47  ;;  %v10947_v47 = vld [vmem:[#allocation86_spill] sm:$0xff]  ;;  %v4840_v26 = vld [vmem:[#allocation10 + $0x140] sm:$0xff] }
 0x6b6   : > { %v3826_v8 = vadd.f32 %v9366_v13, %v10947_v47  ;;  %5459 = vmatpush.msrb.mxu3 %v4817_v24  ;;  %v5783_v63 = vld [vmem:[#allocation10 + $0x378] sm:$0xff]  ;;  %v5781_v47 = vld [vmem:[#allocation10 + $0x368] sm:$0xff] }
 0x6b7   : > { %v5034_v22 = vpop.f32.mrf.mxu3  ;;  %v4418_v48 = vadd.f32 %v9568_v38, %v4384_v61  ;;  %v10948_v13 = vld [vmem:[#allocation66_spill] sm:$0xff]  ;;  %5816 = vmatpush.msra.mxu1 %v5783_v63  ;;  %v5782_v61 = vld [vmem:[#allocation10 + $0x370] sm:$0xff] }
 0x6b8   : > { %v9573_v18 = vadd.f32 %v5147_v37, %v5034_v22  ;;  %v4309_v7 = vpop.f32.mrf.mxu2  ;;  %v5153_v58 = vpop.f32.mrf.mxu0  ;;  %v4841_v37 = vld [vmem:[#allocation10 + $0x148] sm:$0xff]  ;;  %v10949_v22 = vld [vmem:[#allocation85_spill] sm:$0xff] }
 0x6b9   : > { %v4450_v51 = vmax.f32 %v4418_v48, 0.0  ;;  %v4310_v10 = vadd.f32 %v4309_v7, %v4197_v43  ;;  %5564 = vmatpush.msra.mxu0 %v4841_v37  ;;  %v4200_v27 = vadd.f32 %v9388_v39, %v10949_v22  ;;  %5817 = vmatpush.msra.mxu1 %v5782_v61  ;;  %v4839_v48 = vld [vmem:[#allocation10 + $0x138] sm:$0xff]  ;;  %v4837_v61 = vld [vmem:[#allocation10 + $0x128] sm:$0xff] }
 0x6ba   : > { %v9577_v59 = vld [vmem:[#allocation2 + $0x1af] sm:$0xff] }
 0x6bb   : > { %v4658_v12 = vld [vmem:[#allocation2 + $0x1a9] sm:$0xff]  ;;  %4482 = vst [vmem:[#allocation2 + $0x1c8] sm:$0xff] %v4450_v51  ;;  %v4351_v5 = vadd.f32 %v4310_v10, %v3826_v8  ;;  %5200 = vmatmul.f32.gmra.mxu0 %v4450_v51  ;;  %5818 = vmatpush.msra.mxu1 %v5781_v47  ;;  %v9593_v39 = vld [vmem:[#allocation2 + $0x1b1] sm:$0xff]  ;;  %v4836_v47 = vld [vmem:[#allocation10 + $0x120] sm:$0xff] }
 0x6bc   : > { %5084 = vmatmul.f32.gmra.mxu3 %v9577_v59  ;;  %5565 = vmatpush.msra.mxu0 %v4840_v26  ;;  %v10950_v8 = vld [vmem:[#allocation32_spill] sm:$0xff] }
 0x6bd   : > { %5307 = vmatmul.f32.gmra.mxu1 %v4658_v12  ;;  %v4385_v33 = vmul.f32 %v9559_v60, %v4351_v5  ;;  %5384 = vmatmul.f32.gmra.mxu2 %v10948_v13  ;;  %v3829_v51 = vadd.f32 %v9384_v62, %v10950_v8  ;;  %v9589_v12 = vpop.f32.mrf.mxu1  ;;  %v5779_v62 = vld [vmem:[#allocation10 + $0x358] sm:$0xff]  ;;  %v4838_v13 = vld [vmem:[#allocation10 + $0x130] sm:$0xff] }
 0x6be   : > { %5566 = vmatpush.msra.mxu0 %v4839_v48 }
 0x6bf   : > { %v5037_v25 = vpop.f32.mrf.mxu3  ;;  %v4419_v0 = vadd.f32 %v9568_v38, %v4385_v33  ;;  %v4816_v33 = vld [vmem:[#allocation10 + $0x80] sm:$0xff] }
 0x6c0   : > { %v9585_v43 = vadd.f32 %v5150_v11, %v5037_v25  ;;  %v4312_v7 = vpop.f32.mrf.mxu2  ;;  %v5156_v24 = vpop.f32.mrf.mxu0  ;;  %v5780_v11 = vld [vmem:[#allocation10 + $0x360] sm:$0xff]  ;;  %v10951_v25 = vld [vmem:[#allocation38_spill] sm:$0xff]  ;;  %5460 = vmatpush.msrb.mxu3 %v4816_v33  ;;  %5567 = vmatpush.msra.mxu0 %v4838_v13 }
 0x6c1   : > { %v4451_v10 = vmax.f32 %v4419_v0, 0.0  ;;  %v4313_v5 = vadd.f32 %v4312_v7, %v4200_v27  ;;  %5819 = vmatpush.msra.mxu1 %v5780_v11  ;;  %v5778_v27 = vld [vmem:[#allocation10 + $0x350] sm:$0xff]  ;;  %v4203_v0 = vadd.f32 %v9406_v4, %v9378_v45  ;;  %v4835_v4 = vld [vmem:[#allocation10 + $0x118] sm:$0xff] }
 0x6c2   : > { %v9591_v37 = vld [vmem:[#allocation2 + $0x1c7] sm:$0xff]  ;;  %5568 = vmatpush.msra.mxu0 %v4837_v61  ;;  %v4206_v61 = vadd.f32 %v9421_v55, %v9393_v35 }
 0x6c3   : > { %4483 = vst [vmem:[#allocation2 + $0x1d0] sm:$0xff] %v4451_v10  ;;  %v4352_v63 = vadd.f32 %v4313_v5, %v3829_v51  ;;  %5203 = vmatmul.f32.gmra.mxu0 %v4451_v10  ;;  %5820 = vmatpush.msra.mxu1 %v5779_v62  ;;  %v5777_v51 = vld [vmem:[#allocation10 + $0x348] sm:$0xff]  ;;  %v10952_v10 = vld [vmem:[#allocation83_spill] sm:$0xff] }
 0x6c4   : > { %5087 = vmatmul.f32.gmra.mxu3 %v9591_v37  ;;  %v3832_v5 = vadd.f32 %v9401_v14, %v10952_v10  ;;  %v5776_v62 = vld [vmem:[#allocation10 + $0x340] sm:$0xff]  ;;  %5569 = vmatpush.msra.mxu0 %v4836_v47  ;;  %v5775_v14 = vld [vmem:[#allocation10 + $0x338] sm:$0xff]  ;;  %v4833_v47 = vld [vmem:[#allocation10 + $0x108] sm:$0xff] }
 0x6c5   : > { %5310 = vmatmul.f32.gmra.mxu1 %v9593_v39  ;;  %v4386_v26 = vmul.f32 %v9559_v60, %v4352_v63  ;;  %5387 = vmatmul.f32.gmra.mxu2 %v10951_v25  ;;  %v4834_v25 = vld [vmem:[#allocation10 + $0x110] sm:$0xff] }
 0x6c6   : > { %5821 = vmatpush.msra.mxu1 %v5778_v27  ;;  %v10954_v27 = vld [vmem:[#allocation37_spill] sm:$0xff]  ;;  %5570 = vmatpush.msra.mxu0 %v4835_v4  ;;  %v5799_v4 = vld [vmem:[#allocation10 + $0x3f8] sm:$0xff] }
 0x6c7   : > { %v5040_v22 = vpop.f32.mrf.mxu3  ;;  %v4420_v48 = vadd.f32 %v9568_v38, %v4386_v26  ;;  %5929 = vmatpush.msra.mxu2 %v5799_v4 }
 0x6c8   : > { %v9602_v7 = vadd.f32 %v5153_v58, %v5040_v22  ;;  %v4315_v8 = vpop.f32.mrf.mxu2  ;;  %v5159_v33 = vpop.f32.mrf.mxu0  ;;  %5822 = vmatpush.msra.mxu1 %v5777_v51  ;;  %5571 = vmatpush.msra.mxu0 %v4834_v25 }
 0x6c9   : > { %v9606_v11 = vmax.f32 %v4420_v48, 0.0  ;;  %v4316_v63 = vadd.f32 %v4315_v8, %v4203_v0  ;;  %v9613_v58 = vpop.f32.mrf.mxu1  ;;  %v5774_v48 = vld [vmem:[#allocation10 + $0x330] sm:$0xff] }
 0x6ca   : > { %v9608_v13 = vld [vmem:[#allocation2 + $0x1cf] sm:$0xff]  ;;  %5823 = vmatpush.msra.mxu1 %v5776_v62  ;;  %5572 = vmatpush.msra.mxu0 %v4833_v47 }
 0x6cb   : > { %10953 = vst [vmem:[#allocation89_spill] sm:$0xff] %v9606_v11  ;;  %v9610_v45 = vld [vmem:[#allocation2 + $0x1c9] sm:$0xff]  ;;  %v4353_v26 = vadd.f32 %v4316_v63, %v3832_v5  ;;  %5206 = vmatmul.f32.gmra.mxu0 %v9606_v11 }
 0x6cc   : > { %4484 = vst [vmem:[#allocation2 + $0x1e8] sm:$0xff] %v9606_v11  ;;  %5090 = vmatmul.f32.gmra.mxu3 %v9608_v13  ;;  %5824 = vmatpush.msra.mxu1 %v5775_v14  ;;  %v5773_v5 = vld [vmem:[#allocation10 + $0x328] sm:$0xff]  ;;  %v5772_v14 = vld [vmem:[#allocation10 + $0x320] sm:$0xff]  ;;  %v9631_v11 = vld [vmem:[#allocation2 + $0x1d1] sm:$0xff] }
 0x6cd   : > { %5313 = vmatmul.f32.gmra.mxu1 %v9610_v45  ;;  %v4387_v22 = vmul.f32 %v9559_v60, %v4353_v26  ;;  %5390 = vmatmul.f32.gmra.mxu2 %v10954_v27  ;;  %v10955_v63 = vld [vmem:[#allocation36_spill] sm:$0xff] }
 0x6ce   : > { %5825 = vmatpush.msra.mxu1 %v5774_v48  ;;  %v3835_v35 = vadd.f32 %v9419_v29, %v10955_v63  ;;  %v5815_v29 = vld [vmem:[#allocation10 + $0x478] sm:$0xff] }
 0x6cf   : > { %v5043_v0 = vpop.f32.mrf.mxu3  ;;  %v4421_v8 = vadd.f32 %v9568_v38, %v4387_v22  ;;  %v4209_v22 = vadd.f32 %v9436_v16, %v9409_v40  ;;  %6042 = vmatpush.msra.mxu3 %v5815_v29  ;;  %v10960_v29 = vld [vmem:[#allocation87_spill] sm:$0xff] }
 0x6d0   : > { %v9623_v51 = vadd.f32 %v5156_v24, %v5043_v0  ;;  %v4318_v10 = vpop.f32.mrf.mxu2  ;;  %v5162_v26 = vpop.f32.mrf.mxu0  ;;  %5826 = vmatpush.msra.mxu1 %v5773_v5  ;;  %v4832_v24 = vld [vmem:[#allocation10 + $0x100] sm:$0xff] }
 0x6d1   : > { %v9627_v55 = vmax.f32 %v4421_v8, 0.0  ;;  %v4319_v62 = vadd.f32 %v4318_v10, %v4206_v61  ;;  %v5771_v61 = vld [vmem:[#allocation10 + $0x318] sm:$0xff]  ;;  %v9639_v0 = vpop.f32.mrf.mxu1  ;;  %5573 = vmatpush.msra.mxu0 %v4832_v24  ;;  %v5770_v8 = vld [vmem:[#allocation10 + $0x310] sm:$0xff] }
 0x6d2   : > { %5827 = vmatpush.msra.mxu1 %v5772_v14 }
 0x6d3   : > { %10956 = vst [vmem:[#allocation40_spill] sm:$0xff] %v9627_v55  ;;  %v9629_v27 = vld [vmem:[#allocation2 + $0x1e7] sm:$0xff]  ;;  %v4354_v25 = vadd.f32 %v4319_v62, %v3835_v35  ;;  %5209 = vmatmul.f32.gmra.mxu0 %v9627_v55  ;;  %v10957_v62 = vld [vmem:[#allocation74_spill] sm:$0xff] }
 0x6d4   : > { %4485 = vst [vmem:[#allocation2 + $0x1f0] sm:$0xff] %v9627_v55  ;;  %5093 = vmatmul.f32.gmra.mxu3 %v9629_v27  ;;  %5828 = vmatpush.msra.mxu1 %v5771_v61  ;;  %v5769_v35 = vld [vmem:[#allocation10 + $0x308] sm:$0xff]  ;;  %v3838_v40 = vadd.f32 %v9434_v49, %v10957_v62 }
 0x6d5   : > { %5316 = vmatmul.f32.gmra.mxu1 %v9631_v11  ;;  %v4388_v48 = vmul.f32 %v9559_v60, %v4354_v25  ;;  %5393 = vmatmul.f32.gmra.mxu2 %v9403_v36  ;;  %v5768_v36 = vld [vmem:[#allocation10 + $0x300] sm:$0xff] }
 0x6d6   : > { %5829 = vmatpush.msra.mxu1 %v5770_v8 }
 0x6d7   : > { %v5046_v47 = vpop.f32.mrf.mxu3  ;;  %v4422_v10 = vadd.f32 %v9568_v38, %v4388_v48 }
 0x6d8   : > { %v9644_v5 = vadd.f32 %v5159_v33, %v5046_v47  ;;  %v4321_v63 = vpop.f32.mrf.mxu2  ;;  %v5165_v14 = vpop.f32.mrf.mxu0  ;;  %5830 = vmatpush.msra.mxu1 %v5769_v35 }
 0x6d9   : > { %v9648_v16 = vmax.f32 %v4422_v10, 0.0  ;;  %v4322_v4 = vadd.f32 %v4321_v63, %v4209_v22  ;;  %v5237_v22 = vadd.f32 %v9453_v17, %v9451_v53  ;;  %v9662_v48 = vpop.f32.mrf.mxu1  ;;  %v5814_v53 = vld [vmem:[#allocation10 + $0x470] sm:$0xff] }
 0x6da   : > { %5831 = vmatpush.msra.mxu1 %v5768_v36  ;;  %6043 = vmatpush.msra.mxu3 %v5814_v53  ;;  %v4633_v53 = vld [vmem:[#allocation2 + $0x11] sm:$0xff] }
 0x6db   : > { %10958 = vst [vmem:[#allocation81_spill] sm:$0xff] %v9648_v16  ;;  %v9650_v24 = vld [vmem:[#allocation2 + $0x1ef] sm:$0xff]  ;;  %v4355_v33 = vadd.f32 %v4322_v4, %v3838_v40  ;;  %5212 = vmatmul.f32.gmra.mxu0 %v9648_v16 }
 0x6dc   : > { %v9652_v25 = vld [vmem:[#allocation2 + $0x1e9] sm:$0xff]  ;;  %4486 = vst [vmem:[#allocation2 + $0x208] sm:$0xff] %v9648_v16  ;;  %5096 = vmatmul.f32.gmra.mxu3 %v9650_v24  ;;  %v9673_v4 = vld [vmem:[#allocation2 + $0x1f1] sm:$0xff] }
 0x6dd   : > { %10959 = vst [vmem:[#allocation30_spill] sm:$0xff] %v9652_v25  ;;  %5319 = vmatmul.f32.gmra.mxu1 %v9652_v25  ;;  %v4389_v49 = vmul.f32 %v9559_v60, %v4355_v33  ;;  %5396 = vmatmul.f32.gmra.mxu2 %v10960_v29  ;;  %v5798_v40 = vld [vmem:[#allocation10 + $0x3f0] sm:$0xff] }
 0x6de   : > { %10963 = vst [vmem:[#allocation55_spill] sm:$0xff] %v9673_v4  ;;  %5930 = vmatpush.msra.mxu2 %v5798_v40  ;;  %v5810_v16 = vld [vmem:[#allocation10 + $0x450] sm:$0xff] }
 0x6df   : > { %v5049_v61 = vpop.f32.mrf.mxu3  ;;  %v4423_v47 = vadd.f32 %v9568_v38, %v4389_v49  ;;  %v5240_v38 = vadd.f32 %v9467_v44, %v9465_v46  ;;  %v5243_v46 = vadd.f32 %v9481_v21, %v9479_v56  ;;  %v5246_v21 = vadd.f32 %v9495_v2, %v9493_v6  ;;  %v9860_v25 = vld [vmem:[#allocation2 + $0xd1] sm:$0xff] }
 0x6e0   : > { %v9665_v8 = vadd.f32 %v5162_v26, %v5049_v61  ;;  %v5349_v10 = vpop.f32.mrf.mxu2  ;;  %v5168_v62 = vpop.f32.mrf.mxu0  ;;  %v4632_v61 = vld [vmem:[#allocation2 + $0x9] sm:$0xff]  ;;  %v5249_v6 = vadd.f32 %v9511_v31, %v9507_v32  ;;  %v5252_v32 = vadd.f32 %v9527_v54, %v9521_v20  ;;  %v5255_v20 = vadd.f32 %v9543_v57, %v9535_v15  ;;  %10977 = vst [vmem:[#allocation72_spill] sm:$0xff] %v9860_v25 }
 0x6e1   : > { %v9667_v63 = vmax.f32 %v4423_v47, 0.0  ;;  %v9669_v35 = vadd.f32 %v5349_v10, %v5237_v22  ;;  %v9684_v33 = vpop.f32.mrf.mxu1  ;;  %v5258_v57 = vadd.f32 %v9571_v23, %v9549_v9  ;;  %v5261_v9 = vadd.f32 %v9589_v12, %v9573_v18 }
 0x6e3   : > { %10961 = vst [vmem:[#allocation44_spill] sm:$0xff] %v9667_v63  ;;  %v9671_v60 = vld [vmem:[#allocation2 + $0x207] sm:$0xff]  ;;  %5215 = vmatmul.f32.gmra.mxu0 %v9667_v63 }
 0x6e4   : > { %10962 = vst [vmem:[#allocation67_spill] sm:$0xff] %v9671_v60  ;;  %5099 = vmatmul.f32.gmra.mxu3 %v9671_v60  ;;  %v9887_v60 = vld [vmem:[#allocation2 + $0xe8] sm:$0xff] }
 0x6e5   : > { %4487 = vst [vmem:[#allocation2 + $0x210] sm:$0xff] %v9667_v63  ;;  %5322 = vmatmul.f32.gmra.mxu1 %v9673_v4  ;;  %5399 = vmatmul.f32.gmra.mxu2 %v9429_v30  ;;  %v9769_v63 = vld [vmem:[#allocation2 + $0x68] sm:$0xff]  ;;  %v9814_v4 = vld [vmem:[#allocation2 + $0x90] sm:$0xff] }
 0x6e7   : > { %v5052_v17 = vpop.f32.mrf.mxu3 }
 0x6e8   : > { %v9682_v26 = vadd.f32 %v5165_v14, %v5052_v17  ;;  %v5352_v36 = vpop.f32.mrf.mxu2  ;;  %v5171_v29 = vpop.f32.mrf.mxu0  ;;  %v5797_v17 = vld [vmem:[#allocation10 + $0x3e8] sm:$0xff] }
 0x6e9   : > { %v9686_v49 = vadd.f32 %v5352_v36, %v5240_v38  ;;  %5931 = vmatpush.msra.mxu2 %v5797_v17  ;;  %v9698_v36 = vpop.f32.mrf.mxu1  ;;  %v6704_v17 = vld [vmem:[#allocation2 + $0x29] sm:$0xff] }
 0x6eb   : > { %5574 = vmatmul.f32.vlgmr.msra.gmra.mxu0 %v4632_v61  ;;  %v9700_v61 = vld [vmem:[#allocation2] sm:$0xff] }
 0x6ec   : > { %v9688_v22 = vld [vmem:[#allocation2 + $0x20f] sm:$0xff]  ;;  %10965 = vst [vmem:[#allocation59_spill] sm:$0xff] %v9700_v61 }
 0x6ed   : > { %10964 = vst [vmem:[#allocation63_spill] sm:$0xff] %v9688_v22  ;;  %v4664_v47 = vld [vmem:[#allocation2 + $0x209] sm:$0xff]  ;;  %5102 = vmatmul.f32.gmra.mxu3 %v9688_v22  ;;  %5402 = vmatmul.f32.gmra.mxu2 %v9443_v19  ;;  %v4665_v38 = vld [vmem:[#allocation2 + $0x211] sm:$0xff] }
 0x6ee   : > { %5325 = vmatmul.f32.gmra.mxu1 %v4664_v47  ;;  %v5813_v19 = vld [vmem:[#allocation10 + $0x468] sm:$0xff]  ;;  %v9832_v22 = vld [vmem:[#allocation2 + $0xb1] sm:$0xff] }
 0x6ef   : > { %v5055_v30 = vpop.f32.mrf.mxu3  ;;  %6044 = vmatpush.msra.mxu3 %v5813_v19  ;;  %10973 = vst [vmem:[#allocation21_spill] sm:$0xff] %v9832_v22 }
 0x6f0   : > { %v9694_v44 = vadd.f32 %v5168_v62, %v5055_v30  ;;  %v5355_v14 = vpop.f32.mrf.mxu2  ;;  %v5174_v40 = vpop.f32.mrf.mxu0 }
 0x6f1   : > { %v9696_v10 = vadd.f32 %v5355_v14, %v5243_v46  ;;  %v6703_v14 = vld [vmem:[#allocation2 + $0x47] sm:$0xff] }
 0x6f3   : > { %5577 = vmatmul.f32.gmra.mxu0 %v4633_v53  ;;  %v9711_v53 = vpop.f32.mrf.mxu1 }
 0x6f5   : > { %5461 = vmatmul.f32.vlgmr.msrb.gmra.mxu3 %v9700_v61  ;;  %5405 = vmatmul.f32.gmra.mxu2 %v9457_v3 }
 0x6f6   : > { %5328 = vmatmul.f32.gmra.mxu1 %v4665_v38 }
 0x6f7   : > { %v5058_v56 = vpop.f32.mrf.mxu3 }
 0x6f8   : > { %v9706_v62 = vadd.f32 %v5171_v29, %v5058_v56  ;;  %v5358_v47 = vpop.f32.mrf.mxu2  ;;  %v5177_v46 = vpop.f32.mrf.mxu0  ;;  %v5796_v56 = vld [vmem:[#allocation10 + $0x3e0] sm:$0xff] }
 0x6f9   : > { %v9708_v30 = vadd.f32 %v5358_v47, %v5246_v21  ;;  %5932 = vmatpush.msra.mxu2 %v5796_v56  ;;  %v6705_v21 = vld [vmem:[#allocation2 + $0x28] sm:$0xff]  ;;  %v6708_v56 = vld [vmem:[#allocation2 + $0x30] sm:$0xff] }
 0x6fa   : > { %v6706_v47 = vld [vmem:[#allocation2 + $0x4f] sm:$0xff] }
 0x6fb   : > { %5580 = vmatmul.f32.gmra.mxu0 %v6704_v17  ;;  %v6707_v17 = vld [vmem:[#allocation2 + $0x31] sm:$0xff]  ;;  %v9723_v31 = vpop.f32.mrf.mxu1 }
 0x6fd   : > { %5464 = vmatmul.f32.gmra.mxu3 %v9700_v61  ;;  %5408 = vmatmul.f32.gmra.mxu2 %v9471_v28  ;;  %v6715_v61 = vld [vmem:[#allocation2 + $0x87] sm:$0xff] }
 0x6fe   : > { %5832 = vmatmul.f32.vlgmr.msra.gmra.mxu1 %v6703_v14  ;;  %v5812_v14 = vld [vmem:[#allocation10 + $0x460] sm:$0xff] }
 0x6ff   : > { %v5061_v3 = vpop.f32.mrf.mxu3  ;;  %6045 = vmatpush.msra.mxu3 %v5812_v14 }
 0x700   : > { %v9716_v2 = vadd.f32 %v5174_v40, %v5061_v3  ;;  %v5361_v29 = vpop.f32.mrf.mxu2  ;;  %v5180_v19 = vpop.f32.mrf.mxu0 }
 0x701   : > { %v9718_v38 = vadd.f32 %v5361_v29, %v5249_v6 }
 0x703   : > { %5583 = vmatmul.f32.gmra.mxu0 %v6707_v17  ;;  %v9737_v14 = vpop.f32.mrf.mxu1 }
 0x705   : > { %5467 = vmatmul.f32.gmra.mxu3 %v6705_v21  ;;  %5411 = vmatmul.f32.gmra.mxu2 %v9485_v52  ;;  %v6709_v21 = vld [vmem:[#allocation2 + $0x67] sm:$0xff] }
 0x706   : > { %5835 = vmatmul.f32.gmra.mxu1 %v6706_v47  ;;  %v9729_v47 = vld [vmem:[#allocation2 + $0x49] sm:$0xff] }
 0x707   : > { %v5064_v28 = vpop.f32.mrf.mxu3  ;;  %10966 = vst [vmem:[#allocation57_spill] sm:$0xff] %v9729_v47 }
 0x708   : > { %v9725_v40 = vadd.f32 %v5177_v46, %v5064_v28  ;;  %v5364_v3 = vpop.f32.mrf.mxu2  ;;  %v5183_v29 = vpop.f32.mrf.mxu0 }
 0x709   : > { %v9727_v6 = vadd.f32 %v5364_v3, %v5252_v32  ;;  %v5795_v32 = vld [vmem:[#allocation10 + $0x3d8] sm:$0xff]  ;;  %v9741_v3 = vld [vmem:[#allocation2 + $0x48] sm:$0xff] }
 0x70a   : > { %5933 = vmatpush.msra.mxu2 %v5795_v32 }
 0x70b   : > { %5586 = vmatmul.f32.gmra.mxu0 %v9729_v47  ;;  %v9754_v32 = vpop.f32.mrf.mxu1  ;;  %v5809_v47 = vld [vmem:[#allocation10 + $0x448] sm:$0xff] }
 0x70d   : > { %5470 = vmatmul.f32.gmra.mxu3 %v6708_v56  ;;  %5414 = vmatmul.f32.gmra.mxu2 %v9499_v50  ;;  %v6712_v56 = vld [vmem:[#allocation2 + $0x6f] sm:$0xff]  ;;  %v5811_v50 = vld [vmem:[#allocation10 + $0x458] sm:$0xff] }
 0x70e   : > { %5838 = vmatmul.f32.gmra.mxu1 %v6709_v21  ;;  %v9744_v21 = vld [vmem:[#allocation2 + $0x51] sm:$0xff]  ;;  %6046 = vmatpush.msra.mxu3 %v5811_v50  ;;  %v9759_v50 = vld [vmem:[#allocation2 + $0x69] sm:$0xff] }
 0x70f   : > { %v5067_v52 = vpop.f32.mrf.mxu3  ;;  %10967 = vst [vmem:[#allocation64_spill] sm:$0xff] %v9744_v21 }
 0x710   : > { %v9735_v54 = vadd.f32 %v5180_v19, %v5067_v52  ;;  %v5367_v46 = vpop.f32.mrf.mxu2  ;;  %v5186_v28 = vpop.f32.mrf.mxu0  ;;  %10968 = vst [vmem:[#allocation61_spill] sm:$0xff] %v9759_v50  ;;  %6047 = vmatpush.msra.mxu3 %v5810_v16  ;;  %v6721_v16 = vld [vmem:[#allocation2 + $0xa7] sm:$0xff] }
 0x711   : > { %v9739_v17 = vadd.f32 %v5367_v46, %v5255_v20 }
 0x712   : > { %6048 = vmatpush.msra.mxu3 %v5809_v47  ;;  %v6727_v47 = vld [vmem:[#allocation2 + $0xc7] sm:$0xff] }
 0x713   : > { %5589 = vmatmul.f32.gmra.mxu0 %v9744_v21  ;;  %v9775_v18 = vpop.f32.mrf.mxu1 }
 0x715   : > { %5473 = vmatmul.f32.gmra.mxu3 %v9741_v3  ;;  %5417 = vmatmul.f32.gmra.mxu2 %v9513_v42 }
 0x716   : > { %5841 = vmatmul.f32.gmra.mxu1 %v6712_v56  ;;  %v9756_v56 = vld [vmem:[#allocation2 + $0x50] sm:$0xff] }
 0x717   : > { %v5070_v15 = vpop.f32.mrf.mxu3 }
 0x718   : > { %v9750_v19 = vadd.f32 %v5183_v29, %v5070_v15  ;;  %v5370_v52 = vpop.f32.mrf.mxu2  ;;  %v5189_v46 = vpop.f32.mrf.mxu0 }
 0x719   : > { %v9752_v20 = vadd.f32 %v5370_v52, %v5258_v57  ;;  %v5794_v52 = vld [vmem:[#allocation10 + $0x3d0] sm:$0xff] }
 0x71a   : > { %5934 = vmatpush.msra.mxu2 %v5794_v52 }
 0x71b   : > { %5592 = vmatmul.f32.gmra.mxu0 %v9759_v50  ;;  %v9784_v50 = vld [vmem:[#allocation2 + $0x70] sm:$0xff] }
 0x71d   : > { %5476 = vmatmul.f32.gmra.mxu3 %v9756_v56  ;;  %5420 = vmatmul.f32.gmra.mxu2 %v9525_v34  ;;  %v9772_v34 = vld [vmem:[#allocation2 + $0x71] sm:$0xff] }
 0x71e   : > { %5844 = vmatmul.f32.gmra.mxu1 %v6715_v61  ;;  %v6718_v61 = vld [vmem:[#allocation2 + $0x8f] sm:$0xff]  ;;  %10969 = vst [vmem:[#allocation42_spill] sm:$0xff] %v9772_v34 }
 0x71f   : > { %v5073_v42 = vpop.f32.mrf.mxu3 }
 0x720   : > { %v9765_v23 = vadd.f32 %v5186_v28, %v5073_v42  ;;  %v5373_v29 = vpop.f32.mrf.mxu2  ;;  %v5192_v57 = vpop.f32.mrf.mxu0  ;;  %v5264_v28 = vadd.f32 %v9613_v58, %v9585_v43  ;;  %v5791_v58 = vld [vmem:[#allocation10 + $0x3b8] sm:$0xff] }
 0x721   : > { %v9767_v15 = vadd.f32 %v5373_v29, %v5261_v9 }
 0x723   : > { %5595 = vmatmul.f32.gmra.mxu0 %v9772_v34  ;;  %v5792_v34 = vld [vmem:[#allocation10 + $0x3c0] sm:$0xff] }
 0x725   : > { %5479 = vmatmul.f32.gmra.mxu3 %v9769_v63  ;;  %5423 = vmatmul.f32.gmra.mxu2 %v9539_v1  ;;  %v9787_v1 = vld [vmem:[#allocation2 + $0x89] sm:$0xff] }
 0x726   : > { %5847 = vmatmul.f32.gmra.mxu1 %v6718_v61  ;;  %v5793_v61 = vld [vmem:[#allocation10 + $0x3c8] sm:$0xff]  ;;  %10970 = vst [vmem:[#allocation52_spill] sm:$0xff] %v9787_v1 }
 0x727   : > { %v5076_v12 = vpop.f32.mrf.mxu3  ;;  %5935 = vmatpush.msra.mxu2 %v5793_v61  ;;  %v5790_v61 = vld [vmem:[#allocation10 + $0x3b0] sm:$0xff] }
 0x728   : > { %v9780_v42 = vadd.f32 %v5189_v46, %v5076_v12  ;;  %v5376_v9 = vpop.f32.mrf.mxu2  ;;  %v5195_v52 = vpop.f32.mrf.mxu0  ;;  %v5267_v46 = vadd.f32 %v9639_v0, %v9602_v7  ;;  %v5788_v7 = vld [vmem:[#allocation10 + $0x3a0] sm:$0xff]  ;;  %v9802_v0 = vld [vmem:[#allocation2 + $0x91] sm:$0xff] }
 0x729   : > { %v9782_v29 = vadd.f32 %v5376_v9, %v5264_v28  ;;  %5936 = vmatpush.msra.mxu2 %v5792_v34  ;;  %v9793_v12 = vpop.f32.mrf.mxu1  ;;  %v9799_v34 = vld [vmem:[#allocation2 + $0x88] sm:$0xff]  ;;  %10971 = vst [vmem:[#allocation90_spill] sm:$0xff] %v9802_v0 }
 0x72b   : > { %5598 = vmatmul.f32.gmra.mxu0 %v9787_v1  ;;  %5937 = vmatpush.msra.mxu2 %v5791_v58  ;;  %v5789_v1 = vld [vmem:[#allocation10 + $0x3a8] sm:$0xff]  ;;  %v5270_v58 = vadd.f32 %v9662_v48, %v9623_v51 }
 0x72c   : > { %v9817_v51 = vld [vmem:[#allocation2 + $0xa9] sm:$0xff] }
 0x72d   : > { %5482 = vmatmul.f32.gmra.mxu3 %v9784_v50  ;;  %5426 = vmatmul.f32.gmra.mxu2 %v9553_v41  ;;  %v6724_v41 = vld [vmem:[#allocation2 + $0xaf] sm:$0xff]  ;;  %10972 = vst [vmem:[#allocation68_spill] sm:$0xff] %v9817_v51 }
 0x72e   : > { %5850 = vmatmul.f32.gmra.mxu1 %v6721_v16  ;;  %5938 = vmatpush.msra.mxu2 %v5790_v61  ;;  %v5786_v61 = vld [vmem:[#allocation10 + $0x390] sm:$0xff] }
 0x72f   : > { %v5079_v43 = vpop.f32.mrf.mxu3 }
 0x730   : > { %v9795_v28 = vadd.f32 %v5192_v57, %v5079_v43  ;;  %v5379_v9 = vpop.f32.mrf.mxu2  ;;  %v5198_v21 = vpop.f32.mrf.mxu0  ;;  %5939 = vmatpush.msra.mxu2 %v5789_v1  ;;  %v5787_v43 = vld [vmem:[#allocation10 + $0x398] sm:$0xff]  ;;  %v5785_v1 = vld [vmem:[#allocation10 + $0x388] sm:$0xff] }
 0x731   : > { %v9797_v16 = vadd.f32 %v5379_v9, %v5267_v46 }
 0x732   : > { %5940 = vmatpush.msra.mxu2 %v5788_v7  ;;  %v5784_v7 = vld [vmem:[#allocation10 + $0x380] sm:$0xff] }
 0x733   : > { %5601 = vmatmul.f32.gmra.mxu0 %v9802_v0 }
 0x734   : > { %5941 = vmatpush.msra.mxu2 %v5787_v43 }
 0x735   : > { %5485 = vmatmul.f32.gmra.mxu3 %v9799_v34  ;;  %5429 = vmatmul.f32.gmra.mxu2 %v9577_v59 }
 0x736   : > { %5853 = vmatmul.f32.gmra.mxu1 %v6724_v41  ;;  %v9810_v41 = vpop.f32.mrf.mxu1  ;;  %5942 = vmatpush.msra.mxu2 %v5786_v61 }
 0x737   : > { %v5082_v57 = vpop.f32.mrf.mxu3 }
 0x738   : > { %v9808_v46 = vadd.f32 %v5195_v52, %v5082_v57  ;;  %v5382_v9 = vpop.f32.mrf.mxu2  ;;  %v5201_v0 = vpop.f32.mrf.mxu0  ;;  %5943 = vmatpush.msra.mxu2 %v5785_v1  ;;  %v5273_v52 = vadd.f32 %v9684_v33, %v9644_v5  ;;  %v6730_v1 = vld [vmem:[#allocation2 + $0xcf] sm:$0xff]  ;;  %v5276_v33 = vadd.f32 %v9698_v36, %v9665_v8  ;;  %v5279_v36 = vadd.f32 %v9711_v53, %v9682_v26 }
 0x739   : > { %v9812_v55 = vadd.f32 %v5382_v9, %v5270_v58  ;;  %v5282_v53 = vadd.f32 %v9723_v31, %v9694_v44  ;;  %v5285_v31 = vadd.f32 %v9737_v14, %v9706_v62  ;;  %v5288_v14 = vadd.f32 %v9754_v32, %v9716_v2 }
 0x73a   : > { %5944 = vmatpush.msra.mxu2 %v5784_v7  ;;  %v5291_v32 = vadd.f32 %v9775_v18, %v9725_v40  ;;  %v5294_v18 = vadd.f32 %v9793_v12, %v9735_v54 }
 0x73b   : > { %5604 = vmatmul.f32.gmra.mxu0 %v9817_v51  ;;  %v5808_v51 = vld [vmem:[#allocation10 + $0x440] sm:$0xff] }
 0x73c   : > { %6049 = vmatpush.msra.mxu3 %v5808_v51 }
 0x73d   : > { %5488 = vmatmul.f32.gmra.mxu3 %v9814_v4  ;;  %5432 = vmatmul.f32.gmra.mxu2 %v9591_v37 }
 0x73e   : > { %5856 = vmatmul.f32.gmra.mxu1 %v6727_v47  ;;  %v9827_v61 = vpop.f32.mrf.mxu1  ;;  %v9829_v47 = vld [vmem:[#allocation2 + $0xa8] sm:$0xff] }
 0x73f   : > { %v5085_v48 = vpop.f32.mrf.mxu3 }
 0x740   : > { %v9823_v57 = vadd.f32 %v5198_v21, %v5085_v48  ;;  %v5385_v43 = vpop.f32.mrf.mxu2  ;;  %v5204_v9 = vpop.f32.mrf.mxu0 }
 0x741   : > { %v9825_v58 = vadd.f32 %v5385_v43, %v5273_v52  ;;  %v9842_v43 = vld [vmem:[#allocation2 + $0xb0] sm:$0xff] }
 0x743   : > { %5607 = vmatmul.f32.gmra.mxu0 %v9832_v22  ;;  %v9845_v22 = vld [vmem:[#allocation2 + $0xc9] sm:$0xff] }
 0x744   : > { %10975 = vst [vmem:[#allocation69_spill] sm:$0xff] %v9845_v22 }
 0x745   : > { %5491 = vmatmul.f32.gmra.mxu3 %v9829_v47  ;;  %5435 = vmatmul.f32.gmra.mxu2 %v9608_v13 }
 0x746   : > { %5859 = vmatmul.f32.gmra.mxu1 %v6730_v1  ;;  %v6733_v1 = vld [vmem:[#allocation2 + $0xe7] sm:$0xff]  ;;  %v9848_v51 = vpop.f32.mrf.mxu1 }
 0x747   : > { %v5088_v5 = vpop.f32.mrf.mxu3 }
 0x748   : > { %v9838_v21 = vadd.f32 %v5201_v0, %v5088_v5  ;;  %v5388_v7 = vpop.f32.mrf.mxu2  ;;  %v5207_v52 = vpop.f32.mrf.mxu0 }
 0x749   : > { %v9840_v48 = vadd.f32 %v5388_v7, %v5276_v33 }
 0x74b   : > { %10974 = vst [vmem:[#allocation71_spill] sm:$0xff] %v9840_v48  ;;  %5610 = vmatmul.f32.gmra.mxu0 %v9845_v22  ;;  %v9857_v48 = vld [vmem:[#allocation2 + $0xc8] sm:$0xff]  ;;  %v5807_v22 = vld [vmem:[#allocation10 + $0x438] sm:$0xff] }
 0x74c   : > { %6050 = vmatpush.msra.mxu3 %v5807_v22  ;;  %v9875_v22 = vld [vmem:[#allocation2 + $0xe9] sm:$0xff] }
 0x74d   : > { %5494 = vmatmul.f32.gmra.mxu3 %v9842_v43  ;;  %5438 = vmatmul.f32.gmra.mxu2 %v9629_v27  ;;  %10979 = vst [vmem:[#allocation60_spill] sm:$0xff] %v9875_v22 }
 0x74e   : > { %5862 = vmatmul.f32.gmra.mxu1 %v6733_v1  ;;  %v6736_v1 = vld [vmem:[#allocation2 + $0xef] sm:$0xff] }
 0x74f   : > { %v5091_v8 = vpop.f32.mrf.mxu3 }
 0x750   : > { %v9853_v0 = vadd.f32 %v5204_v9, %v5091_v8  ;;  %v5391_v5 = vpop.f32.mrf.mxu2  ;;  %v5210_v7 = vpop.f32.mrf.mxu0 }
 0x751   : > { %v9855_v33 = vadd.f32 %v5391_v5, %v5279_v36  ;;  %v9866_v9 = vpop.f32.mrf.mxu1 }
 0x753   : > { %10976 = vst [vmem:[#allocation58_spill] sm:$0xff] %v9855_v33  ;;  %5613 = vmatmul.f32.gmra.mxu0 %v9860_v25  ;;  %v9872_v33 = vld [vmem:[#allocation2 + $0xd0] sm:$0xff]  ;;  %v6739_v25 = vld [vmem:[#allocation2 + $0x107] sm:$0xff] }
 0x755   : > { %5497 = vmatmul.f32.gmra.mxu3 %v9857_v48  ;;  %5441 = vmatmul.f32.gmra.mxu2 %v9650_v24 }
 0x756   : > { %5865 = vmatmul.f32.gmra.mxu1 %v6736_v1 }
 0x757   : > { %v5094_v26 = vpop.f32.mrf.mxu3 }
 0x758   : > { %v9868_v8 = vadd.f32 %v5207_v52, %v5094_v26  ;;  %v5394_v36 = vpop.f32.mrf.mxu2  ;;  %v5213_v1 = vpop.f32.mrf.mxu0 }
 0x759   : > { %v9870_v5 = vadd.f32 %v5394_v36, %v5282_v53  ;;  %v9883_v53 = vpop.f32.mrf.mxu1 }
 0x75b   : > { %10978 = vst [vmem:[#allocation70_spill] sm:$0xff] %v9870_v5  ;;  %5616 = vmatmul.f32.gmra.mxu0 %v9875_v22  ;;  %v5806_v22 = vld [vmem:[#allocation10 + $0x430] sm:$0xff] }
 0x75c   : > { %6051 = vmatpush.msra.mxu3 %v5806_v22  ;;  %v9905_v22 = vld [vmem:[#allocation2 + $0x109] sm:$0xff] }
 0x75d   : > { %5500 = vmatmul.f32.gmra.mxu3 %v9872_v33  ;;  %5945 = vmatmul.f32.vlgmr.msra.gmra.mxu2 %v9741_v3  ;;  %v9890_v3 = vld [vmem:[#allocation2 + $0xf1] sm:$0xff]  ;;  %10983 = vst [vmem:[#allocation16_spill] sm:$0xff] %v9905_v22 }
 0x75e   : > { %5868 = vmatmul.f32.gmra.mxu1 %v6739_v25  ;;  %v6742_v25 = vld [vmem:[#allocation2 + $0x10f] sm:$0xff]  ;;  %10981 = vst [vmem:[#allocation50_spill] sm:$0xff] %v9890_v3 }
 0x75f   : > { %v5097_v44 = vpop.f32.mrf.mxu3 }
 0x760   : > { %v9881_v52 = vadd.f32 %v5210_v7, %v5097_v44  ;;  %v5397_v26 = vpop.f32.mrf.mxu2  ;;  %v5216_v5 = vpop.f32.mrf.mxu0 }
 0x761   : > { %v9885_v36 = vadd.f32 %v5397_v26, %v5285_v31 }
 0x763   : > { %10980 = vst [vmem:[#allocation54_spill] sm:$0xff] %v9885_v36  ;;  %5619 = vmatmul.f32.gmra.mxu0 %v9890_v3  ;;  %v9900_v36 = vpop.f32.mrf.mxu1  ;;  %v6745_v3 = vld [vmem:[#allocation2 + $0x127] sm:$0xff] }
 0x765   : > { %5503 = vmatmul.f32.gmra.mxu3 %v9887_v60  ;;  %5948 = vmatmul.f32.gmra.mxu2 %v9756_v56 }
 0x766   : > { %5871 = vmatmul.f32.gmra.mxu1 %v6742_v25  ;;  %v9902_v25 = vld [vmem:[#allocation2 + $0xf0] sm:$0xff] }
 0x767   : > { %v5100_v62 = vpop.f32.mrf.mxu3 }
 0x768   : > { %v9896_v7 = vadd.f32 %v5213_v1, %v5100_v62  ;;  %v5400_v44 = vpop.f32.mrf.mxu2  ;;  %v5575_v26 = vpop.f32.mrf.mxu0 }
 0x769   : > { %v9898_v31 = vadd.f32 %v5400_v44, %v5288_v14  ;;  %v9915_v14 = vld [vmem:[#allocation2 + $0x108] sm:$0xff] }
 0x76a   : > { %v5805_v44 = vld [vmem:[#allocation10 + $0x428] sm:$0xff] }
 0x76b   : > { %10982 = vst [vmem:[#allocation56_spill] sm:$0xff] %v9898_v31  ;;  %5622 = vmatmul.f32.gmra.mxu0 %v9905_v22  ;;  %v9918_v22 = vld [vmem:[#allocation2 + $0x111] sm:$0xff]  ;;  %6052 = vmatpush.msra.mxu3 %v5805_v44  ;;  %v6751_v44 = vld [vmem:[#allocation2 + $0x147] sm:$0xff] }
 0x76c   : > { %10984 = vst [vmem:[#allocation17_spill] sm:$0xff] %v9918_v22 }
 0x76d   : > { %5506 = vmatmul.f32.gmra.mxu3 %v9902_v25  ;;  %5951 = vmatmul.f32.gmra.mxu2 %v9769_v63  ;;  %v9921_v63 = vpop.f32.mrf.mxu1 }
 0x76e   : > { %5874 = vmatmul.f32.gmra.mxu1 %v6745_v3  ;;  %v6748_v3 = vld [vmem:[#allocation2 + $0x12f] sm:$0xff] }
 0x770   : > { %v5103_v2 = vpop.f32.mrf.mxu3  ;;  %v5403_v1 = vpop.f32.mrf.mxu2 }
 0x771   : > { %v9911_v56 = vadd.f32 %v5216_v5, %v5103_v2  ;;  %v9913_v62 = vadd.f32 %v5403_v1, %v5291_v32  ;;  %v5578_v31 = vpop.f32.mrf.mxu0 }
 0x773   : > { %5625 = vmatmul.f32.gmra.mxu0 %v9918_v22  ;;  %v9934_v22 = vld [vmem:[#allocation2 + $0x129] sm:$0xff] }
 0x775   : > { %5509 = vmatmul.f32.gmra.mxu3 %v9915_v14  ;;  %5954 = vmatmul.f32.gmra.mxu2 %v9784_v50  ;;  %v9940_v12 = vpop.f32.mrf.mxu1 }
 0x776   : > { %5877 = vmatmul.f32.gmra.mxu1 %v6748_v3  ;;  %v9931_v3 = vld [vmem:[#allocation2 + $0x110] sm:$0xff] }
 0x778   : > { %v5462_v40 = vpop.f32.mrf.mxu3  ;;  %v5406_v2 = vpop.f32.mrf.mxu2 }
 0x779   : > { %v5463_v5 = vadd.f32 %v5462_v40, %v9669_v35  ;;  %v9929_v1 = vadd.f32 %v5406_v2, %v5294_v18  ;;  %v5581_v50 = vpop.f32.mrf.mxu0  ;;  %v5297_v35 = vadd.f32 %v9810_v41, %v9750_v19  ;;  %v9947_v2 = vld [vmem:[#allocation2 + $0x128] sm:$0xff]  ;;  %v5300_v19 = vadd.f32 %v9827_v61, %v9765_v23 }
 0x77a   : > { %v5303_v23 = vadd.f32 %v9848_v51, %v9780_v42  ;;  %v5306_v42 = vadd.f32 %v9866_v9, %v9795_v28  ;;  %v5309_v28 = vadd.f32 %v9883_v53, %v9808_v46 }
 0x77b   : > { %v9927_v32 = vadd.f32 %v5575_v26, %v5463_v5  ;;  %5628 = vmatmul.f32.gmra.mxu0 %v9934_v22 }
 0x77d   : > { %10985 = vst [vmem:[#allocation15_spill] sm:$0xff] %v9927_v32  ;;  %5512 = vmatmul.f32.gmra.mxu3 %v9931_v3  ;;  %5957 = vmatmul.f32.gmra.mxu2 %v9799_v34  ;;  %v5804_v34 = vld [vmem:[#allocation10 + $0x420] sm:$0xff]  ;;  %v9950_v32 = vld [vmem:[#allocation2 + $0x131] sm:$0xff] }
 0x77e   : > { %5880 = vmatmul.f32.gmra.mxu1 %v6751_v44  ;;  %v6754_v44 = vld [vmem:[#allocation2 + $0x14f] sm:$0xff]  ;;  %6053 = vmatpush.msra.mxu3 %v5804_v34  ;;  %v6757_v34 = vld [vmem:[#allocation2 + $0x167] sm:$0xff] }
 0x780   : > { %v5465_v54 = vpop.f32.mrf.mxu3  ;;  %v5409_v40 = vpop.f32.mrf.mxu2 }
 0x781   : > { %v5466_v26 = vadd.f32 %v5465_v54, %v9686_v49  ;;  %v9945_v5 = vadd.f32 %v5409_v40, %v5297_v35  ;;  %v5584_v54 = vpop.f32.mrf.mxu0  ;;  %v9957_v35 = vpop.f32.mrf.mxu1 }
 0x783   : > { %v9943_v18 = vadd.f32 %v5578_v31, %v5466_v26  ;;  %5631 = vmatmul.f32.gmra.mxu0 %v9950_v32 }
 0x785   : > { %10986 = vst [vmem:[#allocation20_spill] sm:$0xff] %v9943_v18  ;;  %5515 = vmatmul.f32.gmra.mxu3 %v9947_v2  ;;  %5960 = vmatmul.f32.gmra.mxu2 %v9814_v4  ;;  %v9966_v4 = vld [vmem:[#allocation2 + $0x149] sm:$0xff]  ;;  %v9982_v18 = vld [vmem:[#allocation2 + $0x151] sm:$0xff] }
 0x786   : > { %5883 = vmatmul.f32.gmra.mxu1 %v6754_v44  ;;  %v9963_v44 = vld [vmem:[#allocation2 + $0x130] sm:$0xff] }
 0x788   : > { %v5468_v49 = vpop.f32.mrf.mxu3  ;;  %v5412_v31 = vpop.f32.mrf.mxu2 }
 0x789   : > { %v5469_v41 = vadd.f32 %v5468_v49, %v9696_v10  ;;  %v9961_v40 = vadd.f32 %v5412_v31, %v5300_v19  ;;  %v9977_v31 = vpop.f32.mrf.mxu1 }
 0x78b   : > { %v9959_v26 = vadd.f32 %v5581_v50, %v5469_v41  ;;  %5634 = vmatmul.f32.gmra.mxu0 %v9966_v4  ;;  %v5587_v41 = vpop.f32.mrf.mxu0 }
 0x78d   : > { %10987 = vst [vmem:[#allocation18_spill] sm:$0xff] %v9959_v26  ;;  %5518 = vmatmul.f32.gmra.mxu3 %v9963_v44  ;;  %5963 = vmatmul.f32.gmra.mxu2 %v9829_v47  ;;  %v6760_v26 = vld [vmem:[#allocation2 + $0x16f] sm:$0xff]  ;;  %v5803_v47 = vld [vmem:[#allocation10 + $0x418] sm:$0xff] }
 0x78e   : > { %5886 = vmatmul.f32.gmra.mxu1 %v6757_v34  ;;  %v9979_v34 = vld [vmem:[#allocation2 + $0x148] sm:$0xff]  ;;  %6054 = vmatpush.msra.mxu3 %v5803_v47 }
 0x78f   : > { %v9996_v47 = vld [vmem:[#allocation2 + $0x169] sm:$0xff] }
 0x790   : > { %v5471_v10 = vpop.f32.mrf.mxu3  ;;  %v5415_v50 = vpop.f32.mrf.mxu2 }
 0x791   : > { %v5472_v61 = vadd.f32 %v5471_v10, %v9708_v30  ;;  %v9975_v19 = vadd.f32 %v5415_v50, %v5303_v23 }
 0x793   : > { %v9973_v49 = vadd.f32 %v5584_v54, %v5472_v61  ;;  %5637 = vmatmul.f32.gmra.mxu0 %v9982_v18  ;;  %v6763_v61 = vld [vmem:[#allocation2 + $0x187] sm:$0xff]  ;;  %v5590_v50 = vpop.f32.mrf.mxu0 }
 0x795   : > { %5521 = vmatmul.f32.gmra.mxu3 %v9979_v34  ;;  %5966 = vmatmul.f32.gmra.mxu2 %v9842_v43  ;;  %v9999_v43 = vpop.f32.mrf.mxu1 }
 0x796   : > { %5889 = vmatmul.f32.gmra.mxu1 %v6760_v26  ;;  %v9993_v26 = vld [vmem:[#allocation2 + $0x150] sm:$0xff] }
 0x798   : > { %v5474_v30 = vpop.f32.mrf.mxu3  ;;  %v5418_v54 = vpop.f32.mrf.mxu2 }
 0x799   : > { %v5475_v51 = vadd.f32 %v5474_v30, %v9718_v38  ;;  %v9991_v23 = vadd.f32 %v5418_v54, %v5306_v42  ;;  %v6766_v54 = vld [vmem:[#allocation2 + $0x18f] sm:$0xff] }
 0x79b   : > { %v9989_v10 = vadd.f32 %v5587_v41, %v5475_v51  ;;  %5640 = vmatmul.f32.gmra.mxu0 %v9996_v47  ;;  %v10009_v51 = vld [vmem:[#allocation2 + $0x168] sm:$0xff] }
 0x79d   : > { %10988 = vst [vmem:[#allocation78_spill] sm:$0xff] %v9989_v10  ;;  %5524 = vmatmul.f32.gmra.mxu3 %v9993_v26  ;;  %5969 = vmatmul.f32.gmra.mxu2 %v9857_v48  ;;  %v10012_v10 = vld [vmem:[#allocation2 + $0x171] sm:$0xff]  ;;  %v5312_v48 = vadd.f32 %v9900_v36, %v9823_v57  ;;  %v10018_v53 = vpop.f32.mrf.mxu1 }
 0x79e   : > { %5892 = vmatmul.f32.gmra.mxu1 %v6763_v61  ;;  %v5802_v61 = vld [vmem:[#allocation10 + $0x410] sm:$0xff] }
 0x79f   : > { %6055 = vmatpush.msra.mxu3 %v5802_v61 }
 0x7a0   : > { %v5477_v38 = vpop.f32.mrf.mxu3  ;;  %v5421_v41 = vpop.f32.mrf.mxu2 }
 0x7a1   : > { %v5478_v9 = vadd.f32 %v5477_v38, %v9727_v6  ;;  %v10007_v42 = vadd.f32 %v5421_v41, %v5309_v28  ;;  %v5593_v6 = vpop.f32.mrf.mxu0  ;;  %v10025_v41 = vld [vmem:[#allocation2 + $0x170] sm:$0xff] }
 0x7a3   : > { %v10005_v30 = vadd.f32 %v5590_v50, %v5478_v9  ;;  %5643 = vmatmul.f32.gmra.mxu0 %v10012_v10 }
 0x7a5   : > { %5527 = vmatmul.f32.gmra.mxu3 %v10009_v51  ;;  %5972 = vmatmul.f32.gmra.mxu2 %v9872_v33  ;;  %v10028_v33 = vld [vmem:[#allocation2 + $0x189] sm:$0xff] }
 0x7a6   : > { %5895 = vmatmul.f32.gmra.mxu1 %v6766_v54  ;;  %v6769_v54 = vld [vmem:[#allocation2 + $0x1a7] sm:$0xff] }
 0x7a8   : > { %v5480_v46 = vpop.f32.mrf.mxu3  ;;  %v5424_v38 = vpop.f32.mrf.mxu2 }
 0x7a9   : > { %v5481_v50 = vadd.f32 %v5480_v46, %v9739_v17  ;;  %v10023_v9 = vadd.f32 %v5424_v38, %v5312_v48  ;;  %v5315_v17 = vadd.f32 %v9921_v63, %v9838_v21  ;;  %v5596_v61 = vpop.f32.mrf.mxu0  ;;  %v10035_v46 = vpop.f32.mrf.mxu1  ;;  %v10041_v38 = vld [vmem:[#allocation2 + $0x188] sm:$0xff]  ;;  %v5318_v21 = vadd.f32 %v9940_v12, %v9853_v0 }
 0x7ab   : > { %v10021_v28 = vadd.f32 %v5593_v6, %v5481_v50  ;;  %5646 = vmatmul.f32.gmra.mxu0 %v10028_v33 }
 0x7ad   : > { %5530 = vmatmul.f32.gmra.mxu3 %v10025_v41  ;;  %5975 = vmatmul.f32.gmra.mxu2 %v9887_v60  ;;  %v5801_v60 = vld [vmem:[#allocation10 + $0x408] sm:$0xff] }
 0x7ae   : > { %5898 = vmatmul.f32.gmra.mxu1 %v6769_v54  ;;  %v10045_v54 = vld [vmem:[#allocation2 + $0x191] sm:$0xff]  ;;  %6056 = vmatpush.msra.mxu3 %v5801_v60  ;;  %v10073_v60 = vld [vmem:[#allocation2 + $0x1a8] sm:$0xff] }
 0x7b0   : > { %v5483_v57 = vpop.f32.mrf.mxu3  ;;  %v5427_v6 = vpop.f32.mrf.mxu2 }
 0x7b1   : > { %v5484_v36 = vadd.f32 %v5483_v57, %v9752_v20  ;;  %v10039_v50 = vadd.f32 %v5427_v6, %v5315_v17 }
 0x7b3   : > { %v10037_v48 = vadd.f32 %v5596_v61, %v5484_v36  ;;  %5649 = vmatmul.f32.gmra.mxu0 %v10045_v54  ;;  %v10056_v36 = vpop.f32.mrf.mxu1  ;;  %v10062_v61 = vld [vmem:[#allocation2 + $0x1a9] sm:$0xff] }
 0x7b5   : > { %5533 = vmatmul.f32.gmra.mxu3 %v10041_v38  ;;  %5978 = vmatmul.f32.gmra.mxu2 %v9902_v25 }
 0x7b6   : > { %5901 = vmatmul.f32.gmra.mxu1 %v9577_v59  ;;  %v10058_v59 = vld [vmem:[#allocation2 + $0x190] sm:$0xff] }
 0x7b8   : > { %v5486_v20 = vpop.f32.mrf.mxu3  ;;  %v5430_v57 = vpop.f32.mrf.mxu2 }
 0x7b9   : > { %v10052_v63 = vadd.f32 %v5486_v20, %v9767_v15  ;;  %v10054_v17 = vadd.f32 %v5430_v57, %v5318_v21  ;;  %v5321_v15 = vadd.f32 %v9957_v35, %v9868_v8  ;;  %v6776_v57 = vld [vmem:[#allocation2 + $0x1b0] sm:$0xff] }
 0x7bb   : > { %5652 = vmatmul.f32.gmra.mxu0 %v10062_v61 }
 0x7bd   : > { %5536 = vmatmul.f32.gmra.mxu3 %v10058_v59  ;;  %5981 = vmatmul.f32.gmra.mxu2 %v9915_v14  ;;  %v10078_v14 = vpop.f32.mrf.mxu1 }
 0x7be   : > { %5904 = vmatmul.f32.gmra.mxu1 %v9591_v37  ;;  %v5800_v37 = vld [vmem:[#allocation10 + $0x400] sm:$0xff] }
 0x7bf   : > { %6057 = vmatpush.msra.mxu3 %v5800_v37 }
 0x7c0   : > { %v5489_v0 = vpop.f32.mrf.mxu3  ;;  %v5433_v12 = vpop.f32.mrf.mxu2 }
 0x7c1   : > { %v10069_v25 = vadd.f32 %v5489_v0, %v9782_v29  ;;  %v10071_v6 = vadd.f32 %v5433_v12, %v5321_v15  ;;  %v5324_v29 = vadd.f32 %v9977_v31, %v9881_v52  ;;  %v6777_v0 = vld [vmem:[#allocation2 + $0x1c8] sm:$0xff]  ;;  %v6778_v15 = vld [vmem:[#allocation2 + $0x1d0] sm:$0xff]  ;;  %v10989_v12 = vld [vmem:[#allocation67_spill] sm:$0xff] }
 0x7c3   : > { %5655 = vmatmul.f32.gmra.mxu0 %v9593_v39 }
 0x7c5   : > { %5539 = vmatmul.f32.gmra.mxu3 %v10073_v60  ;;  %5984 = vmatmul.f32.gmra.mxu2 %v9931_v3  ;;  %v10093_v3 = vpop.f32.mrf.mxu1 }
 0x7c6   : > { %5907 = vmatmul.f32.gmra.mxu1 %v9608_v13  ;;  %v5327_v13 = vadd.f32 %v9999_v43, %v9896_v7 }
 0x7c8   : > { %v5492_v8 = vpop.f32.mrf.mxu3  ;;  %v5436_v20 = vpop.f32.mrf.mxu2 }
 0x7c9   : > { %v10084_v35 = vadd.f32 %v5492_v8, %v9797_v16  ;;  %v10086_v21 = vadd.f32 %v5436_v20, %v5324_v29  ;;  %v10994_v8 = vld [vmem:[#allocation55_spill] sm:$0xff]  ;;  %v10995_v20 = vld [vmem:[#allocation58_spill] sm:$0xff] }
 0x7cb   : > { %5658 = vmatmul.f32.gmra.mxu0 %v9610_v45 }
 0x7cd   : > { %5542 = vmatmul.f32.gmra.mxu3 %v6776_v57  ;;  %5987 = vmatmul.f32.gmra.mxu2 %v9947_v2  ;;  %v10108_v2 = vpop.f32.mrf.mxu1 }
 0x7ce   : > { %5910 = vmatmul.f32.gmra.mxu1 %v9629_v27  ;;  %v5330_v27 = vadd.f32 %v10018_v53, %v9911_v56  ;;  %v10993_v53 = vld [vmem:[#allocation63_spill] sm:$0xff] }
 0x7d0   : > { %v5495_v39 = vpop.f32.mrf.mxu3  ;;  %v5439_v52 = vpop.f32.mrf.mxu2 }
 0x7d1   : > { %v10096_v16 = vadd.f32 %v5495_v39, %v9812_v55  ;;  %v10098_v31 = vadd.f32 %v5439_v52, %v5327_v13  ;;  %v10996_v13 = vld [vmem:[#allocation40_spill] sm:$0xff]  ;;  %v10997_v52 = vld [vmem:[#allocation70_spill] sm:$0xff] }
 0x7d3   : > { %5661 = vmatmul.f32.gmra.mxu0 %v9631_v11 }
 0x7d5   : > { %5545 = vmatmul.f32.gmra.mxu3 %v6777_v0  ;;  %5990 = vmatmul.f32.gmra.mxu2 %v9963_v44  ;;  %v10991_v44 = vld [vmem:[#allocation71_spill] sm:$0xff]  ;;  %v10118_v56 = vpop.f32.mrf.mxu1 }
 0x7d6   : > { %5913 = vmatmul.f32.gmra.mxu1 %v9650_v24  ;;  %v10990_v24 = vld [vmem:[#allocation30_spill] sm:$0xff] }
 0x7d8   : > { %v5498_v45 = vpop.f32.mrf.mxu3  ;;  %v5442_v55 = vpop.f32.mrf.mxu2 }
 0x7d9   : > { %v10106_v7 = vadd.f32 %v5498_v45, %v9825_v58  ;;  %v10110_v43 = vadd.f32 %v5442_v55, %v5330_v27  ;;  %v10992_v58 = vld [vmem:[#allocation89_spill] sm:$0xff] }
 0x7da   : > { %v10998_v27 = vld [vmem:[#allocation57_spill] sm:$0xff] }
 0x7db   : > { %5664 = vmatmul.f32.gmra.mxu0 %v10990_v24 }
 0x7dd   : > { %5548 = vmatmul.f32.gmra.mxu3 %v6778_v15  ;;  %5993 = vmatmul.f32.gmra.mxu2 %v9979_v34 }
 0x7de   : > { %5916 = vmatmul.f32.gmra.mxu1 %v10989_v12  ;;  %v10999_v12 = vld [vmem:[#allocation54_spill] sm:$0xff] }
 0x7e0   : > { %v5501_v11 = vpop.f32.mrf.mxu3 }
 0x7e1   : > { %v10116_v37 = vadd.f32 %v5501_v11, %v10991_v44  ;;  %v11001_v44 = vld [vmem:[#allocation56_spill] sm:$0xff] }
 0x7e3   : > { %5667 = vmatmul.f32.gmra.mxu0 %v10994_v8 }
 0x7e5   : > { %5551 = vmatmul.f32.gmra.mxu3 %v10992_v58  ;;  %5996 = vmatmul.f32.gmra.mxu2 %v9993_v26  ;;  %v11000_v26 = vld [vmem:[#allocation64_spill] sm:$0xff] }
 0x7e6   : > { %5919 = vmatmul.f32.gmra.mxu1 %v10993_v53 }
 0x7e8   : > { %v5504_v29 = vpop.f32.mrf.mxu3 }
 0x7e9   : > { %v10125_v39 = vadd.f32 %v5504_v29, %v10995_v20  ;;  %v5946_v20 = vpop.f32.mrf.mxu2 }
 0x7ed   : > { %5554 = vmatmul.f32.gmra.mxu3 %v10996_v13  ;;  %5999 = vmatmul.f32.gmra.mxu2 %v10009_v51  ;;  %v11002_v51 = vld [vmem:[#allocation61_spill] sm:$0xff] }
 0x7f0   : > { %v5507_v34 = vpop.f32.mrf.mxu3 }
 0x7f1   : > { %v10130_v45 = vadd.f32 %v5507_v34, %v10997_v52  ;;  %v11004_v34 = vld [vmem:[#allocation52_spill] sm:$0xff] }
 0x7f5   : > { %6058 = vmatmul.f32.vlgmr.msra.gmra.mxu3 %v10998_v27  ;;  %6002 = vmatmul.f32.gmra.mxu2 %v10025_v41  ;;  %v11003_v41 = vld [vmem:[#allocation42_spill] sm:$0xff] }
 0x7f8   : > { %v5510_v55 = vpop.f32.mrf.mxu3 }
 0x7f9   : > { %v10135_v24 = vadd.f32 %v5510_v55, %v10999_v12  ;;  %v11005_v55 = vld [vmem:[#allocation90_spill] sm:$0xff] }
 0x7fd   : > { %6061 = vmatmul.f32.gmra.mxu3 %v11000_v26  ;;  %6005 = vmatmul.f32.gmra.mxu2 %v10041_v38  ;;  %v11006_v26 = vld [vmem:[#allocation68_spill] sm:$0xff] }
 0x800   : > { %v5513_v11 = vpop.f32.mrf.mxu3 }
 0x801   : > { %v10140_v58 = vadd.f32 %v5513_v11, %v11001_v44  ;;  %v11007_v11 = vld [vmem:[#allocation21_spill] sm:$0xff]  ;;  %v6779_v44 = vld [vmem:[#allocation2 + $0x1e8] sm:$0xff] }
 0x805   : > { %6064 = vmatmul.f32.gmra.mxu3 %v11002_v51  ;;  %6008 = vmatmul.f32.gmra.mxu2 %v10058_v59  ;;  %v5949_v59 = vpop.f32.mrf.mxu2 }
 0x808   : > { %v5516_v53 = vpop.f32.mrf.mxu3 }
 0x809   : > { %v10145_v8 = vadd.f32 %v5516_v53, %v9913_v62 }
 0x80d   : > { %6067 = vmatmul.f32.gmra.mxu3 %v11003_v41  ;;  %6011 = vmatmul.f32.gmra.mxu2 %v10073_v60  ;;  %v10160_v60 = vpop.f32.mrf.mxu2  ;;  %v11009_v41 = vld [vmem:[#allocation72_spill] sm:$0xff] }
 0x810   : > { %v5519_v29 = vpop.f32.mrf.mxu3 }
 0x811   : > { %v10150_v38 = vadd.f32 %v5519_v29, %v9929_v1  ;;  %v11010_v29 = vld [vmem:[#allocation81_spill] sm:$0xff] }
 0x815   : > { %6070 = vmatmul.f32.gmra.mxu3 %v11004_v34  ;;  %6014 = vmatmul.f32.gmra.mxu2 %v6776_v57 }
 0x818   : > { %v5522_v52 = vpop.f32.mrf.mxu3 }
 0x819   : > { %v10154_v27 = vadd.f32 %v5522_v52, %v9945_v5  ;;  %v10167_v5 = vpop.f32.mrf.mxu2 }
 0x81d   : > { %6073 = vmatmul.f32.gmra.mxu3 %v11005_v55  ;;  %6017 = vmatmul.f32.gmra.mxu2 %v6777_v0  ;;  %v11011_v55 = vld [vmem:[#allocation60_spill] sm:$0xff] }
 0x820   : > { %v5525_v62 = vpop.f32.mrf.mxu3 }
 0x821   : > { %v10158_v12 = vadd.f32 %v5525_v62, %v9961_v40  ;;  %v11008_v40 = vld [vmem:[#allocation69_spill] sm:$0xff]  ;;  %v11012_v62 = vld [vmem:[#allocation44_spill] sm:$0xff] }
 0x825   : > { %6076 = vmatmul.f32.gmra.mxu3 %v11006_v26  ;;  %6020 = vmatmul.f32.gmra.mxu2 %v6778_v15  ;;  %v10174_v15 = vpop.f32.mrf.mxu2 }
 0x828   : > { %v5528_v1 = vpop.f32.mrf.mxu3 }
 0x829   : > { %v10164_v57 = vadd.f32 %v5528_v1, %v9975_v19  ;;  %v11013_v1 = vld [vmem:[#allocation50_spill] sm:$0xff] }
 0x82d   : > { %6079 = vmatmul.f32.gmra.mxu3 %v11007_v11  ;;  %6023 = vmatmul.f32.gmra.mxu2 %v6779_v44  ;;  %v11014_v11 = vld [vmem:[#allocation59_spill] sm:$0xff] }
 0x830   : > { %v5531_v0 = vpop.f32.mrf.mxu3 }
 0x831   : > { %v10170_v51 = vadd.f32 %v5531_v0, %v9991_v23  ;;  %v10184_v23 = vpop.f32.mrf.mxu2  ;;  %v11015_v0 = vld [vmem:[#allocation16_spill] sm:$0xff] }
 0x835   : > { %6082 = vmatmul.f32.gmra.mxu3 %v11008_v40  ;;  %6026 = vmatmul.f32.gmra.mxu2 %v10996_v13 }
 0x838   : > { %v5534_v53 = vpop.f32.mrf.mxu3 }
 0x839   : > { %v10177_v19 = vadd.f32 %v5534_v53, %v10007_v42  ;;  %v10191_v42 = vpop.f32.mrf.mxu2 }
 0x83d   : > { %6085 = vmatmul.f32.gmra.mxu3 %v11009_v41  ;;  %6029 = vmatmul.f32.gmra.mxu2 %v11010_v29  ;;  %v11016_v41 = vld [vmem:[#allocation17_spill] sm:$0xff] }
 0x840   : > { %v5537_v34 = vpop.f32.mrf.mxu3 }
 0x841   : > { %v10182_v52 = vadd.f32 %v5537_v34, %v10023_v9  ;;  %v10199_v40 = vpop.f32.mrf.mxu2 }
 0x845   : > { %6088 = vmatmul.f32.gmra.mxu3 %v11011_v55  ;;  %6032 = vmatmul.f32.gmra.mxu2 %v11012_v62 }
 0x848   : > { %v5540_v13 = vpop.f32.mrf.mxu3 }
 0x849   : > { %v10189_v26 = vadd.f32 %v5540_v13, %v10039_v50  ;;  %v10214_v13 = vpop.f32.mrf.mxu1 }
 0x84d   : > { %6091 = vmatmul.f32.gmra.mxu3 %v11013_v1  ;;  %6035 = vmatmul.f32.gmra.mxu2 %v11014_v11  ;;  %v5947_v1 = vadd.f32 %v5946_v20, %v10035_v46 }
 0x850   : > { %v5543_v44 = vpop.f32.mrf.mxu3 }
 0x851   : > { %v10196_v9 = vadd.f32 %v5543_v44, %v10054_v17 }
 0x855   : > { %6094 = vmatmul.f32.gmra.mxu3 %v11015_v0  ;;  %6038 = vmatmul.f32.gmra.mxu2 %v11014_v11 }
 0x858   : > { %v5546_v53 = vpop.f32.mrf.mxu3 }
 0x859   : > { %v10203_v50 = vadd.f32 %v5546_v53, %v10071_v6 }
 0x85d   : > { %6097 = vmatmul.f32.gmra.mxu3 %v11016_v41  ;;  %v11018_v41 = vld [vmem:[#allocation20_spill] sm:$0xff] }
 0x860   : > { %v5549_v29 = vpop.f32.mrf.mxu3 }
 0x861   : > { %v10207_v34 = vadd.f32 %v5549_v29, %v10086_v21 }
 0x865   : > { %6100 = vmatmul.f32.gmra.mxu3 %v9934_v22  ;;  %v10225_v22 = vld [vmem:[%s10469_s5 + $0x6] ss:$0 sm:$0xff] }
 0x868   : > { %v5552_v17 = vpop.f32.mrf.mxu3 }
 0x869   : > { %v10211_v55 = vadd.f32 %v5552_v17, %v10098_v31  ;;  %v10227_v31 = vpop.f32.mrf.mxu1 }
 0x86d   : > { %6103 = vmatmul.f32.gmra.mxu3 %v9950_v32  ;;  %v11017_v32 = vld [vmem:[#allocation15_spill] sm:$0xff] }
 0x870   : > { %v5555_v62 = vpop.f32.mrf.mxu3 }
 0x871   : > { %v10217_v6 = vadd.f32 %v5555_v62, %v10110_v43  ;;  %v5950_v43 = vadd.f32 %v5949_v59, %v10056_v36  ;;  %v10245_v17 = vpop.f32.mrf.mxu1  ;;  %v5953_v36 = vadd.f32 %v10160_v60, %v10078_v14 }
 0x875   : > { %6106 = vmatmul.f32.gmra.mxu3 %v9966_v4  ;;  %v10235_v4 = vld [vmem:[%s10469_s5 + $0x7] ss:$0 sm:$0xff] }
 0x878   : > { %v6059_v21 = vpop.f32.mrf.mxu3 }
 0x879   : > { %v6060_v11 = vadd.f32 %v6059_v21, %v5947_v1 }
 0x87b   : > { %v6155_v44 = vadd.f32 %v6060_v11, %v11017_v32  ;;  %v10255_v11 = vpop.f32.mrf.mxu0  ;;  %v11019_v32 = vld [vmem:[#allocation18_spill] sm:$0xff] }
 0x87d   : > { %v6189_v46 = vmul.f32 %v10225_v22, %v6155_v44  ;;  %6109 = vmatmul.f32.gmra.mxu3 %v9982_v18  ;;  %v10249_v18 = vpop.f32.mrf.mxu2 }
 0x87f   : > { %v6223_v20 = vadd.f32 %v10235_v4, %v6189_v46 }
 0x880   : > { %v6062_v0 = vpop.f32.mrf.mxu3 }
 0x881   : > { %6255 = vst [vmem:[%s10241_s13] sm:$0xff] %v6223_v20  ;;  %v6063_v53 = vadd.f32 %v6062_v0, %v5950_v43  ;;  %v5956_v43 = vadd.f32 %v10167_v5, %v10093_v3 }
 0x883   : > { %v6156_v29 = vadd.f32 %v6063_v53, %v11018_v41  ;;  %v5602_v41 = vpop.f32.mrf.mxu0 }
 0x885   : > { %v6190_v62 = vmul.f32 %v10225_v22, %v6156_v29  ;;  %6112 = vmatmul.f32.gmra.mxu3 %v9996_v47  ;;  %v10260_v47 = vpop.f32.mrf.mxu1  ;;  %v10265_v60 = vpop.f32.mrf.mxu2 }
 0x887   : > { %v6224_v59 = vadd.f32 %v10235_v4, %v6190_v62 }
 0x888   : > { %v6065_v1 = vpop.f32.mrf.mxu3 }
 0x889   : > { %6256 = vst [vmem:[%s10241_s13 + $0x8] sm:$0xff] %v6224_v59  ;;  %v6066_v21 = vadd.f32 %v6065_v1, %v5953_v36  ;;  %v11020_v1 = vld [vmem:[#allocation78_spill] sm:$0xff] }
 0x88b   : > { %v6157_v44 = vadd.f32 %v6066_v21, %v11019_v32 }
 0x88d   : > { %v6191_v46 = vmul.f32 %v10225_v22, %v6157_v44  ;;  %6115 = vmatmul.f32.gmra.mxu3 %v10012_v10  ;;  %v5959_v10 = vadd.f32 %v10174_v15, %v10108_v2  ;;  %v10274_v62 = vpop.f32.mrf.mxu1  ;;  %v10277_v59 = vpop.f32.mrf.mxu2  ;;  %v5962_v2 = vadd.f32 %v10184_v23, %v10118_v56 }
 0x88f   : > { %v6225_v14 = vadd.f32 %v10235_v4, %v6191_v46 }
 0x890   : > { %v6068_v20 = vpop.f32.mrf.mxu3 }
 0x891   : > { %6257 = vst [vmem:[%s10241_s13 + $0x10] sm:$0xff] %v6225_v14  ;;  %v6069_v0 = vadd.f32 %v6068_v20, %v5956_v43 }
 0x893   : > { %v6158_v53 = vadd.f32 %v6069_v0, %v9973_v49 }
 0x895   : > { %v6192_v29 = vmul.f32 %v10225_v22, %v6158_v53  ;;  %6118 = vmatmul.f32.gmra.mxu3 %v10028_v33  ;;  %v5605_v33 = vpop.f32.mrf.mxu0  ;;  %v10286_v46 = vpop.f32.mrf.mxu1 }
 0x896   : > { %v10289_v14 = vpop.f32.mrf.mxu2 }
 0x897   : > { %v6226_v3 = vadd.f32 %v10235_v4, %v6192_v29 }
 0x898   : > { %v6071_v5 = vpop.f32.mrf.mxu3 }
 0x899   : > { %6258 = vst [vmem:[%s10241_s13 + $0x18] sm:$0xff] %v6226_v3  ;;  %v6072_v36 = vadd.f32 %v6071_v5, %v5959_v10  ;;  %v6780_v3 = vld [vmem:[#allocation2 + $0x1b1] sm:$0xff] }
 0x89b   : > { %v6159_v49 = vadd.f32 %v6072_v36, %v11020_v1 }
 0x89d   : > { %v6193_v21 = vmul.f32 %v10225_v22, %v6159_v49  ;;  %6121 = vmatmul.f32.gmra.mxu3 %v10045_v54  ;;  %v5965_v54 = vadd.f32 %v10191_v42, %v10214_v13  ;;  %v10296_v23 = vpop.f32.mrf.mxu0  ;;  %v5968_v42 = vadd.f32 %v10199_v40, %v10227_v31 }
 0x89f   : > { %v6227_v15 = vadd.f32 %v10235_v4, %v6193_v21  ;;  %v6781_v21 = vld [vmem:[#allocation2 + $0x1c9] sm:$0xff] }
 0x8a0   : > { %v6074_v32 = vpop.f32.mrf.mxu3 }
 0x8a1   : > { %6259 = vst [vmem:[%s10241_s13 + $0x20] sm:$0xff] %v6227_v15  ;;  %v6075_v44 = vadd.f32 %v6074_v32, %v5962_v2  ;;  %v5971_v15 = vadd.f32 %v10249_v18, %v10245_v17  ;;  %v5974_v17 = vadd.f32 %v10265_v60, %v10260_v47 }
 0x8a3   : > { %v6160_v43 = vadd.f32 %v6075_v44, %v10005_v30  ;;  %v10300_v30 = vpop.f32.mrf.mxu1  ;;  %v5600_v44 = vadd.f32 %v10255_v11, %v10052_v63 }
 0x8a5   : > { %v6194_v20 = vmul.f32 %v10225_v22, %v6160_v43  ;;  %6124 = vmatmul.f32.gmra.mxu3 %v10062_v61  ;;  %v10303_v61 = vpop.f32.mrf.mxu2  ;;  %v10309_v1 = vpop.f32.mrf.mxu0 }
 0x8a7   : > { %v6228_v56 = vadd.f32 %v10235_v4, %v6194_v20 }
 0x8a8   : > { %v6077_v0 = vpop.f32.mrf.mxu3 }
 0x8a9   : > { %6260 = vst [vmem:[%s10241_s13 + $0x28] sm:$0xff] %v6228_v56  ;;  %v6078_v53 = vadd.f32 %v6077_v0, %v5965_v54  ;;  %v6782_v56 = vld [vmem:[#allocation2 + $0x1d1] sm:$0xff] }
 0x8ab   : > { %v6161_v29 = vadd.f32 %v6078_v53, %v10021_v28  ;;  %v10313_v2 = vpop.f32.mrf.mxu1  ;;  %v5603_v53 = vadd.f32 %v5602_v41, %v10069_v25  ;;  %v4522_v41 = vld [vmem:[#allocation2 + $0x227] sm:$0xff] }
 0x8ac   : > { %5922 = vmatmul.f32.gmra.mxu1 %v4522_v41 }
 0x8ad   : > { %v6195_v10 = vmul.f32 %v10225_v22, %v6161_v29  ;;  %6127 = vmatmul.f32.gmra.mxu3 %v6780_v3  ;;  %v10318_v31 = vpop.f32.mrf.mxu2  ;;  %v5614_v20 = vpop.f32.mrf.mxu0 }
 0x8af   : > { %v6229_v13 = vadd.f32 %v10235_v4, %v6195_v10 }
 0x8b0   : > { %v6080_v5 = vpop.f32.mrf.mxu3 }
 0x8b1   : > { %6261 = vst [vmem:[%s10241_s13 + $0x30] sm:$0xff] %v6229_v13  ;;  %v6081_v36 = vadd.f32 %v6080_v5, %v5968_v42  ;;  %v6783_v42 = vld [vmem:[#allocation2 + $0x1e9] sm:$0xff]  ;;  %v5977_v5 = vadd.f32 %v10277_v59, %v10274_v62  ;;  %v5980_v62 = vadd.f32 %v10289_v14, %v10286_v46  ;;  %v5983_v46 = vadd.f32 %v10303_v61, %v10300_v30 }
 0x8b3   : > { %v6162_v28 = vadd.f32 %v6081_v36, %v10037_v48  ;;  %v5875_v29 = vpop.f32.mrf.mxu1  ;;  %v5606_v36 = vadd.f32 %v5605_v33, %v10084_v35  ;;  %v5609_v35 = vadd.f32 %v10296_v23, %v10096_v16  ;;  %v5612_v16 = vadd.f32 %v10309_v1, %v10106_v7  ;;  %v4666_v1 = vld [vmem:[#allocation2 + $0x229] sm:$0xff] }
 0x8b5   : > { %v6196_v49 = vmul.f32 %v10225_v22, %v6162_v28  ;;  %6130 = vmatmul.f32.gmra.mxu3 %v6781_v21  ;;  %v5988_v11 = vpop.f32.mrf.mxu2  ;;  %v5617_v13 = vpop.f32.mrf.mxu0 }
 0x8b7   : > { %v6230_v40 = vadd.f32 %v10235_v4, %v6196_v49 }
 0x8b8   : > { %v6083_v32 = vpop.f32.mrf.mxu3 }
 0x8b9   : > { %6262 = vst [vmem:[%s10241_s13 + $0x38] sm:$0xff] %v6230_v40  ;;  %v6084_v48 = vadd.f32 %v6083_v32, %v5971_v15  ;;  %v6784_v40 = vld [vmem:[#allocation2 + $0x1f1] sm:$0xff] }
 0x8bb   : > { %v6163_v43 = vadd.f32 %v6084_v48, %v5600_v44  ;;  %v5878_v28 = vpop.f32.mrf.mxu1  ;;  %v4523_v48 = vld [vmem:[#allocation2 + $0x22f] sm:$0xff] }
 0x8bc   : > { %5925 = vmatmul.f32.gmra.mxu1 %v4523_v48 }
 0x8bd   : > { %v6197_v54 = vmul.f32 %v10225_v22, %v6163_v43  ;;  %6133 = vmatmul.f32.gmra.mxu3 %v6782_v56  ;;  %v5991_v21 = vpop.f32.mrf.mxu2  ;;  %v5620_v32 = vpop.f32.mrf.mxu0 }
 0x8be   : > { %v5621_v48 = vadd.f32 %v5620_v32, %v10130_v45 }
 0x8bf   : > { %v6231_v18 = vadd.f32 %v10235_v4, %v6197_v54 }
 0x8c0   : > { %v6086_v0 = vpop.f32.mrf.mxu3 }
 0x8c1   : > { %6263 = vst [vmem:[%s10241_s13 + $0x40] sm:$0xff] %v6231_v18  ;;  %v6087_v63 = vadd.f32 %v6086_v0, %v5974_v17  ;;  %v6785_v17 = vld [vmem:[#allocation2 + $0x209] sm:$0xff] }
 0x8c3   : > { %v6164_v10 = vadd.f32 %v6087_v63, %v5603_v53  ;;  %v5881_v54 = vpop.f32.mrf.mxu1 }
 0x8c5   : > { %v6198_v3 = vmul.f32 %v10225_v22, %v6164_v10  ;;  %6136 = vmatmul.f32.gmra.mxu3 %v6783_v42  ;;  %v5994_v18 = vpop.f32.mrf.mxu2  ;;  %v5623_v53 = vpop.f32.mrf.mxu0 }
 0x8c7   : > { %v6232_v47 = vadd.f32 %v10235_v4, %v6198_v3  ;;  %v6786_v3 = vld [vmem:[#allocation2 + $0x211] sm:$0xff] }
 0x8c8   : > { %v6089_v60 = vpop.f32.mrf.mxu3 }
 0x8c9   : > { %6264 = vst [vmem:[%s10241_s13 + $0x48] sm:$0xff] %v6232_v47  ;;  %v6090_v25 = vadd.f32 %v6089_v60, %v5977_v5  ;;  %v5986_v5 = vadd.f32 %v10318_v31, %v10313_v2  ;;  %v5615_v60 = vadd.f32 %v5614_v20, %v10116_v37  ;;  %v5618_v31 = vadd.f32 %v5617_v13, %v10125_v39  ;;  %v4667_v37 = vld [vmem:[#allocation2 + $0x231] sm:$0xff] }
 0x8cb   : > { %v6165_v49 = vadd.f32 %v6090_v25, %v5606_v36  ;;  %v5884_v42 = vpop.f32.mrf.mxu1 }
 0x8cd   : > { %v6199_v15 = vmul.f32 %v10225_v22, %v6165_v49  ;;  %6139 = vmatmul.f32.gmra.mxu3 %v6784_v40  ;;  %v5997_v61 = vpop.f32.mrf.mxu2  ;;  %v5626_v25 = vpop.f32.mrf.mxu0  ;;  %v5989_v49 = vadd.f32 %v5988_v11, %v5875_v29 }
 0x8cf   : > { %v6233_v59 = vadd.f32 %v10235_v4, %v6199_v15 }
 0x8d0   : > { %v6092_v44 = vpop.f32.mrf.mxu3 }
 0x8d1   : > { %6265 = vst [vmem:[%s10241_s13 + $0x50] sm:$0xff] %v6233_v59  ;;  %v6093_v33 = vadd.f32 %v6092_v44, %v5980_v62 }
 0x8d3   : > { %v6166_v43 = vadd.f32 %v6093_v33, %v5609_v35  ;;  %v5887_v40 = vpop.f32.mrf.mxu1  ;;  %v5992_v33 = vadd.f32 %v5991_v21, %v5878_v28  ;;  %v5624_v28 = vadd.f32 %v5623_v53, %v10135_v24 }
 0x8d5   : > { %v6200_v56 = vmul.f32 %v10225_v22, %v6166_v43  ;;  %6142 = vmatmul.f32.gmra.mxu3 %v6785_v17  ;;  %v6000_v59 = vpop.f32.mrf.mxu2  ;;  %v5629_v35 = vpop.f32.mrf.mxu0 }
 0x8d7   : > { %v6234_v14 = vadd.f32 %v10235_v4, %v6200_v56 }
 0x8d8   : > { %v6095_v0 = vpop.f32.mrf.mxu3 }
 0x8d9   : > { %6266 = vst [vmem:[%s10241_s13 + $0x58] sm:$0xff] %v6234_v14  ;;  %v6096_v23 = vadd.f32 %v6095_v0, %v5983_v46  ;;  %v5995_v46 = vadd.f32 %v5994_v18, %v5881_v54  ;;  %v5627_v54 = vadd.f32 %v5626_v25, %v10140_v58 }
 0x8db   : > { %v6167_v63 = vadd.f32 %v6096_v23, %v5612_v16  ;;  %v5890_v39 = vpop.f32.mrf.mxu1 }
 0x8dd   : > { %v6201_v10 = vmul.f32 %v10225_v22, %v6167_v63  ;;  %6145 = vmatmul.f32.gmra.mxu3 %v6786_v3  ;;  %v6003_v56 = vpop.f32.mrf.mxu2  ;;  %v5632_v0 = vpop.f32.mrf.mxu0 }
 0x8de   : > { %v6004_v25 = vadd.f32 %v6003_v56, %v5890_v39 }
 0x8df   : > { %v6235_v30 = vadd.f32 %v10235_v4, %v6201_v10  ;;  %v5998_v10 = vadd.f32 %v5997_v61, %v5884_v42  ;;  %v5630_v42 = vadd.f32 %v5629_v35, %v10145_v8 }
 0x8e0   : > { %v6098_v47 = vpop.f32.mrf.mxu3 }
 0x8e1   : > { %6267 = vst [vmem:[%s10241_s13 + $0x60] sm:$0xff] %v6235_v30  ;;  %v6099_v7 = vadd.f32 %v6098_v47, %v5986_v5 }
 0x8e3   : > { %v6168_v36 = vadd.f32 %v6099_v7, %v5615_v60  ;;  %v5893_v63 = vpop.f32.mrf.mxu1  ;;  %v6001_v60 = vadd.f32 %v6000_v59, %v5887_v40 }
 0x8e5   : > { %v6202_v41 = vmul.f32 %v10225_v22, %v6168_v36  ;;  %6148 = vmatmul.f32.gmra.mxu3 %v4666_v1  ;;  %v6006_v32 = vpop.f32.mrf.mxu2  ;;  %v5635_v30 = vpop.f32.mrf.mxu0 }
 0x8e7   : > { %v6236_v15 = vadd.f32 %v10235_v4, %v6202_v41 }
 0x8e8   : > { %v6101_v2 = vpop.f32.mrf.mxu3 }
 0x8e9   : > { %6268 = vst [vmem:[%s10241_s13 + $0x68] sm:$0xff] %v6236_v15  ;;  %v6102_v62 = vadd.f32 %v6101_v2, %v5989_v49 }
 0x8eb   : > { %v6169_v20 = vadd.f32 %v6102_v62, %v5618_v31  ;;  %v5896_v53 = vpop.f32.mrf.mxu1  ;;  %v5633_v31 = vadd.f32 %v5632_v0, %v10150_v38 }
 0x8ed   : > { %v6203_v44 = vmul.f32 %v10225_v22, %v6169_v20  ;;  %6151 = vmatmul.f32.gmra.mxu3 %v4667_v37  ;;  %v6009_v1 = vpop.f32.mrf.mxu2  ;;  %v5638_v49 = vpop.f32.mrf.mxu0 }
 0x8ef   : > { %v6237_v29 = vadd.f32 %v10235_v4, %v6203_v44  ;;  %v6007_v44 = vadd.f32 %v6006_v32, %v5893_v63 }
 0x8f0   : > { %v6104_v11 = vpop.f32.mrf.mxu3 }
 0x8f1   : > { %6269 = vst [vmem:[%s10241_s13 + $0x70] sm:$0xff] %v6237_v29  ;;  %v6105_v43 = vadd.f32 %v6104_v11, %v5992_v33  ;;  %v5636_v29 = vadd.f32 %v5635_v30, %v10154_v27 }
 0x8f3   : > { %v6170_v13 = vadd.f32 %v6105_v43, %v5621_v48  ;;  %v5899_v40 = vpop.f32.mrf.mxu1 }
 0x8f5   : > { %v6204_v17 = vmul.f32 %v10225_v22, %v6170_v13  ;;  %v6012_v59 = vpop.f32.mrf.mxu2  ;;  %v5641_v20 = vpop.f32.mrf.mxu0  ;;  %v6010_v13 = vadd.f32 %v6009_v1, %v5896_v53 }
 0x8f6   : > { %v5642_v32 = vadd.f32 %v5641_v20, %v10164_v57 }
 0x8f7   : > { %v6238_v14 = vadd.f32 %v10235_v4, %v6204_v17 }
 0x8f8   : > { %v6107_v16 = vpop.f32.mrf.mxu3 }
 0x8f9   : > { %6270 = vst [vmem:[%s10241_s13 + $0x78] sm:$0xff] %v6238_v14  ;;  %v6108_v21 = vadd.f32 %v6107_v16, %v5995_v46  ;;  %v5639_v14 = vadd.f32 %v5638_v49, %v10158_v12 }
 0x8fb   : > { %v6171_v23 = vadd.f32 %v6108_v21, %v5624_v28  ;;  %v5902_v48 = vpop.f32.mrf.mxu1 }
 0x8fd   : > { %v6205_v45 = vmul.f32 %v10225_v22, %v6171_v23  ;;  %v6015_v38 = vpop.f32.mrf.mxu2  ;;  %v5644_v17 = vpop.f32.mrf.mxu0  ;;  %v6013_v23 = vadd.f32 %v6012_v59, %v5899_v40 }
 0x8fe   : > { %v5645_v53 = vadd.f32 %v5644_v17, %v10170_v51 }
 0x8ff   : > { %v6239_v3 = vadd.f32 %v10235_v4, %v6205_v45 }
 0x900   : > { %v6110_v5 = vpop.f32.mrf.mxu3 }
 0x901   : > { %6271 = vst [vmem:[%s10241_s13 + $0x80] sm:$0xff] %v6239_v3  ;;  %v6111_v18 = vadd.f32 %v6110_v5, %v5998_v10 }
 0x903   : > { %v6172_v47 = vadd.f32 %v6111_v18, %v5627_v54  ;;  %v5905_v28 = vpop.f32.mrf.mxu1  ;;  %v6016_v18 = vadd.f32 %v6015_v38, %v5902_v48 }
 0x905   : > { %v6206_v24 = vmul.f32 %v10225_v22, %v6172_v47  ;;  %v6018_v21 = vpop.f32.mrf.mxu2  ;;  %v5647_v3 = vpop.f32.mrf.mxu0 }
 0x907   : > { %v6240_v7 = vadd.f32 %v10235_v4, %v6206_v24 }
 0x908   : > { %v6113_v36 = vpop.f32.mrf.mxu3 }
 0x909   : > { %6272 = vst [vmem:[%s10241_s13 + $0x88] sm:$0xff] %v6240_v7  ;;  %v6114_v61 = vadd.f32 %v6113_v36, %v6001_v60  ;;  %v6019_v36 = vadd.f32 %v6018_v21, %v5905_v28 }
 0x90b   : > { %v6173_v41 = vadd.f32 %v6114_v61, %v5630_v42  ;;  %v5908_v54 = vpop.f32.mrf.mxu1 }
 0x90d   : > { %v6207_v58 = vmul.f32 %v10225_v22, %v6173_v41  ;;  %v6021_v47 = vpop.f32.mrf.mxu2  ;;  %v5650_v1 = vpop.f32.mrf.mxu0  ;;  %v5648_v41 = vadd.f32 %v5647_v3, %v10177_v19 }
 0x90e   : > { %v5651_v59 = vadd.f32 %v5650_v1, %v10182_v52 }
 0x90f   : > { %v6241_v15 = vadd.f32 %v10235_v4, %v6207_v58 }
 0x910   : > { %v6116_v2 = vpop.f32.mrf.mxu3 }
 0x911   : > { %6273 = vst [vmem:[%s10241_s13 + $0x90] sm:$0xff] %v6241_v15  ;;  %v6117_v62 = vadd.f32 %v6116_v2, %v6004_v25 }
 0x913   : > { %v6174_v37 = vadd.f32 %v6117_v62, %v5633_v31  ;;  %v5911_v49 = vpop.f32.mrf.mxu1  ;;  %v6022_v31 = vadd.f32 %v6021_v47, %v5908_v54 }
 0x915   : > { %v6208_v8 = vmul.f32 %v10225_v22, %v6174_v37  ;;  %v6024_v25 = vpop.f32.mrf.mxu2  ;;  %v5653_v2 = vpop.f32.mrf.mxu0 }
 0x916   : > { %v5654_v48 = vadd.f32 %v5653_v2, %v10189_v26 }
 0x917   : > { %v6242_v35 = vadd.f32 %v10235_v4, %v6208_v8 }
 0x918   : > { %v6119_v33 = vpop.f32.mrf.mxu3 }
 0x919   : > { %6274 = vst [vmem:[%s10241_s13 + $0x98] sm:$0xff] %v6242_v35  ;;  %v6120_v11 = vadd.f32 %v6119_v33, %v6007_v44  ;;  %v6025_v35 = vadd.f32 %v6024_v25, %v5911_v49 }
 0x91b   : > { %v6175_v43 = vadd.f32 %v6120_v11, %v5636_v29  ;;  %v5914_v8 = vpop.f32.mrf.mxu1 }
 0x91d   : > { %v6209_v39 = vmul.f32 %v10225_v22, %v6175_v43  ;;  %v6027_v19 = vpop.f32.mrf.mxu2  ;;  %v5656_v29 = vpop.f32.mrf.mxu0 }
 0x91f   : > { %v6243_v56 = vadd.f32 %v10235_v4, %v6209_v39 }
 0x920   : > { %v6122_v46 = vpop.f32.mrf.mxu3 }
 0x921   : > { %6275 = vst [vmem:[%s10241_s13 + $0xa0] sm:$0xff] %v6243_v56  ;;  %v6123_v0 = vadd.f32 %v6122_v46, %v6010_v13  ;;  %v6028_v56 = vadd.f32 %v6027_v19, %v5914_v8 }
 0x923   : > { %v6176_v16 = vadd.f32 %v6123_v0, %v5639_v14  ;;  %v5917_v39 = vpop.f32.mrf.mxu1  ;;  %v5657_v14 = vadd.f32 %v5656_v29, %v10196_v9 }
 0x925   : > { %v6210_v27 = vmul.f32 %v10225_v22, %v6176_v16  ;;  %v6030_v13 = vpop.f32.mrf.mxu2  ;;  %v5659_v16 = vpop.f32.mrf.mxu0 }
 0x926   : > { %v6031_v21 = vadd.f32 %v6030_v13, %v5917_v39 }
 0x927   : > { %v6244_v63 = vadd.f32 %v10235_v4, %v6210_v27 }
 0x928   : > { %v6125_v45 = vpop.f32.mrf.mxu3 }
 0x929   : > { %6276 = vst [vmem:[%s10241_s13 + $0xa8] sm:$0xff] %v6244_v63  ;;  %v6126_v10 = vadd.f32 %v6125_v45, %v6013_v23 }
 0x92b   : > { %v6177_v5 = vadd.f32 %v6126_v10, %v5642_v32  ;;  %v5920_v27 = vpop.f32.mrf.mxu1  ;;  %v5660_v32 = vadd.f32 %v5659_v16, %v10203_v50 }
 0x92d   : > { %v6211_v12 = vmul.f32 %v10225_v22, %v6177_v5  ;;  %v6033_v63 = vpop.f32.mrf.mxu2  ;;  %v5662_v5 = vpop.f32.mrf.mxu0 }
 0x92f   : > { %v6245_v30 = vadd.f32 %v10235_v4, %v6211_v12  ;;  %v6034_v12 = vadd.f32 %v6033_v63, %v5920_v27 }
 0x930   : > { %v6128_v24 = vpop.f32.mrf.mxu3 }
 0x931   : > { %6277 = vst [vmem:[%s10241_s13 + $0xb0] sm:$0xff] %v6245_v30  ;;  %v6129_v60 = vadd.f32 %v6128_v24, %v6016_v18  ;;  %v5663_v24 = vadd.f32 %v5662_v5, %v10207_v34 }
 0x933   : > { %v6178_v7 = vadd.f32 %v6129_v60, %v5645_v53  ;;  %v5923_v18 = vpop.f32.mrf.mxu1 }
 0x935   : > { %v6212_v57 = vmul.f32 %v10225_v22, %v6178_v7  ;;  %v6036_v47 = vpop.f32.mrf.mxu2  ;;  %v5665_v1 = vpop.f32.mrf.mxu0 }
 0x936   : > { %v6037_v7 = vadd.f32 %v6036_v47, %v5923_v18 }
 0x937   : > { %v6246_v42 = vadd.f32 %v10235_v4, %v6212_v57 }
 0x938   : > { %v6131_v61 = vpop.f32.mrf.mxu3 }
 0x939   : > { %6278 = vst [vmem:[%s10241_s13 + $0xb8] sm:$0xff] %v6246_v42  ;;  %v6132_v58 = vadd.f32 %v6131_v61, %v6019_v36  ;;  %v5666_v42 = vadd.f32 %v5665_v1, %v10211_v55 }
 0x93b   : > { %v6179_v15 = vadd.f32 %v6132_v58, %v5648_v41  ;;  %v5926_v41 = vpop.f32.mrf.mxu1 }
 0x93d   : > { %v6213_v51 = vmul.f32 %v10225_v22, %v6179_v15  ;;  %v6039_v49 = vpop.f32.mrf.mxu2 }
 0x93e   : > { %v6040_v25 = vadd.f32 %v6039_v49, %v5926_v41 }
 0x93f   : > { %v6247_v40 = vadd.f32 %v10235_v4, %v6213_v51  ;;  %v5668_v51 = vpop.f32.mrf.mxu0 }
 0x940   : > { %v6134_v62 = vpop.f32.mrf.mxu3  ;;  %v5669_v55 = vadd.f32 %v5668_v51, %v10217_v6 }
 0x941   : > { %6279 = vst [vmem:[%s10241_s13 + $0xc0] sm:$0xff] %v6247_v40  ;;  %v6135_v37 = vadd.f32 %v6134_v62, %v6022_v31 }
 0x943   : > { %v6180_v20 = vadd.f32 %v6135_v37, %v5651_v59 }
 0x945   : > { %v6214_v44 = vmul.f32 %v10225_v22, %v6180_v20 }
 0x947   : > { %v6248_v33 = vadd.f32 %v10235_v4, %v6214_v44 }
 0x948   : > { %v6137_v11 = vpop.f32.mrf.mxu3 }
 0x949   : > { %6280 = vst [vmem:[%s10241_s13 + $0xc8] sm:$0xff] %v6248_v33  ;;  %v6138_v43 = vadd.f32 %v6137_v11, %v6025_v35 }
 0x94b   : > { %v6181_v38 = vadd.f32 %v6138_v43, %v5654_v48 }
 0x94d   : > { %v6215_v52 = vmul.f32 %v10225_v22, %v6181_v38 }
 0x94f   : > { %v6249_v17 = vadd.f32 %v10235_v4, %v6215_v52 }
 0x950   : > { %v6140_v46 = vpop.f32.mrf.mxu3 }
 0x951   : > { %6281 = vst [vmem:[%s10241_s13 + $0xd0] sm:$0xff] %v6249_v17  ;;  %v6141_v0 = vadd.f32 %v6140_v46, %v6028_v56 }
 0x953   : > { %v6182_v28 = vadd.f32 %v6141_v0, %v5657_v14 }
 0x955   : > { %v6216_v26 = vmul.f32 %v10225_v22, %v6182_v28 }
 0x957   : > { %v6250_v23 = vadd.f32 %v10235_v4, %v6216_v26 }
 0x958   : > { %v6143_v45 = vpop.f32.mrf.mxu3 }
 0x959   : > { %6282 = vst [vmem:[%s10241_s13 + $0xd8] sm:$0xff] %v6250_v23  ;;  %v6144_v10 = vadd.f32 %v6143_v45, %v6031_v21 }
 0x95b   : > { %v6183_v3 = vadd.f32 %v6144_v10, %v5660_v32 }
 0x95d   : > { %v6217_v9 = vmul.f32 %v10225_v22, %v6183_v3 }
 0x95f   : > { %v6251_v54 = vadd.f32 %v10235_v4, %v6217_v9 }
 0x960   : > { %v6146_v30 = vpop.f32.mrf.mxu3 }
 0x961   : > { %6283 = vst [vmem:[%s10241_s13 + $0xe0] sm:$0xff] %v6251_v54  ;;  %v6147_v53 = vadd.f32 %v6146_v30, %v6034_v12 }
 0x963   : > { %v6184_v60 = vadd.f32 %v6147_v53, %v5663_v24 }
 0x965   : > { %v6218_v50 = vmul.f32 %v10225_v22, %v6184_v60 }
 0x967   : > { %v6252_v57 = vadd.f32 %v10235_v4, %v6218_v50 }
 0x968   : > { %v6149_v36 = vpop.f32.mrf.mxu3 }
 0x969   : > { %6284 = vst [vmem:[%s10241_s13 + $0xe8] sm:$0xff] %v6252_v57  ;;  %v6150_v61 = vadd.f32 %v6149_v36, %v6037_v7 }
 0x96b   : > { %v6185_v34 = vadd.f32 %v6150_v61, %v5666_v42 }
 0x96d   : > { %v6219_v58 = vmul.f32 %v10225_v22, %v6185_v34 }
 0x96f   : > { %v6253_v15 = vadd.f32 %v10235_v4, %v6219_v58 }
 0x970   : > { %v6152_v2 = vpop.f32.mrf.mxu3 }
 0x971   : > { %6285 = vst [vmem:[%s10241_s13 + $0xf0] sm:$0xff] %v6253_v15  ;;  %v6153_v31 = vadd.f32 %v6152_v2, %v6040_v25 }
 0x973   : > { %v6186_v40 = vadd.f32 %v6153_v31, %v5669_v55 }
 0x975   : > { %v6220_v62 = vmul.f32 %v10225_v22, %v6186_v40 }
 0x977   : > { %v6254_v59 = vadd.f32 %v10235_v4, %v6220_v62 }
 0x979   : > { %6286 = vst [vmem:[%s10241_s13 + $0xf8] sm:$0xff] %v6254_v59 }
 0x97a   : > { %6904 = shalt.err (!%p6901_p8)
}
 0x97b   : > { %s6955_s20 = smov 128   ;;  %s6956_s13 = smov 8  }
 0x97c   : > { %6460 = dma.vmem_to_hbm [thread:$0]  (%p7030_p5), %s6301_s9, 4096, %s6303_s17, %s6288_s25, %s6955_s20, %s6955_s20, %s6956_s13  }
 0x97d PF: > { %p6482_p9 = scmp.ge.s32.totalorder %s6947_s24, 2  ;;  %s6317_s14 = sand.u32 1, %s6935_s21  }
 0x97e   : > { %s6318_s12 = scalar_lea.sflag [#allocation7], %s6317_s14 }
 0x97f   : > { %p6473_p10 = pnand %p6482_p9, %p7034_p6 }
 0x981   : > { %p6474_p11 = pneg %p6473_p10 }
 0x983   : > { %6930 = dma.done.wait (%p6474_p11), %s6318_s12, 4096  }
 0x984   : > { %6932 = vsyncadd (%p6474_p11), %s6318_s12, 4294963200  ;;  %p18_p12 = scmp.ge.s32.totalorder %s7017_s27, 4   ;;  %s11021_s21 = smov %s6939_s22 }
 0x985   : > { %s11022_s22 = smov %s6943_s23  ;;  %s11023_s23 = smov %s7028_s30 }
 0x986   : > { %s11024_s24 = smov %s7017_s27  ;;  %20 = sbr.rel (!%p18_p12) target bundleno = 5 (0x5), region = 102 }
 0x98b   :  { %6324 = vsyncpa [#allocation6], 1 }
 0x98c   :  { %6326 = vsyncpa [#allocation6 + $0x1], 1 }
 0x98d   :  { %6327 = vsyncpa [#allocation9], 1 }
 0x98e   :  { %6328 = vsyncpa [#allocation7], 1 }
 0x98f   :  { %6330 = vsyncpa [#allocation7 + $0x1], 1 }

</bundles_post_ra>
